<compile_context>
chip_gen: v6e
topology: v6e:2x2x1
jax: 0.10.0
libtpu: 0.0.40
codegen_flags: <defaults>
</compile_context>

<pallas_src>
import functools

import jax
import jax.numpy as jnp
from jax import lax
from jax.experimental import pallas as pl
from jax.experimental.pallas import tpu as pltpu


# Scoped-VMEM cap: above v5e's 16 MiB default, comfortably inside v7x's
# 64 MiB physical VMEM; actual per-call usage at these shapes is << 8 MiB.
_VMEM_LIMIT = 48 * 1024 * 1024


def _rup(x, m):
    return (x + m - 1) // m * m


def _choose_tm(M):
    """Largest row tile <= 512 that divides M and leaves grid >= 2 steps."""
    if M <= 16:
        return M
    for tm in (512, 256, 128, 64, 32, 16, 8):
        if M % tm == 0 and M // tm >= 2:
            return tm
    return min(256, _rup(M, 8))  # fallback (pads M; never hit at these shapes)


# ---------------------------------------------------------------------------
# Pallas kernels
# ---------------------------------------------------------------------------
def _conv_epilogue_kernel(relu, has_res, *refs):
    # refs: patches(tm,Kp) bf16, w2(Kp,Cp) bf16, bias(1,Cp) f32,
    #       [res(tm,Cp) bf16,]  out(tm,Cp) bf16
    if has_res:
        p_ref, w_ref, b_ref, r_ref, o_ref = refs
    else:
        p_ref, w_ref, b_ref, o_ref = refs
    y = jnp.dot(p_ref[...], w_ref[...], preferred_element_type=jnp.float32)
    y = y + b_ref[...]
    if has_res:
        y = y + r_ref[...].astype(jnp.float32)
    if relu:
        y = jnp.maximum(y, 0.0)
    o_ref[...] = y.astype(o_ref.dtype)


def _max9_kernel(*refs):
    # 9 shifted-window inputs (tm, Cp) bf16 -> elementwise max -> (tm, Cp)
    o_ref = refs[-1]
    y = refs[0][...]
    for r in refs[1:-1]:
        y = jnp.maximum(y, r[...])
    o_ref[...] = y


def _final_head_kernel(p_ref, w_ref, b_ref, r_ref, pool_ref, fcw_ref, fcb_ref,
                       o_ref):
    # Fused: conv matmul + BN bias + residual + ReLU  (all M rows resident)
    #        -> global average pool (pooling-matrix matmul) -> FC + bias.
    y = jnp.dot(p_ref[...], w_ref[...], preferred_element_type=jnp.float32)
    y = y + b_ref[...] + r_ref[...].astype(jnp.float32)
    y = jnp.maximum(y, 0.0)
    pooled = jnp.dot(pool_ref[...], y, preferred_element_type=jnp.float32)
    o_ref[...] = (
        jnp.dot(pooled, fcw_ref[...], preferred_element_type=jnp.float32)
        + fcb_ref[...]
    )


# ---------------------------------------------------------------------------
# JAX glue: shifted windows / (channel-trimmed) im2col
# ---------------------------------------------------------------------------
def _shifted_windows(x, kh, kw, stride, pad, pad_value=0.0):
    N, H, W, C = x.shape
    xp = jnp.pad(x, ((0, 0), (pad, pad), (pad, pad), (0, 0)),
                 constant_values=pad_value)
    OH = (H + 2 * pad - kh) // stride + 1
    OW = (W + 2 * pad - kw) // stride + 1
    wins = []
    for dy in range(kh):
        for dx in range(kw):
            wins.append(
                lax.slice(
                    xp,
                    (0, dy, dx, 0),
                    (N, dy + stride * (OH - 1) + 1,
                     dx + stride * (OW - 1) + 1, C),
                    (1, stride, stride, 1),
                )
            )
    return wins, N, OH, OW


def _im2col(x, kh, kw, stride, pad):
    # x must already be sliced to the REAL channel count (K-trim).
    wins, N, OH, OW = _shifted_windows(x, kh, kw, stride, pad, 0.0)
    p = jnp.concatenate(wins, axis=-1)  # (N,OH,OW,kh*kw*cin), order (tap, c)
    C = x.shape[-1]
    return p.reshape(N * OH * OW, kh * kw * C), N, OH, OW


# ---------------------------------------------------------------------------
# Layer wrappers
# ---------------------------------------------------------------------------
def conv_bn(x, cp, cin, kh, kw, stride, pad, relu, residual=None):
    """Fused conv + folded-BN bias (+ residual) (+ ReLU). bf16 in/out."""
    w2 = cp["w2"]      # (Kp, Cp) bf16, BN scale folded in
    bias = cp["bias"]  # (1, Cp)  f32
    Kp, coutp = w2.shape

    patches, N, OH, OW = _im2col(x[..., :cin], kh, kw, stride, pad)
    M, K = patches.shape
    if Kp > K:
        patches = jnp.pad(patches, ((0, 0), (0, Kp - K)))
    tm = _choose_tm(M)
    Mp = _rup(M, tm)
    if Mp > M:
        patches = jnp.pad(patches, ((0, Mp - M), (0, 0)))

    in_specs = [
        pl.BlockSpec((tm, Kp), lambda i: (i, 0)),
        pl.BlockSpec((Kp, coutp), lambda i: (0, 0)),
        pl.BlockSpec((1, coutp), lambda i: (0, 0)),
    ]
    args = [patches, w2, bias]
    has_res = residual is not None
    if has_res:
        r = residual.reshape(M, coutp)
        if Mp > M:
            r = jnp.pad(r, ((0, Mp - M), (0, 0)))
        in_specs.append(pl.BlockSpec((tm, coutp), lambda i: (i, 0)))
        args.append(r)

    out = pl.pallas_call(
        functools.partial(_conv_epilogue_kernel, relu, has_res),
        out_shape=jax.ShapeDtypeStruct((Mp, coutp), jnp.bfloat16),
        grid=(Mp // tm,),
        in_specs=in_specs,
        out_specs=pl.BlockSpec((tm, coutp), lambda i: (i, 0)),
        compiler_params=pltpu.CompilerParams(
            dimension_semantics=("parallel",),
            vmem_limit_bytes=_VMEM_LIMIT,
        ),
    )(*args)
    if Mp > M:
        out = out[:M]
    return out.reshape(N, OH, OW, coutp)


def maxpool_3x3_s2_p1(x):
    # Inputs are post-ReLU (>= 0) and padded channels are exactly 0, so
    # zero-padding the border is equivalent to -inf padding for max-pool.
    N, H, W, C = x.shape
    wins, N, OH, OW = _shifted_windows(x, 3, 3, 2, 1, pad_value=0.0)
    M = N * OH * OW
    tm = _choose_tm(M)
    Mp = _rup(M, tm)
    flats = []
    for w in wins:
        f = w.reshape(M, C)
        if Mp > M:
            f = jnp.pad(f, ((0, Mp - M), (0, 0)))
        flats.append(f)
    spec = pl.BlockSpec((tm, C), lambda i: (i, 0))
    out = pl.pallas_call(
        _max9_kernel,
        out_shape=jax.ShapeDtypeStruct((Mp, C), x.dtype),
        grid=(Mp // tm,),
        in_specs=[spec] * 9,
        out_specs=spec,
        compiler_params=pltpu.CompilerParams(
            dimension_semantics=("parallel",),
            vmem_limit_bytes=_VMEM_LIMIT,
        ),
    )(*flats)
    if Mp > M:
        out = out[:M]
    return out.reshape(N, OH, OW, C)


def final_block_head(x, residual, cp, cin, fc_w2, fc_b2, num_classes):
    """One pallas_call: l4_1_c2 conv + BN + residual + ReLU + avgpool + FC."""
    w2 = cp["w2"]      # (Kp, Cp) bf16
    bias = cp["bias"]  # (1, Cp)  f32
    Kp, coutp = w2.shape

    patches, N, OH, OW = _im2col(x[..., :cin], 3, 3, 1, 1)
    M, K = patches.shape
    if Kp > K:
        patches = jnp.pad(patches, ((0, 0), (0, Kp - K)))
    r = residual.reshape(M, coutp)

    hw = OH * OW
    # pool[n, m] = 1/HW if row m belongs to image n else 0  -> (N, M)
    pool = (jnp.arange(M)[None, :] // hw
            == jnp.arange(N)[:, None]).astype(jnp.float32) / float(hw)

    outp = fc_w2.shape[1]
    out = pl.pallas_call(
        _final_head_kernel,
        out_shape=jax.ShapeDtypeStruct((N, outp), jnp.float32),
        grid=(1,),
        in_specs=[
            pl.BlockSpec((M, Kp), lambda i: (0, 0)),
            pl.BlockSpec((Kp, coutp), lambda i: (0, 0)),
            pl.BlockSpec((1, coutp), lambda i: (0, 0)),
            pl.BlockSpec((M, coutp), lambda i: (0, 0)),
            pl.BlockSpec((N, M), lambda i: (0, 0)),
            pl.BlockSpec((coutp, outp), lambda i: (0, 0)),
            pl.BlockSpec((1, outp), lambda i: (0, 0)),
        ],
        out_specs=pl.BlockSpec((N, outp), lambda i: (0, 0)),
        compiler_params=pltpu.CompilerParams(
            dimension_semantics=("arbitrary",),
            vmem_limit_bytes=_VMEM_LIMIT,
        ),
    )(patches, w2, bias, r, pool, fc_w2, fc_b2)
    return out[:, :num_classes]


# ---------------------------------------------------------------------------
# Parameters (deterministic synthetic init, shapes from the PyTorch module)
# ---------------------------------------------------------------------------
_CONV_SPECS = {
    "conv1": (10, 3, 7, 7),
    "l1_0_c1": (33, 10, 3, 3), "l1_0_c2": (10, 33, 3, 3),
    "l1_1_c1": (36, 10, 3, 3), "l1_1_c2": (10, 36, 3, 3),
    "l2_0_c1": (72, 10, 3, 3), "l2_0_c2": (39, 72, 3, 3), "l2_0_ds": (39, 10, 1, 1),
    "l2_1_c1": (62, 39, 3, 3), "l2_1_c2": (39, 62, 3, 3),
    "l3_0_c1": (135, 39, 3, 3), "l3_0_c2": (60, 135, 3, 3), "l3_0_ds": (60, 39, 1, 1),
    "l3_1_c1": (154, 60, 3, 3), "l3_1_c2": (60, 154, 3, 3),
    "l4_0_c1": (270, 60, 3, 3), "l4_0_c2": (145, 270, 3, 3), "l4_0_ds": (145, 60, 1, 1),
    "l4_1_c1": (260, 145, 3, 3), "l4_1_c2": (145, 260, 3, 3),
}
_NUM_CLASSES = 1000
_FC_IN = 145


def _make_conv_bn_raw(key, cout, cin, kh, kw):
    k1, k2, k3, k4, k5 = jax.random.split(key, 5)
    return {
        "w": 0.05 * jax.random.normal(k1, (cout, cin, kh, kw), jnp.float32),
        "gamma": 1.0 + 0.1 * jax.random.normal(k2, (cout,), jnp.float32),
        "beta": 0.1 * jax.random.normal(k3, (cout,), jnp.float32),
        "mean": 0.1 * jax.random.normal(k4, (cout,), jnp.float32),
        "var": jax.random.uniform(k5, (cout,), jnp.float32, 0.5, 1.5),
    }


def init_raw_params(key):
    params = {}
    names = sorted(_CONV_SPECS.keys())
    keys = jax.random.split(key, len(names) + 2)
    for name, k in zip(names, keys[: len(names)]):
        cout, cin, kh, kw = _CONV_SPECS[name]
        params[name] = _make_conv_bn_raw(k, cout, cin, kh, kw)
    params["fc_w"] = 0.05 * jax.random.normal(keys[-2], (_FC_IN, _NUM_CLASSES),
                                              jnp.float32)
    params["fc_b"] = 0.1 * jax.random.normal(keys[-1], (_NUM_CLASSES,), jnp.float32)
    return params


def _prep_conv(raw, eps=1e-5):
    """Fold BN scale into weights; K = kh*kw*cin (real channels), padded to
    a multiple of 128 once; cout padded to a multiple of 128 (lane-dense)."""
    w, gamma, beta, mean, var = (raw["w"], raw["gamma"], raw["beta"],
                                 raw["mean"], raw["var"])
    scale = gamma / jnp.sqrt(var + eps)
    bias = beta - mean * scale
    w_f = w * scale[:, None, None, None]
    cout, cin, kh, kw = w.shape
    coutp = _rup(cout, 128)
    K = kh * kw * cin
    Kp = _rup(K, 128)
    wt = jnp.transpose(w_f, (2, 3, 1, 0)).reshape(K, cout)   # (dy, dx, cin) major
    w2 = jnp.pad(wt, ((0, Kp - K), (0, coutp - cout)))
    return {
        "w2": w2.astype(jnp.bfloat16),
        "bias": jnp.pad(bias, (0, coutp - cout)).reshape(1, coutp).astype(jnp.float32),
    }


def prepare_params(raw):
    """One-time weight relayout: done outside jit / forward."""
    prepped = {}
    for name in _CONV_SPECS:
        prepped[name] = _prep_conv(raw[name])
    cinp = _rup(_FC_IN, 128)
    outp = _rup(_NUM_CLASSES, 128)
    prepped["fc_w2"] = jnp.pad(
        raw["fc_w"], ((0, cinp - _FC_IN), (0, outp - _NUM_CLASSES))
    ).astype(jnp.float32)
    prepped["fc_b2"] = jnp.pad(
        raw["fc_b"], (0, outp - _NUM_CLASSES)
    ).reshape(1, outp).astype(jnp.float32)
    return prepped


# ---------------------------------------------------------------------------
# Forward pass (mirrors the PyTorch module's forward)
# ---------------------------------------------------------------------------
def forward(params, x_nchw):
    x = jnp.transpose(x_nchw, (0, 2, 3, 1)).astype(jnp.bfloat16)  # NCHW -> NHWC

    x = conv_bn(x, params["conv1"], 3, 7, 7, stride=2, pad=3, relu=True)
    x = maxpool_3x3_s2_p1(x)

    def c3(x_in, name, stride, relu, residual=None):
        cin = _CONV_SPECS[name][1]
        return conv_bn(x_in, params[name], cin, 3, 3, stride, 1, relu, residual)

    def ds(x_in, name):
        cin = _CONV_SPECS[name][1]
        return conv_bn(x_in, params[name], cin, 1, 1, 2, 0, relu=False)

    # layer1
    m = c3(x, "l1_0_c1", 1, True)
    x = c3(m, "l1_0_c2", 1, True, residual=x)
    m = c3(x, "l1_1_c1", 1, True)
    x = c3(m, "l1_1_c2", 1, True, residual=x)

    # layer2
    r = ds(x, "l2_0_ds")
    m = c3(x, "l2_0_c1", 2, True)
    x = c3(m, "l2_0_c2", 1, True, residual=r)
    m = c3(x, "l2_1_c1", 1, True)
    x = c3(m, "l2_1_c2", 1, True, residual=x)

    # layer3
    r = ds(x, "l3_0_ds")
    m = c3(x, "l3_0_c1", 2, True)
    x = c3(m, "l3_0_c2", 1, True, residual=r)
    m = c3(x, "l3_1_c1", 1, True)
    x = c3(m, "l3_1_c2", 1, True, residual=x)

    # layer4
    r = ds(x, "l4_0_ds")
    m = c3(x, "l4_0_c1", 2, True)
    x = c3(m, "l4_0_c2", 1, True, residual=r)
    m = c3(x, "l4_1_c1", 1, True)

    # fused tail: l4_1_c2 conv + BN + residual + ReLU + avgpool + FC
    return final_block_head(m, x, params["l4_1_c2"], _CONV_SPECS["l4_1_c2"][1],
                            params["fc_w2"], params["fc_b2"], _NUM_CLASSES)


if __name__ == "__main__":
    key = jax.random.PRNGKey(0)
    pkey, xkey = jax.random.split(key)
    raw = init_raw_params(pkey)
    params = prepare_params(raw)

    # Small ImageNet-consistent input: batch=2, 3 channels, 32x32 spatial
    # (conv1->16, maxpool->8, layer2->4, layer3->2, layer4->1).
    x = jax.random.normal(xkey, (2, 3, 32, 32), jnp.float32)

    fwd = jax.jit(forward)
    out = fwd(params, x)
    out = jax.block_until_ready(out)
    assert out.shape == (2, _NUM_CLASSES), out.shape
    assert jnp.all(jnp.isfinite(out))
    print("KERNEL_OK")
</pallas_src>

<mosaic_0001>
module attributes {stable_mosaic.version = 11 : i64} {
  func.func @_conv_epilogue_kernel(%arg0: i32, %arg1: memref<256x256xbf16, #tpu.memory_space<vmem>>, %arg2: memref<256x128xbf16, #tpu.memory_space<vmem>>, %arg3: memref<1x128xf32, #tpu.memory_space<vmem>>, %arg4: memref<256x128xbf16, #tpu.memory_space<vmem>>) attributes {dimension_semantics = [#tpu.dimension_semantics<parallel>], iteration_bounds = array<i64: 2>, scalar_prefetch = 0 : i64, scratch_operands = 0 : i64, tpu.core_type = #tpu.core_type<tc>, window_params = [{transform_indices = @transform_0, window_bounds = array<i64: 256, 256>}, {pipeline_mode = #tpu.pipeline_mode<synchronous>, transform_indices = @transform_1, window_bounds = array<i64: 256, 128>}, {pipeline_mode = #tpu.pipeline_mode<synchronous>, transform_indices = @transform_2, window_bounds = array<i64: 1, 128>}, {transform_indices = @transform_3, window_bounds = array<i64: 256, 128>}]} {
    %c0 = arith.constant 0 : index
    %c0_0 = arith.constant 0 : index
    %0 = vector.load %arg1[%c0, %c0_0] : memref<256x256xbf16, #tpu.memory_space<vmem>>, vector<256x256xbf16>
    %c0_1 = arith.constant 0 : index
    %c0_2 = arith.constant 0 : index
    %1 = vector.load %arg2[%c0_1, %c0_2] : memref<256x128xbf16, #tpu.memory_space<vmem>>, vector<256x128xbf16>
    %cst = arith.constant dense<0.000000e+00> : vector<256x128xf32>
    %2 = tpu.matmul %0, %1, %cst {dimension_numbers = #tpu.dot_dimension_numbers<[1], [0], [0], [1], [0, 0, 1, 1], [], []>} : vector<256x256xbf16>, vector<256x128xbf16>, vector<256x128xf32> -> vector<256x128xf32>
    %c0_3 = arith.constant 0 : index
    %c0_4 = arith.constant 0 : index
    %3 = vector.load %arg3[%c0_3, %c0_4] : memref<1x128xf32, #tpu.memory_space<vmem>>, vector<1x128xf32>
    %4 = vector.broadcast %3 : vector<1x128xf32> to vector<256x128xf32>
    %5 = arith.addf %2, %4 : vector<256x128xf32>
    %cst_5 = arith.constant 0.000000e+00 : f32
    %6 = vector.broadcast %cst_5 : f32 to vector<256x128xf32>
    %7 = arith.maximumf %5, %6 : vector<256x128xf32>
    %8 = arith.truncf %7 : vector<256x128xf32> to vector<256x128xbf16>
    %c0_6 = arith.constant 0 : index
    %c0_7 = arith.constant 0 : index
    %9 = vector.load %arg4[%c0_6, %c0_7] : memref<256x128xbf16, #tpu.memory_space<vmem>>, vector<256x128xbf16>
    tpu.vector_store %arg4[%c0_6, %c0_7], %8 {strides = array<i32>} : memref<256x128xbf16, #tpu.memory_space<vmem>>, vector<256x128xbf16>,
    return
  }
  func.func @transform_0(%arg0: i32) -> (i32, i32) {
    %c0_i32 = arith.constant 0 : i32
    %c0_i32_0 = arith.constant 0 : i32
    return %arg0, %c0_i32 : i32, i32
  }
  func.func @transform_1(%arg0: i32) -> (i32, i32) {
    %c0_i32 = arith.constant 0 : i32
    %c0_i32_0 = arith.constant 0 : i32
    %c0_i32_1 = arith.constant 0 : i32
    return %c0_i32, %c0_i32_0 : i32, i32
  }
  func.func @transform_2(%arg0: i32) -> (i32, i32) {
    %c0_i32 = arith.constant 0 : i32
    %c0_i32_0 = arith.constant 0 : i32
    %c0_i32_1 = arith.constant 0 : i32
    return %c0_i32, %c0_i32_0 : i32, i32
  }
  func.func @transform_3(%arg0: i32) -> (i32, i32) {
    %c0_i32 = arith.constant 0 : i32
    %c0_i32_0 = arith.constant 0 : i32
    return %arg0, %c0_i32 : i32, i32
  }
}

module attributes {stable_mosaic.version = 11 : i64} {
  func.func @_max9_kernel(%arg0: i32, %arg1: memref<64x128xbf16, #tpu.memory_space<vmem>>, %arg2: memref<64x128xbf16, #tpu.memory_space<vmem>>, %arg3: memref<64x128xbf16, #tpu.memory_space<vmem>>, %arg4: memref<64x128xbf16, #tpu.memory_space<vmem>>, %arg5: memref<64x128xbf16, #tpu.memory_space<vmem>>, %arg6: memref<64x128xbf16, #tpu.memory_space<vmem>>, %arg7: memref<64x128xbf16, #tpu.memory_space<vmem>>, %arg8: memref<64x128xbf16, #tpu.memory_space<vmem>>, %arg9: memref<64x128xbf16, #tpu.memory_space<vmem>>, %arg10: memref<64x128xbf16, #tpu.memory_space<vmem>>) attributes {dimension_semantics = [#tpu.dimension_semantics<parallel>], iteration_bounds = array<i64: 2>, scalar_prefetch = 0 : i64, scratch_operands = 0 : i64, tpu.core_type = #tpu.core_type<tc>, window_params = [{transform_indices = @transform_0, window_bounds = array<i64: 64, 128>}, {transform_indices = @transform_1, window_bounds = array<i64: 64, 128>}, {transform_indices = @transform_2, window_bounds = array<i64: 64, 128>}, {transform_indices = @transform_3, window_bounds = array<i64: 64, 128>}, {transform_indices = @transform_4, window_bounds = array<i64: 64, 128>}, {transform_indices = @transform_5, window_bounds = array<i64: 64, 128>}, {transform_indices = @transform_6, window_bounds = array<i64: 64, 128>}, {transform_indices = @transform_7, window_bounds = array<i64: 64, 128>}, {transform_indices = @transform_8, window_bounds = array<i64: 64, 128>}, {transform_indices = @transform_9, window_bounds = array<i64: 64, 128>}]} {
    %c0 = arith.constant 0 : index
    %c0_0 = arith.constant 0 : index
    %0 = vector.load %arg1[%c0, %c0_0] : memref<64x128xbf16, #tpu.memory_space<vmem>>, vector<64x128xbf16>
    %c0_1 = arith.constant 0 : index
    %c0_2 = arith.constant 0 : index
    %1 = vector.load %arg2[%c0_1, %c0_2] : memref<64x128xbf16, #tpu.memory_space<vmem>>, vector<64x128xbf16>
    %2 = arith.maximumf %0, %1 : vector<64x128xbf16>
    %c0_3 = arith.constant 0 : index
    %c0_4 = arith.constant 0 : index
    %3 = vector.load %arg3[%c0_3, %c0_4] : memref<64x128xbf16, #tpu.memory_space<vmem>>, vector<64x128xbf16>
    %4 = arith.maximumf %2, %3 : vector<64x128xbf16>
    %c0_5 = arith.constant 0 : index
    %c0_6 = arith.constant 0 : index
    %5 = vector.load %arg4[%c0_5, %c0_6] : memref<64x128xbf16, #tpu.memory_space<vmem>>, vector<64x128xbf16>
    %6 = arith.maximumf %4, %5 : vector<64x128xbf16>
    %c0_7 = arith.constant 0 : index
    %c0_8 = arith.constant 0 : index
    %7 = vector.load %arg5[%c0_7, %c0_8] : memref<64x128xbf16, #tpu.memory_space<vmem>>, vector<64x128xbf16>
    %8 = arith.maximumf %6, %7 : vector<64x128xbf16>
    %c0_9 = arith.constant 0 : index
    %c0_10 = arith.constant 0 : index
    %9 = vector.load %arg6[%c0_9, %c0_10] : memref<64x128xbf16, #tpu.memory_space<vmem>>, vector<64x128xbf16>
    %10 = arith.maximumf %8, %9 : vector<64x128xbf16>
    %c0_11 = arith.constant 0 : index
    %c0_12 = arith.constant 0 : index
    %11 = vector.load %arg7[%c0_11, %c0_12] : memref<64x128xbf16, #tpu.memory_space<vmem>>, vector<64x128xbf16>
    %12 = arith.maximumf %10, %11 : vector<64x128xbf16>
    %c0_13 = arith.constant 0 : index
    %c0_14 = arith.constant 0 : index
    %13 = vector.load %arg8[%c0_13, %c0_14] : memref<64x128xbf16, #tpu.memory_space<vmem>>, vector<64x128xbf16>
    %14 = arith.maximumf %12, %13 : vector<64x128xbf16>
    %c0_15 = arith.constant 0 : index
    %c0_16 = arith.constant 0 : index
    %15 = vector.load %arg9[%c0_15, %c0_16] : memref<64x128xbf16, #tpu.memory_space<vmem>>, vector<64x128xbf16>
    %16 = arith.maximumf %14, %15 : vector<64x128xbf16>
    %c0_17 = arith.constant 0 : index
    %c0_18 = arith.constant 0 : index
    %17 = vector.load %arg10[%c0_17, %c0_18] : memref<64x128xbf16, #tpu.memory_space<vmem>>, vector<64x128xbf16>
    tpu.vector_store %arg10[%c0_17, %c0_18], %16 {strides = array<i32>} : memref<64x128xbf16, #tpu.memory_space<vmem>>, vector<64x128xbf16>,
    return
  }
  func.func @transform_0(%arg0: i32) -> (i32, i32) {
    %c0_i32 = arith.constant 0 : i32
    %c0_i32_0 = arith.constant 0 : i32
    return %arg0, %c0_i32 : i32, i32
  }
  func.func @transform_1(%arg0: i32) -> (i32, i32) {
    %c0_i32 = arith.constant 0 : i32
    %c0_i32_0 = arith.constant 0 : i32
    return %arg0, %c0_i32 : i32, i32
  }
  func.func @transform_2(%arg0: i32) -> (i32, i32) {
    %c0_i32 = arith.constant 0 : i32
    %c0_i32_0 = arith.constant 0 : i32
    return %arg0, %c0_i32 : i32, i32
  }
  func.func @transform_3(%arg0: i32) -> (i32, i32) {
    %c0_i32 = arith.constant 0 : i32
    %c0_i32_0 = arith.constant 0 : i32
    return %arg0, %c0_i32 : i32, i32
  }
  func.func @transform_4(%arg0: i32) -> (i32, i32) {
    %c0_i32 = arith.constant 0 : i32
    %c0_i32_0 = arith.constant 0 : i32
    return %arg0, %c0_i32 : i32, i32
  }
  func.func @transform_5(%arg0: i32) -> (i32, i32) {
    %c0_i32 = arith.constant 0 : i32
    %c0_i32_0 = arith.constant 0 : i32
    return %arg0, %c0_i32 : i32, i32
  }
  func.func @transform_6(%arg0: i32) -> (i32, i32) {
    %c0_i32 = arith.constant 0 : i32
    %c0_i32_0 = arith.constant 0 : i32
    return %arg0, %c0_i32 : i32, i32
  }
  func.func @transform_7(%arg0: i32) -> (i32, i32) {
    %c0_i32 = arith.constant 0 : i32
    %c0_i32_0 = arith.constant 0 : i32
    return %arg0, %c0_i32 : i32, i32
  }
  func.func @transform_8(%arg0: i32) -> (i32, i32) {
    %c0_i32 = arith.constant 0 : i32
    %c0_i32_0 = arith.constant 0 : i32
    return %arg0, %c0_i32 : i32, i32
  }
  func.func @transform_9(%arg0: i32) -> (i32, i32) {
    %c0_i32 = arith.constant 0 : i32
    %c0_i32_0 = arith.constant 0 : i32
    return %arg0, %c0_i32 : i32, i32
  }
}

module attributes {stable_mosaic.version = 11 : i64} {
  func.func @_conv_epilogue_kernel(%arg0: i32, %arg1: memref<64x128xbf16, #tpu.memory_space<vmem>>, %arg2: memref<128x128xbf16, #tpu.memory_space<vmem>>, %arg3: memref<1x128xf32, #tpu.memory_space<vmem>>, %arg4: memref<64x128xbf16, #tpu.memory_space<vmem>>) attributes {dimension_semantics = [#tpu.dimension_semantics<parallel>], iteration_bounds = array<i64: 2>, scalar_prefetch = 0 : i64, scratch_operands = 0 : i64, tpu.core_type = #tpu.core_type<tc>, window_params = [{transform_indices = @transform_0, window_bounds = array<i64: 64, 128>}, {pipeline_mode = #tpu.pipeline_mode<synchronous>, transform_indices = @transform_1, window_bounds = array<i64: 128, 128>}, {pipeline_mode = #tpu.pipeline_mode<synchronous>, transform_indices = @transform_2, window_bounds = array<i64: 1, 128>}, {transform_indices = @transform_3, window_bounds = array<i64: 64, 128>}]} {
    %c0 = arith.constant 0 : index
    %c0_0 = arith.constant 0 : index
    %0 = vector.load %arg1[%c0, %c0_0] : memref<64x128xbf16, #tpu.memory_space<vmem>>, vector<64x128xbf16>
    %c0_1 = arith.constant 0 : index
    %c0_2 = arith.constant 0 : index
    %1 = vector.load %arg2[%c0_1, %c0_2] : memref<128x128xbf16, #tpu.memory_space<vmem>>, vector<128x128xbf16>
    %cst = arith.constant dense<0.000000e+00> : vector<64x128xf32>
    %2 = tpu.matmul %0, %1, %cst {dimension_numbers = #tpu.dot_dimension_numbers<[1], [0], [0], [1], [0, 0, 1, 1], [], []>} : vector<64x128xbf16>, vector<128x128xbf16>, vector<64x128xf32> -> vector<64x128xf32>
    %c0_3 = arith.constant 0 : index
    %c0_4 = arith.constant 0 : index
    %3 = vector.load %arg3[%c0_3, %c0_4] : memref<1x128xf32, #tpu.memory_space<vmem>>, vector<1x128xf32>
    %4 = vector.broadcast %3 : vector<1x128xf32> to vector<64x128xf32>
    %5 = arith.addf %2, %4 : vector<64x128xf32>
    %cst_5 = arith.constant 0.000000e+00 : f32
    %6 = vector.broadcast %cst_5 : f32 to vector<64x128xf32>
    %7 = arith.maximumf %5, %6 : vector<64x128xf32>
    %8 = arith.truncf %7 : vector<64x128xf32> to vector<64x128xbf16>
    %c0_6 = arith.constant 0 : index
    %c0_7 = arith.constant 0 : index
    %9 = vector.load %arg4[%c0_6, %c0_7] : memref<64x128xbf16, #tpu.memory_space<vmem>>, vector<64x128xbf16>
    tpu.vector_store %arg4[%c0_6, %c0_7], %8 {strides = array<i32>} : memref<64x128xbf16, #tpu.memory_space<vmem>>, vector<64x128xbf16>,
    return
  }
  func.func @transform_0(%arg0: i32) -> (i32, i32) {
    %c0_i32 = arith.constant 0 : i32
    %c0_i32_0 = arith.constant 0 : i32
    return %arg0, %c0_i32 : i32, i32
  }
  func.func @transform_1(%arg0: i32) -> (i32, i32) {
    %c0_i32 = arith.constant 0 : i32
    %c0_i32_0 = arith.constant 0 : i32
    %c0_i32_1 = arith.constant 0 : i32
    return %c0_i32, %c0_i32_0 : i32, i32
  }
  func.func @transform_2(%arg0: i32) -> (i32, i32) {
    %c0_i32 = arith.constant 0 : i32
    %c0_i32_0 = arith.constant 0 : i32
    %c0_i32_1 = arith.constant 0 : i32
    return %c0_i32, %c0_i32_0 : i32, i32
  }
  func.func @transform_3(%arg0: i32) -> (i32, i32) {
    %c0_i32 = arith.constant 0 : i32
    %c0_i32_0 = arith.constant 0 : i32
    return %arg0, %c0_i32 : i32, i32
  }
}

module attributes {stable_mosaic.version = 11 : i64} {
  func.func @_conv_epilogue_kernel(%arg0: i32, %arg1: memref<64x384xbf16, #tpu.memory_space<vmem>>, %arg2: memref<384x128xbf16, #tpu.memory_space<vmem>>, %arg3: memref<1x128xf32, #tpu.memory_space<vmem>>, %arg4: memref<64x128xbf16, #tpu.memory_space<vmem>>, %arg5: memref<64x128xbf16, #tpu.memory_space<vmem>>) attributes {dimension_semantics = [#tpu.dimension_semantics<parallel>], iteration_bounds = array<i64: 2>, scalar_prefetch = 0 : i64, scratch_operands = 0 : i64, tpu.core_type = #tpu.core_type<tc>, window_params = [{transform_indices = @transform_0, window_bounds = array<i64: 64, 384>}, {pipeline_mode = #tpu.pipeline_mode<synchronous>, transform_indices = @transform_1, window_bounds = array<i64: 384, 128>}, {pipeline_mode = #tpu.pipeline_mode<synchronous>, transform_indices = @transform_2, window_bounds = array<i64: 1, 128>}, {transform_indices = @transform_3, window_bounds = array<i64: 64, 128>}, {transform_indices = @transform_4, window_bounds = array<i64: 64, 128>}]} {
    %c0 = arith.constant 0 : index
    %c0_0 = arith.constant 0 : index
    %0 = vector.load %arg1[%c0, %c0_0] : memref<64x384xbf16, #tpu.memory_space<vmem>>, vector<64x384xbf16>
    %c0_1 = arith.constant 0 : index
    %c0_2 = arith.constant 0 : index
    %1 = vector.load %arg2[%c0_1, %c0_2] : memref<384x128xbf16, #tpu.memory_space<vmem>>, vector<384x128xbf16>
    %cst = arith.constant dense<0.000000e+00> : vector<64x128xf32>
    %2 = tpu.matmul %0, %1, %cst {dimension_numbers = #tpu.dot_dimension_numbers<[1], [0], [0], [1], [0, 0, 1, 1], [], []>} : vector<64x384xbf16>, vector<384x128xbf16>, vector<64x128xf32> -> vector<64x128xf32>
    %c0_3 = arith.constant 0 : index
    %c0_4 = arith.constant 0 : index
    %3 = vector.load %arg3[%c0_3, %c0_4] : memref<1x128xf32, #tpu.memory_space<vmem>>, vector<1x128xf32>
    %4 = vector.broadcast %3 : vector<1x128xf32> to vector<64x128xf32>
    %5 = arith.addf %2, %4 : vector<64x128xf32>
    %c0_5 = arith.constant 0 : index
    %c0_6 = arith.constant 0 : index
    %6 = vector.load %arg4[%c0_5, %c0_6] : memref<64x128xbf16, #tpu.memory_space<vmem>>, vector<64x128xbf16>
    %7 = arith.extf %6 : vector<64x128xbf16> to vector<64x128xf32>
    %8 = arith.addf %5, %7 : vector<64x128xf32>
    %cst_7 = arith.constant 0.000000e+00 : f32
    %9 = vector.broadcast %cst_7 : f32 to vector<64x128xf32>
    %10 = arith.maximumf %8, %9 : vector<64x128xf32>
    %11 = arith.truncf %10 : vector<64x128xf32> to vector<64x128xbf16>
    %c0_8 = arith.constant 0 : index
    %c0_9 = arith.constant 0 : index
    %12 = vector.load %arg5[%c0_8, %c0_9] : memref<64x128xbf16, #tpu.memory_space<vmem>>, vector<64x128xbf16>
    tpu.vector_store %arg5[%c0_8, %c0_9], %11 {strides = array<i32>} : memref<64x128xbf16, #tpu.memory_space<vmem>>, vector<64x128xbf16>,
    return
  }
  func.func @transform_0(%arg0: i32) -> (i32, i32) {
    %c0_i32 = arith.constant 0 : i32
    %c0_i32_0 = arith.constant 0 : i32
    return %arg0, %c0_i32 : i32, i32
  }
  func.func @transform_1(%arg0: i32) -> (i32, i32) {
    %c0_i32 = arith.constant 0 : i32
    %c0_i32_0 = arith.constant 0 : i32
    %c0_i32_1 = arith.constant 0 : i32
    return %c0_i32, %c0_i32_0 : i32, i32
  }
  func.func @transform_2(%arg0: i32) -> (i32, i32) {
    %c0_i32 = arith.constant 0 : i32
    %c0_i32_0 = arith.constant 0 : i32
    %c0_i32_1 = arith.constant 0 : i32
    return %c0_i32, %c0_i32_0 : i32, i32
  }
  func.func @transform_3(%arg0: i32) -> (i32, i32) {
    %c0_i32 = arith.constant 0 : i32
    %c0_i32_0 = arith.constant 0 : i32
    return %arg0, %c0_i32 : i32, i32
  }
  func.func @transform_4(%arg0: i32) -> (i32, i32) {
    %c0_i32 = arith.constant 0 : i32
    %c0_i32_0 = arith.constant 0 : i32
    return %arg0, %c0_i32 : i32, i32
  }
}

module attributes {stable_mosaic.version = 11 : i64} {
  func.func @_conv_epilogue_kernel(%arg0: i32, %arg1: memref<16x128xbf16, #tpu.memory_space<vmem>>, %arg2: memref<128x128xbf16, #tpu.memory_space<vmem>>, %arg3: memref<1x128xf32, #tpu.memory_space<vmem>>, %arg4: memref<16x128xbf16, #tpu.memory_space<vmem>>) attributes {dimension_semantics = [#tpu.dimension_semantics<parallel>], iteration_bounds = array<i64: 2>, scalar_prefetch = 0 : i64, scratch_operands = 0 : i64, tpu.core_type = #tpu.core_type<tc>, window_params = [{transform_indices = @transform_0, window_bounds = array<i64: 16, 128>}, {pipeline_mode = #tpu.pipeline_mode<synchronous>, transform_indices = @transform_1, window_bounds = array<i64: 128, 128>}, {pipeline_mode = #tpu.pipeline_mode<synchronous>, transform_indices = @transform_2, window_bounds = array<i64: 1, 128>}, {transform_indices = @transform_3, window_bounds = array<i64: 16, 128>}]} {
    %c0 = arith.constant 0 : index
    %c0_0 = arith.constant 0 : index
    %0 = vector.load %arg1[%c0, %c0_0] : memref<16x128xbf16, #tpu.memory_space<vmem>>, vector<16x128xbf16>
    %c0_1 = arith.constant 0 : index
    %c0_2 = arith.constant 0 : index
    %1 = vector.load %arg2[%c0_1, %c0_2] : memref<128x128xbf16, #tpu.memory_space<vmem>>, vector<128x128xbf16>
    %cst = arith.constant dense<0.000000e+00> : vector<16x128xf32>
    %2 = tpu.matmul %0, %1, %cst {dimension_numbers = #tpu.dot_dimension_numbers<[1], [0], [0], [1], [0, 0, 1, 1], [], []>} : vector<16x128xbf16>, vector<128x128xbf16>, vector<16x128xf32> -> vector<16x128xf32>
    %c0_3 = arith.constant 0 : index
    %c0_4 = arith.constant 0 : index
    %3 = vector.load %arg3[%c0_3, %c0_4] : memref<1x128xf32, #tpu.memory_space<vmem>>, vector<1x128xf32>
    %4 = vector.broadcast %3 : vector<1x128xf32> to vector<16x128xf32>
    %5 = arith.addf %2, %4 : vector<16x128xf32>
    %cst_5 = arith.constant 0.000000e+00 : f32
    %6 = vector.broadcast %cst_5 : f32 to vector<16x128xf32>
    %7 = arith.maximumf %5, %6 : vector<16x128xf32>
    %8 = arith.truncf %7 : vector<16x128xf32> to vector<16x128xbf16>
    %c0_6 = arith.constant 0 : index
    %c0_7 = arith.constant 0 : index
    %9 = vector.load %arg4[%c0_6, %c0_7] : memref<16x128xbf16, #tpu.memory_space<vmem>>, vector<16x128xbf16>
    tpu.vector_store %arg4[%c0_6, %c0_7], %8 {strides = array<i32>} : memref<16x128xbf16, #tpu.memory_space<vmem>>, vector<16x128xbf16>,
    return
  }
  func.func @transform_0(%arg0: i32) -> (i32, i32) {
    %c0_i32 = arith.constant 0 : i32
    %c0_i32_0 = arith.constant 0 : i32
    return %arg0, %c0_i32 : i32, i32
  }
  func.func @transform_1(%arg0: i32) -> (i32, i32) {
    %c0_i32 = arith.constant 0 : i32
    %c0_i32_0 = arith.constant 0 : i32
    %c0_i32_1 = arith.constant 0 : i32
    return %c0_i32, %c0_i32_0 : i32, i32
  }
  func.func @transform_2(%arg0: i32) -> (i32, i32) {
    %c0_i32 = arith.constant 0 : i32
    %c0_i32_0 = arith.constant 0 : i32
    %c0_i32_1 = arith.constant 0 : i32
    return %c0_i32, %c0_i32_0 : i32, i32
  }
  func.func @transform_3(%arg0: i32) -> (i32, i32) {
    %c0_i32 = arith.constant 0 : i32
    %c0_i32_0 = arith.constant 0 : i32
    return %arg0, %c0_i32 : i32, i32
  }
}

module attributes {stable_mosaic.version = 11 : i64} {
  func.func @_conv_epilogue_kernel(%arg0: i32, %arg1: memref<16x128xbf16, #tpu.memory_space<vmem>>, %arg2: memref<128x128xbf16, #tpu.memory_space<vmem>>, %arg3: memref<1x128xf32, #tpu.memory_space<vmem>>, %arg4: memref<16x128xbf16, #tpu.memory_space<vmem>>) attributes {dimension_semantics = [#tpu.dimension_semantics<parallel>], iteration_bounds = array<i64: 2>, scalar_prefetch = 0 : i64, scratch_operands = 0 : i64, tpu.core_type = #tpu.core_type<tc>, window_params = [{transform_indices = @transform_0, window_bounds = array<i64: 16, 128>}, {pipeline_mode = #tpu.pipeline_mode<synchronous>, transform_indices = @transform_1, window_bounds = array<i64: 128, 128>}, {pipeline_mode = #tpu.pipeline_mode<synchronous>, transform_indices = @transform_2, window_bounds = array<i64: 1, 128>}, {transform_indices = @transform_3, window_bounds = array<i64: 16, 128>}]} {
    %c0 = arith.constant 0 : index
    %c0_0 = arith.constant 0 : index
    %0 = vector.load %arg1[%c0, %c0_0] : memref<16x128xbf16, #tpu.memory_space<vmem>>, vector<16x128xbf16>
    %c0_1 = arith.constant 0 : index
    %c0_2 = arith.constant 0 : index
    %1 = vector.load %arg2[%c0_1, %c0_2] : memref<128x128xbf16, #tpu.memory_space<vmem>>, vector<128x128xbf16>
    %cst = arith.constant dense<0.000000e+00> : vector<16x128xf32>
    %2 = tpu.matmul %0, %1, %cst {dimension_numbers = #tpu.dot_dimension_numbers<[1], [0], [0], [1], [0, 0, 1, 1], [], []>} : vector<16x128xbf16>, vector<128x128xbf16>, vector<16x128xf32> -> vector<16x128xf32>
    %c0_3 = arith.constant 0 : index
    %c0_4 = arith.constant 0 : index
    %3 = vector.load %arg3[%c0_3, %c0_4] : memref<1x128xf32, #tpu.memory_space<vmem>>, vector<1x128xf32>
    %4 = vector.broadcast %3 : vector<1x128xf32> to vector<16x128xf32>
    %5 = arith.addf %2, %4 : vector<16x128xf32>
    %6 = arith.truncf %5 : vector<16x128xf32> to vector<16x128xbf16>
    %c0_5 = arith.constant 0 : index
    %c0_6 = arith.constant 0 : index
    %7 = vector.load %arg4[%c0_5, %c0_6] : memref<16x128xbf16, #tpu.memory_space<vmem>>, vector<16x128xbf16>
    tpu.vector_store %arg4[%c0_5, %c0_6], %6 {strides = array<i32>} : memref<16x128xbf16, #tpu.memory_space<vmem>>, vector<16x128xbf16>,
    return
  }
  func.func @transform_0(%arg0: i32) -> (i32, i32) {
    %c0_i32 = arith.constant 0 : i32
    %c0_i32_0 = arith.constant 0 : i32
    return %arg0, %c0_i32 : i32, i32
  }
  func.func @transform_1(%arg0: i32) -> (i32, i32) {
    %c0_i32 = arith.constant 0 : i32
    %c0_i32_0 = arith.constant 0 : i32
    %c0_i32_1 = arith.constant 0 : i32
    return %c0_i32, %c0_i32_0 : i32, i32
  }
  func.func @transform_2(%arg0: i32) -> (i32, i32) {
    %c0_i32 = arith.constant 0 : i32
    %c0_i32_0 = arith.constant 0 : i32
    %c0_i32_1 = arith.constant 0 : i32
    return %c0_i32, %c0_i32_0 : i32, i32
  }
  func.func @transform_3(%arg0: i32) -> (i32, i32) {
    %c0_i32 = arith.constant 0 : i32
    %c0_i32_0 = arith.constant 0 : i32
    return %arg0, %c0_i32 : i32, i32
  }
}

module attributes {stable_mosaic.version = 11 : i64} {
  func.func @_conv_epilogue_kernel(%arg0: i32, %arg1: memref<16x768xbf16, #tpu.memory_space<vmem>>, %arg2: memref<768x128xbf16, #tpu.memory_space<vmem>>, %arg3: memref<1x128xf32, #tpu.memory_space<vmem>>, %arg4: memref<16x128xbf16, #tpu.memory_space<vmem>>, %arg5: memref<16x128xbf16, #tpu.memory_space<vmem>>) attributes {dimension_semantics = [#tpu.dimension_semantics<parallel>], iteration_bounds = array<i64: 2>, scalar_prefetch = 0 : i64, scratch_operands = 0 : i64, tpu.core_type = #tpu.core_type<tc>, window_params = [{transform_indices = @transform_0, window_bounds = array<i64: 16, 768>}, {pipeline_mode = #tpu.pipeline_mode<synchronous>, transform_indices = @transform_1, window_bounds = array<i64: 768, 128>}, {pipeline_mode = #tpu.pipeline_mode<synchronous>, transform_indices = @transform_2, window_bounds = array<i64: 1, 128>}, {transform_indices = @transform_3, window_bounds = array<i64: 16, 128>}, {transform_indices = @transform_4, window_bounds = array<i64: 16, 128>}]} {
    %c0 = arith.constant 0 : index
    %c0_0 = arith.constant 0 : index
    %0 = vector.load %arg1[%c0, %c0_0] : memref<16x768xbf16, #tpu.memory_space<vmem>>, vector<16x768xbf16>
    %c0_1 = arith.constant 0 : index
    %c0_2 = arith.constant 0 : index
    %1 = vector.load %arg2[%c0_1, %c0_2] : memref<768x128xbf16, #tpu.memory_space<vmem>>, vector<768x128xbf16>
    %cst = arith.constant dense<0.000000e+00> : vector<16x128xf32>
    %2 = tpu.matmul %0, %1, %cst {dimension_numbers = #tpu.dot_dimension_numbers<[1], [0], [0], [1], [0, 0, 1, 1], [], []>} : vector<16x768xbf16>, vector<768x128xbf16>, vector<16x128xf32> -> vector<16x128xf32>
    %c0_3 = arith.constant 0 : index
    %c0_4 = arith.constant 0 : index
    %3 = vector.load %arg3[%c0_3, %c0_4] : memref<1x128xf32, #tpu.memory_space<vmem>>, vector<1x128xf32>
    %4 = vector.broadcast %3 : vector<1x128xf32> to vector<16x128xf32>
    %5 = arith.addf %2, %4 : vector<16x128xf32>
    %c0_5 = arith.constant 0 : index
    %c0_6 = arith.constant 0 : index
    %6 = vector.load %arg4[%c0_5, %c0_6] : memref<16x128xbf16, #tpu.memory_space<vmem>>, vector<16x128xbf16>
    %7 = arith.extf %6 : vector<16x128xbf16> to vector<16x128xf32>
    %8 = arith.addf %5, %7 : vector<16x128xf32>
    %cst_7 = arith.constant 0.000000e+00 : f32
    %9 = vector.broadcast %cst_7 : f32 to vector<16x128xf32>
    %10 = arith.maximumf %8, %9 : vector<16x128xf32>
    %11 = arith.truncf %10 : vector<16x128xf32> to vector<16x128xbf16>
    %c0_8 = arith.constant 0 : index
    %c0_9 = arith.constant 0 : index
    %12 = vector.load %arg5[%c0_8, %c0_9] : memref<16x128xbf16, #tpu.memory_space<vmem>>, vector<16x128xbf16>
    tpu.vector_store %arg5[%c0_8, %c0_9], %11 {strides = array<i32>} : memref<16x128xbf16, #tpu.memory_space<vmem>>, vector<16x128xbf16>,
    return
  }
  func.func @transform_0(%arg0: i32) -> (i32, i32) {
    %c0_i32 = arith.constant 0 : i32
    %c0_i32_0 = arith.constant 0 : i32
    return %arg0, %c0_i32 : i32, i32
  }
  func.func @transform_1(%arg0: i32) -> (i32, i32) {
    %c0_i32 = arith.constant 0 : i32
    %c0_i32_0 = arith.constant 0 : i32
    %c0_i32_1 = arith.constant 0 : i32
    return %c0_i32, %c0_i32_0 : i32, i32
  }
  func.func @transform_2(%arg0: i32) -> (i32, i32) {
    %c0_i32 = arith.constant 0 : i32
    %c0_i32_0 = arith.constant 0 : i32
    %c0_i32_1 = arith.constant 0 : i32
    return %c0_i32, %c0_i32_0 : i32, i32
  }
  func.func @transform_3(%arg0: i32) -> (i32, i32) {
    %c0_i32 = arith.constant 0 : i32
    %c0_i32_0 = arith.constant 0 : i32
    return %arg0, %c0_i32 : i32, i32
  }
  func.func @transform_4(%arg0: i32) -> (i32, i32) {
    %c0_i32 = arith.constant 0 : i32
    %c0_i32_0 = arith.constant 0 : i32
    return %arg0, %c0_i32 : i32, i32
  }
}

module attributes {stable_mosaic.version = 11 : i64} {
  func.func @_conv_epilogue_kernel(%arg0: i32, %arg1: memref<16x384xbf16, #tpu.memory_space<vmem>>, %arg2: memref<384x128xbf16, #tpu.memory_space<vmem>>, %arg3: memref<1x128xf32, #tpu.memory_space<vmem>>, %arg4: memref<16x128xbf16, #tpu.memory_space<vmem>>) attributes {dimension_semantics = [#tpu.dimension_semantics<parallel>], iteration_bounds = array<i64: 2>, scalar_prefetch = 0 : i64, scratch_operands = 0 : i64, tpu.core_type = #tpu.core_type<tc>, window_params = [{transform_indices = @transform_0, window_bounds = array<i64: 16, 384>}, {pipeline_mode = #tpu.pipeline_mode<synchronous>, transform_indices = @transform_1, window_bounds = array<i64: 384, 128>}, {pipeline_mode = #tpu.pipeline_mode<synchronous>, transform_indices = @transform_2, window_bounds = array<i64: 1, 128>}, {transform_indices = @transform_3, window_bounds = array<i64: 16, 128>}]} {
    %c0 = arith.constant 0 : index
    %c0_0 = arith.constant 0 : index
    %0 = vector.load %arg1[%c0, %c0_0] : memref<16x384xbf16, #tpu.memory_space<vmem>>, vector<16x384xbf16>
    %c0_1 = arith.constant 0 : index
    %c0_2 = arith.constant 0 : index
    %1 = vector.load %arg2[%c0_1, %c0_2] : memref<384x128xbf16, #tpu.memory_space<vmem>>, vector<384x128xbf16>
    %cst = arith.constant dense<0.000000e+00> : vector<16x128xf32>
    %2 = tpu.matmul %0, %1, %cst {dimension_numbers = #tpu.dot_dimension_numbers<[1], [0], [0], [1], [0, 0, 1, 1], [], []>} : vector<16x384xbf16>, vector<384x128xbf16>, vector<16x128xf32> -> vector<16x128xf32>
    %c0_3 = arith.constant 0 : index
    %c0_4 = arith.constant 0 : index
    %3 = vector.load %arg3[%c0_3, %c0_4] : memref<1x128xf32, #tpu.memory_space<vmem>>, vector<1x128xf32>
    %4 = vector.broadcast %3 : vector<1x128xf32> to vector<16x128xf32>
    %5 = arith.addf %2, %4 : vector<16x128xf32>
    %cst_5 = arith.constant 0.000000e+00 : f32
    %6 = vector.broadcast %cst_5 : f32 to vector<16x128xf32>
    %7 = arith.maximumf %5, %6 : vector<16x128xf32>
    %8 = arith.truncf %7 : vector<16x128xf32> to vector<16x128xbf16>
    %c0_6 = arith.constant 0 : index
    %c0_7 = arith.constant 0 : index
    %9 = vector.load %arg4[%c0_6, %c0_7] : memref<16x128xbf16, #tpu.memory_space<vmem>>, vector<16x128xbf16>
    tpu.vector_store %arg4[%c0_6, %c0_7], %8 {strides = array<i32>} : memref<16x128xbf16, #tpu.memory_space<vmem>>, vector<16x128xbf16>,
    return
  }
  func.func @transform_0(%arg0: i32) -> (i32, i32) {
    %c0_i32 = arith.constant 0 : i32
    %c0_i32_0 = arith.constant 0 : i32
    return %arg0, %c0_i32 : i32, i32
  }
  func.func @transform_1(%arg0: i32) -> (i32, i32) {
    %c0_i32 = arith.constant 0 : i32
    %c0_i32_0 = arith.constant 0 : i32
    %c0_i32_1 = arith.constant 0 : i32
    return %c0_i32, %c0_i32_0 : i32, i32
  }
  func.func @transform_2(%arg0: i32) -> (i32, i32) {
    %c0_i32 = arith.constant 0 : i32
    %c0_i32_0 = arith.constant 0 : i32
    %c0_i32_1 = arith.constant 0 : i32
    return %c0_i32, %c0_i32_0 : i32, i32
  }
  func.func @transform_3(%arg0: i32) -> (i32, i32) {
    %c0_i32 = arith.constant 0 : i32
    %c0_i32_0 = arith.constant 0 : i32
    return %arg0, %c0_i32 : i32, i32
  }
}

module attributes {stable_mosaic.version = 11 : i64} {
  func.func @_conv_epilogue_kernel(%arg0: i32, %arg1: memref<16x640xbf16, #tpu.memory_space<vmem>>, %arg2: memref<640x128xbf16, #tpu.memory_space<vmem>>, %arg3: memref<1x128xf32, #tpu.memory_space<vmem>>, %arg4: memref<16x128xbf16, #tpu.memory_space<vmem>>, %arg5: memref<16x128xbf16, #tpu.memory_space<vmem>>) attributes {dimension_semantics = [#tpu.dimension_semantics<parallel>], iteration_bounds = array<i64: 2>, scalar_prefetch = 0 : i64, scratch_operands = 0 : i64, tpu.core_type = #tpu.core_type<tc>, window_params = [{transform_indices = @transform_0, window_bounds = array<i64: 16, 640>}, {pipeline_mode = #tpu.pipeline_mode<synchronous>, transform_indices = @transform_1, window_bounds = array<i64: 640, 128>}, {pipeline_mode = #tpu.pipeline_mode<synchronous>, transform_indices = @transform_2, window_bounds = array<i64: 1, 128>}, {transform_indices = @transform_3, window_bounds = array<i64: 16, 128>}, {transform_indices = @transform_4, window_bounds = array<i64: 16, 128>}]} {
    %c0 = arith.constant 0 : index
    %c0_0 = arith.constant 0 : index
    %0 = vector.load %arg1[%c0, %c0_0] : memref<16x640xbf16, #tpu.memory_space<vmem>>, vector<16x640xbf16>
    %c0_1 = arith.constant 0 : index
    %c0_2 = arith.constant 0 : index
    %1 = vector.load %arg2[%c0_1, %c0_2] : memref<640x128xbf16, #tpu.memory_space<vmem>>, vector<640x128xbf16>
    %cst = arith.constant dense<0.000000e+00> : vector<16x128xf32>
    %2 = tpu.matmul %0, %1, %cst {dimension_numbers = #tpu.dot_dimension_numbers<[1], [0], [0], [1], [0, 0, 1, 1], [], []>} : vector<16x640xbf16>, vector<640x128xbf16>, vector<16x128xf32> -> vector<16x128xf32>
    %c0_3 = arith.constant 0 : index
    %c0_4 = arith.constant 0 : index
    %3 = vector.load %arg3[%c0_3, %c0_4] : memref<1x128xf32, #tpu.memory_space<vmem>>, vector<1x128xf32>
    %4 = vector.broadcast %3 : vector<1x128xf32> to vector<16x128xf32>
    %5 = arith.addf %2, %4 : vector<16x128xf32>
    %c0_5 = arith.constant 0 : index
    %c0_6 = arith.constant 0 : index
    %6 = vector.load %arg4[%c0_5, %c0_6] : memref<16x128xbf16, #tpu.memory_space<vmem>>, vector<16x128xbf16>
    %7 = arith.extf %6 : vector<16x128xbf16> to vector<16x128xf32>
    %8 = arith.addf %5, %7 : vector<16x128xf32>
    %cst_7 = arith.constant 0.000000e+00 : f32
    %9 = vector.broadcast %cst_7 : f32 to vector<16x128xf32>
    %10 = arith.maximumf %8, %9 : vector<16x128xf32>
    %11 = arith.truncf %10 : vector<16x128xf32> to vector<16x128xbf16>
    %c0_8 = arith.constant 0 : index
    %c0_9 = arith.constant 0 : index
    %12 = vector.load %arg5[%c0_8, %c0_9] : memref<16x128xbf16, #tpu.memory_space<vmem>>, vector<16x128xbf16>
    tpu.vector_store %arg5[%c0_8, %c0_9], %11 {strides = array<i32>} : memref<16x128xbf16, #tpu.memory_space<vmem>>, vector<16x128xbf16>,
    return
  }
  func.func @transform_0(%arg0: i32) -> (i32, i32) {
    %c0_i32 = arith.constant 0 : i32
    %c0_i32_0 = arith.constant 0 : i32
    return %arg0, %c0_i32 : i32, i32
  }
  func.func @transform_1(%arg0: i32) -> (i32, i32) {
    %c0_i32 = arith.constant 0 : i32
    %c0_i32_0 = arith.constant 0 : i32
    %c0_i32_1 = arith.constant 0 : i32
    return %c0_i32, %c0_i32_0 : i32, i32
  }
  func.func @transform_2(%arg0: i32) -> (i32, i32) {
    %c0_i32 = arith.constant 0 : i32
    %c0_i32_0 = arith.constant 0 : i32
    %c0_i32_1 = arith.constant 0 : i32
    return %c0_i32, %c0_i32_0 : i32, i32
  }
  func.func @transform_3(%arg0: i32) -> (i32, i32) {
    %c0_i32 = arith.constant 0 : i32
    %c0_i32_0 = arith.constant 0 : i32
    return %arg0, %c0_i32 : i32, i32
  }
  func.func @transform_4(%arg0: i32) -> (i32, i32) {
    %c0_i32 = arith.constant 0 : i32
    %c0_i32_0 = arith.constant 0 : i32
    return %arg0, %c0_i32 : i32, i32
  }
}

module attributes {stable_mosaic.version = 11 : i64} {
  func.func @_conv_epilogue_kernel(%arg0: i32, %arg1: memref<8x384xbf16, #tpu.memory_space<vmem>>, %arg2: memref<384x256xbf16, #tpu.memory_space<vmem>>, %arg3: memref<1x256xf32, #tpu.memory_space<vmem>>, %arg4: memref<8x256xbf16, #tpu.memory_space<vmem>>) attributes {dimension_semantics = [#tpu.dimension_semantics<parallel>], iteration_bounds = array<i64: 1>, scalar_prefetch = 0 : i64, scratch_operands = 0 : i64, tpu.core_type = #tpu.core_type<tc>, window_params = [{transform_indices = @transform_0, window_bounds = array<i64: 8, 384>}, {pipeline_mode = #tpu.pipeline_mode<synchronous>, transform_indices = @transform_1, window_bounds = array<i64: 384, 256>}, {pipeline_mode = #tpu.pipeline_mode<synchronous>, transform_indices = @transform_2, window_bounds = array<i64: 1, 256>}, {transform_indices = @transform_3, window_bounds = array<i64: 8, 256>}]} {
    %c0 = arith.constant 0 : index
    %c0_0 = arith.constant 0 : index
    %0 = vector.load %arg1[%c0, %c0_0] : memref<8x384xbf16, #tpu.memory_space<vmem>>, vector<8x384xbf16>
    %c0_1 = arith.constant 0 : index
    %c0_2 = arith.constant 0 : index
    %1 = vector.load %arg2[%c0_1, %c0_2] : memref<384x256xbf16, #tpu.memory_space<vmem>>, vector<384x256xbf16>
    %cst = arith.constant dense<0.000000e+00> : vector<8x256xf32>
    %2 = tpu.matmul %0, %1, %cst {dimension_numbers = #tpu.dot_dimension_numbers<[1], [0], [0], [1], [0, 0, 1, 1], [], []>} : vector<8x384xbf16>, vector<384x256xbf16>, vector<8x256xf32> -> vector<8x256xf32>
    %c0_3 = arith.constant 0 : index
    %c0_4 = arith.constant 0 : index
    %3 = vector.load %arg3[%c0_3, %c0_4] : memref<1x256xf32, #tpu.memory_space<vmem>>, vector<1x256xf32>
    %4 = vector.broadcast %3 : vector<1x256xf32> to vector<8x256xf32>
    %5 = arith.addf %2, %4 : vector<8x256xf32>
    %cst_5 = arith.constant 0.000000e+00 : f32
    %6 = vector.broadcast %cst_5 : f32 to vector<8x256xf32>
    %7 = arith.maximumf %5, %6 : vector<8x256xf32>
    %8 = arith.truncf %7 : vector<8x256xf32> to vector<8x256xbf16>
    %c0_6 = arith.constant 0 : index
    %c0_7 = arith.constant 0 : index
    %9 = vector.load %arg4[%c0_6, %c0_7] : memref<8x256xbf16, #tpu.memory_space<vmem>>, vector<8x256xbf16>
    tpu.vector_store %arg4[%c0_6, %c0_7], %8 {strides = array<i32>} : memref<8x256xbf16, #tpu.memory_space<vmem>>, vector<8x256xbf16>,
    return
  }
  func.func @transform_0(%arg0: i32) -> (i32, i32) {
    %c0_i32 = arith.constant 0 : i32
    %c0_i32_0 = arith.constant 0 : i32
    return %arg0, %c0_i32 : i32, i32
  }
  func.func @transform_1(%arg0: i32) -> (i32, i32) {
    %c0_i32 = arith.constant 0 : i32
    %c0_i32_0 = arith.constant 0 : i32
    %c0_i32_1 = arith.constant 0 : i32
    return %c0_i32, %c0_i32_0 : i32, i32
  }
  func.func @transform_2(%arg0: i32) -> (i32, i32) {
    %c0_i32 = arith.constant 0 : i32
    %c0_i32_0 = arith.constant 0 : i32
    %c0_i32_1 = arith.constant 0 : i32
    return %c0_i32, %c0_i32_0 : i32, i32
  }
  func.func @transform_3(%arg0: i32) -> (i32, i32) {
    %c0_i32 = arith.constant 0 : i32
    %c0_i32_0 = arith.constant 0 : i32
    return %arg0, %c0_i32 : i32, i32
  }
}

module attributes {stable_mosaic.version = 11 : i64} {
  func.func @_conv_epilogue_kernel(%arg0: i32, %arg1: memref<8x128xbf16, #tpu.memory_space<vmem>>, %arg2: memref<128x128xbf16, #tpu.memory_space<vmem>>, %arg3: memref<1x128xf32, #tpu.memory_space<vmem>>, %arg4: memref<8x128xbf16, #tpu.memory_space<vmem>>) attributes {dimension_semantics = [#tpu.dimension_semantics<parallel>], iteration_bounds = array<i64: 1>, scalar_prefetch = 0 : i64, scratch_operands = 0 : i64, tpu.core_type = #tpu.core_type<tc>, window_params = [{transform_indices = @transform_0, window_bounds = array<i64: 8, 128>}, {pipeline_mode = #tpu.pipeline_mode<synchronous>, transform_indices = @transform_1, window_bounds = array<i64: 128, 128>}, {pipeline_mode = #tpu.pipeline_mode<synchronous>, transform_indices = @transform_2, window_bounds = array<i64: 1, 128>}, {transform_indices = @transform_3, window_bounds = array<i64: 8, 128>}]} {
    %c0 = arith.constant 0 : index
    %c0_0 = arith.constant 0 : index
    %0 = vector.load %arg1[%c0, %c0_0] : memref<8x128xbf16, #tpu.memory_space<vmem>>, vector<8x128xbf16>
    %c0_1 = arith.constant 0 : index
    %c0_2 = arith.constant 0 : index
    %1 = vector.load %arg2[%c0_1, %c0_2] : memref<128x128xbf16, #tpu.memory_space<vmem>>, vector<128x128xbf16>
    %cst = arith.constant dense<0.000000e+00> : vector<8x128xf32>
    %2 = tpu.matmul %0, %1, %cst {dimension_numbers = #tpu.dot_dimension_numbers<[1], [0], [0], [1], [0, 0, 1, 1], [], []>} : vector<8x128xbf16>, vector<128x128xbf16>, vector<8x128xf32> -> vector<8x128xf32>
    %c0_3 = arith.constant 0 : index
    %c0_4 = arith.constant 0 : index
    %3 = vector.load %arg3[%c0_3, %c0_4] : memref<1x128xf32, #tpu.memory_space<vmem>>, vector<1x128xf32>
    %4 = vector.broadcast %3 : vector<1x128xf32> to vector<8x128xf32>
    %5 = arith.addf %2, %4 : vector<8x128xf32>
    %6 = arith.truncf %5 : vector<8x128xf32> to vector<8x128xbf16>
    %c0_5 = arith.constant 0 : index
    %c0_6 = arith.constant 0 : index
    %7 = vector.load %arg4[%c0_5, %c0_6] : memref<8x128xbf16, #tpu.memory_space<vmem>>, vector<8x128xbf16>
    tpu.vector_store %arg4[%c0_5, %c0_6], %6 {strides = array<i32>} : memref<8x128xbf16, #tpu.memory_space<vmem>>, vector<8x128xbf16>,
    return
  }
  func.func @transform_0(%arg0: i32) -> (i32, i32) {
    %c0_i32 = arith.constant 0 : i32
    %c0_i32_0 = arith.constant 0 : i32
    return %arg0, %c0_i32 : i32, i32
  }
  func.func @transform_1(%arg0: i32) -> (i32, i32) {
    %c0_i32 = arith.constant 0 : i32
    %c0_i32_0 = arith.constant 0 : i32
    %c0_i32_1 = arith.constant 0 : i32
    return %c0_i32, %c0_i32_0 : i32, i32
  }
  func.func @transform_2(%arg0: i32) -> (i32, i32) {
    %c0_i32 = arith.constant 0 : i32
    %c0_i32_0 = arith.constant 0 : i32
    %c0_i32_1 = arith.constant 0 : i32
    return %c0_i32, %c0_i32_0 : i32, i32
  }
  func.func @transform_3(%arg0: i32) -> (i32, i32) {
    %c0_i32 = arith.constant 0 : i32
    %c0_i32_0 = arith.constant 0 : i32
    return %arg0, %c0_i32 : i32, i32
  }
}

module attributes {stable_mosaic.version = 11 : i64} {
  func.func @_conv_epilogue_kernel(%arg0: i32, %arg1: memref<8x1280xbf16, #tpu.memory_space<vmem>>, %arg2: memref<1280x128xbf16, #tpu.memory_space<vmem>>, %arg3: memref<1x128xf32, #tpu.memory_space<vmem>>, %arg4: memref<8x128xbf16, #tpu.memory_space<vmem>>, %arg5: memref<8x128xbf16, #tpu.memory_space<vmem>>) attributes {dimension_semantics = [#tpu.dimension_semantics<parallel>], iteration_bounds = array<i64: 1>, scalar_prefetch = 0 : i64, scratch_operands = 0 : i64, tpu.core_type = #tpu.core_type<tc>, window_params = [{transform_indices = @transform_0, window_bounds = array<i64: 8, 1280>}, {pipeline_mode = #tpu.pipeline_mode<synchronous>, transform_indices = @transform_1, window_bounds = array<i64: 1280, 128>}, {pipeline_mode = #tpu.pipeline_mode<synchronous>, transform_indices = @transform_2, window_bounds = array<i64: 1, 128>}, {transform_indices = @transform_3, window_bounds = array<i64: 8, 128>}, {transform_indices = @transform_4, window_bounds = array<i64: 8, 128>}]} {
    %c0 = arith.constant 0 : index
    %c0_0 = arith.constant 0 : index
    %0 = vector.load %arg1[%c0, %c0_0] : memref<8x1280xbf16, #tpu.memory_space<vmem>>, vector<8x1280xbf16>
    %c0_1 = arith.constant 0 : index
    %c0_2 = arith.constant 0 : index
    %1 = vector.load %arg2[%c0_1, %c0_2] : memref<1280x128xbf16, #tpu.memory_space<vmem>>, vector<1280x128xbf16>
    %cst = arith.constant dense<0.000000e+00> : vector<8x128xf32>
    %2 = tpu.matmul %0, %1, %cst {dimension_numbers = #tpu.dot_dimension_numbers<[1], [0], [0], [1], [0, 0, 1, 1], [], []>} : vector<8x1280xbf16>, vector<1280x128xbf16>, vector<8x128xf32> -> vector<8x128xf32>
    %c0_3 = arith.constant 0 : index
    %c0_4 = arith.constant 0 : index
    %3 = vector.load %arg3[%c0_3, %c0_4] : memref<1x128xf32, #tpu.memory_space<vmem>>, vector<1x128xf32>
    %4 = vector.broadcast %3 : vector<1x128xf32> to vector<8x128xf32>
    %5 = arith.addf %2, %4 : vector<8x128xf32>
    %c0_5 = arith.constant 0 : index
    %c0_6 = arith.constant 0 : index
    %6 = vector.load %arg4[%c0_5, %c0_6] : memref<8x128xbf16, #tpu.memory_space<vmem>>, vector<8x128xbf16>
    %7 = arith.extf %6 : vector<8x128xbf16> to vector<8x128xf32>
    %8 = arith.addf %5, %7 : vector<8x128xf32>
    %cst_7 = arith.constant 0.000000e+00 : f32
    %9 = vector.broadcast %cst_7 : f32 to vector<8x128xf32>
    %10 = arith.maximumf %8, %9 : vector<8x128xf32>
    %11 = arith.truncf %10 : vector<8x128xf32> to vector<8x128xbf16>
    %c0_8 = arith.constant 0 : index
    %c0_9 = arith.constant 0 : index
    %12 = vector.load %arg5[%c0_8, %c0_9] : memref<8x128xbf16, #tpu.memory_space<vmem>>, vector<8x128xbf16>
    tpu.vector_store %arg5[%c0_8, %c0_9], %11 {strides = array<i32>} : memref<8x128xbf16, #tpu.memory_space<vmem>>, vector<8x128xbf16>,
    return
  }
  func.func @transform_0(%arg0: i32) -> (i32, i32) {
    %c0_i32 = arith.constant 0 : i32
    %c0_i32_0 = arith.constant 0 : i32
    return %arg0, %c0_i32 : i32, i32
  }
  func.func @transform_1(%arg0: i32) -> (i32, i32) {
    %c0_i32 = arith.constant 0 : i32
    %c0_i32_0 = arith.constant 0 : i32
    %c0_i32_1 = arith.constant 0 : i32
    return %c0_i32, %c0_i32_0 : i32, i32
  }
  func.func @transform_2(%arg0: i32) -> (i32, i32) {
    %c0_i32 = arith.constant 0 : i32
    %c0_i32_0 = arith.constant 0 : i32
    %c0_i32_1 = arith.constant 0 : i32
    return %c0_i32, %c0_i32_0 : i32, i32
  }
  func.func @transform_3(%arg0: i32) -> (i32, i32) {
    %c0_i32 = arith.constant 0 : i32
    %c0_i32_0 = arith.constant 0 : i32
    return %arg0, %c0_i32 : i32, i32
  }
  func.func @transform_4(%arg0: i32) -> (i32, i32) {
    %c0_i32 = arith.constant 0 : i32
    %c0_i32_0 = arith.constant 0 : i32
    return %arg0, %c0_i32 : i32, i32
  }
}

module attributes {stable_mosaic.version = 11 : i64} {
  func.func @_conv_epilogue_kernel(%arg0: i32, %arg1: memref<8x640xbf16, #tpu.memory_space<vmem>>, %arg2: memref<640x256xbf16, #tpu.memory_space<vmem>>, %arg3: memref<1x256xf32, #tpu.memory_space<vmem>>, %arg4: memref<8x256xbf16, #tpu.memory_space<vmem>>) attributes {dimension_semantics = [#tpu.dimension_semantics<parallel>], iteration_bounds = array<i64: 1>, scalar_prefetch = 0 : i64, scratch_operands = 0 : i64, tpu.core_type = #tpu.core_type<tc>, window_params = [{transform_indices = @transform_0, window_bounds = array<i64: 8, 640>}, {pipeline_mode = #tpu.pipeline_mode<synchronous>, transform_indices = @transform_1, window_bounds = array<i64: 640, 256>}, {pipeline_mode = #tpu.pipeline_mode<synchronous>, transform_indices = @transform_2, window_bounds = array<i64: 1, 256>}, {transform_indices = @transform_3, window_bounds = array<i64: 8, 256>}]} {
    %c0 = arith.constant 0 : index
    %c0_0 = arith.constant 0 : index
    %0 = vector.load %arg1[%c0, %c0_0] : memref<8x640xbf16, #tpu.memory_space<vmem>>, vector<8x640xbf16>
    %c0_1 = arith.constant 0 : index
    %c0_2 = arith.constant 0 : index
    %1 = vector.load %arg2[%c0_1, %c0_2] : memref<640x256xbf16, #tpu.memory_space<vmem>>, vector<640x256xbf16>
    %cst = arith.constant dense<0.000000e+00> : vector<8x256xf32>
    %2 = tpu.matmul %0, %1, %cst {dimension_numbers = #tpu.dot_dimension_numbers<[1], [0], [0], [1], [0, 0, 1, 1], [], []>} : vector<8x640xbf16>, vector<640x256xbf16>, vector<8x256xf32> -> vector<8x256xf32>
    %c0_3 = arith.constant 0 : index
    %c0_4 = arith.constant 0 : index
    %3 = vector.load %arg3[%c0_3, %c0_4] : memref<1x256xf32, #tpu.memory_space<vmem>>, vector<1x256xf32>
    %4 = vector.broadcast %3 : vector<1x256xf32> to vector<8x256xf32>
    %5 = arith.addf %2, %4 : vector<8x256xf32>
    %cst_5 = arith.constant 0.000000e+00 : f32
    %6 = vector.broadcast %cst_5 : f32 to vector<8x256xf32>
    %7 = arith.maximumf %5, %6 : vector<8x256xf32>
    %8 = arith.truncf %7 : vector<8x256xf32> to vector<8x256xbf16>
    %c0_6 = arith.constant 0 : index
    %c0_7 = arith.constant 0 : index
    %9 = vector.load %arg4[%c0_6, %c0_7] : memref<8x256xbf16, #tpu.memory_space<vmem>>, vector<8x256xbf16>
    tpu.vector_store %arg4[%c0_6, %c0_7], %8 {strides = array<i32>} : memref<8x256xbf16, #tpu.memory_space<vmem>>, vector<8x256xbf16>,
    return
  }
  func.func @transform_0(%arg0: i32) -> (i32, i32) {
    %c0_i32 = arith.constant 0 : i32
    %c0_i32_0 = arith.constant 0 : i32
    return %arg0, %c0_i32 : i32, i32
  }
  func.func @transform_1(%arg0: i32) -> (i32, i32) {
    %c0_i32 = arith.constant 0 : i32
    %c0_i32_0 = arith.constant 0 : i32
    %c0_i32_1 = arith.constant 0 : i32
    return %c0_i32, %c0_i32_0 : i32, i32
  }
  func.func @transform_2(%arg0: i32) -> (i32, i32) {
    %c0_i32 = arith.constant 0 : i32
    %c0_i32_0 = arith.constant 0 : i32
    %c0_i32_1 = arith.constant 0 : i32
    return %c0_i32, %c0_i32_0 : i32, i32
  }
  func.func @transform_3(%arg0: i32) -> (i32, i32) {
    %c0_i32 = arith.constant 0 : i32
    %c0_i32_0 = arith.constant 0 : i32
    return %arg0, %c0_i32 : i32, i32
  }
}

module attributes {stable_mosaic.version = 11 : i64} {
  func.func @_conv_epilogue_kernel(%arg0: i32, %arg1: memref<8x1408xbf16, #tpu.memory_space<vmem>>, %arg2: memref<1408x128xbf16, #tpu.memory_space<vmem>>, %arg3: memref<1x128xf32, #tpu.memory_space<vmem>>, %arg4: memref<8x128xbf16, #tpu.memory_space<vmem>>, %arg5: memref<8x128xbf16, #tpu.memory_space<vmem>>) attributes {dimension_semantics = [#tpu.dimension_semantics<parallel>], iteration_bounds = array<i64: 1>, scalar_prefetch = 0 : i64, scratch_operands = 0 : i64, tpu.core_type = #tpu.core_type<tc>, window_params = [{transform_indices = @transform_0, window_bounds = array<i64: 8, 1408>}, {pipeline_mode = #tpu.pipeline_mode<synchronous>, transform_indices = @transform_1, window_bounds = array<i64: 1408, 128>}, {pipeline_mode = #tpu.pipeline_mode<synchronous>, transform_indices = @transform_2, window_bounds = array<i64: 1, 128>}, {transform_indices = @transform_3, window_bounds = array<i64: 8, 128>}, {transform_indices = @transform_4, window_bounds = array<i64: 8, 128>}]} {
    %c0 = arith.constant 0 : index
    %c0_0 = arith.constant 0 : index
    %0 = vector.load %arg1[%c0, %c0_0] : memref<8x1408xbf16, #tpu.memory_space<vmem>>, vector<8x1408xbf16>
    %c0_1 = arith.constant 0 : index
    %c0_2 = arith.constant 0 : index
    %1 = vector.load %arg2[%c0_1, %c0_2] : memref<1408x128xbf16, #tpu.memory_space<vmem>>, vector<1408x128xbf16>
    %cst = arith.constant dense<0.000000e+00> : vector<8x128xf32>
    %2 = tpu.matmul %0, %1, %cst {dimension_numbers = #tpu.dot_dimension_numbers<[1], [0], [0], [1], [0, 0, 1, 1], [], []>} : vector<8x1408xbf16>, vector<1408x128xbf16>, vector<8x128xf32> -> vector<8x128xf32>
    %c0_3 = arith.constant 0 : index
    %c0_4 = arith.constant 0 : index
    %3 = vector.load %arg3[%c0_3, %c0_4] : memref<1x128xf32, #tpu.memory_space<vmem>>, vector<1x128xf32>
    %4 = vector.broadcast %3 : vector<1x128xf32> to vector<8x128xf32>
    %5 = arith.addf %2, %4 : vector<8x128xf32>
    %c0_5 = arith.constant 0 : index
    %c0_6 = arith.constant 0 : index
    %6 = vector.load %arg4[%c0_5, %c0_6] : memref<8x128xbf16, #tpu.memory_space<vmem>>, vector<8x128xbf16>
    %7 = arith.extf %6 : vector<8x128xbf16> to vector<8x128xf32>
    %8 = arith.addf %5, %7 : vector<8x128xf32>
    %cst_7 = arith.constant 0.000000e+00 : f32
    %9 = vector.broadcast %cst_7 : f32 to vector<8x128xf32>
    %10 = arith.maximumf %8, %9 : vector<8x128xf32>
    %11 = arith.truncf %10 : vector<8x128xf32> to vector<8x128xbf16>
    %c0_8 = arith.constant 0 : index
    %c0_9 = arith.constant 0 : index
    %12 = vector.load %arg5[%c0_8, %c0_9] : memref<8x128xbf16, #tpu.memory_space<vmem>>, vector<8x128xbf16>
    tpu.vector_store %arg5[%c0_8, %c0_9], %11 {strides = array<i32>} : memref<8x128xbf16, #tpu.memory_space<vmem>>, vector<8x128xbf16>,
    return
  }
  func.func @transform_0(%arg0: i32) -> (i32, i32) {
    %c0_i32 = arith.constant 0 : i32
    %c0_i32_0 = arith.constant 0 : i32
    return %arg0, %c0_i32 : i32, i32
  }
  func.func @transform_1(%arg0: i32) -> (i32, i32) {
    %c0_i32 = arith.constant 0 : i32
    %c0_i32_0 = arith.constant 0 : i32
    %c0_i32_1 = arith.constant 0 : i32
    return %c0_i32, %c0_i32_0 : i32, i32
  }
  func.func @transform_2(%arg0: i32) -> (i32, i32) {
    %c0_i32 = arith.constant 0 : i32
    %c0_i32_0 = arith.constant 0 : i32
    %c0_i32_1 = arith.constant 0 : i32
    return %c0_i32, %c0_i32_0 : i32, i32
  }
  func.func @transform_3(%arg0: i32) -> (i32, i32) {
    %c0_i32 = arith.constant 0 : i32
    %c0_i32_0 = arith.constant 0 : i32
    return %arg0, %c0_i32 : i32, i32
  }
  func.func @transform_4(%arg0: i32) -> (i32, i32) {
    %c0_i32 = arith.constant 0 : i32
    %c0_i32_0 = arith.constant 0 : i32
    return %arg0, %c0_i32 : i32, i32
  }
}

module attributes {stable_mosaic.version = 11 : i64} {
  func.func @_conv_epilogue_kernel(%arg0: i32, %arg1: memref<2x640xbf16, #tpu.memory_space<vmem>>, %arg2: memref<640x384xbf16, #tpu.memory_space<vmem>>, %arg3: memref<1x384xf32, #tpu.memory_space<vmem>>, %arg4: memref<2x384xbf16, #tpu.memory_space<vmem>>) attributes {dimension_semantics = [#tpu.dimension_semantics<parallel>], iteration_bounds = array<i64: 1>, scalar_prefetch = 0 : i64, scratch_operands = 0 : i64, tpu.core_type = #tpu.core_type<tc>, window_params = [{transform_indices = @transform_0, window_bounds = array<i64: 2, 640>}, {pipeline_mode = #tpu.pipeline_mode<synchronous>, transform_indices = @transform_1, window_bounds = array<i64: 640, 384>}, {pipeline_mode = #tpu.pipeline_mode<synchronous>, transform_indices = @transform_2, window_bounds = array<i64: 1, 384>}, {transform_indices = @transform_3, window_bounds = array<i64: 2, 384>}]} {
    %c0 = arith.constant 0 : index
    %c0_0 = arith.constant 0 : index
    %0 = vector.load %arg1[%c0, %c0_0] : memref<2x640xbf16, #tpu.memory_space<vmem>>, vector<2x640xbf16>
    %c0_1 = arith.constant 0 : index
    %c0_2 = arith.constant 0 : index
    %1 = vector.load %arg2[%c0_1, %c0_2] : memref<640x384xbf16, #tpu.memory_space<vmem>>, vector<640x384xbf16>
    %cst = arith.constant dense<0.000000e+00> : vector<2x384xf32>
    %2 = tpu.matmul %0, %1, %cst {dimension_numbers = #tpu.dot_dimension_numbers<[1], [0], [0], [1], [0, 0, 1, 1], [], []>} : vector<2x640xbf16>, vector<640x384xbf16>, vector<2x384xf32> -> vector<2x384xf32>
    %c0_3 = arith.constant 0 : index
    %c0_4 = arith.constant 0 : index
    %3 = vector.load %arg3[%c0_3, %c0_4] : memref<1x384xf32, #tpu.memory_space<vmem>>, vector<1x384xf32>
    %4 = vector.broadcast %3 : vector<1x384xf32> to vector<2x384xf32>
    %5 = arith.addf %2, %4 : vector<2x384xf32>
    %cst_5 = arith.constant 0.000000e+00 : f32
    %6 = vector.broadcast %cst_5 : f32 to vector<2x384xf32>
    %7 = arith.maximumf %5, %6 : vector<2x384xf32>
    %8 = arith.truncf %7 : vector<2x384xf32> to vector<2x384xbf16>
    %c0_6 = arith.constant 0 : index
    %c0_7 = arith.constant 0 : index
    %9 = vector.load %arg4[%c0_6, %c0_7] : memref<2x384xbf16, #tpu.memory_space<vmem>>, vector<2x384xbf16>
    tpu.vector_store %arg4[%c0_6, %c0_7], %8 {strides = array<i32>} : memref<2x384xbf16, #tpu.memory_space<vmem>>, vector<2x384xbf16>,
    return
  }
  func.func @transform_0(%arg0: i32) -> (i32, i32) {
    %c0_i32 = arith.constant 0 : i32
    %c0_i32_0 = arith.constant 0 : i32
    return %arg0, %c0_i32 : i32, i32
  }
  func.func @transform_1(%arg0: i32) -> (i32, i32) {
    %c0_i32 = arith.constant 0 : i32
    %c0_i32_0 = arith.constant 0 : i32
    %c0_i32_1 = arith.constant 0 : i32
    return %c0_i32, %c0_i32_0 : i32, i32
  }
  func.func @transform_2(%arg0: i32) -> (i32, i32) {
    %c0_i32 = arith.constant 0 : i32
    %c0_i32_0 = arith.constant 0 : i32
    %c0_i32_1 = arith.constant 0 : i32
    return %c0_i32, %c0_i32_0 : i32, i32
  }
  func.func @transform_3(%arg0: i32) -> (i32, i32) {
    %c0_i32 = arith.constant 0 : i32
    %c0_i32_0 = arith.constant 0 : i32
    return %arg0, %c0_i32 : i32, i32
  }
}

module attributes {stable_mosaic.version = 11 : i64} {
  func.func @_conv_epilogue_kernel(%arg0: i32, %arg1: memref<2x128xbf16, #tpu.memory_space<vmem>>, %arg2: memref<128x256xbf16, #tpu.memory_space<vmem>>, %arg3: memref<1x256xf32, #tpu.memory_space<vmem>>, %arg4: memref<2x256xbf16, #tpu.memory_space<vmem>>) attributes {dimension_semantics = [#tpu.dimension_semantics<parallel>], iteration_bounds = array<i64: 1>, scalar_prefetch = 0 : i64, scratch_operands = 0 : i64, tpu.core_type = #tpu.core_type<tc>, window_params = [{transform_indices = @transform_0, window_bounds = array<i64: 2, 128>}, {pipeline_mode = #tpu.pipeline_mode<synchronous>, transform_indices = @transform_1, window_bounds = array<i64: 128, 256>}, {pipeline_mode = #tpu.pipeline_mode<synchronous>, transform_indices = @transform_2, window_bounds = array<i64: 1, 256>}, {transform_indices = @transform_3, window_bounds = array<i64: 2, 256>}]} {
    %c0 = arith.constant 0 : index
    %c0_0 = arith.constant 0 : index
    %0 = vector.load %arg1[%c0, %c0_0] : memref<2x128xbf16, #tpu.memory_space<vmem>>, vector<2x128xbf16>
    %c0_1 = arith.constant 0 : index
    %c0_2 = arith.constant 0 : index
    %1 = vector.load %arg2[%c0_1, %c0_2] : memref<128x256xbf16, #tpu.memory_space<vmem>>, vector<128x256xbf16>
    %cst = arith.constant dense<0.000000e+00> : vector<2x256xf32>
    %2 = tpu.matmul %0, %1, %cst {dimension_numbers = #tpu.dot_dimension_numbers<[1], [0], [0], [1], [0, 0, 1, 1], [], []>} : vector<2x128xbf16>, vector<128x256xbf16>, vector<2x256xf32> -> vector<2x256xf32>
    %c0_3 = arith.constant 0 : index
    %c0_4 = arith.constant 0 : index
    %3 = vector.load %arg3[%c0_3, %c0_4] : memref<1x256xf32, #tpu.memory_space<vmem>>, vector<1x256xf32>
    %4 = vector.broadcast %3 : vector<1x256xf32> to vector<2x256xf32>
    %5 = arith.addf %2, %4 : vector<2x256xf32>
    %6 = arith.truncf %5 : vector<2x256xf32> to vector<2x256xbf16>
    %c0_5 = arith.constant 0 : index
    %c0_6 = arith.constant 0 : index
    %7 = vector.load %arg4[%c0_5, %c0_6] : memref<2x256xbf16, #tpu.memory_space<vmem>>, vector<2x256xbf16>
    tpu.vector_store %arg4[%c0_5, %c0_6], %6 {strides = array<i32>} : memref<2x256xbf16, #tpu.memory_space<vmem>>, vector<2x256xbf16>,
    return
  }
  func.func @transform_0(%arg0: i32) -> (i32, i32) {
    %c0_i32 = arith.constant 0 : i32
    %c0_i32_0 = arith.constant 0 : i32
    return %arg0, %c0_i32 : i32, i32
  }
  func.func @transform_1(%arg0: i32) -> (i32, i32) {
    %c0_i32 = arith.constant 0 : i32
    %c0_i32_0 = arith.constant 0 : i32
    %c0_i32_1 = arith.constant 0 : i32
    return %c0_i32, %c0_i32_0 : i32, i32
  }
  func.func @transform_2(%arg0: i32) -> (i32, i32) {
    %c0_i32 = arith.constant 0 : i32
    %c0_i32_0 = arith.constant 0 : i32
    %c0_i32_1 = arith.constant 0 : i32
    return %c0_i32, %c0_i32_0 : i32, i32
  }
  func.func @transform_3(%arg0: i32) -> (i32, i32) {
    %c0_i32 = arith.constant 0 : i32
    %c0_i32_0 = arith.constant 0 : i32
    return %arg0, %c0_i32 : i32, i32
  }
}

module attributes {stable_mosaic.version = 11 : i64} {
  func.func @_conv_epilogue_kernel(%arg0: i32, %arg1: memref<2x2432xbf16, #tpu.memory_space<vmem>>, %arg2: memref<2432x256xbf16, #tpu.memory_space<vmem>>, %arg3: memref<1x256xf32, #tpu.memory_space<vmem>>, %arg4: memref<2x256xbf16, #tpu.memory_space<vmem>>, %arg5: memref<2x256xbf16, #tpu.memory_space<vmem>>) attributes {dimension_semantics = [#tpu.dimension_semantics<parallel>], iteration_bounds = array<i64: 1>, scalar_prefetch = 0 : i64, scratch_operands = 0 : i64, tpu.core_type = #tpu.core_type<tc>, window_params = [{transform_indices = @transform_0, window_bounds = array<i64: 2, 2432>}, {pipeline_mode = #tpu.pipeline_mode<synchronous>, transform_indices = @transform_1, window_bounds = array<i64: 2432, 256>}, {pipeline_mode = #tpu.pipeline_mode<synchronous>, transform_indices = @transform_2, window_bounds = array<i64: 1, 256>}, {transform_indices = @transform_3, window_bounds = array<i64: 2, 256>}, {transform_indices = @transform_4, window_bounds = array<i64: 2, 256>}]} {
    %c0 = arith.constant 0 : index
    %c0_0 = arith.constant 0 : index
    %0 = vector.load %arg1[%c0, %c0_0] : memref<2x2432xbf16, #tpu.memory_space<vmem>>, vector<2x2432xbf16>
    %c0_1 = arith.constant 0 : index
    %c0_2 = arith.constant 0 : index
    %1 = vector.load %arg2[%c0_1, %c0_2] : memref<2432x256xbf16, #tpu.memory_space<vmem>>, vector<2432x256xbf16>
    %cst = arith.constant dense<0.000000e+00> : vector<2x256xf32>
    %2 = tpu.matmul %0, %1, %cst {dimension_numbers = #tpu.dot_dimension_numbers<[1], [0], [0], [1], [0, 0, 1, 1], [], []>} : vector<2x2432xbf16>, vector<2432x256xbf16>, vector<2x256xf32> -> vector<2x256xf32>
    %c0_3 = arith.constant 0 : index
    %c0_4 = arith.constant 0 : index
    %3 = vector.load %arg3[%c0_3, %c0_4] : memref<1x256xf32, #tpu.memory_space<vmem>>, vector<1x256xf32>
    %4 = vector.broadcast %3 : vector<1x256xf32> to vector<2x256xf32>
    %5 = arith.addf %2, %4 : vector<2x256xf32>
    %c0_5 = arith.constant 0 : index
    %c0_6 = arith.constant 0 : index
    %6 = vector.load %arg4[%c0_5, %c0_6] : memref<2x256xbf16, #tpu.memory_space<vmem>>, vector<2x256xbf16>
    %7 = arith.extf %6 : vector<2x256xbf16> to vector<2x256xf32>
    %8 = arith.addf %5, %7 : vector<2x256xf32>
    %cst_7 = arith.constant 0.000000e+00 : f32
    %9 = vector.broadcast %cst_7 : f32 to vector<2x256xf32>
    %10 = arith.maximumf %8, %9 : vector<2x256xf32>
    %11 = arith.truncf %10 : vector<2x256xf32> to vector<2x256xbf16>
    %c0_8 = arith.constant 0 : index
    %c0_9 = arith.constant 0 : index
    %12 = vector.load %arg5[%c0_8, %c0_9] : memref<2x256xbf16, #tpu.memory_space<vmem>>, vector<2x256xbf16>
    tpu.vector_store %arg5[%c0_8, %c0_9], %11 {strides = array<i32>} : memref<2x256xbf16, #tpu.memory_space<vmem>>, vector<2x256xbf16>,
    return
  }
  func.func @transform_0(%arg0: i32) -> (i32, i32) {
    %c0_i32 = arith.constant 0 : i32
    %c0_i32_0 = arith.constant 0 : i32
    return %arg0, %c0_i32 : i32, i32
  }
  func.func @transform_1(%arg0: i32) -> (i32, i32) {
    %c0_i32 = arith.constant 0 : i32
    %c0_i32_0 = arith.constant 0 : i32
    %c0_i32_1 = arith.constant 0 : i32
    return %c0_i32, %c0_i32_0 : i32, i32
  }
  func.func @transform_2(%arg0: i32) -> (i32, i32) {
    %c0_i32 = arith.constant 0 : i32
    %c0_i32_0 = arith.constant 0 : i32
    %c0_i32_1 = arith.constant 0 : i32
    return %c0_i32, %c0_i32_0 : i32, i32
  }
  func.func @transform_3(%arg0: i32) -> (i32, i32) {
    %c0_i32 = arith.constant 0 : i32
    %c0_i32_0 = arith.constant 0 : i32
    return %arg0, %c0_i32 : i32, i32
  }
  func.func @transform_4(%arg0: i32) -> (i32, i32) {
    %c0_i32 = arith.constant 0 : i32
    %c0_i32_0 = arith.constant 0 : i32
    return %arg0, %c0_i32 : i32, i32
  }
}

module attributes {stable_mosaic.version = 11 : i64} {
  func.func @_conv_epilogue_kernel(%arg0: i32, %arg1: memref<2x1408xbf16, #tpu.memory_space<vmem>>, %arg2: memref<1408x384xbf16, #tpu.memory_space<vmem>>, %arg3: memref<1x384xf32, #tpu.memory_space<vmem>>, %arg4: memref<2x384xbf16, #tpu.memory_space<vmem>>) attributes {dimension_semantics = [#tpu.dimension_semantics<parallel>], iteration_bounds = array<i64: 1>, scalar_prefetch = 0 : i64, scratch_operands = 0 : i64, tpu.core_type = #tpu.core_type<tc>, window_params = [{transform_indices = @transform_0, window_bounds = array<i64: 2, 1408>}, {pipeline_mode = #tpu.pipeline_mode<synchronous>, transform_indices = @transform_1, window_bounds = array<i64: 1408, 384>}, {pipeline_mode = #tpu.pipeline_mode<synchronous>, transform_indices = @transform_2, window_bounds = array<i64: 1, 384>}, {transform_indices = @transform_3, window_bounds = array<i64: 2, 384>}]} {
    %c0 = arith.constant 0 : index
    %c0_0 = arith.constant 0 : index
    %0 = vector.load %arg1[%c0, %c0_0] : memref<2x1408xbf16, #tpu.memory_space<vmem>>, vector<2x1408xbf16>
    %c0_1 = arith.constant 0 : index
    %c0_2 = arith.constant 0 : index
    %1 = vector.load %arg2[%c0_1, %c0_2] : memref<1408x384xbf16, #tpu.memory_space<vmem>>, vector<1408x384xbf16>
    %cst = arith.constant dense<0.000000e+00> : vector<2x384xf32>
    %2 = tpu.matmul %0, %1, %cst {dimension_numbers = #tpu.dot_dimension_numbers<[1], [0], [0], [1], [0, 0, 1, 1], [], []>} : vector<2x1408xbf16>, vector<1408x384xbf16>, vector<2x384xf32> -> vector<2x384xf32>
    %c0_3 = arith.constant 0 : index
    %c0_4 = arith.constant 0 : index
    %3 = vector.load %arg3[%c0_3, %c0_4] : memref<1x384xf32, #tpu.memory_space<vmem>>, vector<1x384xf32>
    %4 = vector.broadcast %3 : vector<1x384xf32> to vector<2x384xf32>
    %5 = arith.addf %2, %4 : vector<2x384xf32>
    %cst_5 = arith.constant 0.000000e+00 : f32
    %6 = vector.broadcast %cst_5 : f32 to vector<2x384xf32>
    %7 = arith.maximumf %5, %6 : vector<2x384xf32>
    %8 = arith.truncf %7 : vector<2x384xf32> to vector<2x384xbf16>
    %c0_6 = arith.constant 0 : index
    %c0_7 = arith.constant 0 : index
    %9 = vector.load %arg4[%c0_6, %c0_7] : memref<2x384xbf16, #tpu.memory_space<vmem>>, vector<2x384xbf16>
    tpu.vector_store %arg4[%c0_6, %c0_7], %8 {strides = array<i32>} : memref<2x384xbf16, #tpu.memory_space<vmem>>, vector<2x384xbf16>,
    return
  }
  func.func @transform_0(%arg0: i32) -> (i32, i32) {
    %c0_i32 = arith.constant 0 : i32
    %c0_i32_0 = arith.constant 0 : i32
    return %arg0, %c0_i32 : i32, i32
  }
  func.func @transform_1(%arg0: i32) -> (i32, i32) {
    %c0_i32 = arith.constant 0 : i32
    %c0_i32_0 = arith.constant 0 : i32
    %c0_i32_1 = arith.constant 0 : i32
    return %c0_i32, %c0_i32_0 : i32, i32
  }
  func.func @transform_2(%arg0: i32) -> (i32, i32) {
    %c0_i32 = arith.constant 0 : i32
    %c0_i32_0 = arith.constant 0 : i32
    %c0_i32_1 = arith.constant 0 : i32
    return %c0_i32, %c0_i32_0 : i32, i32
  }
  func.func @transform_3(%arg0: i32) -> (i32, i32) {
    %c0_i32 = arith.constant 0 : i32
    %c0_i32_0 = arith.constant 0 : i32
    return %arg0, %c0_i32 : i32, i32
  }
}

module attributes {stable_mosaic.version = 11 : i64} {
  func.func @_final_head_kernel(%arg0: i32, %arg1: memref<2x2432xbf16, #tpu.memory_space<vmem>>, %arg2: memref<2432x256xbf16, #tpu.memory_space<vmem>>, %arg3: memref<1x256xf32, #tpu.memory_space<vmem>>, %arg4: memref<2x256xbf16, #tpu.memory_space<vmem>>, %arg5: memref<2x2xf32, #tpu.memory_space<vmem>>, %arg6: memref<256x1024xf32, #tpu.memory_space<vmem>>, %arg7: memref<1x1024xf32, #tpu.memory_space<vmem>>, %arg8: memref<2x1024xf32, #tpu.memory_space<vmem>>) attributes {dimension_semantics = [#tpu.dimension_semantics<arbitrary>], iteration_bounds = array<i64: 1>, scalar_prefetch = 0 : i64, scratch_operands = 0 : i64, tpu.core_type = #tpu.core_type<tc>, window_params = [{pipeline_mode = #tpu.pipeline_mode<synchronous>, transform_indices = @transform_0, window_bounds = array<i64: 2, 2432>}, {pipeline_mode = #tpu.pipeline_mode<synchronous>, transform_indices = @transform_1, window_bounds = array<i64: 2432, 256>}, {pipeline_mode = #tpu.pipeline_mode<synchronous>, transform_indices = @transform_2, window_bounds = array<i64: 1, 256>}, {pipeline_mode = #tpu.pipeline_mode<synchronous>, transform_indices = @transform_3, window_bounds = array<i64: 2, 256>}, {pipeline_mode = #tpu.pipeline_mode<synchronous>, transform_indices = @transform_4, window_bounds = array<i64: 2, 2>}, {pipeline_mode = #tpu.pipeline_mode<synchronous>, transform_indices = @transform_5, window_bounds = array<i64: 256, 1024>}, {pipeline_mode = #tpu.pipeline_mode<synchronous>, transform_indices = @transform_6, window_bounds = array<i64: 1, 1024>}, {pipeline_mode = #tpu.pipeline_mode<synchronous>, transform_indices = @transform_7, window_bounds = array<i64: 2, 1024>}]} {
    %c0 = arith.constant 0 : index
    %c0_0 = arith.constant 0 : index
    %0 = vector.load %arg1[%c0, %c0_0] : memref<2x2432xbf16, #tpu.memory_space<vmem>>, vector<2x2432xbf16>
    %c0_1 = arith.constant 0 : index
    %c0_2 = arith.constant 0 : index
    %1 = vector.load %arg2[%c0_1, %c0_2] : memref<2432x256xbf16, #tpu.memory_space<vmem>>, vector<2432x256xbf16>
    %cst = arith.constant dense<0.000000e+00> : vector<2x256xf32>
    %2 = tpu.matmul %0, %1, %cst {dimension_numbers = #tpu.dot_dimension_numbers<[1], [0], [0], [1], [0, 0, 1, 1], [], []>} : vector<2x2432xbf16>, vector<2432x256xbf16>, vector<2x256xf32> -> vector<2x256xf32>
    %c0_3 = arith.constant 0 : index
    %c0_4 = arith.constant 0 : index
    %3 = vector.load %arg3[%c0_3, %c0_4] : memref<1x256xf32, #tpu.memory_space<vmem>>, vector<1x256xf32>
    %4 = vector.broadcast %3 : vector<1x256xf32> to vector<2x256xf32>
    %5 = arith.addf %2, %4 : vector<2x256xf32>
    %c0_5 = arith.constant 0 : index
    %c0_6 = arith.constant 0 : index
    %6 = vector.load %arg4[%c0_5, %c0_6] : memref<2x256xbf16, #tpu.memory_space<vmem>>, vector<2x256xbf16>
    %7 = arith.extf %6 : vector<2x256xbf16> to vector<2x256xf32>
    %8 = arith.addf %5, %7 : vector<2x256xf32>
    %cst_7 = arith.constant 0.000000e+00 : f32
    %9 = vector.broadcast %cst_7 : f32 to vector<2x256xf32>
    %10 = arith.maximumf %8, %9 : vector<2x256xf32>
    %c0_8 = arith.constant 0 : index
    %c0_9 = arith.constant 0 : index
    %11 = vector.load %arg5[%c0_8, %c0_9] : memref<2x2xf32, #tpu.memory_space<vmem>>, vector<2x2xf32>
    %cst_10 = arith.constant dense<0.000000e+00> : vector<2x256xf32>
    %12 = tpu.matmul %11, %10, %cst_10 {dimension_numbers = #tpu.dot_dimension_numbers<[1], [0], [0], [1], [0, 0, 1, 1], [], []>} : vector<2x2xf32>, vector<2x256xf32>, vector<2x256xf32> -> vector<2x256xf32>
    %c0_11 = arith.constant 0 : index
    %c0_12 = arith.constant 0 : index
    %13 = vector.load %arg6[%c0_11, %c0_12] : memref<256x1024xf32, #tpu.memory_space<vmem>>, vector<256x1024xf32>
    %cst_13 = arith.constant dense<0.000000e+00> : vector<2x1024xf32>
    %14 = tpu.matmul %12, %13, %cst_13 {dimension_numbers = #tpu.dot_dimension_numbers<[1], [0], [0], [1], [0, 0, 1, 1], [], []>} : vector<2x256xf32>, vector<256x1024xf32>, vector<2x1024xf32> -> vector<2x1024xf32>
    %c0_14 = arith.constant 0 : index
    %c0_15 = arith.constant 0 : index
    %15 = vector.load %arg7[%c0_14, %c0_15] : memref<1x1024xf32, #tpu.memory_space<vmem>>, vector<1x1024xf32>
    %16 = vector.broadcast %15 : vector<1x1024xf32> to vector<2x1024xf32>
    %17 = arith.addf %14, %16 : vector<2x1024xf32>
    %c0_16 = arith.constant 0 : index
    %c0_17 = arith.constant 0 : index
    %18 = vector.load %arg8[%c0_16, %c0_17] : memref<2x1024xf32, #tpu.memory_space<vmem>>, vector<2x1024xf32>
    tpu.vector_store %arg8[%c0_16, %c0_17], %17 {strides = array<i32>} : memref<2x1024xf32, #tpu.memory_space<vmem>>, vector<2x1024xf32>,
    return
  }
  func.func @transform_0(%arg0: i32) -> (i32, i32) {
    %c0_i32 = arith.constant 0 : i32
    %c0_i32_0 = arith.constant 0 : i32
    %c0_i32_1 = arith.constant 0 : i32
    return %c0_i32, %c0_i32_0 : i32, i32
  }
  func.func @transform_1(%arg0: i32) -> (i32, i32) {
    %c0_i32 = arith.constant 0 : i32
    %c0_i32_0 = arith.constant 0 : i32
    %c0_i32_1 = arith.constant 0 : i32
    return %c0_i32, %c0_i32_0 : i32, i32
  }
  func.func @transform_2(%arg0: i32) -> (i32, i32) {
    %c0_i32 = arith.constant 0 : i32
    %c0_i32_0 = arith.constant 0 : i32
    %c0_i32_1 = arith.constant 0 : i32
    return %c0_i32, %c0_i32_0 : i32, i32
  }
  func.func @transform_3(%arg0: i32) -> (i32, i32) {
    %c0_i32 = arith.constant 0 : i32
    %c0_i32_0 = arith.constant 0 : i32
    %c0_i32_1 = arith.constant 0 : i32
    return %c0_i32, %c0_i32_0 : i32, i32
  }
  func.func @transform_4(%arg0: i32) -> (i32, i32) {
    %c0_i32 = arith.constant 0 : i32
    %c0_i32_0 = arith.constant 0 : i32
    %c0_i32_1 = arith.constant 0 : i32
    return %c0_i32, %c0_i32_0 : i32, i32
  }
  func.func @transform_5(%arg0: i32) -> (i32, i32) {
    %c0_i32 = arith.constant 0 : i32
    %c0_i32_0 = arith.constant 0 : i32
    %c0_i32_1 = arith.constant 0 : i32
    return %c0_i32, %c0_i32_0 : i32, i32
  }
  func.func @transform_6(%arg0: i32) -> (i32, i32) {
    %c0_i32 = arith.constant 0 : i32
    %c0_i32_0 = arith.constant 0 : i32
    %c0_i32_1 = arith.constant 0 : i32
    return %c0_i32, %c0_i32_0 : i32, i32
  }
  func.func @transform_7(%arg0: i32) -> (i32, i32) {
    %c0_i32 = arith.constant 0 : i32
    %c0_i32_0 = arith.constant 0 : i32
    %c0_i32_1 = arith.constant 0 : i32
    return %c0_i32, %c0_i32_0 : i32, i32
  }
}

</mosaic_0001>

<bundles_post_ra>
// kernel: forward.21
= control target key start
LH: loop header
LB: loop body
LE: loop exit
PB: predicated region body
PF: predicated region fallthrough
CT: control target
= control target key end

     0   :  { %s1363_s12 = smov 0   ;;  %s1521_s0 = inlined_call_operand.vmem [shape: bf16[512,256], index: 0, kind: input, shape index: {}]   ;;  %s1522_s1 = inlined_call_operand.vmem [shape: bf16[256,128], index: 1, kind: input, shape index: {}]   ;;  %s1523_s2 = inlined_call_operand.vmem [shape: f32[1,128], index: 2, kind: input, shape index: {}]   ;;  %s1524_s3 = inlined_call_operand.vmem [shape: bf16[512,128], index: 3, kind: output, shape index: {}]  }
   0x1 LB: > { %s914_s13 = sadd.s32 4294967295, %s1341_s12   ;;  %p918_p0 = scmp.ge.s32.totalorder %s1341_s12, 1  ;;  %s1341_s12 = sphi %s1363_s12, %s13_s12  }
   0x2   : > { %p139_p1 = scmp.lt.s32.totalorder %s1341_s12, 3 }
   0x4   : > { %p140_p2 = pnand %p918_p0, %p139_p1 }
   0x5   : > { %s919_s16 = sshll.u32 (!%p140_p2), %s914_s13, 5 }
   0x6   : > { %143 = sbr.rel (%p140_p2) target bundleno = 308 (0x134), region = 32  ;;  %p165_p3 = scmp.lt.s32.totalorder (!%p140_p2), %s919_s16, 63 }
   0xb   : > { %v1271_v0 = vld [vmem:[%s1522_s1 + $0x78] sm:$0xff]   ;;  %v1273_v2 = vld [vmem:[%s1522_s1 + $0x70] sm:$0xff]   ;;  %v1275_v4 = vld [vmem:[%s1522_s1 + $0x68] sm:$0xff]   ;;  %s1526_s16 = smov (!%p165_p3, %s919_s16), 63 }
   0xc   : > { %v1272_v1 = vld [vmem:[%s1522_s1 + $0x38] sm:$0xff]   ;;  %1135 = vmatprep.subr.bf16.mxu0 %v1271_v0  ;;  %1247 = vmatprep.subr.bf16.mxu1 %v1271_v0  ;;  %v1274_v3 = vld [vmem:[%s1522_s1 + $0x30] sm:$0xff]   ;;  %v1276_v5 = vld [vmem:[%s1522_s1 + $0x28] sm:$0xff]   ;;  %s1007_s4 = sshll.u32 %s1526_s16, 3  ;;  %s923_s28 = sshll.u32 %s1526_s16, 2 }
   0xd   : > { %1136 = vmatpush3.bf16.msra.mxu0 %v1272_v1  ;;  %1255 = vmatpush3.bf16.msra.mxu1 %v1272_v1  ;;  %v1277_v6 = vld [vmem:[%s1522_s1 + $0x60] sm:$0xff]   ;;  %v1279_v8 = vld [vmem:[%s1522_s1 + $0x58] sm:$0xff]   ;;  %s1404_s9 = scalar_lea.vmem %s1521_s0, %s1007_s4  ;;  %v1281_v10 = vld [vmem:[%s1522_s1 + $0x50] sm:$0xff]   ;;  %s1472_s4 = scalar_lea.vmem %s1524_s3, %s923_s28 }
   0xe   : > { %1137 = vmatprep.subr.bf16.mxu0 %v1273_v2  ;;  %1248 = vmatprep.subr.bf16.mxu1 %v1273_v2  ;;  %v1278_v7 = vld [vmem:[%s1522_s1 + $0x20] sm:$0xff]   ;;  %v1280_v9 = vld [vmem:[%s1522_s1 + $0x18] sm:$0xff]   ;;  %v1282_v13 = vld [vmem:[%s1522_s1 + $0x10] sm:$0xff]  }
   0xf   : > { %v1289_v11 = vld [vmem:[%s1404_s9 + $0x4] ss:$8 sps:$4 sm:$0xff]   ;;  %v1287_v18 = vld [vmem:[%s1404_s9] ss:$8 sps:$4 sm:$0xff]   ;;  %v1293_v20 = vld [vmem:[%s1404_s9 + $0x14] ss:$8 sps:$4 sm:$0xff]  }
  0x10   : > { %v1292_v12 = vld [vmem:[%s1404_s9 + $0x84] ss:$8 sps:$4 sm:$0xff]   ;;  %537 = vmatprep.mubr.bf16.mxu0 %v1289_v11  ;;  %v1290_v19 = vld [vmem:[%s1404_s9 + $0x80] ss:$8 sps:$4 sm:$0xff]   ;;  %v1295_v21 = vld [vmem:[%s1404_s9 + $0x94] ss:$8 sps:$4 sm:$0xff]  }
  0x11   : > { %1138 = vmatpush3.bf16.msra.mxu0 %v1274_v3  ;;  %1256 = vmatpush3.bf16.msra.mxu1 %v1274_v3  ;;  %v1283_v14 = vld [vmem:[%s1522_s1 + $0x48] sm:$0xff]   ;;  %v1285_v16 = vld [vmem:[%s1522_s1 + $0x40] sm:$0xff]   ;;  %v1297_v22 = vld [vmem:[%s1404_s9 + $0x10] ss:$8 sps:$4 sm:$0xff]  }
  0x12   : > { %1139 = vmatprep.subr.bf16.mxu0 %v1275_v4  ;;  %1249 = vmatprep.subr.bf16.mxu1 %v1275_v4  ;;  %v1284_v15 = vld [vmem:[%s1522_s1 + $0x8] sm:$0xff]   ;;  %v1286_v17 = vld [vmem:[%s1522_s1] sm:$0xff]   ;;  %v1298_v23 = vld [vmem:[%s1404_s9 + $0x90] ss:$8 sps:$4 sm:$0xff]  }
  0x13   : > { %601 = vmatprep.mubr.bf16.mxu1 %v1292_v12  ;;  %v1299_v24 = vld [vmem:[%s1404_s9 + $0x24] ss:$8 sps:$4 sm:$0xff]   ;;  %v1303_v26 = vld [vmem:[%s1404_s9 + $0x20] ss:$8 sps:$4 sm:$0xff]   ;;  %v1305_v28 = vld [vmem:[%s1404_s9 + $0x34] ss:$8 sps:$4 sm:$0xff]  }
  0x14   : > { %v1301_v25 = vld [vmem:[%s1404_s9 + $0xa4] ss:$8 sps:$4 sm:$0xff]   ;;  %v1304_v27 = vld [vmem:[%s1404_s9 + $0xa0] ss:$8 sps:$4 sm:$0xff]   ;;  %v1307_v29 = vld [vmem:[%s1404_s9 + $0xb4] ss:$8 sps:$4 sm:$0xff]  }
  0x15   : > { %1140 = vmatpush3.bf16.msra.mxu0 %v1276_v5  ;;  %1257 = vmatpush3.bf16.msra.mxu1 %v1276_v5  ;;  %v1309_v30 = vld [vmem:[%s1404_s9 + $0x30] ss:$8 sps:$4 sm:$0xff]   ;;  %v1311_v32 = vld [vmem:[%s1404_s9 + $0x44] ss:$8 sps:$4 sm:$0xff]   ;;  %v1315_v34 = vld [vmem:[%s1404_s9 + $0x40] ss:$8 sps:$4 sm:$0xff]  }
  0x16   : > { %1141 = vmatprep.subr.bf16.mxu0 %v1277_v6  ;;  %1250 = vmatprep.subr.bf16.mxu1 %v1277_v6  ;;  %v1310_v31 = vld [vmem:[%s1404_s9 + $0xb0] ss:$8 sps:$4 sm:$0xff]   ;;  %v1313_v33 = vld [vmem:[%s1404_s9 + $0xc4] ss:$8 sps:$4 sm:$0xff]   ;;  %v1316_v35 = vld [vmem:[%s1404_s9 + $0xc0] ss:$8 sps:$4 sm:$0xff]  }
  0x17   : > { %v1317_v36 = vld [vmem:[%s1404_s9 + $0x54] ss:$8 sps:$4 sm:$0xff]   ;;  %v1321_v38 = vld [vmem:[%s1404_s9 + $0x50] ss:$8 sps:$4 sm:$0xff]   ;;  %v1323_v40 = vld [vmem:[%s1404_s9 + $0x64] ss:$8 sps:$4 sm:$0xff]  }
  0x18   : > { %v1319_v37 = vld [vmem:[%s1404_s9 + $0xd4] ss:$8 sps:$4 sm:$0xff]   ;;  %v1322_v39 = vld [vmem:[%s1404_s9 + $0xd0] ss:$8 sps:$4 sm:$0xff]   ;;  %v1325_v41 = vld [vmem:[%s1404_s9 + $0xe4] ss:$8 sps:$4 sm:$0xff]  }
  0x19   : > { %1142 = vmatpush3.bf16.msra.mxu0 %v1278_v7  ;;  %1258 = vmatpush3.bf16.msra.mxu1 %v1278_v7  ;;  %v1327_v42 = vld [vmem:[%s1404_s9 + $0x60] ss:$8 sps:$4 sm:$0xff]   ;;  %v1329_v44 = vld [vmem:[%s1404_s9 + $0x74] ss:$8 sps:$4 sm:$0xff]   ;;  %v1333_v46 = vld [vmem:[%s1404_s9 + $0x70] ss:$8 sps:$4 sm:$0xff]  }
  0x1a   : > { %1143 = vmatprep.subr.bf16.mxu0 %v1279_v8  ;;  %1251 = vmatprep.subr.bf16.mxu1 %v1279_v8  ;;  %v1328_v43 = vld [vmem:[%s1404_s9 + $0xe0] ss:$8 sps:$4 sm:$0xff]   ;;  %v1331_v45 = vld [vmem:[%s1404_s9 + $0xf4] ss:$8 sps:$4 sm:$0xff]   ;;  %v1334_v47 = vld [vmem:[%s1404_s9 + $0xf0] ss:$8 sps:$4 sm:$0xff]  }
  0x1b   : > { %v1462_v52 = vld [vmem:[%s1523_s2] ss:$0 sm:$0xff] }
  0x1d   : > { %1144 = vmatpush3.bf16.msra.mxu0 %v1280_v9  ;;  %1259 = vmatpush3.bf16.msra.mxu1 %v1280_v9 }
  0x1e   : > { %1145 = vmatprep.subr.bf16.mxu0 %v1281_v10  ;;  %1252 = vmatprep.subr.bf16.mxu1 %v1281_v10 }
  0x21   : > { %1146 = vmatpush3.bf16.msra.mxu0 %v1282_v13  ;;  %1260 = vmatpush3.bf16.msra.mxu1 %v1282_v13 }
  0x22   : > { %1147 = vmatprep.subr.bf16.mxu0 %v1283_v14  ;;  %1253 = vmatprep.subr.bf16.mxu1 %v1283_v14 }
  0x25   : > { %1148 = vmatpush3.bf16.msra.mxu0 %v1284_v15  ;;  %1261 = vmatpush3.bf16.msra.mxu1 %v1284_v15 }
  0x26   : > { %1149 = vmatprep.subr.bf16.mxu0 %v1285_v16  ;;  %1254 = vmatprep.subr.bf16.mxu1 %v1285_v16 }
  0x29   : > { %1150 = vmatpush3.bf16.msra.mxu0 %v1286_v17  ;;  %1262 = vmatpush3.bf16.msra.mxu1 %v1286_v17 }
  0x2c   : > { %538 = vmatmul.mubr.bf16.vlgmr.msra.gmra.mxu0 %v1287_v18  ;;  %602 = vmatmul.mubr.bf16.vlgmr.msra.gmra.mxu1 %v1290_v19 }
  0x2d   : > { %545 = vmatprep.mubr.bf16.mxu0 %v1293_v20  ;;  %609 = vmatprep.mubr.bf16.mxu1 %v1295_v21 }
  0x34   : > { %546 = vmatmul.mubr.bf16.gmra.mxu0 %v1297_v22  ;;  %610 = vmatmul.mubr.bf16.gmra.mxu1 %v1298_v23 }
  0x35   : > { %553 = vmatprep.mubr.bf16.mxu0 %v1299_v24  ;;  %617 = vmatprep.mubr.bf16.mxu1 %v1301_v25 }
  0x3c   : > { %554 = vmatmul.mubr.bf16.gmra.mxu0 %v1303_v26  ;;  %618 = vmatmul.mubr.bf16.gmra.mxu1 %v1304_v27 }
  0x3d   : > { %561 = vmatprep.mubr.bf16.mxu0 %v1305_v28  ;;  %625 = vmatprep.mubr.bf16.mxu1 %v1307_v29 }
  0x44   : > { %562 = vmatmul.mubr.bf16.gmra.mxu0 %v1309_v30  ;;  %626 = vmatmul.mubr.bf16.gmra.mxu1 %v1310_v31 }
  0x45   : > { %569 = vmatprep.mubr.bf16.mxu0 %v1311_v32  ;;  %633 = vmatprep.mubr.bf16.mxu1 %v1313_v33 }
  0x4c   : > { %570 = vmatmul.mubr.bf16.gmra.mxu0 %v1315_v34  ;;  %634 = vmatmul.mubr.bf16.gmra.mxu1 %v1316_v35 }
  0x4d   : > { %577 = vmatprep.mubr.bf16.mxu0 %v1317_v36  ;;  %641 = vmatprep.mubr.bf16.mxu1 %v1319_v37 }
  0x54   : > { %578 = vmatmul.mubr.bf16.gmra.mxu0 %v1321_v38  ;;  %642 = vmatmul.mubr.bf16.gmra.mxu1 %v1322_v39 }
  0x55   : > { %585 = vmatprep.mubr.bf16.mxu0 %v1323_v40  ;;  %649 = vmatprep.mubr.bf16.mxu1 %v1325_v41 }
  0x5c   : > { %586 = vmatmul.mubr.bf16.gmra.mxu0 %v1327_v42  ;;  %650 = vmatmul.mubr.bf16.gmra.mxu1 %v1328_v43 }
  0x5d   : > { %593 = vmatprep.mubr.bf16.mxu0 %v1329_v44  ;;  %657 = vmatprep.mubr.bf16.mxu1 %v1331_v45 }
  0x64   : > { %594 = vmatmul.mubr.bf16.gmra.mxu0 %v1333_v46  ;;  %658 = vmatmul.mubr.bf16.gmra.mxu1 %v1334_v47 }
  0xec   : > { %v1151_v48 = vpop.f32.mrf.mxu0  ;;  %v1199_v49 = vpop.f32.mrf.mxu1 }
  0xee   : > { %v1152_v50 = vpop.f32.mrf.mxu0  ;;  %v1200_v51 = vpop.f32.mrf.mxu1 }
  0xef   : > { %v1153_v53 = vadd.f32 %v1152_v50, %v1151_v48  ;;  %v1201_v54 = vadd.f32 %v1200_v51, %v1199_v49 }
  0xf0   : > { %v1154_v55 = vpop.f32.mrf.mxu0  ;;  %v1202_v56 = vpop.f32.mrf.mxu1 }
  0xf1   : > { %v540_v57 = vadd.f32 %v1153_v53, %v1462_v52  ;;  %v604_v58 = vadd.f32 %v1201_v54, %v1462_v52 }
  0xf2   : > { %v1155_v59 = vpop.f32.mrf.mxu0  ;;  %v1203_v60 = vpop.f32.mrf.mxu1 }
  0xf3   : > { %v1156_v61 = vadd.f32 %v1155_v59, %v1154_v55  ;;  %v1204_v62 = vadd.f32 %v1203_v60, %v1202_v56  ;;  %v666_v3 = vmax.f32 %v540_v57, 0.0  ;;  %v682_v4 = vmax.f32 %v604_v58, 0.0 }
  0xf4   : > { %v1157_v63 = vpop.f32.mrf.mxu0  ;;  %v1205_v0 = vpop.f32.mrf.mxu1 }
  0xf5   : > { %v543_v1 = vadd.f32 %v1156_v61, %v1462_v52  ;;  %v607_v2 = vadd.f32 %v1204_v62, %v1462_v52 }
  0xf6   : > { %v1158_v5 = vpop.f32.mrf.mxu0  ;;  %v1206_v6 = vpop.f32.mrf.mxu1 }
  0xf7   : > { %v667_v7 = vmax.f32 %v543_v1, 0.0  ;;  %v683_v8 = vmax.f32 %v607_v2, 0.0  ;;  %v1159_v9 = vadd.f32 %v1158_v5, %v1157_v63  ;;  %v1207_v10 = vadd.f32 %v1206_v6, %v1205_v0 }
  0xf8   : > { %v1160_v11 = vpop.f32.mrf.mxu0  ;;  %v1208_v12 = vpop.f32.mrf.mxu1 }
  0xf9   : > { %v1043_v13 = vpack.c.bf16 %v667_v7, %v666_v3  ;;  %v1083_v14 = vpack.c.bf16 %v683_v8, %v682_v4  ;;  %v548_v15 = vadd.f32 %v1159_v9, %v1462_v52  ;;  %v612_v16 = vadd.f32 %v1207_v10, %v1462_v52 }
  0xfa   : > { %v1161_v17 = vpop.f32.mrf.mxu0  ;;  %v1209_v18 = vpop.f32.mrf.mxu1 }
  0xfb   : > { %1044 = vst [vmem:[%s1472_s4] sm:$0xff] %v1043_v13   ;;  %1127 = vst [vmem:[%s1472_s4 + $0x40] sm:$0xff] %v1083_v14   ;;  %v1162_v19 = vadd.f32 %v1161_v17, %v1160_v11  ;;  %v1210_v20 = vadd.f32 %v1209_v18, %v1208_v12  ;;  %v668_v25 = vmax.f32 %v548_v15, 0.0  ;;  %v684_v26 = vmax.f32 %v612_v16, 0.0 }
  0xfc   : > { %v1163_v21 = vpop.f32.mrf.mxu0  ;;  %v1211_v22 = vpop.f32.mrf.mxu1 }
  0xfd   : > { %v551_v23 = vadd.f32 %v1162_v19, %v1462_v52  ;;  %v615_v24 = vadd.f32 %v1210_v20, %v1462_v52 }
  0xfe   : > { %v1164_v27 = vpop.f32.mrf.mxu0  ;;  %v1212_v28 = vpop.f32.mrf.mxu1 }
  0xff   : > { %v669_v29 = vmax.f32 %v551_v23, 0.0  ;;  %v685_v30 = vmax.f32 %v615_v24, 0.0  ;;  %v1165_v31 = vadd.f32 %v1164_v27, %v1163_v21  ;;  %v1213_v32 = vadd.f32 %v1212_v28, %v1211_v22 }
 0x100   : > { %v1166_v33 = vpop.f32.mrf.mxu0  ;;  %v1214_v34 = vpop.f32.mrf.mxu1 }
 0x101   : > { %v1048_v35 = vpack.c.bf16 %v669_v29, %v668_v25  ;;  %v1088_v36 = vpack.c.bf16 %v685_v30, %v684_v26  ;;  %v556_v37 = vadd.f32 %v1165_v31, %v1462_v52  ;;  %v620_v38 = vadd.f32 %v1213_v32, %v1462_v52 }
 0x102   : > { %v1167_v39 = vpop.f32.mrf.mxu0  ;;  %v1215_v40 = vpop.f32.mrf.mxu1 }
 0x103   : > { %1120 = vst [vmem:[%s1472_s4 + $0x8] sm:$0xff] %v1048_v35   ;;  %1128 = vst [vmem:[%s1472_s4 + $0x48] sm:$0xff] %v1088_v36   ;;  %v1168_v41 = vadd.f32 %v1167_v39, %v1166_v33  ;;  %v1216_v42 = vadd.f32 %v1215_v40, %v1214_v34  ;;  %v670_v47 = vmax.f32 %v556_v37, 0.0  ;;  %v686_v48 = vmax.f32 %v620_v38, 0.0 }
 0x104   : > { %v1169_v43 = vpop.f32.mrf.mxu0  ;;  %v1217_v44 = vpop.f32.mrf.mxu1 }
 0x105   : > { %v559_v45 = vadd.f32 %v1168_v41, %v1462_v52  ;;  %v623_v46 = vadd.f32 %v1216_v42, %v1462_v52 }
 0x106   : > { %v1170_v49 = vpop.f32.mrf.mxu0  ;;  %v1218_v50 = vpop.f32.mrf.mxu1 }
 0x107   : > { %v671_v51 = vmax.f32 %v559_v45, 0.0  ;;  %v687_v53 = vmax.f32 %v623_v46, 0.0  ;;  %v1171_v54 = vadd.f32 %v1170_v49, %v1169_v43  ;;  %v1219_v55 = vadd.f32 %v1218_v50, %v1217_v44 }
 0x108   : > { %v1172_v56 = vpop.f32.mrf.mxu0  ;;  %v1220_v57 = vpop.f32.mrf.mxu1 }
 0x109   : > { %v1053_v58 = vpack.c.bf16 %v671_v51, %v670_v47  ;;  %v1093_v59 = vpack.c.bf16 %v687_v53, %v686_v48  ;;  %v564_v60 = vadd.f32 %v1171_v54, %v1462_v52  ;;  %v628_v61 = vadd.f32 %v1219_v55, %v1462_v52 }
 0x10a   : > { %v1173_v62 = vpop.f32.mrf.mxu0  ;;  %v1221_v63 = vpop.f32.mrf.mxu1 }
 0x10b   : > { %1121 = vst [vmem:[%s1472_s4 + $0x10] sm:$0xff] %v1053_v58   ;;  %1129 = vst [vmem:[%s1472_s4 + $0x50] sm:$0xff] %v1093_v59   ;;  %v1174_v0 = vadd.f32 %v1173_v62, %v1172_v56  ;;  %v1222_v1 = vadd.f32 %v1221_v63, %v1220_v57  ;;  %v672_v6 = vmax.f32 %v564_v60, 0.0  ;;  %v688_v7 = vmax.f32 %v628_v61, 0.0 }
 0x10c   : > { %v1175_v2 = vpop.f32.mrf.mxu0  ;;  %v1223_v3 = vpop.f32.mrf.mxu1 }
 0x10d   : > { %v567_v4 = vadd.f32 %v1174_v0, %v1462_v52  ;;  %v631_v5 = vadd.f32 %v1222_v1, %v1462_v52 }
 0x10e   : > { %v1176_v8 = vpop.f32.mrf.mxu0  ;;  %v1224_v9 = vpop.f32.mrf.mxu1 }
 0x10f   : > { %v673_v10 = vmax.f32 %v567_v4, 0.0  ;;  %v689_v11 = vmax.f32 %v631_v5, 0.0  ;;  %v1177_v12 = vadd.f32 %v1176_v8, %v1175_v2  ;;  %v1225_v13 = vadd.f32 %v1224_v9, %v1223_v3 }
 0x110   : > { %v1178_v14 = vpop.f32.mrf.mxu0  ;;  %v1226_v15 = vpop.f32.mrf.mxu1 }
 0x111   : > { %v1058_v16 = vpack.c.bf16 %v673_v10, %v672_v6  ;;  %v1098_v17 = vpack.c.bf16 %v689_v11, %v688_v7  ;;  %v572_v18 = vadd.f32 %v1177_v12, %v1462_v52  ;;  %v636_v19 = vadd.f32 %v1225_v13, %v1462_v52 }
 0x112   : > { %v1179_v20 = vpop.f32.mrf.mxu0  ;;  %v1227_v21 = vpop.f32.mrf.mxu1 }
 0x113   : > { %1122 = vst [vmem:[%s1472_s4 + $0x18] sm:$0xff] %v1058_v16   ;;  %1130 = vst [vmem:[%s1472_s4 + $0x58] sm:$0xff] %v1098_v17   ;;  %v1180_v22 = vadd.f32 %v1179_v20, %v1178_v14  ;;  %v1228_v23 = vadd.f32 %v1227_v21, %v1226_v15  ;;  %v674_v28 = vmax.f32 %v572_v18, 0.0  ;;  %v690_v29 = vmax.f32 %v636_v19, 0.0 }
 0x114   : > { %v1181_v24 = vpop.f32.mrf.mxu0  ;;  %v1229_v25 = vpop.f32.mrf.mxu1 }
 0x115   : > { %v575_v26 = vadd.f32 %v1180_v22, %v1462_v52  ;;  %v639_v27 = vadd.f32 %v1228_v23, %v1462_v52 }
 0x116   : > { %v1182_v30 = vpop.f32.mrf.mxu0  ;;  %v1230_v31 = vpop.f32.mrf.mxu1 }
 0x117   : > { %v675_v32 = vmax.f32 %v575_v26, 0.0  ;;  %v691_v33 = vmax.f32 %v639_v27, 0.0  ;;  %v1183_v34 = vadd.f32 %v1182_v30, %v1181_v24  ;;  %v1231_v35 = vadd.f32 %v1230_v31, %v1229_v25 }
 0x118   : > { %v1184_v36 = vpop.f32.mrf.mxu0  ;;  %v1232_v37 = vpop.f32.mrf.mxu1 }
 0x119   : > { %v1063_v38 = vpack.c.bf16 %v675_v32, %v674_v28  ;;  %v1103_v39 = vpack.c.bf16 %v691_v33, %v690_v29  ;;  %v580_v40 = vadd.f32 %v1183_v34, %v1462_v52  ;;  %v644_v41 = vadd.f32 %v1231_v35, %v1462_v52 }
 0x11a   : > { %v1185_v42 = vpop.f32.mrf.mxu0  ;;  %v1233_v43 = vpop.f32.mrf.mxu1 }
 0x11b   : > { %1123 = vst [vmem:[%s1472_s4 + $0x20] sm:$0xff] %v1063_v38   ;;  %1131 = vst [vmem:[%s1472_s4 + $0x60] sm:$0xff] %v1103_v39   ;;  %v1186_v44 = vadd.f32 %v1185_v42, %v1184_v36  ;;  %v1234_v45 = vadd.f32 %v1233_v43, %v1232_v37  ;;  %v676_v50 = vmax.f32 %v580_v40, 0.0  ;;  %v692_v51 = vmax.f32 %v644_v41, 0.0 }
 0x11c   : > { %v1187_v46 = vpop.f32.mrf.mxu0  ;;  %v1235_v47 = vpop.f32.mrf.mxu1 }
 0x11d   : > { %v583_v48 = vadd.f32 %v1186_v44, %v1462_v52  ;;  %v647_v49 = vadd.f32 %v1234_v45, %v1462_v52 }
 0x11e   : > { %v1188_v53 = vpop.f32.mrf.mxu0  ;;  %v1236_v54 = vpop.f32.mrf.mxu1 }
 0x11f   : > { %v677_v55 = vmax.f32 %v583_v48, 0.0  ;;  %v693_v56 = vmax.f32 %v647_v49, 0.0  ;;  %v1189_v57 = vadd.f32 %v1188_v53, %v1187_v46  ;;  %v1237_v58 = vadd.f32 %v1236_v54, %v1235_v47 }
 0x120   : > { %v1190_v59 = vpop.f32.mrf.mxu0  ;;  %v1238_v60 = vpop.f32.mrf.mxu1 }
 0x121   : > { %v1068_v61 = vpack.c.bf16 %v677_v55, %v676_v50  ;;  %v1108_v62 = vpack.c.bf16 %v693_v56, %v692_v51  ;;  %v588_v63 = vadd.f32 %v1189_v57, %v1462_v52  ;;  %v652_v0 = vadd.f32 %v1237_v58, %v1462_v52 }
 0x122   : > { %v1191_v1 = vpop.f32.mrf.mxu0  ;;  %v1239_v2 = vpop.f32.mrf.mxu1 }
 0x123   : > { %1124 = vst [vmem:[%s1472_s4 + $0x28] sm:$0xff] %v1068_v61   ;;  %1132 = vst [vmem:[%s1472_s4 + $0x68] sm:$0xff] %v1108_v62   ;;  %v1192_v3 = vadd.f32 %v1191_v1, %v1190_v59  ;;  %v1240_v4 = vadd.f32 %v1239_v2, %v1238_v60  ;;  %v678_v9 = vmax.f32 %v588_v63, 0.0  ;;  %v694_v10 = vmax.f32 %v652_v0, 0.0 }
 0x124   : > { %v1193_v5 = vpop.f32.mrf.mxu0  ;;  %v1241_v6 = vpop.f32.mrf.mxu1 }
 0x125   : > { %v591_v7 = vadd.f32 %v1192_v3, %v1462_v52  ;;  %v655_v8 = vadd.f32 %v1240_v4, %v1462_v52 }
 0x126   : > { %v1194_v11 = vpop.f32.mrf.mxu0  ;;  %v1242_v12 = vpop.f32.mrf.mxu1 }
 0x127   : > { %v679_v13 = vmax.f32 %v591_v7, 0.0  ;;  %v695_v14 = vmax.f32 %v655_v8, 0.0  ;;  %v1195_v15 = vadd.f32 %v1194_v11, %v1193_v5  ;;  %v1243_v16 = vadd.f32 %v1242_v12, %v1241_v6 }
 0x128   : > { %v1196_v17 = vpop.f32.mrf.mxu0  ;;  %v1244_v18 = vpop.f32.mrf.mxu1 }
 0x129   : > { %v1073_v19 = vpack.c.bf16 %v679_v13, %v678_v9  ;;  %v1113_v20 = vpack.c.bf16 %v695_v14, %v694_v10  ;;  %v596_v23 = vadd.f32 %v1195_v15, %v1462_v52  ;;  %v660_v24 = vadd.f32 %v1243_v16, %v1462_v52 }
 0x12a   : > { %v1197_v21 = vpop.f32.mrf.mxu0  ;;  %v1245_v22 = vpop.f32.mrf.mxu1 }
 0x12b   : > { %1125 = vst [vmem:[%s1472_s4 + $0x30] sm:$0xff] %v1073_v19   ;;  %1133 = vst [vmem:[%s1472_s4 + $0x70] sm:$0xff] %v1113_v20   ;;  %v1198_v25 = vadd.f32 %v1197_v21, %v1196_v17  ;;  %v1246_v26 = vadd.f32 %v1245_v22, %v1244_v18  ;;  %v680_v29 = vmax.f32 %v596_v23, 0.0  ;;  %v696_v30 = vmax.f32 %v660_v24, 0.0 }
 0x12d   : > { %v599_v27 = vadd.f32 %v1198_v25, %v1462_v52  ;;  %v663_v28 = vadd.f32 %v1246_v26, %v1462_v52 }
 0x12f   : > { %v681_v31 = vmax.f32 %v599_v27, 0.0  ;;  %v697_v32 = vmax.f32 %v663_v28, 0.0 }
 0x131   : > { %v1078_v33 = vpack.c.bf16 %v681_v31, %v680_v29  ;;  %v1118_v34 = vpack.c.bf16 %v697_v32, %v696_v30 }
 0x133   : > { %1126 = vst [vmem:[%s1472_s4 + $0x38] sm:$0xff] %v1078_v33   ;;  %1134 = vst [vmem:[%s1472_s4 + $0x78] sm:$0xff] %v1118_v34  }
 0x134 PF: > { %s13_s12 = sadd.s32 1, %s1341_s12  }
 0x135   : > { %p10_p4 = scmp.ge.s32.totalorder %s13_s12, 4  }
 0x137   :  { %12 = sbr.rel (!%p10_p4) target bundleno = 1 (0x1), region = 62 }

// kernel: forward.22
= control target key start
LH: loop header
LB: loop body
LE: loop exit
PB: predicated region body
PF: predicated region fallthrough
CT: control target
= control target key end

     0   :  { %s928_s30 = smov 0   ;;  %s1077_s0 = inlined_call_operand.vmem [shape: bf16[128,128], index: 0, kind: input, shape index: {}]   ;;  %s1078_s1 = inlined_call_operand.vmem [shape: bf16[128,128], index: 1, kind: input, shape index: {}]   ;;  %s1079_s2 = inlined_call_operand.vmem [shape: bf16[128,128], index: 2, kind: input, shape index: {}]   ;;  %s1080_s3 = inlined_call_operand.vmem [shape: bf16[128,128], index: 3, kind: input, shape index: {}]   ;;  %s1081_s4 = inlined_call_operand.vmem [shape: bf16[128,128], index: 4, kind: input, shape index: {}]   ;;  %s1082_s5 = inlined_call_operand.vmem [shape: bf16[128,128], index: 5, kind: input, shape index: {}]   ;;  %s1083_s6 = inlined_call_operand.vmem [shape: bf16[128,128], index: 6, kind: input, shape index: {}]   ;;  %s1084_s7 = inlined_call_operand.vmem [shape: bf16[128,128], index: 7, kind: input, shape index: {}]   ;;  %s1085_s8 = inlined_call_operand.vmem [shape: bf16[128,128], index: 8, kind: input, shape index: {}]   ;;  %s1086_s9 = inlined_call_operand.vmem [shape: bf16[128,128], index: 9, kind: output, shape index: {}]  }
   0x1 LB: > { %s808_s10 = sadd.s32 4294967295, %s876_s30   ;;  %p812_p0 = scmp.ge.s32.totalorder %s876_s30, 1  ;;  %s876_s30 = sphi %s928_s30, %s19_s30  }
   0x2   : > { %p376_p1 = scmp.lt.s32.totalorder %s876_s30, 3 }
   0x4   : > { %p377_p2 = pnand %p812_p0, %p376_p1 }
   0x5   : > { %s813_s11 = sshll.u32 (!%p377_p2), %s808_s10, 3 }
   0x6   : > { %380 = sbr.rel (%p377_p2) target bundleno = 51 (0x33), region = 56  ;;  %p453_p3 = scmp.lt.s32.totalorder (!%p377_p2), %s813_s11, 15 }
   0xb   : > { %s1088_s11 = smov (!%p453_p3, %s813_s11), 15 }
   0xc   : > { %s936_s12 = sshll.u32 %s1088_s11, 2 }
   0xd   : > { %s942_s15 = scalar_lea.vmem %s1077_s0, %s936_s12  ;;  %s948_s18 = scalar_lea.vmem %s1078_s1, %s936_s12 }
   0xe   : > { %s954_s21 = scalar_lea.vmem %s1079_s2, %s936_s12  ;;  %s960_s24 = scalar_lea.vmem %s1080_s3, %s936_s12  ;;  %v512_v0 = vld [vmem:[%s942_s15] sm:$0xf]  ;;  %v513_v1 = vld [vmem:[%s942_s15 + $0x4] sm:$0xf]  ;;  %v514_v18 = vld [vmem:[%s942_s15 + $0x8] sm:$0xf] }
   0xf   : > { %v520_v2 = vld [vmem:[%s948_s18] sm:$0xf]  ;;  %s969_s27 = scalar_lea.vmem %s1081_s4, %s936_s12  ;;  %v521_v3 = vld [vmem:[%s948_s18 + $0x4] sm:$0xf]  ;;  %s978_s10 = scalar_lea.vmem %s1082_s5, %s936_s12  ;;  %v515_v19 = vld [vmem:[%s942_s15 + $0xc] sm:$0xf] }
  0x10   : > { %v528_v4 = vmax.bf16 %v520_v2, %v512_v0  ;;  %v536_v5 = vld [vmem:[%s954_s21] sm:$0xf]  ;;  %v537_v6 = vld [vmem:[%s954_s21 + $0x4] sm:$0xf]  ;;  %v529_v7 = vmax.bf16 %v521_v3, %v513_v1  ;;  %s987_s14 = scalar_lea.vmem %s1083_s6, %s936_s12  ;;  %s996_s19 = scalar_lea.vmem %s1084_s7, %s936_s12  ;;  %v522_v20 = vld [vmem:[%s948_s18 + $0x8] sm:$0xf] }
  0x11   : > { %v552_v8 = vld [vmem:[%s960_s24] sm:$0xf]  ;;  %v553_v10 = vld [vmem:[%s960_s24 + $0x4] sm:$0xf]  ;;  %s1005_s23 = scalar_lea.vmem %s1085_s8, %s936_s12  ;;  %v523_v22 = vld [vmem:[%s948_s18 + $0xc] sm:$0xf]  ;;  %v530_v23 = vmax.bf16 %v522_v20, %v514_v18  ;;  %s1040_s28 = scalar_lea.vmem %s1086_s9, %s936_s12 }
  0x12   : > { %v544_v9 = vmax.bf16 %v536_v5, %v528_v4  ;;  %v545_v11 = vmax.bf16 %v537_v6, %v529_v7  ;;  %v568_v12 = vld [vmem:[%s969_s27] sm:$0xf]  ;;  %v569_v14 = vld [vmem:[%s969_s27 + $0x4] sm:$0xf]  ;;  %v538_v24 = vld [vmem:[%s954_s21 + $0x8] sm:$0xf]  ;;  %v531_v28 = vmax.bf16 %v523_v22, %v515_v19 }
  0x13   : > { %v584_v15 = vld [vmem:[%s978_s10] sm:$0xf]  ;;  %v585_v16 = vld [vmem:[%s978_s10 + $0x4] sm:$0xf]  ;;  %v539_v25 = vld [vmem:[%s954_s21 + $0xc] sm:$0xf]  ;;  %v546_v33 = vmax.bf16 %v538_v24, %v530_v23 }
  0x14   : > { %v560_v13 = vmax.bf16 %v552_v8, %v544_v9  ;;  %v561_v17 = vmax.bf16 %v553_v10, %v545_v11  ;;  %v600_v27 = vld [vmem:[%s987_s14] sm:$0xf]  ;;  %v554_v29 = vld [vmem:[%s960_s24 + $0x8] sm:$0xf]  ;;  %v601_v31 = vld [vmem:[%s987_s14 + $0x4] sm:$0xf]  ;;  %v547_v38 = vmax.bf16 %v539_v25, %v531_v28 }
  0x15   : > { %v616_v32 = vld [vmem:[%s996_s19] sm:$0xf]  ;;  %v555_v34 = vld [vmem:[%s960_s24 + $0xc] sm:$0xf]  ;;  %v617_v36 = vld [vmem:[%s996_s19 + $0x4] sm:$0xf]  ;;  %v562_v42 = vmax.bf16 %v554_v29, %v546_v33 }
  0x16   : > { %v576_v21 = vmax.bf16 %v568_v12, %v560_v13  ;;  %v577_v26 = vmax.bf16 %v569_v14, %v561_v17  ;;  %v632_v37 = vld [vmem:[%s1005_s23] sm:$0xf]  ;;  %v570_v39 = vld [vmem:[%s969_s27 + $0x8] sm:$0xf]  ;;  %v633_v41 = vld [vmem:[%s1005_s23 + $0x4] sm:$0xf]  ;;  %v563_v47 = vmax.bf16 %v555_v34, %v547_v38 }
  0x17   : > { %v571_v43 = vld [vmem:[%s969_s27 + $0xc] sm:$0xf]  ;;  %v586_v44 = vld [vmem:[%s978_s10 + $0x8] sm:$0xf]  ;;  %v516_v48 = vld [vmem:[%s942_s15 + $0x10] sm:$0xf]  ;;  %v578_v52 = vmax.bf16 %v570_v39, %v562_v42 }
  0x18   : > { %v592_v30 = vmax.bf16 %v584_v15, %v576_v21  ;;  %v593_v35 = vmax.bf16 %v585_v16, %v577_v26  ;;  %v587_v45 = vld [vmem:[%s978_s10 + $0xc] sm:$0xf]  ;;  %v517_v49 = vld [vmem:[%s942_s15 + $0x14] sm:$0xf]  ;;  %v524_v50 = vld [vmem:[%s948_s18 + $0x10] sm:$0xf]  ;;  %v579_v58 = vmax.bf16 %v571_v43, %v563_v47 }
  0x19   : > { %v525_v53 = vld [vmem:[%s948_s18 + $0x14] sm:$0xf]  ;;  %v532_v54 = vmax.bf16 %v524_v50, %v516_v48  ;;  %v540_v55 = vld [vmem:[%s954_s21 + $0x10] sm:$0xf]  ;;  %v602_v59 = vld [vmem:[%s987_s14 + $0x8] sm:$0xf]  ;;  %v594_v63 = vmax.bf16 %v586_v44, %v578_v52 }
  0x1a   : > { %v608_v40 = vmax.bf16 %v600_v27, %v592_v30  ;;  %v609_v46 = vmax.bf16 %v601_v31, %v593_v35  ;;  %v541_v56 = vld [vmem:[%s954_s21 + $0x14] sm:$0xf]  ;;  %v533_v60 = vmax.bf16 %v525_v53, %v517_v49  ;;  %v556_v61 = vld [vmem:[%s960_s24 + $0x10] sm:$0xf]  ;;  %v603_v0 = vld [vmem:[%s987_s14 + $0xc] sm:$0xf]  ;;  %v595_v5 = vmax.bf16 %v587_v45, %v579_v58 }
  0x1b   : > { %v618_v1 = vld [vmem:[%s996_s19 + $0x8] sm:$0xf]  ;;  %v548_v2 = vmax.bf16 %v540_v55, %v532_v54  ;;  %v557_v3 = vld [vmem:[%s960_s24 + $0x14] sm:$0xf]  ;;  %v619_v6 = vld [vmem:[%s996_s19 + $0xc] sm:$0xf]  ;;  %v610_v10 = vmax.bf16 %v602_v59, %v594_v63 }
  0x1c   : > { %v624_v51 = vmax.bf16 %v616_v32, %v608_v40  ;;  %v625_v57 = vmax.bf16 %v617_v36, %v609_v46  ;;  %v634_v7 = vld [vmem:[%s1005_s23 + $0x8] sm:$0xf]  ;;  %v549_v8 = vmax.bf16 %v541_v56, %v533_v60  ;;  %v572_v9 = vld [vmem:[%s969_s27 + $0x10] sm:$0xf]  ;;  %v635_v11 = vld [vmem:[%s1005_s23 + $0xc] sm:$0xf]  ;;  %v611_v17 = vmax.bf16 %v603_v0, %v595_v5 }
  0x1d   : > { %v564_v12 = vmax.bf16 %v556_v61, %v548_v2  ;;  %v573_v13 = vld [vmem:[%s969_s27 + $0x14] sm:$0xf]  ;;  %v588_v14 = vld [vmem:[%s978_s10 + $0x10] sm:$0xf]  ;;  %v518_v19 = vld [vmem:[%s942_s15 + $0x18] sm:$0xf]  ;;  %v626_v22 = vmax.bf16 %v618_v1, %v610_v10 }
  0x1e   : > { %v640_v62 = vmax.bf16 %v632_v37, %v624_v51  ;;  %v641_v4 = vmax.bf16 %v633_v41, %v625_v57  ;;  %v589_v15 = vld [vmem:[%s978_s10 + $0x14] sm:$0xf]  ;;  %v565_v18 = vmax.bf16 %v557_v3, %v549_v8  ;;  %v519_v20 = vld [vmem:[%s942_s15 + $0x1c] sm:$0xf]  ;;  %v526_v21 = vld [vmem:[%s948_s18 + $0x18] sm:$0xf]  ;;  %v627_v28 = vmax.bf16 %v619_v6, %v611_v17 }
  0x1f   : > { %v580_v23 = vmax.bf16 %v572_v9, %v564_v12  ;;  %v527_v24 = vld [vmem:[%s948_s18 + $0x1c] sm:$0xf]  ;;  %v534_v25 = vmax.bf16 %v526_v21, %v518_v19  ;;  %v542_v26 = vld [vmem:[%s954_s21 + $0x18] sm:$0xf]  ;;  %v604_v30 = vld [vmem:[%s987_s14 + $0x10] sm:$0xf]  ;;  %v642_v33 = vmax.bf16 %v634_v7, %v626_v22 }
  0x20   : > { %v855_v16 = vcombine.low %v640_v62, %v641_v4  ;;  %v543_v27 = vld [vmem:[%s954_s21 + $0x1c] sm:$0xf]  ;;  %v581_v29 = vmax.bf16 %v573_v13, %v565_v18  ;;  %v535_v31 = vmax.bf16 %v527_v24, %v519_v20  ;;  %v558_v32 = vld [vmem:[%s960_s24 + $0x18] sm:$0xf]  ;;  %v605_v35 = vld [vmem:[%s987_s14 + $0x14] sm:$0xf]  ;;  %v643_v38 = vmax.bf16 %v635_v11, %v627_v28 }
  0x21   : > { %v596_v34 = vmax.bf16 %v588_v14, %v580_v23  ;;  %v550_v36 = vmax.bf16 %v542_v26, %v534_v25  ;;  %v559_v37 = vld [vmem:[%s960_s24 + $0x1c] sm:$0xf]  ;;  %v620_v40 = vld [vmem:[%s996_s19 + $0x10] sm:$0xf]  ;;  %v574_v42 = vld [vmem:[%s969_s27 + $0x18] sm:$0xf] }
  0x22   : > { %839 = vst [vmem:[%s1040_s28] sm:$0xff] %v855_v16   ;;  %v597_v39 = vmax.bf16 %v589_v15, %v581_v29  ;;  %v551_v41 = vmax.bf16 %v543_v27, %v535_v31  ;;  %v621_v44 = vld [vmem:[%s996_s19 + $0x14] sm:$0xf]  ;;  %v575_v46 = vld [vmem:[%s969_s27 + $0x1c] sm:$0xf]  ;;  %v856_v47 = vcombine.low %v642_v33, %v643_v38  ;;  %v636_v49 = vld [vmem:[%s1005_s23 + $0x10] sm:$0xf] }
  0x23   : > { %v612_v43 = vmax.bf16 %v604_v30, %v596_v34  ;;  %v566_v45 = vmax.bf16 %v558_v32, %v550_v36  ;;  %v590_v51 = vld [vmem:[%s978_s10 + $0x18] sm:$0xf]  ;;  %v637_v53 = vld [vmem:[%s1005_s23 + $0x14] sm:$0xf]  ;;  %v591_v55 = vld [vmem:[%s978_s10 + $0x1c] sm:$0xf] }
  0x24   : > { %v613_v48 = vmax.bf16 %v605_v35, %v597_v39  ;;  %v567_v50 = vmax.bf16 %v559_v37, %v551_v41  ;;  %857 = vst [vmem:[%s1040_s28 + $0x8] sm:$0xff] %v856_v47   ;;  %v606_v58 = vld [vmem:[%s987_s14 + $0x18] sm:$0xf]  ;;  %v607_v61 = vld [vmem:[%s987_s14 + $0x1c] sm:$0xf] }
  0x25   : > { %v628_v52 = vmax.bf16 %v620_v40, %v612_v43  ;;  %v582_v54 = vmax.bf16 %v574_v42, %v566_v45  ;;  %v622_v0 = vld [vmem:[%s996_s19 + $0x18] sm:$0xf]  ;;  %v623_v2 = vld [vmem:[%s996_s19 + $0x1c] sm:$0xf] }
  0x26   : > { %v629_v56 = vmax.bf16 %v621_v44, %v613_v48  ;;  %v583_v57 = vmax.bf16 %v575_v46, %v567_v50  ;;  %v638_v5 = vld [vmem:[%s1005_s23 + $0x18] sm:$0xf]  ;;  %v639_v7 = vld [vmem:[%s1005_s23 + $0x1c] sm:$0xf] }
  0x27   : > { %v644_v59 = vmax.bf16 %v636_v49, %v628_v52  ;;  %v598_v60 = vmax.bf16 %v590_v51, %v582_v54 }
  0x28   : > { %v645_v62 = vmax.bf16 %v637_v53, %v629_v56  ;;  %v599_v63 = vmax.bf16 %v591_v55, %v583_v57 }
  0x29   : > { %v614_v1 = vmax.bf16 %v606_v58, %v598_v60 }
  0x2a   : > { %v858_v3 = vcombine.low %v644_v59, %v645_v62  ;;  %v615_v4 = vmax.bf16 %v607_v61, %v599_v63 }
  0x2b   : > { %v630_v6 = vmax.bf16 %v622_v0, %v614_v1 }
  0x2c   : > { %859 = vst [vmem:[%s1040_s28 + $0x10] sm:$0xff] %v858_v3   ;;  %v631_v8 = vmax.bf16 %v623_v2, %v615_v4 }
  0x2d   : > { %v646_v9 = vmax.bf16 %v638_v5, %v630_v6 }
  0x2e   : > { %v647_v10 = vmax.bf16 %v639_v7, %v631_v8 }
  0x30   : > { %v860_v11 = vcombine.low %v646_v9, %v647_v10 }
  0x32   : > { %861 = vst [vmem:[%s1040_s28 + $0x18] sm:$0xff] %v860_v11  }
  0x33 PF: > { %s19_s30 = sadd.s32 1, %s876_s30  }
  0x34   : > { %p16_p4 = scmp.ge.s32.totalorder %s19_s30, 4  }
  0x36   :  { %18 = sbr.rel (!%p16_p4) target bundleno = 1 (0x1), region = 110 }

// kernel: forward.23
= control target key start
LH: loop header
LB: loop body
LE: loop exit
PB: predicated region body
PF: predicated region fallthrough
CT: control target
= control target key end

     0   :  { %s610_s12 = smov 0   ;;  %s667_s0 = inlined_call_operand.vmem [shape: bf16[128,128], index: 0, kind: input, shape index: {}]   ;;  %s668_s1 = inlined_call_operand.vmem [shape: bf16[128,128], index: 1, kind: input, shape index: {}]   ;;  %s669_s2 = inlined_call_operand.vmem [shape: f32[1,128], index: 2, kind: input, shape index: {}]   ;;  %s670_s3 = inlined_call_operand.vmem [shape: bf16[128,128], index: 3, kind: output, shape index: {}]  }
   0x1 LB: > { %s447_s13 = sadd.s32 4294967295, %s588_s12   ;;  %p451_p0 = scmp.ge.s32.totalorder %s588_s12, 1  ;;  %s588_s12 = sphi %s610_s12, %s13_s12  }
   0x2   : > { %p138_p1 = scmp.lt.s32.totalorder %s588_s12, 3 }
   0x4   : > { %p139_p2 = pnand %p451_p0, %p138_p1 }
   0x5   : > { %s452_s16 = sshll.u32 (!%p139_p2), %s447_s13, 3 }
   0x6   : > { %142 = sbr.rel (%p139_p2) target bundleno = 250 (0xfa), region = 32  ;;  %p163_p3 = scmp.lt.s32.totalorder (!%p139_p2), %s452_s16, 15 }
   0xb   : > { %v570_v0 = vld [vmem:[%s668_s1 + $0x38] sm:$0xff]   ;;  %v571_v1 = vld [vmem:[%s668_s1 + $0x30] sm:$0xff]   ;;  %s672_s16 = smov (!%p163_p3, %s452_s16), 15  ;;  %v572_v2 = vld [vmem:[%s668_s1 + $0x28] sm:$0xff]  }
   0xc   : > { %522 = vmatprep.subr.bf16.mxu0 %v570_v0  ;;  %546 = vmatprep.subr.bf16.mxu1 %v570_v0  ;;  %s453_s21 = sshll.u32 %s672_s16, 2  ;;  %v573_v3 = vld [vmem:[%s668_s1 + $0x20] sm:$0xff]   ;;  %v574_v6 = vld [vmem:[%s668_s1 + $0x18] sm:$0xff]   ;;  %v575_v7 = vld [vmem:[%s668_s1 + $0x10] sm:$0xff]  }
   0xd   : > { %523 = vmatpush3.bf16.msra.mxu0 %v570_v0  ;;  %554 = vmatpush3.bf16.msra.mxu1 %v570_v0  ;;  %s635_s24 = scalar_lea.vmem %s667_s0, %s453_s21  ;;  %v576_v8 = vld [vmem:[%s668_s1 + $0x8] sm:$0xff]   ;;  %v577_v9 = vld [vmem:[%s668_s1] sm:$0xff]   ;;  %s172_s13 = scalar_lea.vmem %s670_s3, %s453_s21 }
   0xe   : > { %524 = vmatprep.subr.bf16.mxu0 %v571_v1  ;;  %547 = vmatprep.subr.bf16.mxu1 %v571_v1  ;;  %v578_v4 = vld [vmem:[%s635_s24] sm:$0xff]   ;;  %v579_v5 = vld [vmem:[%s635_s24 + $0x10] sm:$0xff]   ;;  %v580_v10 = vld [vmem:[%s635_s24 + $0x8] sm:$0xff]  }
   0xf   : > { %538 = vmatprep.mubr.bf16.mxu0 %v578_v4  ;;  %542 = vmatprep.mubr.bf16.mxu1 %v579_v5  ;;  %v581_v11 = vld [vmem:[%s635_s24 + $0x18] sm:$0xff]   ;;  %v456_v12 = vld [vmem:[%s669_s2] ss:$0 sm:$0xff] }
  0x11   : > { %525 = vmatpush3.bf16.msra.mxu0 %v571_v1  ;;  %555 = vmatpush3.bf16.msra.mxu1 %v571_v1 }
  0x12   : > { %526 = vmatprep.subr.bf16.mxu0 %v572_v2  ;;  %548 = vmatprep.subr.bf16.mxu1 %v572_v2 }
  0x15   : > { %527 = vmatpush3.bf16.msra.mxu0 %v572_v2  ;;  %556 = vmatpush3.bf16.msra.mxu1 %v572_v2 }
  0x16   : > { %528 = vmatprep.subr.bf16.mxu0 %v573_v3  ;;  %549 = vmatprep.subr.bf16.mxu1 %v573_v3 }
  0x19   : > { %529 = vmatpush3.bf16.msra.mxu0 %v573_v3  ;;  %557 = vmatpush3.bf16.msra.mxu1 %v573_v3 }
  0x1a   : > { %530 = vmatprep.subr.bf16.mxu0 %v574_v6  ;;  %550 = vmatprep.subr.bf16.mxu1 %v574_v6 }
  0x1d   : > { %531 = vmatpush3.bf16.msra.mxu0 %v574_v6  ;;  %558 = vmatpush3.bf16.msra.mxu1 %v574_v6 }
  0x1e   : > { %532 = vmatprep.subr.bf16.mxu0 %v575_v7  ;;  %551 = vmatprep.subr.bf16.mxu1 %v575_v7 }
  0x21   : > { %533 = vmatpush3.bf16.msra.mxu0 %v575_v7  ;;  %559 = vmatpush3.bf16.msra.mxu1 %v575_v7 }
  0x22   : > { %534 = vmatprep.subr.bf16.mxu0 %v576_v8  ;;  %552 = vmatprep.subr.bf16.mxu1 %v576_v8 }
  0x25   : > { %535 = vmatpush3.bf16.msra.mxu0 %v576_v8  ;;  %560 = vmatpush3.bf16.msra.mxu1 %v576_v8 }
  0x26   : > { %536 = vmatprep.subr.bf16.mxu0 %v577_v9  ;;  %553 = vmatprep.subr.bf16.mxu1 %v577_v9 }
  0x29   : > { %537 = vmatpush3.bf16.msra.mxu0 %v577_v9  ;;  %561 = vmatpush3.bf16.msra.mxu1 %v577_v9 }
  0x2c   : > { %539 = vmatmul.mubr.bf16.vlgmr.msra.gmra.mxu0 %v580_v10  ;;  %543 = vmatmul.mubr.bf16.vlgmr.msra.gmra.mxu1 %v581_v11 }
  0xec   : > { %v540_v13 = vpop.f32.mrf.mxu0  ;;  %v544_v14 = vpop.f32.mrf.mxu1 }
  0xed   : > { %v321_v15 = vadd.f32 %v540_v13, %v456_v12  ;;  %v337_v16 = vadd.f32 %v544_v14, %v456_v12 }
  0xee   : > { %v312_v17 = vpop.f32.mrf.mxu0  ;;  %v328_v18 = vpop.f32.mrf.mxu1 }
  0xef   : > { %v313_v19 = vadd.f32 %v456_v12, %v312_v17  ;;  %v329_v20 = vadd.f32 %v456_v12, %v328_v18  ;;  %v345_v25 = vmax.f32 %v321_v15, 0.0  ;;  %v349_v26 = vmax.f32 %v337_v16, 0.0 }
  0xf0   : > { %v541_v21 = vpop.f32.mrf.mxu0  ;;  %v545_v22 = vpop.f32.mrf.mxu1 }
  0xf1   : > { %v324_v23 = vadd.f32 %v541_v21, %v456_v12  ;;  %v340_v24 = vadd.f32 %v545_v22, %v456_v12  ;;  %v343_v33 = vmax.f32 %v313_v19, 0.0  ;;  %v347_v34 = vmax.f32 %v329_v20, 0.0 }
  0xf2   : > { %v315_v27 = vpop.f32.mrf.mxu0  ;;  %v331_v28 = vpop.f32.mrf.mxu1 }
  0xf3   : > { %v346_v29 = vmax.f32 %v324_v23, 0.0  ;;  %v350_v30 = vmax.f32 %v340_v24, 0.0  ;;  %v316_v31 = vadd.f32 %v456_v12, %v315_v27  ;;  %v332_v32 = vadd.f32 %v456_v12, %v331_v28 }
  0xf5   : > { %v495_v35 = vpack.c.bf16 %v346_v29, %v345_v25  ;;  %v505_v36 = vpack.c.bf16 %v350_v30, %v349_v26  ;;  %v344_v37 = vmax.f32 %v316_v31, 0.0  ;;  %v348_v38 = vmax.f32 %v332_v32, 0.0 }
  0xf7   : > { %507 = vst [vmem:[%s172_s13 + $0x8] sm:$0xff] %v495_v35   ;;  %509 = vst [vmem:[%s172_s13 + $0x18] sm:$0xff] %v505_v36   ;;  %v490_v39 = vpack.c.bf16 %v344_v37, %v343_v33  ;;  %v500_v40 = vpack.c.bf16 %v348_v38, %v347_v34 }
  0xf9   : > { %491 = vst [vmem:[%s172_s13] sm:$0xff] %v490_v39   ;;  %508 = vst [vmem:[%s172_s13 + $0x10] sm:$0xff] %v500_v40  }
  0xfa PF: > { %s13_s12 = sadd.s32 1, %s588_s12  }
  0xfb   : > { %p10_p4 = scmp.ge.s32.totalorder %s13_s12, 4  }
  0xfd   :  { %12 = sbr.rel (!%p10_p4) target bundleno = 1 (0x1), region = 62 }

// kernel: forward.24
= control target key start
LH: loop header
LB: loop body
LE: loop exit
PB: predicated region body
PF: predicated region fallthrough
CT: control target
= control target key end

     0   :  { %s1042_s15 = smov 0   ;;  %s1181_s0 = inlined_call_operand.vmem [shape: bf16[128,384], index: 0, kind: input, shape index: {}]   ;;  %s1182_s1 = inlined_call_operand.vmem [shape: bf16[384,128], index: 1, kind: input, shape index: {}]   ;;  %s1183_s2 = inlined_call_operand.vmem [shape: f32[1,128], index: 2, kind: input, shape index: {}]   ;;  %s1184_s3 = inlined_call_operand.vmem [shape: bf16[128,128], index: 3, kind: input, shape index: {}]   ;;  %s1185_s4 = inlined_call_operand.vmem [shape: bf16[128,128], index: 4, kind: output, shape index: {}]  }
   0x1 LB: > { %s776_s16 = sadd.s32 4294967295, %s1015_s15   ;;  %p780_p0 = scmp.ge.s32.totalorder %s1015_s15, 1  ;;  %s1015_s15 = sphi %s1042_s15, %s14_s15  }
   0x2   : > { %p175_p1 = scmp.lt.s32.totalorder %s1015_s15, 3 }
   0x4   : > { %p176_p2 = pnand %p780_p0, %p175_p1 }
   0x5   : > { %s781_s5 = sshll.u32 (!%p176_p2), %s776_s16, 3 }
   0x6   : > { %179 = sbr.rel (%p176_p2) target bundleno = 280 (0x118), region = 36  ;;  %p208_p3 = scmp.lt.s32.totalorder (!%p176_p2), %s781_s5, 15 }
   0xb   : > { %v969_v0 = vld [vmem:[%s1182_s1 + $0x78] sm:$0xff]   ;;  %v971_v2 = vld [vmem:[%s1182_s1 + $0x70] sm:$0xff]   ;;  %v974_v5 = vld [vmem:[%s1182_s1 + $0x68] sm:$0xff]   ;;  %s1187_s5 = smov (!%p208_p3, %s781_s5), 15 }
   0xc   : > { %v970_v1 = vld [vmem:[%s1182_s1 + $0x38] sm:$0xff]   ;;  %884 = vmatprep.subr.bf16.mxu0 %v969_v0  ;;  %v973_v4 = vld [vmem:[%s1182_s1 + $0x30] sm:$0xff]   ;;  %v976_v7 = vld [vmem:[%s1182_s1 + $0x28] sm:$0xff]   ;;  %s960_s25 = smul.u32 12, %s1187_s5  ;;  %s784_s21 = sshll.u32 %s1187_s5, 2 }
   0xd   : > { %885 = vmatpush3.bf16.msra.mxu0 %v970_v1  ;;  %v972_v3 = vld [vmem:[%s1182_s1 + $0xb8] sm:$0xff]   ;;  %v975_v6 = vld [vmem:[%s1182_s1 + $0xb0] sm:$0xff]   ;;  %v977_v8 = vld [vmem:[%s1182_s1 + $0x60] sm:$0xff]   ;;  %s1148_s24 = scalar_lea.vmem %s1184_s3, %s784_s21  ;;  %s1165_s29 = scalar_lea.vmem %s1185_s4, %s784_s21 }
   0xe   : > { %886 = vmatprep.subr.bf16.mxu0 %v971_v2  ;;  %936 = vmatprep.subr.bf16.mxu1 %v972_v3  ;;  %v978_v9 = vld [vmem:[%s1182_s1 + $0xa8] sm:$0xff]   ;;  %v979_v10 = vld [vmem:[%s1182_s1 + $0x20] sm:$0xff]   ;;  %v980_v11 = vld [vmem:[%s1182_s1 + $0x58] sm:$0xff]   ;;  %s1116_s11 = scalar_lea.vmem %s1181_s0, %s960_s25 }
   0xf   : > { %937 = vmatpush3.bf16.msra.mxu1 %v972_v3  ;;  %v981_v12 = vld [vmem:[%s1182_s1 + $0xa0] sm:$0xff]   ;;  %v982_v13 = vld [vmem:[%s1182_s1 + $0x18] sm:$0xff]   ;;  %v983_v15 = vld [vmem:[%s1182_s1 + $0x50] sm:$0xff]  }
  0x10   : > { %938 = vmatprep.subr.bf16.mxu1 %v975_v6  ;;  %v984_v14 = vld [vmem:[%s1182_s1 + $0x98] sm:$0xff]   ;;  %v985_v16 = vld [vmem:[%s1182_s1 + $0x10] sm:$0xff]   ;;  %v986_v18 = vld [vmem:[%s1182_s1 + $0x48] sm:$0xff]  }
  0x11   : > { %887 = vmatpush3.bf16.msra.mxu0 %v973_v4  ;;  %v987_v17 = vld [vmem:[%s1182_s1 + $0x90] sm:$0xff]   ;;  %v988_v19 = vld [vmem:[%s1182_s1 + $0x8] sm:$0xff]   ;;  %v989_v20 = vld [vmem:[%s1182_s1 + $0x40] sm:$0xff]  }
  0x12   : > { %888 = vmatprep.subr.bf16.mxu0 %v974_v5  ;;  %v990_v21 = vld [vmem:[%s1182_s1 + $0x88] sm:$0xff]   ;;  %v994_v22 = vld [vmem:[%s1116_s11 + $0x4] ss:$12 sps:$4 sm:$0xff]   ;;  %v1001_v31 = vld [vmem:[%s1116_s11 + $0x34] ss:$12 sps:$4 sm:$0xff]  }
  0x13   : > { %939 = vmatpush3.bf16.msra.mxu1 %v975_v6  ;;  %v991_v23 = vld [vmem:[%s1182_s1] sm:$0xff]   ;;  %538 = vmatprep.mubr.bf16.mxu0 %v994_v22  ;;  %v996_v24 = vld [vmem:[%s1116_s11 + $0x8] ss:$12 sps:$4 sm:$0xff]   ;;  %v1005_v32 = vld [vmem:[%s1116_s11 + $0x50] ss:$12 sps:$4 sm:$0xff]  }
  0x14   : > { %940 = vmatprep.subr.bf16.mxu1 %v978_v9  ;;  %v995_v25 = vld [vmem:[%s1182_s1 + $0x80] sm:$0xff]   ;;  %952 = vmatprep.mubr.bf16.mxu1 %v996_v24  ;;  %v998_v27 = vld [vmem:[%s1116_s11 + $0x1c] ss:$12 sps:$4 sm:$0xff]   ;;  %v1006_v34 = vld [vmem:[%s1116_s11 + $0x4c] ss:$12 sps:$4 sm:$0xff]  }
  0x15   : > { %889 = vmatpush3.bf16.msra.mxu0 %v976_v7  ;;  %v992_v26 = vld [vmem:[%s1116_s11] ss:$12 sps:$4 sm:$0xff]   ;;  %v1004_v29 = vld [vmem:[%s1116_s11 + $0x38] ss:$12 sps:$4 sm:$0xff]   ;;  %v1003_v33 = vld [vmem:[%s1116_s11 + $0x30] ss:$12 sps:$4 sm:$0xff]  }
  0x16   : > { %890 = vmatprep.subr.bf16.mxu0 %v977_v8  ;;  %v997_v28 = vld [vmem:[%s1116_s11 + $0x20] ss:$12 sps:$4 sm:$0xff]   ;;  %v1000_v30 = vld [vmem:[%s1116_s11 + $0x18] ss:$12 sps:$4 sm:$0xff]   ;;  %v1008_v35 = vld [vmem:[%s1116_s11 + $0x48] ss:$12 sps:$4 sm:$0xff]  }
  0x17   : > { %941 = vmatpush3.bf16.msra.mxu1 %v978_v9  ;;  %v1153_v38 = vld [vmem:[%s1183_s2] ss:$0 sm:$0xff]  ;;  %v878_v57 = vld [vmem:[%s1148_s24 + $0x8] sm:$0xff]  }
  0x18   : > { %942 = vmatprep.subr.bf16.mxu1 %v981_v12  ;;  %v843_v42 = vld [vmem:[%s1148_s24] sm:$0xff]   ;;  %v848_v63 = vunpack.c.l.bf16 %v878_v57  ;;  %v849_v9 = vunpack.c.h.bf16 %v878_v57 }
  0x19   : > { %891 = vmatpush3.bf16.msra.mxu0 %v979_v10  ;;  %v844_v48 = vunpack.c.l.bf16 %v843_v42  ;;  %v845_v53 = vunpack.c.h.bf16 %v843_v42 }
  0x1a   : > { %892 = vmatprep.subr.bf16.mxu0 %v980_v11 }
  0x1b   : > { %943 = vmatpush3.bf16.msra.mxu1 %v981_v12 }
  0x1c   : > { %944 = vmatprep.subr.bf16.mxu1 %v984_v14 }
  0x1d   : > { %893 = vmatpush3.bf16.msra.mxu0 %v982_v13 }
  0x1e   : > { %894 = vmatprep.subr.bf16.mxu0 %v983_v15 }
  0x1f   : > { %945 = vmatpush3.bf16.msra.mxu1 %v984_v14  ;;  %v879_v14 = vld [vmem:[%s1148_s24 + $0x10] sm:$0xff]  }
  0x20   : > { %946 = vmatprep.subr.bf16.mxu1 %v987_v17 }
  0x21   : > { %895 = vmatpush3.bf16.msra.mxu0 %v985_v16 }
  0x22   : > { %896 = vmatprep.subr.bf16.mxu0 %v986_v18 }
  0x23   : > { %947 = vmatpush3.bf16.msra.mxu1 %v987_v17 }
  0x24   : > { %948 = vmatprep.subr.bf16.mxu1 %v990_v21 }
  0x25   : > { %897 = vmatpush3.bf16.msra.mxu0 %v988_v19 }
  0x26   : > { %898 = vmatprep.subr.bf16.mxu0 %v989_v20  ;;  %v852_v20 = vunpack.c.l.bf16 %v879_v14 }
  0x27   : > { %949 = vmatpush3.bf16.msra.mxu1 %v990_v21 }
  0x28   : > { %950 = vmatprep.subr.bf16.mxu1 %v995_v25 }
  0x29   : > { %899 = vmatpush3.bf16.msra.mxu0 %v991_v23 }
  0x2b   : > { %951 = vmatpush3.bf16.msra.mxu1 %v995_v25 }
  0x2c   : > { %539 = vmatmul.mubr.bf16.vlgmr.msra.gmra.mxu0 %v992_v26 }
  0x2d   : > { %546 = vmatprep.mubr.bf16.mxu0 %v998_v27 }
  0x2e   : > { %953 = vmatmul.mubr.bf16.vlgmr.msra.gmra.mxu1 %v997_v28 }
  0x2f   : > { %956 = vmatprep.mubr.bf16.mxu1 %v1004_v29  ;;  %v853_v29 = vunpack.c.h.bf16 %v879_v14 }
  0x34   : > { %547 = vmatmul.mubr.bf16.gmra.mxu0 %v1000_v30 }
  0x35   : > { %554 = vmatprep.mubr.bf16.mxu0 %v1001_v31 }
  0x36   : > { %957 = vmatmul.mubr.bf16.gmra.mxu1 %v1005_v32 }
  0x3c   : > { %555 = vmatmul.mubr.bf16.gmra.mxu0 %v1003_v33  ;;  %v880_v33 = vld [vmem:[%s1148_s24 + $0x18] sm:$0xff]  }
  0x3d   : > { %562 = vmatprep.mubr.bf16.mxu0 %v1006_v34 }
  0x44   : > { %563 = vmatmul.mubr.bf16.gmra.mxu0 %v1008_v35 }
  0xec   : > { %v900_v36 = vpop.f32.mrf.mxu0 }
  0xee   : > { %v901_v37 = vpop.f32.mrf.mxu0  ;;  %v954_v40 = vpop.f32.mrf.mxu1 }
  0xef   : > { %v902_v39 = vadd.f32 %v901_v37, %v900_v36 }
  0xf0   : > { %v903_v41 = vpop.f32.mrf.mxu0  ;;  %v605_v44 = vpop.f32.mrf.mxu1 }
  0xf1   : > { %v541_v43 = vadd.f32 %v902_v39, %v1153_v38  ;;  %v856_v39 = vunpack.c.l.bf16 %v880_v33 }
  0xf2   : > { %v904_v45 = vpop.f32.mrf.mxu0  ;;  %v955_v49 = vpop.f32.mrf.mxu1 }
  0xf3   : > { %v905_v46 = vadd.f32 %v904_v45, %v903_v41  ;;  %v606_v47 = vadd.f32 %v605_v44, %v541_v43 }
  0xf4   : > { %v906_v50 = vpop.f32.mrf.mxu0  ;;  %v608_v52 = vpop.f32.mrf.mxu1 }
  0xf5   : > { %v544_v51 = vadd.f32 %v905_v46, %v1153_v38  ;;  %v652_v55 = vadd.f32 %v844_v48, %v606_v47  ;;  %v857_v47 = vunpack.c.h.bf16 %v880_v33 }
  0xf6   : > { %v907_v54 = vpop.f32.mrf.mxu0  ;;  %v958_v60 = vpop.f32.mrf.mxu1 }
  0xf7   : > { %v908_v56 = vadd.f32 %v907_v54, %v906_v50  ;;  %v609_v58 = vadd.f32 %v608_v52, %v544_v51  ;;  %v660_v1 = vmax.f32 %v652_v55, 0.0 }
  0xf8   : > { %v909_v59 = vpop.f32.mrf.mxu0  ;;  %v621_v6 = vpop.f32.mrf.mxu1 }
  0xf9   : > { %v549_v61 = vadd.f32 %v908_v56, %v1153_v38  ;;  %v653_v62 = vadd.f32 %v845_v53, %v609_v58 }
  0xfa   : > { %v910_v0 = vpop.f32.mrf.mxu0  ;;  %v959_v16 = vpop.f32.mrf.mxu1 }
  0xfb   : > { %v614_v2 = vadd.f32 %v954_v40, %v549_v61  ;;  %v661_v3 = vmax.f32 %v653_v62, 0.0  ;;  %v911_v4 = vadd.f32 %v910_v0, %v909_v59 }
  0xfc   : > { %v912_v5 = vpop.f32.mrf.mxu0  ;;  %v624_v26 = vpop.f32.mrf.mxu1 }
  0xfd   : > { %v861_v7 = vpack.c.bf16 %v661_v3, %v660_v1  ;;  %v552_v8 = vadd.f32 %v911_v4, %v1153_v38  ;;  %v654_v11 = vadd.f32 %v848_v63, %v614_v2 }
  0xfe   : > { %v913_v10 = vpop.f32.mrf.mxu0 }
  0xff   : > { %862 = vst [vmem:[%s1165_s29] sm:$0xff] %v861_v7   ;;  %v617_v12 = vadd.f32 %v955_v49, %v552_v8  ;;  %v914_v13 = vadd.f32 %v913_v10, %v912_v5  ;;  %v662_v21 = vmax.f32 %v654_v11, 0.0 }
 0x100   : > { %v915_v15 = vpop.f32.mrf.mxu0 }
 0x101   : > { %v655_v17 = vadd.f32 %v849_v9, %v617_v12  ;;  %v557_v18 = vadd.f32 %v914_v13, %v1153_v38 }
 0x102   : > { %v916_v19 = vpop.f32.mrf.mxu0 }
 0x103   : > { %v663_v22 = vmax.f32 %v655_v17, 0.0  ;;  %v917_v23 = vadd.f32 %v916_v19, %v915_v15  ;;  %v622_v24 = vadd.f32 %v621_v6, %v557_v18 }
 0x104   : > { %v918_v25 = vpop.f32.mrf.mxu0 }
 0x105   : > { %v866_v27 = vpack.c.bf16 %v663_v22, %v662_v21  ;;  %v560_v28 = vadd.f32 %v917_v23, %v1153_v38  ;;  %v656_v31 = vadd.f32 %v852_v20, %v622_v24 }
 0x106   : > { %v919_v30 = vpop.f32.mrf.mxu0 }
 0x107   : > { %881 = vst [vmem:[%s1165_s29 + $0x8] sm:$0xff] %v866_v27   ;;  %v920_v32 = vadd.f32 %v919_v30, %v918_v25  ;;  %v625_v34 = vadd.f32 %v624_v26, %v560_v28  ;;  %v664_v41 = vmax.f32 %v656_v31, 0.0 }
 0x108   : > { %v921_v35 = vpop.f32.mrf.mxu0 }
 0x109   : > { %v565_v36 = vadd.f32 %v920_v32, %v1153_v38  ;;  %v657_v37 = vadd.f32 %v853_v29, %v625_v34 }
 0x10a   : > { %v922_v40 = vpop.f32.mrf.mxu0 }
 0x10b   : > { %v630_v42 = vadd.f32 %v958_v60, %v565_v36  ;;  %v665_v43 = vmax.f32 %v657_v37, 0.0  ;;  %v923_v44 = vadd.f32 %v922_v40, %v921_v35 }
 0x10d   : > { %v871_v45 = vpack.c.bf16 %v665_v43, %v664_v41  ;;  %v568_v46 = vadd.f32 %v923_v44, %v1153_v38  ;;  %v658_v48 = vadd.f32 %v856_v39, %v630_v42 }
 0x10f   : > { %882 = vst [vmem:[%s1165_s29 + $0x10] sm:$0xff] %v871_v45   ;;  %v633_v49 = vadd.f32 %v959_v16, %v568_v46  ;;  %v666_v51 = vmax.f32 %v658_v48, 0.0 }
 0x111   : > { %v659_v50 = vadd.f32 %v857_v47, %v633_v49 }
 0x113   : > { %v667_v52 = vmax.f32 %v659_v50, 0.0 }
 0x115   : > { %v876_v53 = vpack.c.bf16 %v667_v52, %v666_v51 }
 0x117   : > { %883 = vst [vmem:[%s1165_s29 + $0x18] sm:$0xff] %v876_v53  }
 0x118 PF: > { %s14_s15 = sadd.s32 1, %s1015_s15  }
 0x119   : > { %p11_p4 = scmp.ge.s32.totalorder %s14_s15, 4  }
 0x11b   :  { %13 = sbr.rel (!%p11_p4) target bundleno = 1 (0x1), region = 69 }

// kernel: forward.28
= control target key start
LH: loop header
LB: loop body
LE: loop exit
PB: predicated region body
PF: predicated region fallthrough
CT: control target
= control target key end

     0   :  { %s471_s12 = smov 0   ;;  %s522_s0 = inlined_call_operand.vmem [shape: bf16[32,128], index: 0, kind: input, shape index: {}]   ;;  %s523_s1 = inlined_call_operand.vmem [shape: bf16[128,128], index: 1, kind: input, shape index: {}]   ;;  %s524_s2 = inlined_call_operand.vmem [shape: f32[1,128], index: 2, kind: input, shape index: {}]   ;;  %s525_s3 = inlined_call_operand.vmem [shape: bf16[32,128], index: 3, kind: output, shape index: {}]  }
   0x1 LB: > { %s363_s13 = sadd.s32 4294967295, %s447_s12   ;;  %p367_p0 = scmp.ge.s32.totalorder %s447_s12, 1  ;;  %s447_s12 = sphi %s471_s12, %s13_s12  }
   0x2   : > { %p138_p1 = scmp.lt.s32.totalorder %s447_s12, 3 }
   0x4   : > { %p139_p2 = pnand %p367_p0, %p138_p1 }
   0x5   : > { %s368_s18 = sshll.u32 (!%p139_p2), %s363_s13, 1 }
   0x6   : > { %142 = sbr.rel (%p139_p2) target bundleno = 248 (0xf8), region = 32  ;;  %p163_p3 = scmp.lt.s32.totalorder (!%p139_p2), %s368_s18, 3 }
   0xb   : > { %v432_v0 = vld [vmem:[%s523_s1 + $0x38] sm:$0xff]   ;;  %v449_v1 = vmov 0.0   ;;  %v433_v2 = vld [vmem:[%s523_s1 + $0x30] sm:$0xff]   ;;  %vm450_vm0 = vmmov 0   ;;  %s527_s18 = smov (!%p163_p3, %s368_s18), 3  ;;  %v434_v3 = vld [vmem:[%s523_s1 + $0x28] sm:$0xff]  }
   0xc   : > { %402 = vmatprep.subr.bf16.mxu0 %v449_v1  ;;  %418 = vmatprep.mubr.msk.bf16.mxu0 %vm450_vm0, %v449_v1  ;;  %s369_s21 = sshll.u32 %s527_s18, 2  ;;  %v435_v4 = vld [vmem:[%s523_s1 + $0x20] sm:$0xff]   ;;  %v436_v5 = vld [vmem:[%s523_s1 + $0x18] sm:$0xff]   ;;  %v437_v6 = vld [vmem:[%s523_s1 + $0x10] sm:$0xff]  }
   0xd   : > { %403 = vmatpush3.bf16.msra.mxu0 %v432_v0  ;;  %s166_s24 = scalar_lea.vmem %s522_s0, %s369_s21  ;;  %v438_v7 = vld [vmem:[%s523_s1 + $0x8] sm:$0xff]   ;;  %v439_v8 = vld [vmem:[%s523_s1] sm:$0xff]   ;;  %s172_s13 = scalar_lea.vmem %s525_s3, %s369_s21 }
   0xe   : > { %404 = vmatprep.subr.bf16.mxu0 %v449_v1  ;;  %v440_v9 = vld [vmem:[%s166_s24] sm:$0xff]  }
   0xf   : > { %v372_v10 = vld [vmem:[%s524_s2] ss:$0 sm:$0xff] }
  0x11   : > { %405 = vmatpush3.bf16.msra.mxu0 %v433_v2 }
  0x12   : > { %406 = vmatprep.subr.bf16.mxu0 %v449_v1 }
  0x15   : > { %407 = vmatpush3.bf16.msra.mxu0 %v434_v3 }
  0x16   : > { %408 = vmatprep.subr.bf16.mxu0 %v449_v1 }
  0x19   : > { %409 = vmatpush3.bf16.msra.mxu0 %v435_v4 }
  0x1a   : > { %410 = vmatprep.subr.bf16.mxu0 %v449_v1 }
  0x1d   : > { %411 = vmatpush3.bf16.msra.mxu0 %v436_v5 }
  0x1e   : > { %412 = vmatprep.subr.bf16.mxu0 %v449_v1 }
  0x21   : > { %413 = vmatpush3.bf16.msra.mxu0 %v437_v6 }
  0x22   : > { %414 = vmatprep.subr.bf16.mxu0 %v449_v1 }
  0x25   : > { %415 = vmatpush3.bf16.msra.mxu0 %v438_v7 }
  0x26   : > { %416 = vmatprep.subr.bf16.mxu0 %v449_v1 }
  0x29   : > { %417 = vmatpush3.bf16.msra.mxu0 %v439_v8 }
  0x2c   : > { %419 = vmatmul.mubr.bf16.vlgmr.msra.gmra.mxu0 %v440_v9 }
  0xec   : > { %v288_v11 = vpop.f32.mrf.mxu0 }
  0xed   : > { %v289_v13 = vadd.f32 %v372_v10, %v288_v11 }
  0xee   : > { %v420_v12 = vpop.f32.mrf.mxu0 }
  0xef   : > { %v295_v17 = vmax.f32 %v289_v13, 0.0 }
  0xf0   : > { %v291_v14 = vpop.f32.mrf.mxu0 }
  0xf1   : > { %v292_v15 = vadd.f32 %v372_v10, %v291_v14 }
  0xf2   : > { %v421_v16 = vpop.f32.mrf.mxu0 }
  0xf3   : > { %v296_v18 = vmax.f32 %v292_v15, 0.0 }
  0xf5   : > { %v391_v19 = vpack.c.bf16 %v296_v18, %v295_v17 }
  0xf7   : > { %392 = vst [vmem:[%s172_s13] sm:$0xff] %v391_v19  }
  0xf8 PF: > { %s13_s12 = sadd.s32 1, %s447_s12  }
  0xf9   : > { %p10_p4 = scmp.ge.s32.totalorder %s13_s12, 4  }
  0xfb   :  { %12 = sbr.rel (!%p10_p4) target bundleno = 1 (0x1), region = 62 }

// kernel: forward.27
= control target key start
LH: loop header
LB: loop body
LE: loop exit
PB: predicated region body
PF: predicated region fallthrough
CT: control target
= control target key end

     0   :  { %s469_s12 = smov 0   ;;  %s516_s0 = inlined_call_operand.vmem [shape: bf16[32,128], index: 0, kind: input, shape index: {}]   ;;  %s517_s1 = inlined_call_operand.vmem [shape: bf16[128,128], index: 1, kind: input, shape index: {}]   ;;  %s518_s2 = inlined_call_operand.vmem [shape: f32[1,128], index: 2, kind: input, shape index: {}]   ;;  %s519_s3 = inlined_call_operand.vmem [shape: bf16[32,128], index: 3, kind: output, shape index: {}]  }
   0x1 LB: > { %s361_s13 = sadd.s32 4294967295, %s445_s12   ;;  %p365_p0 = scmp.ge.s32.totalorder %s445_s12, 1  ;;  %s445_s12 = sphi %s469_s12, %s13_s12  }
   0x2   : > { %p138_p1 = scmp.lt.s32.totalorder %s445_s12, 3 }
   0x4   : > { %p139_p2 = pnand %p365_p0, %p138_p1 }
   0x5   : > { %s366_s18 = sshll.u32 (!%p139_p2), %s361_s13, 1 }
   0x6   : > { %142 = sbr.rel (%p139_p2) target bundleno = 246 (0xf6), region = 32  ;;  %p163_p3 = scmp.lt.s32.totalorder (!%p139_p2), %s366_s18, 3 }
   0xb   : > { %v430_v0 = vld [vmem:[%s517_s1 + $0x38] sm:$0xff]   ;;  %v447_v1 = vmov 0.0   ;;  %v431_v2 = vld [vmem:[%s517_s1 + $0x30] sm:$0xff]   ;;  %vm448_vm0 = vmmov 0   ;;  %s521_s18 = smov (!%p163_p3, %s366_s18), 3  ;;  %v432_v3 = vld [vmem:[%s517_s1 + $0x28] sm:$0xff]  }
   0xc   : > { %400 = vmatprep.subr.bf16.mxu0 %v447_v1  ;;  %416 = vmatprep.mubr.msk.bf16.mxu0 %vm448_vm0, %v447_v1  ;;  %s367_s21 = sshll.u32 %s521_s18, 2  ;;  %v433_v4 = vld [vmem:[%s517_s1 + $0x20] sm:$0xff]   ;;  %v434_v5 = vld [vmem:[%s517_s1 + $0x18] sm:$0xff]   ;;  %v435_v6 = vld [vmem:[%s517_s1 + $0x10] sm:$0xff]  }
   0xd   : > { %401 = vmatpush3.bf16.msra.mxu0 %v430_v0  ;;  %s166_s24 = scalar_lea.vmem %s516_s0, %s367_s21  ;;  %v436_v7 = vld [vmem:[%s517_s1 + $0x8] sm:$0xff]   ;;  %v437_v8 = vld [vmem:[%s517_s1] sm:$0xff]   ;;  %s172_s13 = scalar_lea.vmem %s519_s3, %s367_s21 }
   0xe   : > { %402 = vmatprep.subr.bf16.mxu0 %v447_v1  ;;  %v438_v9 = vld [vmem:[%s166_s24] sm:$0xff]  }
   0xf   : > { %v370_v11 = vld [vmem:[%s518_s2] ss:$0 sm:$0xff] }
  0x11   : > { %403 = vmatpush3.bf16.msra.mxu0 %v431_v2 }
  0x12   : > { %404 = vmatprep.subr.bf16.mxu0 %v447_v1 }
  0x15   : > { %405 = vmatpush3.bf16.msra.mxu0 %v432_v3 }
  0x16   : > { %406 = vmatprep.subr.bf16.mxu0 %v447_v1 }
  0x19   : > { %407 = vmatpush3.bf16.msra.mxu0 %v433_v4 }
  0x1a   : > { %408 = vmatprep.subr.bf16.mxu0 %v447_v1 }
  0x1d   : > { %409 = vmatpush3.bf16.msra.mxu0 %v434_v5 }
  0x1e   : > { %410 = vmatprep.subr.bf16.mxu0 %v447_v1 }
  0x21   : > { %411 = vmatpush3.bf16.msra.mxu0 %v435_v6 }
  0x22   : > { %412 = vmatprep.subr.bf16.mxu0 %v447_v1 }
  0x25   : > { %413 = vmatpush3.bf16.msra.mxu0 %v436_v7 }
  0x26   : > { %414 = vmatprep.subr.bf16.mxu0 %v447_v1 }
  0x29   : > { %415 = vmatpush3.bf16.msra.mxu0 %v437_v8 }
  0x2c   : > { %417 = vmatmul.mubr.bf16.vlgmr.msra.gmra.mxu0 %v438_v9 }
  0xec   : > { %v288_v10 = vpop.f32.mrf.mxu0 }
  0xed   : > { %v289_v14 = vadd.f32 %v370_v11, %v288_v10 }
  0xee   : > { %v418_v12 = vpop.f32.mrf.mxu0 }
  0xf0   : > { %v291_v13 = vpop.f32.mrf.mxu0 }
  0xf1   : > { %v292_v15 = vadd.f32 %v370_v11, %v291_v13 }
  0xf2   : > { %v419_v16 = vpop.f32.mrf.mxu0 }
  0xf3   : > { %v389_v17 = vpack.c.bf16 %v292_v15, %v289_v14 }
  0xf5   : > { %390 = vst [vmem:[%s172_s13] sm:$0xff] %v389_v17  }
  0xf6 PF: > { %s13_s12 = sadd.s32 1, %s445_s12  }
  0xf7   : > { %p10_p4 = scmp.ge.s32.totalorder %s13_s12, 4  }
  0xf9   :  { %12 = sbr.rel (!%p10_p4) target bundleno = 1 (0x1), region = 62 }

// kernel: forward.29
= control target key start
LH: loop header
LB: loop body
LE: loop exit
PB: predicated region body
PF: predicated region fallthrough
CT: control target
= control target key end

     0   :  { %s1109_s15 = smov 0   ;;  %s1290_s0 = inlined_call_operand.vmem [shape: bf16[32,768], index: 0, kind: input, shape index: {}]   ;;  %s1291_s1 = inlined_call_operand.vmem [shape: bf16[768,128], index: 1, kind: input, shape index: {}]   ;;  %s1292_s2 = inlined_call_operand.vmem [shape: f32[1,128], index: 2, kind: input, shape index: {}]   ;;  %s1293_s3 = inlined_call_operand.vmem [shape: bf16[32,128], index: 3, kind: input, shape index: {}]   ;;  %s1294_s4 = inlined_call_operand.vmem [shape: bf16[32,128], index: 4, kind: output, shape index: {}]  }
   0x1 LB: > { %s863_s16 = sadd.s32 4294967295, %s1082_s15   ;;  %p867_p0 = scmp.ge.s32.totalorder %s1082_s15, 1  ;;  %s1082_s15 = sphi %s1109_s15, %s14_s15  }
   0x2   : > { %p175_p1 = scmp.lt.s32.totalorder %s1082_s15, 3 }
   0x4   : > { %p176_p2 = pnand %p867_p0, %p175_p1 }
   0x5   : > { %s868_s21 = sshll.u32 (!%p176_p2), %s863_s16, 1 }
   0x6   : > { %179 = sbr.rel (%p176_p2) target bundleno = 286 (0x11e), region = 36  ;;  %p208_p3 = scmp.lt.s32.totalorder (!%p176_p2), %s868_s21, 3 }
   0xb   : > { %v1019_v0 = vld [vmem:[%s1291_s1 + $0x78] sm:$0xff]   ;;  %v1023_v4 = vld [vmem:[%s1291_s1 + $0x70] sm:$0xff]   ;;  %v1027_v8 = vld [vmem:[%s1291_s1 + $0x68] sm:$0xff]   ;;  %s1296_s21 = smov (!%p208_p3, %s868_s21), 3 }
   0xc   : > { %v1020_v1 = vld [vmem:[%s1291_s1 + $0x38] sm:$0xff]   ;;  %944 = vmatprep.subr.bf16.mxu0 %v1019_v0  ;;  %v1024_v5 = vld [vmem:[%s1291_s1 + $0x30] sm:$0xff]   ;;  %v1028_v9 = vld [vmem:[%s1291_s1 + $0x28] sm:$0xff]   ;;  %s1010_s19 = smul.u32 24, %s1296_s21  ;;  %s871_s25 = sshll.u32 %s1296_s21, 2 }
   0xd   : > { %v1021_v2 = vld [vmem:[%s1291_s1 + $0xf8] sm:$0xff]   ;;  %945 = vmatpush3.bf16.msra.mxu0 %v1020_v1  ;;  %v1025_v6 = vld [vmem:[%s1291_s1 + $0xf0] sm:$0xff]   ;;  %v1029_v10 = vld [vmem:[%s1291_s1 + $0xe8] sm:$0xff]   ;;  %s218_s27 = scalar_lea.vmem %s1293_s3, %s871_s25  ;;  %s224_s29 = scalar_lea.vmem %s1294_s4, %s871_s25 }
   0xe   : > { %v1022_v3 = vld [vmem:[%s1291_s1 + $0xb8] sm:$0xff]   ;;  %966 = vmatprep.subr.bf16.mxu1 %v1021_v2  ;;  %946 = vmatprep.subr.bf16.mxu0 %v1023_v4  ;;  %v1026_v7 = vld [vmem:[%s1291_s1 + $0xb0] sm:$0xff]   ;;  %v1030_v11 = vld [vmem:[%s1291_s1 + $0xa8] sm:$0xff]   ;;  %s1212_s30 = scalar_lea.vmem %s1290_s0, %s1010_s19 }
   0xf   : > { %967 = vmatpush3.bf16.msra.mxu1 %v1022_v3  ;;  %v1031_v12 = vld [vmem:[%s1291_s1 + $0x60] sm:$0xff]   ;;  %v1035_v16 = vld [vmem:[%s1291_s1 + $0x58] sm:$0xff]   ;;  %v1039_v20 = vld [vmem:[%s1291_s1 + $0x50] sm:$0xff]  }
  0x10   : > { %968 = vmatprep.subr.bf16.mxu1 %v1025_v6  ;;  %v1032_v13 = vld [vmem:[%s1291_s1 + $0x20] sm:$0xff]   ;;  %v1036_v17 = vld [vmem:[%s1291_s1 + $0x18] sm:$0xff]   ;;  %v1040_v21 = vld [vmem:[%s1291_s1 + $0x10] sm:$0xff]  }
  0x11   : > { %947 = vmatpush3.bf16.msra.mxu0 %v1024_v5  ;;  %v1033_v14 = vld [vmem:[%s1291_s1 + $0xe0] sm:$0xff]   ;;  %v1037_v18 = vld [vmem:[%s1291_s1 + $0xd8] sm:$0xff]   ;;  %v1041_v22 = vld [vmem:[%s1291_s1 + $0xd0] sm:$0xff]  }
  0x12   : > { %948 = vmatprep.subr.bf16.mxu0 %v1027_v8  ;;  %v1034_v15 = vld [vmem:[%s1291_s1 + $0xa0] sm:$0xff]   ;;  %v1038_v19 = vld [vmem:[%s1291_s1 + $0x98] sm:$0xff]   ;;  %v1042_v23 = vld [vmem:[%s1291_s1 + $0x90] sm:$0xff]  }
  0x13   : > { %969 = vmatpush3.bf16.msra.mxu1 %v1026_v7  ;;  %v1043_v24 = vld [vmem:[%s1291_s1 + $0x48] sm:$0xff]   ;;  %v1047_v28 = vld [vmem:[%s1291_s1 + $0x40] sm:$0xff]   ;;  %v1054_v34 = vld [vmem:[%s1291_s1 + $0x178] sm:$0xff]  }
  0x14   : > { %970 = vmatprep.subr.bf16.mxu1 %v1029_v10  ;;  %v1044_v25 = vld [vmem:[%s1291_s1 + $0x8] sm:$0xff]   ;;  %v1048_v29 = vld [vmem:[%s1291_s1] sm:$0xff]   ;;  %v1058_v37 = vld [vmem:[%s1291_s1 + $0x138] sm:$0xff]  }
  0x15   : > { %949 = vmatpush3.bf16.msra.mxu0 %v1028_v9  ;;  %v1045_v26 = vld [vmem:[%s1291_s1 + $0xc8] sm:$0xff]   ;;  %v1049_v30 = vld [vmem:[%s1291_s1 + $0xc0] sm:$0xff]   ;;  %v1059_v38 = vld [vmem:[%s1291_s1 + $0x170] sm:$0xff]  }
  0x16   : > { %950 = vmatprep.subr.bf16.mxu0 %v1031_v12  ;;  %v1046_v27 = vld [vmem:[%s1291_s1 + $0x88] sm:$0xff]   ;;  %v1050_v31 = vld [vmem:[%s1212_s30] ss:$24 sps:$4 sm:$0xff]   ;;  %v1052_v32 = vld [vmem:[%s1212_s30 + $0x4] ss:$24 sps:$4 sm:$0xff]  }
  0x17   : > { %971 = vmatpush3.bf16.msra.mxu1 %v1030_v11  ;;  %v1053_v33 = vld [vmem:[%s1291_s1 + $0x80] sm:$0xff]   ;;  %686 = vmatprep.mubr.bf16.mxu0 %v1052_v32  ;;  %v1060_v39 = vld [vmem:[%s1291_s1 + $0x130] sm:$0xff]   ;;  %v1061_v40 = vld [vmem:[%s1291_s1 + $0x168] sm:$0xff]  }
  0x18   : > { %972 = vmatprep.subr.bf16.mxu1 %v1033_v14  ;;  %v1055_v35 = vld [vmem:[%s1212_s30 + $0x8] ss:$24 sps:$4 sm:$0xff]   ;;  %v1057_v36 = vld [vmem:[%s1212_s30 + $0xc] ss:$24 sps:$4 sm:$0xff]   ;;  %v1065_v44 = vld [vmem:[%s1291_s1 + $0x158] sm:$0xff]  }
  0x19   : > { %951 = vmatpush3.bf16.msra.mxu0 %v1032_v13  ;;  %727 = vmatprep.mubr.bf16.mxu1 %v1057_v36  ;;  %v1062_v41 = vld [vmem:[%s1291_s1 + $0x128] sm:$0xff]   ;;  %v1063_v42 = vld [vmem:[%s1291_s1 + $0x160] sm:$0xff]   ;;  %v1066_v45 = vld [vmem:[%s1291_s1 + $0x118] sm:$0xff]  }
  0x1a   : > { %952 = vmatprep.subr.bf16.mxu0 %v1035_v16  ;;  %v1064_v43 = vld [vmem:[%s1291_s1 + $0x120] sm:$0xff]   ;;  %v1067_v46 = vld [vmem:[%s1291_s1 + $0x150] sm:$0xff]   ;;  %v1069_v49 = vld [vmem:[%s1291_s1 + $0x148] sm:$0xff]  }
  0x1b   : > { %973 = vmatpush3.bf16.msra.mxu1 %v1034_v15  ;;  %v1075_v47 = vld [vmem:[%s1212_s30 + $0x14] ss:$24 sps:$4 sm:$0xff]   ;;  %v1071_v51 = vld [vmem:[%s1291_s1 + $0x140] sm:$0xff]   ;;  %v1073_v53 = vld [vmem:[%s1212_s30 + $0x10] ss:$24 sps:$4 sm:$0xff]  }
  0x1c   : > { %974 = vmatprep.subr.bf16.mxu1 %v1037_v18  ;;  %v1068_v48 = vld [vmem:[%s1291_s1 + $0x110] sm:$0xff]   ;;  %v1070_v50 = vld [vmem:[%s1291_s1 + $0x108] sm:$0xff]   ;;  %v1072_v52 = vld [vmem:[%s1291_s1 + $0x100] sm:$0xff]  }
  0x1d   : > { %953 = vmatpush3.bf16.msra.mxu0 %v1036_v17  ;;  %v874_v60 = vld [vmem:[%s1292_s2] ss:$0 sm:$0xff] }
  0x1e   : > { %954 = vmatprep.subr.bf16.mxu0 %v1039_v20  ;;  %v936_v5 = vld [vmem:[%s218_s27] sm:$0xff]  }
  0x1f   : > { %975 = vmatpush3.bf16.msra.mxu1 %v1038_v19  ;;  %v937_v12 = vunpack.c.l.bf16 %v936_v5  ;;  %v938_v16 = vunpack.c.h.bf16 %v936_v5 }
  0x20   : > { %976 = vmatprep.subr.bf16.mxu1 %v1041_v22 }
  0x21   : > { %955 = vmatpush3.bf16.msra.mxu0 %v1040_v21 }
  0x22   : > { %956 = vmatprep.subr.bf16.mxu0 %v1043_v24 }
  0x23   : > { %977 = vmatpush3.bf16.msra.mxu1 %v1042_v23 }
  0x24   : > { %978 = vmatprep.subr.bf16.mxu1 %v1045_v26 }
  0x25   : > { %957 = vmatpush3.bf16.msra.mxu0 %v1044_v25 }
  0x26   : > { %958 = vmatprep.subr.bf16.mxu0 %v1047_v28 }
  0x27   : > { %979 = vmatpush3.bf16.msra.mxu1 %v1046_v27 }
  0x28   : > { %980 = vmatprep.subr.bf16.mxu1 %v1049_v30 }
  0x29   : > { %959 = vmatpush3.bf16.msra.mxu0 %v1048_v29 }
  0x2a   : > { %988 = vmatprep.subr.bf16.mxu0 %v1054_v34 }
  0x2b   : > { %981 = vmatpush3.bf16.msra.mxu1 %v1053_v33 }
  0x2c   : > { %687 = vmatmul.mubr.bf16.vlgmr.msra.gmra.mxu0 %v1050_v31 }
  0x2d   : > { %989 = vmatpush3.bf16.msra.mxu0 %v1058_v37  ;;  %768 = vmatprep.mubr.bf16.mxu0 %v1075_v47 }
  0x2e   : > { %728 = vmatmul.mubr.bf16.vlgmr.msra.gmra.mxu1 %v1055_v35  ;;  %990 = vmatprep.subr.bf16.mxu0 %v1059_v38 }
  0x31   : > { %991 = vmatpush3.bf16.msra.mxu0 %v1060_v39 }
  0x32   : > { %992 = vmatprep.subr.bf16.mxu0 %v1061_v40 }
  0x35   : > { %993 = vmatpush3.bf16.msra.mxu0 %v1062_v41 }
  0x36   : > { %994 = vmatprep.subr.bf16.mxu0 %v1063_v42 }
  0x39   : > { %995 = vmatpush3.bf16.msra.mxu0 %v1064_v43 }
  0x3a   : > { %996 = vmatprep.subr.bf16.mxu0 %v1065_v44 }
  0x3d   : > { %997 = vmatpush3.bf16.msra.mxu0 %v1066_v45 }
  0x3e   : > { %998 = vmatprep.subr.bf16.mxu0 %v1067_v46 }
  0x41   : > { %999 = vmatpush3.bf16.msra.mxu0 %v1068_v48 }
  0x42   : > { %1000 = vmatprep.subr.bf16.mxu0 %v1069_v49 }
  0x45   : > { %1001 = vmatpush3.bf16.msra.mxu0 %v1070_v50 }
  0x46   : > { %1002 = vmatprep.subr.bf16.mxu0 %v1071_v51 }
  0x49   : > { %1003 = vmatpush3.bf16.msra.mxu0 %v1072_v52 }
  0x4c   : > { %769 = vmatmul.mubr.bf16.vlgmr.msra.gmra.mxu0 %v1073_v53 }
  0xec   : > { %v960_v54 = vpop.f32.mrf.mxu0 }
  0xee   : > { %v961_v55 = vpop.f32.mrf.mxu0  ;;  %v982_v56 = vpop.f32.mrf.mxu1 }
  0xef   : > { %v962_v59 = vadd.f32 %v961_v55, %v960_v54 }
  0xf0   : > { %v963_v57 = vpop.f32.mrf.mxu0  ;;  %v983_v58 = vpop.f32.mrf.mxu1 }
  0xf1   : > { %v689_v63 = vadd.f32 %v962_v59, %v874_v60  ;;  %v984_v0 = vadd.f32 %v983_v58, %v982_v56 }
  0xf2   : > { %v964_v61 = vpop.f32.mrf.mxu0  ;;  %v985_v62 = vpop.f32.mrf.mxu1 }
  0xf3   : > { %v965_v1 = vadd.f32 %v964_v61, %v963_v57  ;;  %v730_v6 = vadd.f32 %v984_v0, %v689_v63 }
  0xf4   : > { %v986_v2 = vpop.f32.mrf.mxu1 }
  0xf5   : > { %v692_v7 = vadd.f32 %v965_v1, %v874_v60  ;;  %v987_v8 = vadd.f32 %v986_v2, %v985_v62 }
  0xf7   : > { %v733_v14 = vadd.f32 %v987_v8, %v692_v7 }
 0x10c   : > { %v1004_v3 = vpop.f32.mrf.mxu0 }
 0x10e   : > { %v1005_v4 = vpop.f32.mrf.mxu0 }
 0x10f   : > { %v1006_v9 = vadd.f32 %v1005_v4, %v1004_v3 }
 0x110   : > { %v1007_v10 = vpop.f32.mrf.mxu0 }
 0x111   : > { %v771_v11 = vadd.f32 %v1006_v9, %v730_v6 }
 0x112   : > { %v1008_v13 = vpop.f32.mrf.mxu0 }
 0x113   : > { %v1009_v15 = vadd.f32 %v1008_v13, %v1007_v10  ;;  %v781_v17 = vadd.f32 %v937_v12, %v771_v11 }
 0x115   : > { %v774_v18 = vadd.f32 %v1009_v15, %v733_v14  ;;  %v783_v20 = vmax.f32 %v781_v17, 0.0 }
 0x117   : > { %v782_v19 = vadd.f32 %v938_v16, %v774_v18 }
 0x119   : > { %v784_v21 = vmax.f32 %v782_v19, 0.0 }
 0x11b   : > { %v942_v22 = vpack.c.bf16 %v784_v21, %v783_v20 }
 0x11d   : > { %943 = vst [vmem:[%s224_s29] sm:$0xff] %v942_v22  }
 0x11e PF: > { %s14_s15 = sadd.s32 1, %s1082_s15  }
 0x11f   : > { %p11_p4 = scmp.ge.s32.totalorder %s14_s15, 4  }
 0x121   :  { %13 = sbr.rel (!%p11_p4) target bundleno = 1 (0x1), region = 69 }

// kernel: forward.30
= control target key start
LH: loop header
LB: loop body
LE: loop exit
PB: predicated region body
PF: predicated region fallthrough
CT: control target
= control target key end

     0   :  { %s715_s12 = smov 0   ;;  %s811_s0 = inlined_call_operand.vmem [shape: bf16[32,384], index: 0, kind: input, shape index: {}]   ;;  %s812_s1 = inlined_call_operand.vmem [shape: bf16[384,128], index: 1, kind: input, shape index: {}]   ;;  %s813_s2 = inlined_call_operand.vmem [shape: f32[1,128], index: 2, kind: input, shape index: {}]   ;;  %s814_s3 = inlined_call_operand.vmem [shape: bf16[32,128], index: 3, kind: output, shape index: {}]  }
   0x1 LB: > { %s547_s13 = sadd.s32 4294967295, %s691_s12   ;;  %p551_p0 = scmp.ge.s32.totalorder %s691_s12, 1  ;;  %s691_s12 = sphi %s715_s12, %s13_s12  }
   0x2   : > { %p139_p1 = scmp.lt.s32.totalorder %s691_s12, 3 }
   0x4   : > { %p140_p2 = pnand %p551_p0, %p139_p1 }
   0x5   : > { %s552_s30 = sshll.u32 (!%p140_p2), %s547_s13, 1 }
   0x6   : > { %143 = sbr.rel (%p140_p2) target bundleno = 254 (0xfe), region = 32  ;;  %p165_p3 = scmp.lt.s32.totalorder (!%p140_p2), %s552_s30, 3 }
   0xb   : > { %v657_v0 = vld [vmem:[%s812_s1 + $0x78] sm:$0xff]   ;;  %v693_v1 = vmov 0.0   ;;  %v660_v4 = vld [vmem:[%s812_s1 + $0x70] sm:$0xff]   ;;  %vm694_vm0 = vmmov 0   ;;  %v663_v7 = vld [vmem:[%s812_s1 + $0x68] sm:$0xff]   ;;  %s816_s30 = smov (!%p165_p3, %s552_s30), 3 }
   0xc   : > { %626 = vmatprep.subr.bf16.mxu1 %v693_v1  ;;  %v658_v2 = vld [vmem:[%s812_s1 + $0x38] sm:$0xff]   ;;  %595 = vmatprep.subr.bf16.mxu0 %v657_v0  ;;  %v661_v5 = vld [vmem:[%s812_s1 + $0x30] sm:$0xff]   ;;  %v664_v8 = vld [vmem:[%s812_s1 + $0x28] sm:$0xff]   ;;  %s646_s23 = smul.u32 12, %s816_s30  ;;  %s555_s18 = sshll.u32 %s816_s30, 2 }
   0xd   : > { %v659_v3 = vld [vmem:[%s812_s1 + $0xb8] sm:$0xff]   ;;  %596 = vmatpush3.bf16.msra.mxu0 %v658_v2  ;;  %642 = vmatprep.mubr.msk.bf16.mxu1 %vm694_vm0, %v693_v1  ;;  %v662_v6 = vld [vmem:[%s812_s1 + $0xb0] sm:$0xff]   ;;  %v665_v9 = vld [vmem:[%s812_s1 + $0xa8] sm:$0xff]   ;;  %s175_s21 = scalar_lea.vmem %s814_s3, %s555_s18 }
   0xe   : > { %627 = vmatpush3.bf16.msra.mxu1 %v659_v3  ;;  %597 = vmatprep.subr.bf16.mxu0 %v660_v4  ;;  %v666_v10 = vld [vmem:[%s812_s1 + $0x60] sm:$0xff]   ;;  %v669_v13 = vld [vmem:[%s812_s1 + $0x58] sm:$0xff]   ;;  %v672_v16 = vld [vmem:[%s812_s1 + $0x50] sm:$0xff]   ;;  %s169_s6 = scalar_lea.vmem %s811_s0, %s646_s23 }
   0xf   : > { %628 = vmatprep.subr.bf16.mxu1 %v693_v1  ;;  %v667_v11 = vld [vmem:[%s812_s1 + $0x20] sm:$0xff]   ;;  %v670_v14 = vld [vmem:[%s812_s1 + $0x18] sm:$0xff]   ;;  %v673_v17 = vld [vmem:[%s812_s1 + $0x10] sm:$0xff]  }
  0x10   : > { %v668_v12 = vld [vmem:[%s812_s1 + $0xa0] sm:$0xff]   ;;  %v671_v15 = vld [vmem:[%s812_s1 + $0x98] sm:$0xff]   ;;  %v674_v18 = vld [vmem:[%s812_s1 + $0x90] sm:$0xff]  }
  0x11   : > { %598 = vmatpush3.bf16.msra.mxu0 %v661_v5  ;;  %v675_v19 = vld [vmem:[%s812_s1 + $0x48] sm:$0xff]   ;;  %v678_v22 = vld [vmem:[%s812_s1 + $0x40] sm:$0xff]  }
  0x12   : > { %629 = vmatpush3.bf16.msra.mxu1 %v662_v6  ;;  %599 = vmatprep.subr.bf16.mxu0 %v663_v7  ;;  %v676_v20 = vld [vmem:[%s812_s1 + $0x8] sm:$0xff]   ;;  %v683_v23 = vld [vmem:[%s169_s6 + $0x4] ss:$12 sps:$4 sm:$0xff]   ;;  %v556_v30 = vld [vmem:[%s813_s2] ss:$0 sm:$0xff] }
  0x13   : > { %630 = vmatprep.subr.bf16.mxu1 %v693_v1  ;;  %v677_v21 = vld [vmem:[%s812_s1 + $0x88] sm:$0xff]   ;;  %v679_v24 = vld [vmem:[%s812_s1] sm:$0xff]   ;;  %429 = vmatprep.mubr.bf16.mxu0 %v683_v23 }
  0x14   : > { %v680_v25 = vld [vmem:[%s812_s1 + $0x80] sm:$0xff]   ;;  %v684_v27 = vld [vmem:[%s169_s6 + $0x8] ss:$12 sps:$4 sm:$0xff]  }
  0x15   : > { %600 = vmatpush3.bf16.msra.mxu0 %v664_v8  ;;  %v681_v26 = vld [vmem:[%s169_s6] ss:$12 sps:$4 sm:$0xff]  }
  0x16   : > { %631 = vmatpush3.bf16.msra.mxu1 %v665_v9  ;;  %601 = vmatprep.subr.bf16.mxu0 %v666_v10 }
  0x17   : > { %632 = vmatprep.subr.bf16.mxu1 %v693_v1 }
  0x19   : > { %602 = vmatpush3.bf16.msra.mxu0 %v667_v11 }
  0x1a   : > { %633 = vmatpush3.bf16.msra.mxu1 %v668_v12  ;;  %603 = vmatprep.subr.bf16.mxu0 %v669_v13 }
  0x1b   : > { %634 = vmatprep.subr.bf16.mxu1 %v693_v1 }
  0x1d   : > { %604 = vmatpush3.bf16.msra.mxu0 %v670_v14 }
  0x1e   : > { %635 = vmatpush3.bf16.msra.mxu1 %v671_v15  ;;  %605 = vmatprep.subr.bf16.mxu0 %v672_v16 }
  0x1f   : > { %636 = vmatprep.subr.bf16.mxu1 %v693_v1 }
  0x21   : > { %606 = vmatpush3.bf16.msra.mxu0 %v673_v17 }
  0x22   : > { %637 = vmatpush3.bf16.msra.mxu1 %v674_v18  ;;  %607 = vmatprep.subr.bf16.mxu0 %v675_v19 }
  0x23   : > { %638 = vmatprep.subr.bf16.mxu1 %v693_v1 }
  0x25   : > { %608 = vmatpush3.bf16.msra.mxu0 %v676_v20 }
  0x26   : > { %639 = vmatpush3.bf16.msra.mxu1 %v677_v21  ;;  %609 = vmatprep.subr.bf16.mxu0 %v678_v22 }
  0x27   : > { %640 = vmatprep.subr.bf16.mxu1 %v693_v1 }
  0x29   : > { %610 = vmatpush3.bf16.msra.mxu0 %v679_v24 }
  0x2a   : > { %641 = vmatpush3.bf16.msra.mxu1 %v680_v25 }
  0x2c   : > { %430 = vmatmul.mubr.bf16.vlgmr.msra.gmra.mxu0 %v681_v26 }
  0x2d   : > { %643 = vmatmul.mubr.bf16.vlgmr.msra.gmra.mxu1 %v684_v27 }
  0xec   : > { %v611_v28 = vpop.f32.mrf.mxu0 }
  0xed   : > { %v472_v29 = vpop.f32.mrf.mxu1 }
  0xee   : > { %v612_v31 = vpop.f32.mrf.mxu0 }
  0xef   : > { %v613_v32 = vadd.f32 %v612_v31, %v611_v28  ;;  %v644_v33 = vpop.f32.mrf.mxu1 }
  0xf0   : > { %v614_v34 = vpop.f32.mrf.mxu0 }
  0xf1   : > { %v432_v35 = vadd.f32 %v613_v32, %v556_v30  ;;  %v475_v36 = vpop.f32.mrf.mxu1 }
  0xf2   : > { %v615_v37 = vpop.f32.mrf.mxu0 }
  0xf3   : > { %v616_v38 = vadd.f32 %v615_v37, %v614_v34  ;;  %v645_v39 = vpop.f32.mrf.mxu1  ;;  %v473_v40 = vadd.f32 %v472_v29, %v432_v35 }
  0xf5   : > { %v435_v41 = vadd.f32 %v616_v38, %v556_v30  ;;  %v479_v43 = vmax.f32 %v473_v40, 0.0 }
  0xf7   : > { %v476_v42 = vadd.f32 %v475_v36, %v435_v41 }
  0xf9   : > { %v480_v44 = vmax.f32 %v476_v42, 0.0 }
  0xfb   : > { %v593_v45 = vpack.c.bf16 %v480_v44, %v479_v43 }
  0xfd   : > { %594 = vst [vmem:[%s175_s21] sm:$0xff] %v593_v45  }
  0xfe PF: > { %s13_s12 = sadd.s32 1, %s691_s12  }
  0xff   : > { %p10_p4 = scmp.ge.s32.totalorder %s13_s12, 4  }
 0x101   :  { %12 = sbr.rel (!%p10_p4) target bundleno = 1 (0x1), region = 62 }

// kernel: forward.31
= control target key start
LH: loop header
LB: loop body
LE: loop exit
PB: predicated region body
PF: predicated region fallthrough
CT: control target
= control target key end

     0   :  { %s1033_s15 = smov 0   ;;  %s1189_s0 = inlined_call_operand.vmem [shape: bf16[32,640], index: 0, kind: input, shape index: {}]   ;;  %s1190_s1 = inlined_call_operand.vmem [shape: bf16[640,128], index: 1, kind: input, shape index: {}]   ;;  %s1191_s2 = inlined_call_operand.vmem [shape: f32[1,128], index: 2, kind: input, shape index: {}]   ;;  %s1192_s3 = inlined_call_operand.vmem [shape: bf16[32,128], index: 3, kind: input, shape index: {}]   ;;  %s1193_s4 = inlined_call_operand.vmem [shape: bf16[32,128], index: 4, kind: output, shape index: {}]  }
   0x1 LB: > { %s795_s16 = sadd.s32 4294967295, %s1004_s15   ;;  %p799_p0 = scmp.ge.s32.totalorder %s1004_s15, 1  ;;  %s1004_s15 = sphi %s1033_s15, %s14_s15  }
   0x2   : > { %p175_p1 = scmp.lt.s32.totalorder %s1004_s15, 3 }
   0x4   : > { %p176_p2 = pnand %p799_p0, %p175_p1 }
   0x5   : > { %s800_s21 = sshll.u32 (!%p176_p2), %s795_s16, 1 }
   0x6   : > { %179 = sbr.rel (%p176_p2) target bundleno = 282 (0x11a), region = 36  ;;  %p208_p3 = scmp.lt.s32.totalorder (!%p176_p2), %s800_s21, 3 }
   0xb   : > { %v951_v0 = vld [vmem:[%s1190_s1 + $0x78] sm:$0xff]   ;;  %v955_v4 = vld [vmem:[%s1190_s1 + $0x70] sm:$0xff]   ;;  %v959_v8 = vld [vmem:[%s1190_s1 + $0x68] sm:$0xff]   ;;  %s1195_s21 = smov (!%p208_p3, %s800_s21), 3  ;;  %v1006_v33 = vmov 0.0   ;;  %vm1007_vm0 = vmmov 0  }
   0xc   : > { %v952_v1 = vld [vmem:[%s1190_s1 + $0x38] sm:$0xff]   ;;  %867 = vmatprep.subr.bf16.mxu0 %v951_v0  ;;  %v956_v5 = vld [vmem:[%s1190_s1 + $0x30] sm:$0xff]   ;;  %v960_v9 = vld [vmem:[%s1190_s1 + $0x28] sm:$0xff]   ;;  %s940_s19 = smul.u32 20, %s1195_s21  ;;  %s803_s6 = sshll.u32 %s1195_s21, 2 }
   0xd   : > { %v953_v2 = vld [vmem:[%s1190_s1 + $0xf8] sm:$0xff]   ;;  %868 = vmatpush3.bf16.msra.mxu0 %v952_v1  ;;  %v957_v6 = vld [vmem:[%s1190_s1 + $0xf0] sm:$0xff]   ;;  %v961_v10 = vld [vmem:[%s1190_s1 + $0xe8] sm:$0xff]   ;;  %s218_s8 = scalar_lea.vmem %s1192_s3, %s803_s6  ;;  %s224_s10 = scalar_lea.vmem %s1193_s4, %s803_s6 }
   0xe   : > { %v954_v3 = vld [vmem:[%s1190_s1 + $0xb8] sm:$0xff]   ;;  %889 = vmatprep.subr.bf16.mxu1 %v953_v2  ;;  %869 = vmatprep.subr.bf16.mxu0 %v955_v4  ;;  %v958_v7 = vld [vmem:[%s1190_s1 + $0xb0] sm:$0xff]   ;;  %v962_v11 = vld [vmem:[%s1190_s1 + $0xa8] sm:$0xff]   ;;  %s1136_s30 = scalar_lea.vmem %s1189_s0, %s940_s19 }
   0xf   : > { %890 = vmatpush3.bf16.msra.mxu1 %v954_v3  ;;  %v963_v12 = vld [vmem:[%s1190_s1 + $0x60] sm:$0xff]   ;;  %v967_v16 = vld [vmem:[%s1190_s1 + $0x58] sm:$0xff]   ;;  %v971_v20 = vld [vmem:[%s1190_s1 + $0x50] sm:$0xff]  }
  0x10   : > { %891 = vmatprep.subr.bf16.mxu1 %v957_v6  ;;  %v964_v13 = vld [vmem:[%s1190_s1 + $0x20] sm:$0xff]   ;;  %v968_v17 = vld [vmem:[%s1190_s1 + $0x18] sm:$0xff]   ;;  %v972_v21 = vld [vmem:[%s1190_s1 + $0x10] sm:$0xff]  }
  0x11   : > { %870 = vmatpush3.bf16.msra.mxu0 %v956_v5  ;;  %v965_v14 = vld [vmem:[%s1190_s1 + $0xe0] sm:$0xff]   ;;  %v969_v18 = vld [vmem:[%s1190_s1 + $0xd8] sm:$0xff]   ;;  %v973_v22 = vld [vmem:[%s1190_s1 + $0xd0] sm:$0xff]  }
  0x12   : > { %871 = vmatprep.subr.bf16.mxu0 %v959_v8  ;;  %v966_v15 = vld [vmem:[%s1190_s1 + $0xa0] sm:$0xff]   ;;  %v970_v19 = vld [vmem:[%s1190_s1 + $0x98] sm:$0xff]   ;;  %v974_v23 = vld [vmem:[%s1190_s1 + $0x90] sm:$0xff]  }
  0x13   : > { %892 = vmatpush3.bf16.msra.mxu1 %v958_v7  ;;  %v975_v24 = vld [vmem:[%s1190_s1 + $0x48] sm:$0xff]   ;;  %v979_v28 = vld [vmem:[%s1190_s1 + $0x40] sm:$0xff]   ;;  %v989_v37 = vld [vmem:[%s1190_s1 + $0x138] sm:$0xff]  }
  0x14   : > { %893 = vmatprep.subr.bf16.mxu1 %v961_v10  ;;  %v976_v25 = vld [vmem:[%s1190_s1 + $0x8] sm:$0xff]   ;;  %v980_v29 = vld [vmem:[%s1190_s1] sm:$0xff]   ;;  %v990_v38 = vld [vmem:[%s1190_s1 + $0x130] sm:$0xff]  }
  0x15   : > { %872 = vmatpush3.bf16.msra.mxu0 %v960_v9  ;;  %v977_v26 = vld [vmem:[%s1190_s1 + $0xc8] sm:$0xff]   ;;  %v981_v30 = vld [vmem:[%s1190_s1 + $0xc0] sm:$0xff]   ;;  %v993_v41 = vld [vmem:[%s1190_s1 + $0x118] sm:$0xff]  }
  0x16   : > { %873 = vmatprep.subr.bf16.mxu0 %v963_v12  ;;  %v978_v27 = vld [vmem:[%s1190_s1 + $0x88] sm:$0xff]   ;;  %v982_v31 = vld [vmem:[%s1136_s30] ss:$20 sps:$4 sm:$0xff]   ;;  %v984_v32 = vld [vmem:[%s1136_s30 + $0x4] ss:$20 sps:$4 sm:$0xff]  }
  0x17   : > { %894 = vmatpush3.bf16.msra.mxu1 %v962_v11  ;;  %v985_v34 = vld [vmem:[%s1190_s1 + $0x80] sm:$0xff]   ;;  %618 = vmatprep.mubr.bf16.mxu0 %v984_v32  ;;  %v986_v35 = vld [vmem:[%s1136_s30 + $0x8] ss:$20 sps:$4 sm:$0xff]   ;;  %v994_v42 = vld [vmem:[%s1190_s1 + $0x110] sm:$0xff]  }
  0x18   : > { %895 = vmatprep.subr.bf16.mxu1 %v965_v14  ;;  %v988_v36 = vld [vmem:[%s1136_s30 + $0xc] ss:$20 sps:$4 sm:$0xff]   ;;  %v997_v45 = vld [vmem:[%s1136_s30 + $0x10] ss:$20 sps:$4 sm:$0xff]  }
  0x19   : > { %874 = vmatpush3.bf16.msra.mxu0 %v964_v13  ;;  %659 = vmatprep.mubr.bf16.mxu1 %v988_v36  ;;  %v991_v39 = vld [vmem:[%s1190_s1 + $0x128] sm:$0xff]   ;;  %v992_v40 = vld [vmem:[%s1190_s1 + $0x120] sm:$0xff]  }
  0x1a   : > { %875 = vmatprep.subr.bf16.mxu0 %v967_v16  ;;  %v995_v43 = vld [vmem:[%s1190_s1 + $0x108] sm:$0xff]   ;;  %v996_v44 = vld [vmem:[%s1190_s1 + $0x100] sm:$0xff]  }
  0x1b   : > { %896 = vmatpush3.bf16.msra.mxu1 %v966_v15  ;;  %v806_v52 = vld [vmem:[%s1191_s2] ss:$0 sm:$0xff] }
  0x1c   : > { %897 = vmatprep.subr.bf16.mxu1 %v969_v18  ;;  %v859_v59 = vld [vmem:[%s218_s8] sm:$0xff]  }
  0x1d   : > { %876 = vmatpush3.bf16.msra.mxu0 %v968_v17  ;;  %v860_v1 = vunpack.c.l.bf16 %v859_v59  ;;  %v861_v4 = vunpack.c.h.bf16 %v859_v59 }
  0x1e   : > { %877 = vmatprep.subr.bf16.mxu0 %v971_v20 }
  0x1f   : > { %898 = vmatpush3.bf16.msra.mxu1 %v970_v19 }
  0x20   : > { %899 = vmatprep.subr.bf16.mxu1 %v973_v22 }
  0x21   : > { %878 = vmatpush3.bf16.msra.mxu0 %v972_v21 }
  0x22   : > { %879 = vmatprep.subr.bf16.mxu0 %v975_v24 }
  0x23   : > { %900 = vmatpush3.bf16.msra.mxu1 %v974_v23 }
  0x24   : > { %901 = vmatprep.subr.bf16.mxu1 %v977_v26 }
  0x25   : > { %880 = vmatpush3.bf16.msra.mxu0 %v976_v25 }
  0x26   : > { %881 = vmatprep.subr.bf16.mxu0 %v979_v28 }
  0x27   : > { %902 = vmatpush3.bf16.msra.mxu1 %v978_v27 }
  0x28   : > { %903 = vmatprep.subr.bf16.mxu1 %v981_v30 }
  0x29   : > { %882 = vmatpush3.bf16.msra.mxu0 %v980_v29 }
  0x2a   : > { %920 = vmatprep.subr.bf16.mxu0 %v1006_v33 }
  0x2b   : > { %904 = vmatpush3.bf16.msra.mxu1 %v985_v34 }
  0x2c   : > { %619 = vmatmul.mubr.bf16.vlgmr.msra.gmra.mxu0 %v982_v31 }
  0x2d   : > { %936 = vmatprep.mubr.msk.bf16.mxu0 %vm1007_vm0, %v1006_v33  ;;  %921 = vmatpush3.bf16.msra.mxu0 %v989_v37 }
  0x2e   : > { %660 = vmatmul.mubr.bf16.vlgmr.msra.gmra.mxu1 %v986_v35  ;;  %922 = vmatprep.subr.bf16.mxu0 %v1006_v33 }
  0x31   : > { %923 = vmatpush3.bf16.msra.mxu0 %v990_v38 }
  0x32   : > { %924 = vmatprep.subr.bf16.mxu0 %v1006_v33 }
  0x35   : > { %925 = vmatpush3.bf16.msra.mxu0 %v991_v39 }
  0x36   : > { %926 = vmatprep.subr.bf16.mxu0 %v1006_v33 }
  0x39   : > { %927 = vmatpush3.bf16.msra.mxu0 %v992_v40 }
  0x3a   : > { %928 = vmatprep.subr.bf16.mxu0 %v1006_v33 }
  0x3d   : > { %929 = vmatpush3.bf16.msra.mxu0 %v993_v41 }
  0x3e   : > { %930 = vmatprep.subr.bf16.mxu0 %v1006_v33 }
  0x41   : > { %931 = vmatpush3.bf16.msra.mxu0 %v994_v42 }
  0x42   : > { %932 = vmatprep.subr.bf16.mxu0 %v1006_v33 }
  0x45   : > { %933 = vmatpush3.bf16.msra.mxu0 %v995_v43 }
  0x46   : > { %934 = vmatprep.subr.bf16.mxu0 %v1006_v33 }
  0x49   : > { %935 = vmatpush3.bf16.msra.mxu0 %v996_v44 }
  0x4c   : > { %937 = vmatmul.mubr.bf16.vlgmr.msra.gmra.mxu0 %v997_v45 }
  0xec   : > { %v883_v46 = vpop.f32.mrf.mxu0 }
  0xee   : > { %v884_v47 = vpop.f32.mrf.mxu0  ;;  %v905_v48 = vpop.f32.mrf.mxu1 }
  0xef   : > { %v885_v51 = vadd.f32 %v884_v47, %v883_v46 }
  0xf0   : > { %v886_v49 = vpop.f32.mrf.mxu0  ;;  %v906_v50 = vpop.f32.mrf.mxu1 }
  0xf1   : > { %v621_v55 = vadd.f32 %v885_v51, %v806_v52  ;;  %v907_v56 = vadd.f32 %v906_v50, %v905_v48 }
  0xf2   : > { %v887_v53 = vpop.f32.mrf.mxu0  ;;  %v908_v54 = vpop.f32.mrf.mxu1 }
  0xf3   : > { %v888_v57 = vadd.f32 %v887_v53, %v886_v49  ;;  %v662_v62 = vadd.f32 %v907_v56, %v621_v55 }
  0xf4   : > { %v909_v58 = vpop.f32.mrf.mxu1 }
  0xf5   : > { %v624_v60 = vadd.f32 %v888_v57, %v806_v52  ;;  %v910_v61 = vadd.f32 %v909_v58, %v908_v54 }
  0xf7   : > { %v665_v3 = vadd.f32 %v910_v61, %v624_v60 }
 0x10c   : > { %v702_v63 = vpop.f32.mrf.mxu0 }
 0x10d   : > { %v703_v0 = vadd.f32 %v702_v63, %v662_v62 }
 0x10e   : > { %v938_v2 = vpop.f32.mrf.mxu0 }
 0x10f   : > { %v713_v6 = vadd.f32 %v860_v1, %v703_v0 }
 0x110   : > { %v705_v5 = vpop.f32.mrf.mxu0 }
 0x111   : > { %v706_v7 = vadd.f32 %v705_v5, %v665_v3  ;;  %v715_v10 = vmax.f32 %v713_v6, 0.0 }
 0x112   : > { %v939_v8 = vpop.f32.mrf.mxu0 }
 0x113   : > { %v714_v9 = vadd.f32 %v861_v4, %v706_v7 }
 0x115   : > { %v716_v11 = vmax.f32 %v714_v9, 0.0 }
 0x117   : > { %v865_v12 = vpack.c.bf16 %v716_v11, %v715_v10 }
 0x119   : > { %866 = vst [vmem:[%s224_s10] sm:$0xff] %v865_v12  }
 0x11a PF: > { %s14_s15 = sadd.s32 1, %s1004_s15  }
 0x11b   : > { %p11_p4 = scmp.ge.s32.totalorder %s14_s15, 4  }
 0x11d   :  { %13 = sbr.rel (!%p11_p4) target bundleno = 1 (0x1), region = 69 }

// kernel: forward.33
= control target key start
LH: loop header
LB: loop body
LE: loop exit
PB: predicated region body
PF: predicated region fallthrough
CT: control target
= control target key end

     0   :  { %v554_v1 = vmov 0   ;;  %v67_v56 = vlaneseq  ;;  %s731_s1 = inlined_call_operand.vmem [shape: bf16[384,256], index: 1, kind: input, shape index: {}]   ;;  %s732_s0 = inlined_call_operand.vmem [shape: bf16[8,384], index: 0, kind: input, shape index: {}]   ;;  %s733_s2 = inlined_call_operand.vmem [shape: f32[1,256], index: 2, kind: input, shape index: {}]   ;;  %s734_s3 = inlined_call_operand.vmem [shape: bf16[8,256], index: 3, kind: output, shape index: {}]  }
   0x1   :  { %v479_v0 = vld [vmem:[%s731_s1 + $0x74] ss:$8 sps:$4 sm:$0xff]   ;;  %401 = vmatprep.mubr.bf16.mxu1 %v554_v1  ;;  %v481_v2 = vld [vmem:[%s731_s1 + $0x70] ss:$8 sps:$4 sm:$0xff]   ;;  %v482_v3 = vld [vmem:[%s731_s1 + $0x64] ss:$8 sps:$4 sm:$0xff]  }
   0x2   :  { %328 = vmatprep.subr.bf16.mxu0 %v479_v0  ;;  %v484_v4 = vld [vmem:[%s731_s1 + $0x60] ss:$8 sps:$4 sm:$0xff]   ;;  %v485_v5 = vld [vmem:[%s731_s1 + $0x54] ss:$8 sps:$4 sm:$0xff]   ;;  %v487_v6 = vld [vmem:[%s731_s1 + $0x50] ss:$8 sps:$4 sm:$0xff]  }
   0x3   :  { %329 = vmatpush1.bf16.msra.mxu0 %v481_v2  ;;  %v488_v7 = vld [vmem:[%s731_s1 + $0x44] ss:$8 sps:$4 sm:$0xff]   ;;  %v490_v8 = vld [vmem:[%s731_s1 + $0x40] ss:$8 sps:$4 sm:$0xff]   ;;  %v502_v9 = vld [vmem:[%s731_s1 + $0x174] ss:$8 sps:$4 sm:$0xff]  }
   0x4   :  { %330 = vmatprep.subr.bf16.mxu0 %v482_v3  ;;  %v505_v10 = vld [vmem:[%s731_s1 + $0x170] ss:$8 sps:$4 sm:$0xff]   ;;  %v491_v11 = vld [vmem:[%s731_s1 + $0x34] ss:$8 sps:$4 sm:$0xff]   ;;  %369 = vmatprep.subr.bf16.mxu1 %v502_v9  ;;  %v508_v12 = vld [vmem:[%s731_s1 + $0x164] ss:$8 sps:$4 sm:$0xff]  }
   0x5   :  { %370 = vmatpush1.bf16.msra.mxu1 %v505_v10  ;;  %v511_v13 = vld [vmem:[%s731_s1 + $0x160] ss:$8 sps:$4 sm:$0xff]   ;;  %v493_v14 = vld [vmem:[%s731_s1 + $0x30] ss:$8 sps:$4 sm:$0xff]   ;;  %v494_v15 = vld [vmem:[%s731_s1 + $0x24] ss:$8 sps:$4 sm:$0xff]  }
   0x6   :  { %371 = vmatprep.subr.bf16.mxu1 %v508_v12  ;;  %v514_v16 = vld [vmem:[%s731_s1 + $0x154] ss:$8 sps:$4 sm:$0xff]   ;;  %v517_v17 = vld [vmem:[%s731_s1 + $0x150] ss:$8 sps:$4 sm:$0xff]   ;;  %v496_v18 = vld [vmem:[%s731_s1 + $0x20] ss:$8 sps:$4 sm:$0xff]  }
   0x7   :  { %331 = vmatpush1.bf16.msra.mxu0 %v484_v4  ;;  %v520_v19 = vld [vmem:[%s731_s1 + $0x144] ss:$8 sps:$4 sm:$0xff]   ;;  %v497_v20 = vld [vmem:[%s731_s1 + $0x14] ss:$8 sps:$4 sm:$0xff]   ;;  %v499_v21 = vld [vmem:[%s731_s1 + $0x10] ss:$8 sps:$4 sm:$0xff]  }
   0x8   :  { %332 = vmatprep.subr.bf16.mxu0 %v485_v5  ;;  %v523_v22 = vld [vmem:[%s731_s1 + $0x140] ss:$8 sps:$4 sm:$0xff]   ;;  %v526_v23 = vld [vmem:[%s731_s1 + $0x134] ss:$8 sps:$4 sm:$0xff]   ;;  %v500_v24 = vld [vmem:[%s731_s1 + $0x4] ss:$8 sps:$4 sm:$0xff]  }
   0x9   :  { %372 = vmatpush1.bf16.msra.mxu1 %v511_v13  ;;  %v529_v25 = vld [vmem:[%s731_s1 + $0x130] ss:$8 sps:$4 sm:$0xff]   ;;  %v504_v26 = vld [vmem:[%s731_s1] ss:$8 sps:$4 sm:$0xff]   ;;  %v532_v27 = vld [vmem:[%s731_s1 + $0x124] ss:$8 sps:$4 sm:$0xff]  }
   0xa   :  { %373 = vmatprep.subr.bf16.mxu1 %v514_v16  ;;  %v506_v28 = vld [vmem:[%s731_s1 + $0xf4] ss:$8 sps:$4 sm:$0xff]   ;;  %v510_v29 = vld [vmem:[%s731_s1 + $0xf0] ss:$8 sps:$4 sm:$0xff]   ;;  %v535_v30 = vld [vmem:[%s731_s1 + $0x120] ss:$8 sps:$4 sm:$0xff]  }
   0xb   :  { %333 = vmatpush1.bf16.msra.mxu0 %v487_v6  ;;  %v538_v31 = vld [vmem:[%s731_s1 + $0x114] ss:$8 sps:$4 sm:$0xff]   ;;  %v512_v32 = vld [vmem:[%s731_s1 + $0xe4] ss:$8 sps:$4 sm:$0xff]   ;;  %v541_v35 = vld [vmem:[%s731_s1 + $0x110] ss:$8 sps:$4 sm:$0xff]  }
   0xc   :  { %334 = vmatprep.subr.bf16.mxu0 %v488_v7  ;;  %v15_v33 = vld [vmem:[%s732_s0] sm:$0xff]  ;;  %v518_v38 = vld [vmem:[%s731_s1 + $0xd4] ss:$8 sps:$4 sm:$0xff]   ;;  %v522_v40 = vld [vmem:[%s731_s1 + $0xd0] ss:$8 sps:$4 sm:$0xff]   ;;  %v68_v58 = vshrl.u32 %v67_v56, 7 }
   0xd   :  { %374 = vmatpush1.bf16.msra.mxu1 %v517_v17  ;;  %v426_v34 = vcombine.high %v15_v33, %v15_v33  ;;  %v516_v36 = vld [vmem:[%s731_s1 + $0xe0] ss:$8 sps:$4 sm:$0xff]   ;;  %v544_v37 = vld [vmem:[%s731_s1 + $0x104] ss:$8 sps:$4 sm:$0xff]   ;;  %v530_v44 = vld [vmem:[%s731_s1 + $0xb4] ss:$8 sps:$4 sm:$0xff]   ;;  %v425_v52 = vcombine.low %v15_v33, %v15_v33 }
   0xe   :  { %375 = vmatprep.subr.bf16.mxu1 %v520_v19  ;;  %v547_v39 = vld [vmem:[%s731_s1 + $0x100] ss:$8 sps:$4 sm:$0xff]   ;;  %v524_v41 = vld [vmem:[%s731_s1 + $0xc4] ss:$8 sps:$4 sm:$0xff]   ;;  %v534_v45 = vld [vmem:[%s731_s1 + $0xb0] ss:$8 sps:$4 sm:$0xff]  }
   0xf   :  { %335 = vmatpush1.bf16.msra.mxu0 %v490_v8  ;;  %360 = vmatprep.mubr.bf16.mxu0 %v426_v34  ;;  %v550_v42 = vld [vmem:[%s732_s0 + $0x8] ss:$0 sps:$4 sm:$0xff]   ;;  %v536_v46 = vld [vmem:[%s731_s1 + $0xa4] ss:$8 sps:$4 sm:$0xff]   ;;  %v542_v48 = vld [vmem:[%s731_s1 + $0x94] ss:$8 sps:$4 sm:$0xff]  }
  0x10   :  { %336 = vmatprep.subr.bf16.mxu0 %v491_v11  ;;  %v528_v43 = vld [vmem:[%s731_s1 + $0xc0] ss:$8 sps:$4 sm:$0xff]   ;;  %v546_v49 = vld [vmem:[%s731_s1 + $0x90] ss:$8 sps:$4 sm:$0xff]   ;;  %v548_v50 = vld [vmem:[%s731_s1 + $0x84] ss:$8 sps:$4 sm:$0xff]  }
  0x11   :  { %376 = vmatpush1.bf16.msra.mxu1 %v523_v22  ;;  %v540_v47 = vld [vmem:[%s731_s1 + $0xa0] ss:$8 sps:$4 sm:$0xff]   ;;  %v69_v59 = vsub.s32 0, %v68_v58  ;;  %v73_v61 = vsub.s32 1, %v68_v58 }
  0x12   :  { %377 = vmatprep.subr.bf16.mxu1 %v526_v23  ;;  %v551_v51 = vld [vmem:[%s731_s1 + $0x80] ss:$8 sps:$4 sm:$0xff]  }
  0x13   :  { %337 = vmatpush1.bf16.msra.mxu0 %v493_v14  ;;  %v65_v60 = vld [vmem:[%s733_s2] sm:$0x3] }
  0x14   :  { %338 = vmatprep.subr.bf16.mxu0 %v494_v15  ;;  %v70_v62 = vrot.slane %v65_v60, %v69_v59  ;;  %v74_v63 = vrot.slane %v65_v60, %v73_v61 }
  0x15   :  { %378 = vmatpush1.bf16.msra.mxu1 %v529_v25 }
  0x16   :  { %379 = vmatprep.subr.bf16.mxu1 %v532_v27 }
  0x17   :  { %339 = vmatpush1.bf16.msra.mxu0 %v496_v18 }
  0x18   :  { %340 = vmatprep.subr.bf16.mxu0 %v497_v20 }
  0x19   :  { %380 = vmatpush1.bf16.msra.mxu1 %v535_v30 }
  0x1a   :  { %381 = vmatprep.subr.bf16.mxu1 %v538_v31 }
  0x1b   :  { %341 = vmatpush1.bf16.msra.mxu0 %v499_v21 }
  0x1c   :  { %342 = vmatprep.subr.bf16.mxu0 %v500_v24 }
  0x1d   :  { %382 = vmatpush1.bf16.msra.mxu1 %v541_v35 }
  0x1e   :  { %383 = vmatprep.subr.bf16.mxu1 %v544_v37 }
  0x1f   :  { %343 = vmatpush1.bf16.msra.mxu0 %v504_v26 }
  0x20   :  { %344 = vmatprep.subr.bf16.mxu0 %v506_v28 }
  0x21   :  { %384 = vmatpush1.bf16.msra.mxu1 %v547_v39 }
  0x23   :  { %345 = vmatpush2.bf16.msra.mxu0 %v510_v29 }
  0x24   :  { %346 = vmatprep.subr.bf16.mxu0 %v512_v32  ;;  %402 = vmatmul.mubr.bf16.vlgmr.msra.gmra.mxu1 %v550_v42 }
  0x27   :  { %347 = vmatpush2.bf16.msra.mxu0 %v516_v36 }
  0x28   :  { %348 = vmatprep.subr.bf16.mxu0 %v518_v38 }
  0x2b   :  { %349 = vmatpush2.bf16.msra.mxu0 %v522_v40 }
  0x2c   :  { %350 = vmatprep.subr.bf16.mxu0 %v524_v41 }
  0x2f   :  { %351 = vmatpush2.bf16.msra.mxu0 %v528_v43 }
  0x30   :  { %352 = vmatprep.subr.bf16.mxu0 %v530_v44 }
  0x33   :  { %353 = vmatpush2.bf16.msra.mxu0 %v534_v45 }
  0x34   :  { %354 = vmatprep.subr.bf16.mxu0 %v536_v46 }
  0x37   :  { %355 = vmatpush2.bf16.msra.mxu0 %v540_v47 }
  0x38   :  { %356 = vmatprep.subr.bf16.mxu0 %v542_v48 }
  0x3b   :  { %357 = vmatpush2.bf16.msra.mxu0 %v546_v49 }
  0x3c   :  { %358 = vmatprep.subr.bf16.mxu0 %v548_v50 }
  0x3f   :  { %359 = vmatpush2.bf16.msra.mxu0 %v551_v51 }
  0x42   :  { %361 = vmatmul.mubr.bf16.vlgmr.msra.gmra.mxu0 %v425_v52 }
  0xe4   :  { %v403_v53 = vpop.f32.mrf.mxu1 }
  0xe6   :  { %v405_v54 = vpop.f32.mrf.mxu1 }
  0xe8   :  { %v407_v55 = vpop.f32.mrf.mxu1 }
  0xea   :  { %v408_v57 = vpop.f32.mrf.mxu1 }
 0x102   :  { %v362_v0 = vpop.f32.mrf.mxu0 }
 0x103   :  { %v363_v1 = vadd.f32 %v362_v0, %v70_v62 }
 0x104   :  { %v364_v2 = vpop.f32.mrf.mxu0 }
 0x105   :  { %v404_v3 = vadd.f32 %v403_v53, %v363_v1  ;;  %v365_v4 = vadd.f32 %v364_v2, %v74_v63 }
 0x106   :  { %v366_v5 = vpop.f32.mrf.mxu0 }
 0x107   :  { %v406_v6 = vadd.f32 %v405_v54, %v365_v4  ;;  %v410_v8 = vmax.f32 %v404_v3, 0.0 }
 0x108   :  { %v367_v7 = vpop.f32.mrf.mxu0 }
 0x109   :  { %v411_v9 = vmax.f32 %v406_v6, 0.0 }
 0x10b   :  { %v477_v10 = vpack.c.bf16 %v411_v9, %v410_v8 }
 0x10d   :  { %420 = vst [vmem:[%s734_s3] sm:$0xff] %v477_v10 }

// kernel: forward.32
= control target key start
LH: loop header
LB: loop body
LE: loop exit
PB: predicated region body
PF: predicated region fallthrough
CT: control target
= control target key end

     0   :  { %v181_v0 = vmov 0.0   ;;  %vm182_vm0 = vmmov 0   ;;  %s236_s1 = inlined_call_operand.vmem [shape: bf16[128,128], index: 1, kind: input, shape index: {}]   ;;  %s237_s0 = inlined_call_operand.vmem [shape: bf16[8,128], index: 0, kind: input, shape index: {}]   ;;  %s238_s2 = inlined_call_operand.vmem [shape: f32[1,128], index: 2, kind: input, shape index: {}]   ;;  %s239_s3 = inlined_call_operand.vmem [shape: bf16[8,128], index: 3, kind: output, shape index: {}]  }
   0x1   :  { %151 = vmatprep.subr.bf16.mxu0 %v181_v0  ;;  %v173_v1 = vld [vmem:[%s236_s1 + $0x38] sm:$0xff]   ;;  %167 = vmatprep.mubr.msk.bf16.mxu0 %vm182_vm0, %v181_v0  ;;  %v174_v2 = vld [vmem:[%s236_s1 + $0x30] sm:$0xff]   ;;  %v175_v3 = vld [vmem:[%s236_s1 + $0x28] sm:$0xff]  }
   0x2   :  { %152 = vmatpush3.bf16.msra.mxu0 %v173_v1  ;;  %v176_v4 = vld [vmem:[%s236_s1 + $0x20] sm:$0xff]   ;;  %v177_v5 = vld [vmem:[%s236_s1 + $0x18] sm:$0xff]   ;;  %v178_v6 = vld [vmem:[%s236_s1 + $0x10] sm:$0xff]  }
   0x3   :  { %153 = vmatprep.subr.bf16.mxu0 %v181_v0  ;;  %v179_v7 = vld [vmem:[%s236_s1 + $0x8] sm:$0xff]   ;;  %v180_v8 = vld [vmem:[%s236_s1] sm:$0xff]  }
   0x4   :  { %v15_v9 = vld [vmem:[%s237_s0] sm:$0xf] }
   0x5   :  { %v133_v10 = vld [vmem:[%s238_s2] ss:$0 sm:$0xff] }
   0x6   :  { %154 = vmatpush3.bf16.msra.mxu0 %v174_v2 }
   0x7   :  { %155 = vmatprep.subr.bf16.mxu0 %v181_v0 }
   0xa   :  { %156 = vmatpush3.bf16.msra.mxu0 %v175_v3 }
   0xb   :  { %157 = vmatprep.subr.bf16.mxu0 %v181_v0 }
   0xe   :  { %158 = vmatpush3.bf16.msra.mxu0 %v176_v4 }
   0xf   :  { %159 = vmatprep.subr.bf16.mxu0 %v181_v0 }
  0x12   :  { %160 = vmatpush3.bf16.msra.mxu0 %v177_v5 }
  0x13   :  { %161 = vmatprep.subr.bf16.mxu0 %v181_v0 }
  0x16   :  { %162 = vmatpush3.bf16.msra.mxu0 %v178_v6 }
  0x17   :  { %163 = vmatprep.subr.bf16.mxu0 %v181_v0 }
  0x1a   :  { %164 = vmatpush3.bf16.msra.mxu0 %v179_v7 }
  0x1b   :  { %165 = vmatprep.subr.bf16.mxu0 %v181_v0 }
  0x1e   :  { %166 = vmatpush3.bf16.msra.mxu0 %v180_v8 }
  0x21   :  { %168 = vmatmul.mubr.bf16.vlgmr.msra.gmra.mxu0 %v15_v9 }
  0xe1   :  { %v121_v11 = vpop.f32.mrf.mxu0 }
  0xe2   :  { %v122_v12 = vadd.f32 %v133_v10, %v121_v11 }
  0xe3   :  { %v169_v13 = vpop.f32.mrf.mxu0 }
  0xe4   :  { %v127_v14 = vpack.c.bf16 %v122_v12, %v122_v12 }
  0xe5   :  { %v124_v15 = vpop.f32.mrf.mxu0 }
  0xe6   :  { %128 = vst [vmem:[%s239_s3] sm:$0xf] %v127_v14 }
  0xe7   :  { %v170_v16 = vpop.f32.mrf.mxu0 }

// kernel: forward.34
= control target key start
LH: loop header
LB: loop body
LE: loop exit
PB: predicated region body
PF: predicated region fallthrough
CT: control target
= control target key end

     0   :  { %s1495_s1 = inlined_call_operand.vmem [shape: bf16[1280,128], index: 1, kind: input, shape index: {}]   ;;  %s1496_s0 = inlined_call_operand.vmem [shape: bf16[8,1280], index: 0, kind: input, shape index: {}]   ;;  %s1497_s2 = inlined_call_operand.vmem [shape: f32[1,128], index: 2, kind: input, shape index: {}]   ;;  %s1498_s3 = inlined_call_operand.vmem [shape: bf16[8,128], index: 3, kind: input, shape index: {}]   ;;  %s1499_s4 = inlined_call_operand.vmem [shape: bf16[8,128], index: 4, kind: output, shape index: {}]  }
   0x1   :  { %v1116_v0 = vld [vmem:[%s1495_s1 + $0x78] sm:$0xff]   ;;  %v1120_v4 = vld [vmem:[%s1495_s1 + $0x70] sm:$0xff]   ;;  %v1124_v8 = vld [vmem:[%s1495_s1 + $0x68] sm:$0xff]  }
   0x2   :  { %v1117_v1 = vld [vmem:[%s1495_s1 + $0x38] sm:$0xff]   ;;  %1006 = vmatprep.subr.bf16.mxu0 %v1116_v0  ;;  %v1121_v5 = vld [vmem:[%s1495_s1 + $0x30] sm:$0xff]   ;;  %v1125_v9 = vld [vmem:[%s1495_s1 + $0x28] sm:$0xff]  }
   0x3   :  { %v1118_v2 = vld [vmem:[%s1495_s1 + $0xf8] sm:$0xff]   ;;  %1007 = vmatpush3.bf16.msra.mxu0 %v1117_v1  ;;  %v1122_v6 = vld [vmem:[%s1495_s1 + $0xf0] sm:$0xff]   ;;  %v1126_v10 = vld [vmem:[%s1495_s1 + $0xe8] sm:$0xff]  }
   0x4   :  { %v1119_v3 = vld [vmem:[%s1495_s1 + $0xb8] sm:$0xff]   ;;  %1028 = vmatprep.subr.bf16.mxu1 %v1118_v2  ;;  %1008 = vmatprep.subr.bf16.mxu0 %v1120_v4  ;;  %v1123_v7 = vld [vmem:[%s1495_s1 + $0xb0] sm:$0xff]   ;;  %v1127_v11 = vld [vmem:[%s1495_s1 + $0xa8] sm:$0xff]  }
   0x5   :  { %1029 = vmatpush3.bf16.msra.mxu1 %v1119_v3  ;;  %v1128_v12 = vld [vmem:[%s1495_s1 + $0x60] sm:$0xff]   ;;  %v1132_v16 = vld [vmem:[%s1495_s1 + $0x58] sm:$0xff]   ;;  %v1136_v20 = vld [vmem:[%s1495_s1 + $0x50] sm:$0xff]  }
   0x6   :  { %1030 = vmatprep.subr.bf16.mxu1 %v1122_v6  ;;  %v1129_v13 = vld [vmem:[%s1495_s1 + $0x20] sm:$0xff]   ;;  %v1133_v17 = vld [vmem:[%s1495_s1 + $0x18] sm:$0xff]   ;;  %v1137_v21 = vld [vmem:[%s1495_s1 + $0x10] sm:$0xff]  }
   0x7   :  { %1009 = vmatpush3.bf16.msra.mxu0 %v1121_v5  ;;  %v1130_v14 = vld [vmem:[%s1495_s1 + $0xe0] sm:$0xff]   ;;  %v1134_v18 = vld [vmem:[%s1495_s1 + $0xd8] sm:$0xff]   ;;  %v1138_v22 = vld [vmem:[%s1495_s1 + $0xd0] sm:$0xff]  }
   0x8   :  { %1010 = vmatprep.subr.bf16.mxu0 %v1124_v8  ;;  %v1131_v15 = vld [vmem:[%s1495_s1 + $0xa0] sm:$0xff]   ;;  %v1135_v19 = vld [vmem:[%s1495_s1 + $0x98] sm:$0xff]   ;;  %v1139_v23 = vld [vmem:[%s1495_s1 + $0x90] sm:$0xff]  }
   0x9   :  { %1031 = vmatpush3.bf16.msra.mxu1 %v1123_v7  ;;  %v1140_v24 = vld [vmem:[%s1495_s1 + $0x48] sm:$0xff]   ;;  %v1144_v28 = vld [vmem:[%s1495_s1 + $0x40] sm:$0xff]   ;;  %v1150_v35 = vld [vmem:[%s1495_s1 + $0x178] sm:$0xff]  }
   0xa   :  { %1032 = vmatprep.subr.bf16.mxu1 %v1126_v10  ;;  %v1141_v25 = vld [vmem:[%s1495_s1 + $0x8] sm:$0xff]   ;;  %v1145_v29 = vld [vmem:[%s1495_s1] sm:$0xff]   ;;  %v1153_v39 = vld [vmem:[%s1495_s1 + $0x138] sm:$0xff]  }
   0xb   :  { %1011 = vmatpush3.bf16.msra.mxu0 %v1125_v9  ;;  %v1142_v26 = vld [vmem:[%s1495_s1 + $0xc8] sm:$0xff]   ;;  %v1146_v30 = vld [vmem:[%s1495_s1 + $0xc0] sm:$0xff]   ;;  %v1154_v40 = vld [vmem:[%s1495_s1 + $0x1f8] sm:$0xff]  }
   0xc   :  { %1012 = vmatprep.subr.bf16.mxu0 %v1128_v12  ;;  %v1143_v27 = vld [vmem:[%s1495_s1 + $0x88] sm:$0xff]   ;;  %v18_v31 = vld [vmem:[%s1496_s0] sm:$0xff]  ;;  %v1155_v41 = vld [vmem:[%s1495_s1 + $0x1b8] sm:$0xff]  }
   0xd   :  { %1033 = vmatpush3.bf16.msra.mxu1 %v1127_v11  ;;  %v916_v32 = vcombine.low %v18_v31, %v18_v31  ;;  %v917_v33 = vcombine.high %v18_v31, %v18_v31  ;;  %v1149_v34 = vld [vmem:[%s1495_s1 + $0x80] sm:$0xff]   ;;  %v19_v36 = vld [vmem:[%s1496_s0 + $0x8] sm:$0xff]  ;;  %v1156_v42 = vld [vmem:[%s1495_s1 + $0x170] sm:$0xff]  }
   0xe   :  { %1034 = vmatprep.subr.bf16.mxu1 %v1130_v14  ;;  %v918_v37 = vcombine.low %v19_v36, %v19_v36  ;;  %v919_v38 = vcombine.high %v19_v36, %v19_v36  ;;  %v1157_v43 = vld [vmem:[%s1495_s1 + $0x130] sm:$0xff]   ;;  %v1160_v46 = vld [vmem:[%s1495_s1 + $0x168] sm:$0xff]   ;;  %v1164_v50 = vld [vmem:[%s1495_s1 + $0x160] sm:$0xff]  }
   0xf   :  { %1013 = vmatpush3.bf16.msra.mxu0 %v1129_v13  ;;  %737 = vmatprep.mubr.bf16.mxu0 %v917_v33  ;;  %v1158_v44 = vld [vmem:[%s1495_s1 + $0x1f0] sm:$0xff]   ;;  %v1161_v47 = vld [vmem:[%s1495_s1 + $0x128] sm:$0xff]   ;;  %v1165_v51 = vld [vmem:[%s1495_s1 + $0x120] sm:$0xff]  }
  0x10   :  { %1014 = vmatprep.subr.bf16.mxu0 %v1132_v16  ;;  %777 = vmatprep.mubr.bf16.mxu1 %v919_v38  ;;  %v1159_v45 = vld [vmem:[%s1495_s1 + $0x1b0] sm:$0xff]   ;;  %v1162_v48 = vld [vmem:[%s1495_s1 + $0x1e8] sm:$0xff]   ;;  %v1166_v52 = vld [vmem:[%s1495_s1 + $0x1e0] sm:$0xff]  }
  0x11   :  { %1035 = vmatpush3.bf16.msra.mxu1 %v1131_v15  ;;  %v1163_v49 = vld [vmem:[%s1495_s1 + $0x1a8] sm:$0xff]   ;;  %v1167_v53 = vld [vmem:[%s1495_s1 + $0x1a0] sm:$0xff]   ;;  %v1168_v54 = vld [vmem:[%s1495_s1 + $0x158] sm:$0xff]  }
  0x12   :  { %1036 = vmatprep.subr.bf16.mxu1 %v1134_v18  ;;  %v1169_v55 = vld [vmem:[%s1495_s1 + $0x118] sm:$0xff]   ;;  %v1172_v58 = vld [vmem:[%s1495_s1 + $0x150] sm:$0xff]   ;;  %v1176_v62 = vld [vmem:[%s1495_s1 + $0x148] sm:$0xff]  }
  0x13   :  { %1015 = vmatpush3.bf16.msra.mxu0 %v1133_v17  ;;  %v1170_v56 = vld [vmem:[%s1495_s1 + $0x1d8] sm:$0xff]   ;;  %v1173_v59 = vld [vmem:[%s1495_s1 + $0x110] sm:$0xff]   ;;  %v1177_v63 = vld [vmem:[%s1495_s1 + $0x108] sm:$0xff]  }
  0x14   :  { %1016 = vmatprep.subr.bf16.mxu0 %v1136_v20  ;;  %v1171_v57 = vld [vmem:[%s1495_s1 + $0x198] sm:$0xff]   ;;  %v1174_v60 = vld [vmem:[%s1495_s1 + $0x1d0] sm:$0xff]   ;;  %v1178_v0 = vld [vmem:[%s1495_s1 + $0x1c8] sm:$0xff]  }
  0x15   :  { %1037 = vmatpush3.bf16.msra.mxu1 %v1135_v19  ;;  %v1175_v61 = vld [vmem:[%s1495_s1 + $0x190] sm:$0xff]   ;;  %v1179_v1 = vld [vmem:[%s1495_s1 + $0x188] sm:$0xff]   ;;  %v1180_v2 = vld [vmem:[%s1495_s1 + $0x140] sm:$0xff]  }
  0x16   :  { %1038 = vmatprep.subr.bf16.mxu1 %v1138_v22  ;;  %v1181_v3 = vld [vmem:[%s1495_s1 + $0x100] sm:$0xff]   ;;  %v20_v5 = vld [vmem:[%s1496_s0 + $0x10] sm:$0xff]  ;;  %v1186_v9 = vld [vmem:[%s1495_s1 + $0x278] sm:$0xff]  }
  0x17   :  { %1017 = vmatpush3.bf16.msra.mxu0 %v1137_v21  ;;  %v1182_v4 = vld [vmem:[%s1495_s1 + $0x1c0] sm:$0xff]   ;;  %v920_v6 = vcombine.low %v20_v5, %v20_v5  ;;  %v921_v7 = vcombine.high %v20_v5, %v20_v5  ;;  %v21_v10 = vld [vmem:[%s1496_s0 + $0x18] sm:$0xff]  ;;  %v1190_v14 = vld [vmem:[%s1495_s1 + $0x270] sm:$0xff]  }
  0x18   :  { %1018 = vmatprep.subr.bf16.mxu0 %v1140_v24  ;;  %v1185_v8 = vld [vmem:[%s1495_s1 + $0x180] sm:$0xff]   ;;  %v922_v11 = vcombine.low %v21_v10, %v21_v10  ;;  %v923_v12 = vcombine.high %v21_v10, %v21_v10  ;;  %v1189_v13 = vld [vmem:[%s1495_s1 + $0x238] sm:$0xff]   ;;  %v1191_v15 = vld [vmem:[%s1495_s1 + $0x230] sm:$0xff]  }
  0x19   :  { %1039 = vmatpush3.bf16.msra.mxu1 %v1139_v23  ;;  %v1192_v16 = vld [vmem:[%s1495_s1 + $0x268] sm:$0xff]   ;;  %v1194_v18 = vld [vmem:[%s1495_s1 + $0x260] sm:$0xff]   ;;  %v1196_v20 = vld [vmem:[%s1495_s1 + $0x258] sm:$0xff]  }
  0x1a   :  { %1040 = vmatprep.subr.bf16.mxu1 %v1142_v26  ;;  %v1193_v17 = vld [vmem:[%s1495_s1 + $0x228] sm:$0xff]   ;;  %v1195_v19 = vld [vmem:[%s1495_s1 + $0x220] sm:$0xff]   ;;  %v1197_v21 = vld [vmem:[%s1495_s1 + $0x218] sm:$0xff]  }
  0x1b   :  { %1019 = vmatpush3.bf16.msra.mxu0 %v1141_v25  ;;  %v22_v22 = vld [vmem:[%s1496_s0 + $0x20] sm:$0xff]  ;;  %v1198_v23 = vld [vmem:[%s1495_s1 + $0x250] sm:$0xff]   ;;  %v1200_v26 = vld [vmem:[%s1495_s1 + $0x248] sm:$0xff]  }
  0x1c   :  { %1020 = vmatprep.subr.bf16.mxu0 %v1144_v28  ;;  %v925_v24 = vcombine.high %v22_v22, %v22_v22  ;;  %v1199_v25 = vld [vmem:[%s1495_s1 + $0x210] sm:$0xff]   ;;  %v1202_v28 = vld [vmem:[%s1495_s1 + $0x240] sm:$0xff]  }
  0x1d   :  { %1041 = vmatpush3.bf16.msra.mxu1 %v1143_v27  ;;  %v1201_v27 = vld [vmem:[%s1495_s1 + $0x208] sm:$0xff]  }
  0x1e   :  { %1042 = vmatprep.subr.bf16.mxu1 %v1146_v30  ;;  %v924_v30 = vcombine.low %v22_v22, %v22_v22 }
  0x1f   :  { %1021 = vmatpush3.bf16.msra.mxu0 %v1145_v29  ;;  %v1203_v29 = vld [vmem:[%s1495_s1 + $0x200] sm:$0xff]  }
  0x20   :  { %1050 = vmatprep.subr.bf16.mxu0 %v1150_v35 }
  0x21   :  { %1043 = vmatpush3.bf16.msra.mxu1 %v1149_v34 }
  0x22   :  { %738 = vmatmul.mubr.bf16.vlgmr.msra.gmra.mxu0 %v916_v32  ;;  %1072 = vmatprep.subr.bf16.mxu1 %v1154_v40 }
  0x23   :  { %1051 = vmatpush3.bf16.msra.mxu0 %v1153_v39  ;;  %817 = vmatprep.mubr.bf16.mxu0 %v921_v7 }
  0x24   :  { %778 = vmatmul.mubr.bf16.vlgmr.msra.gmra.mxu1 %v918_v37  ;;  %1052 = vmatprep.subr.bf16.mxu0 %v1156_v42 }
  0x25   :  { %1073 = vmatpush3.bf16.msra.mxu1 %v1155_v41  ;;  %857 = vmatprep.mubr.bf16.mxu1 %v923_v12 }
  0x26   :  { %1074 = vmatprep.subr.bf16.mxu1 %v1158_v44 }
  0x27   :  { %1053 = vmatpush3.bf16.msra.mxu0 %v1157_v43 }
  0x28   :  { %1054 = vmatprep.subr.bf16.mxu0 %v1160_v46 }
  0x29   :  { %1075 = vmatpush3.bf16.msra.mxu1 %v1159_v45 }
  0x2a   :  { %1076 = vmatprep.subr.bf16.mxu1 %v1162_v48  ;;  %v915_v48 = vld [vmem:[%s1497_s2] ss:$0 sm:$0xff] }
  0x2b   :  { %1055 = vmatpush3.bf16.msra.mxu0 %v1161_v47 }
  0x2c   :  { %1056 = vmatprep.subr.bf16.mxu0 %v1164_v50 }
  0x2d   :  { %1077 = vmatpush3.bf16.msra.mxu1 %v1163_v49 }
  0x2e   :  { %1078 = vmatprep.subr.bf16.mxu1 %v1166_v52 }
  0x2f   :  { %1057 = vmatpush3.bf16.msra.mxu0 %v1165_v51 }
  0x30   :  { %1058 = vmatprep.subr.bf16.mxu0 %v1168_v54 }
  0x31   :  { %1079 = vmatpush3.bf16.msra.mxu1 %v1167_v53 }
  0x32   :  { %1080 = vmatprep.subr.bf16.mxu1 %v1170_v56  ;;  %v905_v56 = vld [vmem:[%s1498_s3] sm:$0xf] }
  0x33   :  { %1059 = vmatpush3.bf16.msra.mxu0 %v1169_v55 }
  0x34   :  { %1060 = vmatprep.subr.bf16.mxu0 %v1172_v58 }
  0x35   :  { %1081 = vmatpush3.bf16.msra.mxu1 %v1171_v57 }
  0x36   :  { %1082 = vmatprep.subr.bf16.mxu1 %v1174_v60  ;;  %v906_v60 = vunpack.c.l.bf16 %v905_v56 }
  0x37   :  { %1061 = vmatpush3.bf16.msra.mxu0 %v1173_v59 }
  0x38   :  { %1062 = vmatprep.subr.bf16.mxu0 %v1176_v62 }
  0x39   :  { %1083 = vmatpush3.bf16.msra.mxu1 %v1175_v61 }
  0x3a   :  { %1084 = vmatprep.subr.bf16.mxu1 %v1178_v0 }
  0x3b   :  { %1063 = vmatpush3.bf16.msra.mxu0 %v1177_v63 }
  0x3c   :  { %1064 = vmatprep.subr.bf16.mxu0 %v1180_v2 }
  0x3d   :  { %1085 = vmatpush3.bf16.msra.mxu1 %v1179_v1 }
  0x3e   :  { %1086 = vmatprep.subr.bf16.mxu1 %v1182_v4 }
  0x3f   :  { %1065 = vmatpush3.bf16.msra.mxu0 %v1181_v3 }
  0x40   :  { %1094 = vmatprep.subr.bf16.mxu0 %v1186_v9 }
  0x41   :  { %1087 = vmatpush3.bf16.msra.mxu1 %v1185_v8 }
  0x42   :  { %818 = vmatmul.mubr.bf16.vlgmr.msra.gmra.mxu0 %v920_v6 }
  0x43   :  { %1095 = vmatpush3.bf16.msra.mxu0 %v1189_v13  ;;  %897 = vmatprep.mubr.bf16.mxu0 %v925_v24 }
  0x44   :  { %858 = vmatmul.mubr.bf16.vlgmr.msra.gmra.mxu1 %v922_v11  ;;  %1096 = vmatprep.subr.bf16.mxu0 %v1190_v14 }
  0x47   :  { %1097 = vmatpush3.bf16.msra.mxu0 %v1191_v15 }
  0x48   :  { %1098 = vmatprep.subr.bf16.mxu0 %v1192_v16 }
  0x4b   :  { %1099 = vmatpush3.bf16.msra.mxu0 %v1193_v17 }
  0x4c   :  { %1100 = vmatprep.subr.bf16.mxu0 %v1194_v18 }
  0x4f   :  { %1101 = vmatpush3.bf16.msra.mxu0 %v1195_v19 }
  0x50   :  { %1102 = vmatprep.subr.bf16.mxu0 %v1196_v20 }
  0x53   :  { %1103 = vmatpush3.bf16.msra.mxu0 %v1197_v21 }
  0x54   :  { %1104 = vmatprep.subr.bf16.mxu0 %v1198_v23 }
  0x57   :  { %1105 = vmatpush3.bf16.msra.mxu0 %v1199_v25 }
  0x58   :  { %1106 = vmatprep.subr.bf16.mxu0 %v1200_v26 }
  0x5b   :  { %1107 = vmatpush3.bf16.msra.mxu0 %v1201_v27 }
  0x5c   :  { %1108 = vmatprep.subr.bf16.mxu0 %v1202_v28 }
  0x5f   :  { %1109 = vmatpush3.bf16.msra.mxu0 %v1203_v29 }
  0x62   :  { %898 = vmatmul.mubr.bf16.vlgmr.msra.gmra.mxu0 %v924_v30 }
  0xe2   :  { %v1022_v31 = vpop.f32.mrf.mxu0 }
  0xe4   :  { %v1023_v32 = vpop.f32.mrf.mxu0  ;;  %v1044_v33 = vpop.f32.mrf.mxu1 }
  0xe5   :  { %v1024_v47 = vadd.f32 %v1023_v32, %v1022_v31 }
  0xe6   :  { %v1025_v34 = vpop.f32.mrf.mxu0  ;;  %v1045_v35 = vpop.f32.mrf.mxu1 }
  0xe7   :  { %v740_v49 = vadd.f32 %v1024_v47, %v915_v48  ;;  %v1046_v50 = vadd.f32 %v1045_v35, %v1044_v33 }
  0xe8   :  { %v1026_v36 = vpop.f32.mrf.mxu0  ;;  %v1047_v37 = vpop.f32.mrf.mxu1 }
  0xe9   :  { %v780_v52 = vadd.f32 %v1046_v50, %v740_v49 }
  0xea   :  { %v1048_v38 = vpop.f32.mrf.mxu1 }
 0x102   :  { %v1066_v39 = vpop.f32.mrf.mxu0 }
 0x104   :  { %v1067_v40 = vpop.f32.mrf.mxu0  ;;  %v1088_v41 = vpop.f32.mrf.mxu1 }
 0x105   :  { %v1068_v51 = vadd.f32 %v1067_v40, %v1066_v39 }
 0x106   :  { %v1069_v42 = vpop.f32.mrf.mxu0  ;;  %v1089_v43 = vpop.f32.mrf.mxu1 }
 0x107   :  { %v820_v53 = vadd.f32 %v1068_v51, %v780_v52  ;;  %v1090_v54 = vadd.f32 %v1089_v43, %v1088_v41 }
 0x108   :  { %v1070_v44 = vpop.f32.mrf.mxu0  ;;  %v1091_v45 = vpop.f32.mrf.mxu1 }
 0x109   :  { %v860_v58 = vadd.f32 %v1090_v54, %v820_v53 }
 0x10a   :  { %v1092_v46 = vpop.f32.mrf.mxu1 }
 0x122   :  { %v1110_v55 = vpop.f32.mrf.mxu0 }
 0x124   :  { %v1111_v57 = vpop.f32.mrf.mxu0 }
 0x125   :  { %v1112_v59 = vadd.f32 %v1111_v57, %v1110_v55 }
 0x126   :  { %v1113_v61 = vpop.f32.mrf.mxu0 }
 0x127   :  { %v900_v62 = vadd.f32 %v1112_v59, %v860_v58 }
 0x128   :  { %v1114_v63 = vpop.f32.mrf.mxu0 }
 0x129   :  { %v907_v0 = vadd.f32 %v906_v60, %v900_v62 }
 0x12b   :  { %v908_v1 = vmax.f32 %v907_v0, 0.0 }
 0x12d   :  { %v909_v2 = vpack.c.bf16 %v908_v1, %v908_v1 }
 0x12f   :  { %910 = vst [vmem:[%s1499_s4] sm:$0xf] %v909_v2 }

// kernel: forward.35
= control target key start
LH: loop header
LB: loop body
LE: loop exit
PB: predicated region body
PF: predicated region fallthrough
CT: control target
= control target key end

     0   :  { %s1155_s1 = inlined_call_operand.vmem [shape: bf16[640,256], index: 1, kind: input, shape index: {}]   ;;  %s1156_s0 = inlined_call_operand.vmem [shape: bf16[8,640], index: 0, kind: input, shape index: {}]   ;;  %s1157_s2 = inlined_call_operand.vmem [shape: f32[1,256], index: 2, kind: input, shape index: {}]   ;;  %s1158_s3 = inlined_call_operand.vmem [shape: bf16[8,256], index: 3, kind: output, shape index: {}]  }
   0x1   :  { %v754_v0 = vld [vmem:[%s1155_s1 + $0x74] ss:$8 sps:$4 sm:$0xff]   ;;  %v756_v1 = vld [vmem:[%s1155_s1 + $0x70] ss:$8 sps:$4 sm:$0xff]   ;;  %v760_v4 = vld [vmem:[%s1155_s1 + $0x64] ss:$8 sps:$4 sm:$0xff]  }
   0x2   :  { %528 = vmatprep.subr.bf16.mxu0 %v754_v0  ;;  %v757_v2 = vld [vmem:[%s1155_s1 + $0x174] ss:$8 sps:$4 sm:$0xff]   ;;  %v759_v3 = vld [vmem:[%s1155_s1 + $0x170] ss:$8 sps:$4 sm:$0xff]   ;;  %v762_v5 = vld [vmem:[%s1155_s1 + $0x60] ss:$8 sps:$4 sm:$0xff]  }
   0x3   :  { %529 = vmatpush1.bf16.msra.mxu0 %v756_v1  ;;  %569 = vmatprep.subr.bf16.mxu1 %v757_v2  ;;  %v763_v6 = vld [vmem:[%s1155_s1 + $0x164] ss:$8 sps:$4 sm:$0xff]   ;;  %v765_v7 = vld [vmem:[%s1155_s1 + $0x160] ss:$8 sps:$4 sm:$0xff]   ;;  %v766_v8 = vld [vmem:[%s1155_s1 + $0x54] ss:$8 sps:$4 sm:$0xff]  }
   0x4   :  { %570 = vmatpush1.bf16.msra.mxu1 %v759_v3  ;;  %530 = vmatprep.subr.bf16.mxu0 %v760_v4  ;;  %v768_v9 = vld [vmem:[%s1155_s1 + $0x50] ss:$8 sps:$4 sm:$0xff]   ;;  %v769_v10 = vld [vmem:[%s1155_s1 + $0x154] ss:$8 sps:$4 sm:$0xff]   ;;  %v772_v11 = vld [vmem:[%s1155_s1 + $0x44] ss:$8 sps:$4 sm:$0xff]  }
   0x5   :  { %571 = vmatprep.subr.bf16.mxu1 %v763_v6  ;;  %v771_v12 = vld [vmem:[%s1155_s1 + $0x150] ss:$8 sps:$4 sm:$0xff]   ;;  %v775_v13 = vld [vmem:[%s1155_s1 + $0x144] ss:$8 sps:$4 sm:$0xff]   ;;  %v774_v14 = vld [vmem:[%s1155_s1 + $0x40] ss:$8 sps:$4 sm:$0xff]  }
   0x6   :  { %v778_v15 = vld [vmem:[%s1155_s1 + $0x34] ss:$8 sps:$4 sm:$0xff]   ;;  %v777_v16 = vld [vmem:[%s1155_s1 + $0x140] ss:$8 sps:$4 sm:$0xff]   ;;  %v780_v18 = vld [vmem:[%s1155_s1 + $0x30] ss:$8 sps:$4 sm:$0xff]  }
   0x7   :  { %531 = vmatpush1.bf16.msra.mxu0 %v762_v5  ;;  %v781_v17 = vld [vmem:[%s1155_s1 + $0x134] ss:$8 sps:$4 sm:$0xff]   ;;  %v784_v19 = vld [vmem:[%s1155_s1 + $0x24] ss:$8 sps:$4 sm:$0xff]   ;;  %v783_v20 = vld [vmem:[%s1155_s1 + $0x130] ss:$8 sps:$4 sm:$0xff]  }
   0x8   :  { %532 = vmatprep.subr.bf16.mxu0 %v766_v8  ;;  %572 = vmatpush1.bf16.msra.mxu1 %v765_v7  ;;  %v787_v21 = vld [vmem:[%s1155_s1 + $0x124] ss:$8 sps:$4 sm:$0xff]   ;;  %v786_v22 = vld [vmem:[%s1155_s1 + $0x20] ss:$8 sps:$4 sm:$0xff]   ;;  %v790_v23 = vld [vmem:[%s1155_s1 + $0x14] ss:$8 sps:$4 sm:$0xff]  }
   0x9   :  { %573 = vmatprep.subr.bf16.mxu1 %v769_v10  ;;  %v789_v24 = vld [vmem:[%s1155_s1 + $0x120] ss:$8 sps:$4 sm:$0xff]   ;;  %v793_v25 = vld [vmem:[%s1155_s1 + $0x114] ss:$8 sps:$4 sm:$0xff]   ;;  %v792_v26 = vld [vmem:[%s1155_s1 + $0x10] ss:$8 sps:$4 sm:$0xff]  }
   0xa   :  { %v796_v27 = vld [vmem:[%s1155_s1 + $0x4] ss:$8 sps:$4 sm:$0xff]   ;;  %v795_v28 = vld [vmem:[%s1155_s1 + $0x110] ss:$8 sps:$4 sm:$0xff]   ;;  %v798_v30 = vld [vmem:[%s1155_s1] ss:$8 sps:$4 sm:$0xff]  }
   0xb   :  { %533 = vmatpush1.bf16.msra.mxu0 %v768_v9  ;;  %v799_v29 = vld [vmem:[%s1155_s1 + $0x104] ss:$8 sps:$4 sm:$0xff]   ;;  %v802_v31 = vld [vmem:[%s1155_s1 + $0xf4] ss:$8 sps:$4 sm:$0xff]   ;;  %v801_v32 = vld [vmem:[%s1155_s1 + $0x100] ss:$8 sps:$4 sm:$0xff]  }
   0xc   :  { %534 = vmatprep.subr.bf16.mxu0 %v772_v11  ;;  %574 = vmatpush1.bf16.msra.mxu1 %v771_v12  ;;  %v805_v33 = vld [vmem:[%s1155_s1 + $0x1f4] ss:$8 sps:$4 sm:$0xff]   ;;  %v804_v34 = vld [vmem:[%s1155_s1 + $0xf0] ss:$8 sps:$4 sm:$0xff]   ;;  %v808_v35 = vld [vmem:[%s1155_s1 + $0xe4] ss:$8 sps:$4 sm:$0xff]  }
   0xd   :  { %575 = vmatprep.subr.bf16.mxu1 %v775_v13  ;;  %v807_v36 = vld [vmem:[%s1155_s1 + $0x1f0] ss:$8 sps:$4 sm:$0xff]   ;;  %v811_v37 = vld [vmem:[%s1155_s1 + $0x1e4] ss:$8 sps:$4 sm:$0xff]   ;;  %v810_v38 = vld [vmem:[%s1155_s1 + $0xe0] ss:$8 sps:$4 sm:$0xff]  }
   0xe   :  { %v814_v39 = vld [vmem:[%s1155_s1 + $0xd4] ss:$8 sps:$4 sm:$0xff]   ;;  %v813_v40 = vld [vmem:[%s1155_s1 + $0x1e0] ss:$8 sps:$4 sm:$0xff]   ;;  %v816_v42 = vld [vmem:[%s1155_s1 + $0xd0] ss:$8 sps:$4 sm:$0xff]  }
   0xf   :  { %535 = vmatpush1.bf16.msra.mxu0 %v774_v14  ;;  %v817_v41 = vld [vmem:[%s1155_s1 + $0x1d4] ss:$8 sps:$4 sm:$0xff]   ;;  %v820_v43 = vld [vmem:[%s1155_s1 + $0xc4] ss:$8 sps:$4 sm:$0xff]   ;;  %v819_v44 = vld [vmem:[%s1155_s1 + $0x1d0] ss:$8 sps:$4 sm:$0xff]  }
  0x10   :  { %536 = vmatprep.subr.bf16.mxu0 %v778_v15  ;;  %576 = vmatpush1.bf16.msra.mxu1 %v777_v16  ;;  %v823_v45 = vld [vmem:[%s1155_s1 + $0x1c4] ss:$8 sps:$4 sm:$0xff]   ;;  %v822_v47 = vld [vmem:[%s1155_s1 + $0xc0] ss:$8 sps:$4 sm:$0xff]   ;;  %v826_v50 = vld [vmem:[%s1155_s1 + $0xb4] ss:$8 sps:$4 sm:$0xff]  }
  0x11   :  { %577 = vmatprep.subr.bf16.mxu1 %v781_v17  ;;  %v15_v46 = vld [vmem:[%s1156_s0] sm:$0xff]  ;;  %v16_v51 = vld [vmem:[%s1156_s0 + $0x8] sm:$0xff]  ;;  %v829_v52 = vld [vmem:[%s1155_s1 + $0x1b4] ss:$8 sps:$4 sm:$0xff]   ;;  %v879_v10 = vmov 0  }
  0x12   :  { %v667_v48 = vcombine.high %v15_v46, %v15_v46  ;;  %v825_v49 = vld [vmem:[%s1155_s1 + $0x1c0] ss:$8 sps:$4 sm:$0xff]   ;;  %v669_v53 = vcombine.high %v16_v51, %v16_v51  ;;  %v828_v54 = vld [vmem:[%s1155_s1 + $0xb0] ss:$8 sps:$4 sm:$0xff]   ;;  %v832_v55 = vld [vmem:[%s1155_s1 + $0xa4] ss:$8 sps:$4 sm:$0xff]   ;;  %v666_v5 = vcombine.low %v15_v46, %v15_v46  ;;  %v668_v7 = vcombine.low %v16_v51, %v16_v51 }
  0x13   :  { %537 = vmatpush1.bf16.msra.mxu0 %v780_v18  ;;  %v831_v56 = vld [vmem:[%s1155_s1 + $0x1b0] ss:$8 sps:$4 sm:$0xff]   ;;  %v835_v57 = vld [vmem:[%s1155_s1 + $0x1a4] ss:$8 sps:$4 sm:$0xff]   ;;  %v834_v58 = vld [vmem:[%s1155_s1 + $0xa0] ss:$8 sps:$4 sm:$0xff]  }
  0x14   :  { %538 = vmatprep.subr.bf16.mxu0 %v784_v19  ;;  %578 = vmatpush1.bf16.msra.mxu1 %v783_v20  ;;  %v838_v59 = vld [vmem:[%s1155_s1 + $0x94] ss:$8 sps:$4 sm:$0xff]   ;;  %v837_v60 = vld [vmem:[%s1155_s1 + $0x1a0] ss:$8 sps:$4 sm:$0xff]   ;;  %v840_v62 = vld [vmem:[%s1155_s1 + $0x90] ss:$8 sps:$4 sm:$0xff]  }
  0x15   :  { %579 = vmatprep.subr.bf16.mxu1 %v787_v21  ;;  %560 = vmatprep.mubr.bf16.mxu0 %v667_v48  ;;  %v841_v61 = vld [vmem:[%s1155_s1 + $0x194] ss:$8 sps:$4 sm:$0xff]   ;;  %v844_v63 = vld [vmem:[%s1155_s1 + $0x84] ss:$8 sps:$4 sm:$0xff]   ;;  %v843_v0 = vld [vmem:[%s1155_s1 + $0x190] ss:$8 sps:$4 sm:$0xff]  }
  0x16   :  { %601 = vmatprep.mubr.bf16.mxu1 %v669_v53  ;;  %v847_v1 = vld [vmem:[%s1155_s1 + $0x184] ss:$8 sps:$4 sm:$0xff]   ;;  %v846_v2 = vld [vmem:[%s1155_s1 + $0x80] ss:$8 sps:$4 sm:$0xff]   ;;  %v855_v3 = vld [vmem:[%s1155_s1 + $0x274] ss:$8 sps:$4 sm:$0xff]  }
  0x17   :  { %539 = vmatpush1.bf16.msra.mxu0 %v786_v22  ;;  %v852_v4 = vld [vmem:[%s1155_s1 + $0x180] ss:$8 sps:$4 sm:$0xff]   ;;  %v853_v6 = vld [vmem:[%s1155_s1 + $0x270] ss:$8 sps:$4 sm:$0xff]   ;;  %v860_v8 = vld [vmem:[%s1155_s1 + $0x264] ss:$8 sps:$4 sm:$0xff]  }
  0x18   :  { %540 = vmatprep.subr.bf16.mxu0 %v790_v23  ;;  %580 = vmatpush1.bf16.msra.mxu1 %v789_v24  ;;  %v858_v9 = vld [vmem:[%s1155_s1 + $0x260] ss:$8 sps:$4 sm:$0xff]   ;;  %v863_v11 = vld [vmem:[%s1155_s1 + $0x254] ss:$8 sps:$4 sm:$0xff]   ;;  %v861_v12 = vld [vmem:[%s1155_s1 + $0x250] ss:$8 sps:$4 sm:$0xff]  }
  0x19   :  { %581 = vmatprep.subr.bf16.mxu1 %v793_v25  ;;  %v866_v13 = vld [vmem:[%s1155_s1 + $0x244] ss:$8 sps:$4 sm:$0xff]   ;;  %v864_v14 = vld [vmem:[%s1155_s1 + $0x240] ss:$8 sps:$4 sm:$0xff]   ;;  %v869_v15 = vld [vmem:[%s1155_s1 + $0x234] ss:$8 sps:$4 sm:$0xff]  }
  0x1a   :  { %v867_v16 = vld [vmem:[%s1155_s1 + $0x230] ss:$8 sps:$4 sm:$0xff]   ;;  %v872_v17 = vld [vmem:[%s1155_s1 + $0x224] ss:$8 sps:$4 sm:$0xff]   ;;  %v870_v18 = vld [vmem:[%s1155_s1 + $0x220] ss:$8 sps:$4 sm:$0xff]  }
  0x1b   :  { %541 = vmatpush1.bf16.msra.mxu0 %v792_v26  ;;  %v875_v19 = vld [vmem:[%s1155_s1 + $0x214] ss:$8 sps:$4 sm:$0xff]   ;;  %v873_v20 = vld [vmem:[%s1155_s1 + $0x210] ss:$8 sps:$4 sm:$0xff]   ;;  %v878_v21 = vld [vmem:[%s1155_s1 + $0x204] ss:$8 sps:$4 sm:$0xff]  }
  0x1c   :  { %542 = vmatprep.subr.bf16.mxu0 %v796_v27  ;;  %582 = vmatpush1.bf16.msra.mxu1 %v795_v28  ;;  %v876_v22 = vld [vmem:[%s1155_s1 + $0x200] ss:$8 sps:$4 sm:$0xff]   ;;  %v851_v23 = vld [vmem:[%s1156_s0 + $0x10] ss:$0 sps:$4 sm:$0xff]  }
  0x1d   :  { %583 = vmatprep.subr.bf16.mxu1 %v799_v29 }
  0x1f   :  { %543 = vmatpush1.bf16.msra.mxu0 %v798_v30 }
  0x20   :  { %544 = vmatprep.subr.bf16.mxu0 %v802_v31  ;;  %584 = vmatpush1.bf16.msra.mxu1 %v801_v32  ;;  %v100_v32 = vlaneseq }
  0x21   :  { %585 = vmatprep.subr.bf16.mxu1 %v805_v33 }
  0x22   :  { %v101_v33 = vshrl.u32 %v100_v32, 7 }
  0x23   :  { %545 = vmatpush2.bf16.msra.mxu0 %v804_v34 }
  0x24   :  { %546 = vmatprep.subr.bf16.mxu0 %v808_v35  ;;  %586 = vmatpush2.bf16.msra.mxu1 %v807_v36  ;;  %v102_v34 = vsub.s32 0, %v101_v33  ;;  %v98_v35 = vld [vmem:[%s1157_s2] sm:$0x3]  ;;  %v106_v36 = vsub.s32 1, %v101_v33 }
  0x25   :  { %587 = vmatprep.subr.bf16.mxu1 %v811_v37 }
  0x26   :  { %v103_v37 = vrot.slane %v98_v35, %v102_v34 }
  0x27   :  { %547 = vmatpush2.bf16.msra.mxu0 %v810_v38  ;;  %v107_v38 = vrot.slane %v98_v35, %v106_v36 }
  0x28   :  { %548 = vmatprep.subr.bf16.mxu0 %v814_v39  ;;  %588 = vmatpush2.bf16.msra.mxu1 %v813_v40 }
  0x29   :  { %589 = vmatprep.subr.bf16.mxu1 %v817_v41 }
  0x2b   :  { %549 = vmatpush2.bf16.msra.mxu0 %v816_v42 }
  0x2c   :  { %550 = vmatprep.subr.bf16.mxu0 %v820_v43  ;;  %590 = vmatpush2.bf16.msra.mxu1 %v819_v44 }
  0x2d   :  { %591 = vmatprep.subr.bf16.mxu1 %v823_v45 }
  0x2f   :  { %551 = vmatpush2.bf16.msra.mxu0 %v822_v47 }
  0x30   :  { %552 = vmatprep.subr.bf16.mxu0 %v826_v50  ;;  %592 = vmatpush2.bf16.msra.mxu1 %v825_v49 }
  0x31   :  { %593 = vmatprep.subr.bf16.mxu1 %v829_v52 }
  0x33   :  { %553 = vmatpush2.bf16.msra.mxu0 %v828_v54 }
  0x34   :  { %554 = vmatprep.subr.bf16.mxu0 %v832_v55  ;;  %594 = vmatpush2.bf16.msra.mxu1 %v831_v56 }
  0x35   :  { %595 = vmatprep.subr.bf16.mxu1 %v835_v57 }
  0x37   :  { %555 = vmatpush2.bf16.msra.mxu0 %v834_v58 }
  0x38   :  { %556 = vmatprep.subr.bf16.mxu0 %v838_v59  ;;  %596 = vmatpush2.bf16.msra.mxu1 %v837_v60 }
  0x39   :  { %597 = vmatprep.subr.bf16.mxu1 %v841_v61 }
  0x3b   :  { %557 = vmatpush2.bf16.msra.mxu0 %v840_v62 }
  0x3c   :  { %558 = vmatprep.subr.bf16.mxu0 %v844_v63  ;;  %598 = vmatpush2.bf16.msra.mxu1 %v843_v0 }
  0x3d   :  { %599 = vmatprep.subr.bf16.mxu1 %v847_v1 }
  0x3f   :  { %559 = vmatpush2.bf16.msra.mxu0 %v846_v2 }
  0x40   :  { %610 = vmatprep.subr.bf16.mxu0 %v855_v3  ;;  %600 = vmatpush2.bf16.msra.mxu1 %v852_v4 }
  0x42   :  { %561 = vmatmul.mubr.bf16.vlgmr.msra.gmra.mxu0 %v666_v5 }
  0x43   :  { %611 = vmatpush1.bf16.msra.mxu0 %v853_v6  ;;  %642 = vmatprep.mubr.bf16.mxu0 %v879_v10 }
  0x44   :  { %602 = vmatmul.mubr.bf16.vlgmr.msra.gmra.mxu1 %v668_v7  ;;  %612 = vmatprep.subr.bf16.mxu0 %v860_v8 }
  0x47   :  { %613 = vmatpush1.bf16.msra.mxu0 %v858_v9 }
  0x48   :  { %614 = vmatprep.subr.bf16.mxu0 %v863_v11 }
  0x4b   :  { %615 = vmatpush1.bf16.msra.mxu0 %v861_v12 }
  0x4c   :  { %616 = vmatprep.subr.bf16.mxu0 %v866_v13 }
  0x4f   :  { %617 = vmatpush1.bf16.msra.mxu0 %v864_v14 }
  0x50   :  { %618 = vmatprep.subr.bf16.mxu0 %v869_v15 }
  0x53   :  { %619 = vmatpush1.bf16.msra.mxu0 %v867_v16 }
  0x54   :  { %620 = vmatprep.subr.bf16.mxu0 %v872_v17 }
  0x57   :  { %621 = vmatpush1.bf16.msra.mxu0 %v870_v18 }
  0x58   :  { %622 = vmatprep.subr.bf16.mxu0 %v875_v19 }
  0x5b   :  { %623 = vmatpush1.bf16.msra.mxu0 %v873_v20 }
  0x5c   :  { %624 = vmatprep.subr.bf16.mxu0 %v878_v21 }
  0x5f   :  { %625 = vmatpush1.bf16.msra.mxu0 %v876_v22 }
  0x62   :  { %643 = vmatmul.mubr.bf16.vlgmr.msra.gmra.mxu0 %v851_v23 }
 0x102   :  { %v562_v24 = vpop.f32.mrf.mxu0 }
 0x103   :  { %v563_v39 = vadd.f32 %v562_v24, %v103_v37 }
 0x104   :  { %v564_v25 = vpop.f32.mrf.mxu0  ;;  %v603_v26 = vpop.f32.mrf.mxu1 }
 0x105   :  { %v565_v40 = vadd.f32 %v564_v25, %v107_v38  ;;  %v604_v41 = vadd.f32 %v603_v26, %v563_v39 }
 0x106   :  { %v566_v27 = vpop.f32.mrf.mxu0  ;;  %v605_v28 = vpop.f32.mrf.mxu1 }
 0x107   :  { %v606_v43 = vadd.f32 %v605_v28, %v565_v40 }
 0x108   :  { %v567_v29 = vpop.f32.mrf.mxu0  ;;  %v607_v30 = vpop.f32.mrf.mxu1 }
 0x10a   :  { %v608_v31 = vpop.f32.mrf.mxu1 }
 0x122   :  { %v644_v42 = vpop.f32.mrf.mxu0 }
 0x123   :  { %v645_v44 = vadd.f32 %v644_v42, %v604_v41 }
 0x124   :  { %v646_v45 = vpop.f32.mrf.mxu0 }
 0x125   :  { %v647_v46 = vadd.f32 %v646_v45, %v606_v43  ;;  %v651_v48 = vmax.f32 %v645_v44, 0.0 }
 0x126   :  { %v648_v47 = vpop.f32.mrf.mxu0 }
 0x127   :  { %v652_v49 = vmax.f32 %v647_v46, 0.0 }
 0x128   :  { %v649_v50 = vpop.f32.mrf.mxu0 }
 0x129   :  { %v752_v51 = vpack.c.bf16 %v652_v49, %v651_v48 }
 0x12b   :  { %661 = vst [vmem:[%s1158_s3] sm:$0xff] %v752_v51 }

// kernel: forward.37
= control target key start
LH: loop header
LB: loop body
LE: loop exit
PB: predicated region body
PF: predicated region fallthrough
CT: control target
= control target key end

     0   :  { %v234_v1 = vmov 0   ;;  %v34_v18 = vlaneseq  ;;  %v235_v22 = vmov 1966171168   ;;  %s313_s1 = inlined_call_operand.vmem [shape: bf16[128,256], index: 1, kind: input, shape index: {}]   ;;  %s314_s0 = inlined_call_operand.vmem [shape: bf16[2,128], index: 0, kind: input, shape index: {}]   ;;  %s315_s2 = inlined_call_operand.vmem [shape: f32[1,256], index: 2, kind: input, shape index: {}]   ;;  %s316_s3 = inlined_call_operand.vmem [shape: bf16[2,256], index: 3, kind: output, shape index: {}]  }
   0x1   :  { %v210_v0 = vld [vmem:[%s313_s1 + $0x74] ss:$8 sps:$4 sm:$0xff]   ;;  %156 = vmatprep.mubr.bf16.mxu0 %v234_v1  ;;  %v212_v2 = vld [vmem:[%s313_s1 + $0x70] ss:$8 sps:$4 sm:$0xff]   ;;  %v213_v3 = vld [vmem:[%s313_s1 + $0x64] ss:$8 sps:$4 sm:$0xff]   ;;  %v171_v23 = vunpack.c.l.s4 %v235_v22 }
   0x2   :  { %124 = vmatprep.subr.bf16.mxu0 %v210_v0  ;;  %v215_v4 = vld [vmem:[%s313_s1 + $0x60] ss:$8 sps:$4 sm:$0xff]   ;;  %v216_v5 = vld [vmem:[%s313_s1 + $0x54] ss:$8 sps:$4 sm:$0xff]   ;;  %v218_v6 = vld [vmem:[%s313_s1 + $0x50] ss:$8 sps:$4 sm:$0xff]  }
   0x3   :  { %125 = vmatpush1.bf16.msra.mxu0 %v212_v2  ;;  %v219_v7 = vld [vmem:[%s313_s1 + $0x44] ss:$8 sps:$4 sm:$0xff]   ;;  %v221_v8 = vld [vmem:[%s313_s1 + $0x40] ss:$8 sps:$4 sm:$0xff]   ;;  %v222_v9 = vld [vmem:[%s313_s1 + $0x34] ss:$8 sps:$4 sm:$0xff]   ;;  %v172_v27 = vunpack.c.0.s8 %v171_v23 }
   0x4   :  { %126 = vmatprep.subr.bf16.mxu0 %v213_v3  ;;  %v224_v10 = vld [vmem:[%s313_s1 + $0x30] ss:$8 sps:$4 sm:$0xff]   ;;  %v225_v11 = vld [vmem:[%s313_s1 + $0x24] ss:$8 sps:$4 sm:$0xff]   ;;  %v227_v12 = vld [vmem:[%s313_s1 + $0x20] ss:$8 sps:$4 sm:$0xff]  }
   0x5   :  { %v228_v13 = vld [vmem:[%s313_s1 + $0x14] ss:$8 sps:$4 sm:$0xff]   ;;  %v230_v14 = vld [vmem:[%s313_s1 + $0x10] ss:$8 sps:$4 sm:$0xff]   ;;  %v231_v15 = vld [vmem:[%s313_s1 + $0x4] ss:$8 sps:$4 sm:$0xff]  }
   0x6   :  { %v233_v16 = vld [vmem:[%s313_s1] ss:$8 sps:$4 sm:$0xff]   ;;  %v35_v19 = vshrl.u32 %v34_v18, 7 }
   0x7   :  { %127 = vmatpush1.bf16.msra.mxu0 %v215_v4  ;;  %v15_v17 = vld [vmem:[%s314_s0] sm:$0x1] }
   0x8   :  { %128 = vmatprep.subr.bf16.mxu0 %v216_v5  ;;  %v36_v20 = vsub.s32 0, %v35_v19  ;;  %v40_v21 = vsub.s32 1, %v35_v19  ;;  %v32_v24 = vld [vmem:[%s315_s2] sm:$0x3]  ;;  %v175_v32 = vsub.s32 %v172_v27, %v35_v19 }
   0xa   :  { %v37_v25 = vrot.slane %v32_v24, %v36_v20  ;;  %v41_v26 = vrot.slane %v32_v24, %v40_v21 }
   0xb   :  { %129 = vmatpush1.bf16.msra.mxu0 %v218_v6 }
   0xc   :  { %130 = vmatprep.subr.bf16.mxu0 %v219_v7 }
   0xf   :  { %131 = vmatpush1.bf16.msra.mxu0 %v221_v8 }
  0x10   :  { %132 = vmatprep.subr.bf16.mxu0 %v222_v9 }
  0x13   :  { %133 = vmatpush1.bf16.msra.mxu0 %v224_v10 }
  0x14   :  { %134 = vmatprep.subr.bf16.mxu0 %v225_v11 }
  0x17   :  { %135 = vmatpush1.bf16.msra.mxu0 %v227_v12 }
  0x18   :  { %136 = vmatprep.subr.bf16.mxu0 %v228_v13 }
  0x1b   :  { %137 = vmatpush1.bf16.msra.mxu0 %v230_v14 }
  0x1c   :  { %138 = vmatprep.subr.bf16.mxu0 %v231_v15 }
  0x1f   :  { %139 = vmatpush1.bf16.msra.mxu0 %v233_v16 }
  0x22   :  { %157 = vmatmul.mubr.bf16.vlgmr.msra.gmra.mxu0 %v15_v17 }
  0xe2   :  { %v158_v28 = vpop.f32.mrf.mxu0 }
  0xe3   :  { %v159_v30 = vadd.f32 %v158_v28, %v37_v25 }
  0xe4   :  { %v160_v29 = vpop.f32.mrf.mxu0 }
  0xe5   :  { %v161_v31 = vadd.f32 %v160_v29, %v41_v26 }
  0xe6   :  { %v162_v33 = vpop.f32.mrf.mxu0 }
  0xe7   :  { %v206_v34 = vpack.c.bf16 %v161_v31, %v159_v30 }
  0xe8   :  { %v163_v35 = vpop.f32.mrf.mxu0 }
  0xe9   :  { %v176_v36 = vrot.slane %v206_v34, %v175_v32 }
  0xeb   :  { %207 = vst.sshfl [vmem:[%s316_s3] sm:$0x5 pattern:$0x73625140] %v176_v36 }

// kernel: forward.36
= control target key start
LH: loop header
LB: loop body
LE: loop exit
PB: predicated region body
PF: predicated region fallthrough
CT: control target
= control target key end

     0   :  { %vm1365_vm0 = vmmov 0   ;;  %s1682_s1 = inlined_call_operand.vmem [shape: bf16[1408,128], index: 1, kind: input, shape index: {}]   ;;  %s1683_s0 = inlined_call_operand.vmem [shape: bf16[8,1408], index: 0, kind: input, shape index: {}]   ;;  %s1684_s2 = inlined_call_operand.vmem [shape: f32[1,128], index: 2, kind: input, shape index: {}]   ;;  %s1685_s3 = inlined_call_operand.vmem [shape: bf16[8,128], index: 3, kind: input, shape index: {}]   ;;  %s1686_s4 = inlined_call_operand.vmem [shape: bf16[8,128], index: 4, kind: output, shape index: {}]  }
   0x1   :  { %v1265_v0 = vld [vmem:[%s1682_s1 + $0x78] sm:$0xff]   ;;  %v1269_v4 = vld [vmem:[%s1682_s1 + $0x70] sm:$0xff]   ;;  %v1273_v8 = vld [vmem:[%s1682_s1 + $0x68] sm:$0xff]  }
   0x2   :  { %v1266_v1 = vld [vmem:[%s1682_s1 + $0xf8] sm:$0xff]   ;;  %1124 = vmatprep.subr.bf16.mxu0 %v1265_v0  ;;  %v1270_v5 = vld [vmem:[%s1682_s1 + $0xf0] sm:$0xff]   ;;  %v1274_v9 = vld [vmem:[%s1682_s1 + $0xe8] sm:$0xff]  }
   0x3   :  { %v1267_v2 = vld [vmem:[%s1682_s1 + $0x38] sm:$0xff]   ;;  %1146 = vmatprep.subr.bf16.mxu1 %v1266_v1  ;;  %v1271_v6 = vld [vmem:[%s1682_s1 + $0x30] sm:$0xff]   ;;  %v1275_v10 = vld [vmem:[%s1682_s1 + $0x28] sm:$0xff]  }
   0x4   :  { %v1268_v3 = vld [vmem:[%s1682_s1 + $0xb8] sm:$0xff]   ;;  %1125 = vmatpush3.bf16.msra.mxu0 %v1267_v2  ;;  %v1272_v7 = vld [vmem:[%s1682_s1 + $0xb0] sm:$0xff]   ;;  %v1276_v11 = vld [vmem:[%s1682_s1 + $0xa8] sm:$0xff]  }
   0x5   :  { %1147 = vmatpush3.bf16.msra.mxu1 %v1268_v3  ;;  %1126 = vmatprep.subr.bf16.mxu0 %v1269_v4  ;;  %v1277_v12 = vld [vmem:[%s1682_s1 + $0x60] sm:$0xff]   ;;  %v1281_v16 = vld [vmem:[%s1682_s1 + $0x58] sm:$0xff]   ;;  %v1285_v20 = vld [vmem:[%s1682_s1 + $0x50] sm:$0xff]  }
   0x6   :  { %1148 = vmatprep.subr.bf16.mxu1 %v1270_v5  ;;  %v1278_v13 = vld [vmem:[%s1682_s1 + $0xe0] sm:$0xff]   ;;  %v1282_v17 = vld [vmem:[%s1682_s1 + $0xd8] sm:$0xff]   ;;  %v1286_v21 = vld [vmem:[%s1682_s1 + $0xd0] sm:$0xff]  }
   0x7   :  { %v1279_v14 = vld [vmem:[%s1682_s1 + $0x20] sm:$0xff]   ;;  %v1283_v18 = vld [vmem:[%s1682_s1 + $0x18] sm:$0xff]   ;;  %v1287_v22 = vld [vmem:[%s1682_s1 + $0x10] sm:$0xff]  }
   0x8   :  { %1127 = vmatpush3.bf16.msra.mxu0 %v1271_v6  ;;  %v1280_v15 = vld [vmem:[%s1682_s1 + $0xa0] sm:$0xff]   ;;  %v1284_v19 = vld [vmem:[%s1682_s1 + $0x98] sm:$0xff]   ;;  %v1288_v23 = vld [vmem:[%s1682_s1 + $0x90] sm:$0xff]  }
   0x9   :  { %1149 = vmatpush3.bf16.msra.mxu1 %v1272_v7  ;;  %1128 = vmatprep.subr.bf16.mxu0 %v1273_v8  ;;  %v1289_v24 = vld [vmem:[%s1682_s1 + $0x48] sm:$0xff]   ;;  %v1293_v28 = vld [vmem:[%s1682_s1 + $0x40] sm:$0xff]   ;;  %v1301_v38 = vld [vmem:[%s1682_s1 + $0x178] sm:$0xff]  }
   0xa   :  { %1150 = vmatprep.subr.bf16.mxu1 %v1274_v9  ;;  %v1290_v25 = vld [vmem:[%s1682_s1 + $0xc8] sm:$0xff]   ;;  %v1294_v29 = vld [vmem:[%s1682_s1 + $0xc0] sm:$0xff]   ;;  %v1302_v39 = vld [vmem:[%s1682_s1 + $0x1f8] sm:$0xff]  }
   0xb   :  { %v1291_v26 = vld [vmem:[%s1682_s1 + $0x8] sm:$0xff]   ;;  %v1295_v30 = vld [vmem:[%s1682_s1] sm:$0xff]   ;;  %v1303_v40 = vld [vmem:[%s1682_s1 + $0x138] sm:$0xff]  }
   0xc   :  { %1129 = vmatpush3.bf16.msra.mxu0 %v1275_v10  ;;  %v1292_v27 = vld [vmem:[%s1682_s1 + $0x88] sm:$0xff]   ;;  %v1296_v31 = vld [vmem:[%s1682_s1 + $0x80] sm:$0xff]   ;;  %v1304_v41 = vld [vmem:[%s1682_s1 + $0x1b8] sm:$0xff]  }
   0xd   :  { %1151 = vmatpush3.bf16.msra.mxu1 %v1276_v11  ;;  %1130 = vmatprep.subr.bf16.mxu0 %v1277_v12  ;;  %v18_v32 = vld [vmem:[%s1683_s0] sm:$0xff]  ;;  %v19_v33 = vld [vmem:[%s1683_s0 + $0x8] sm:$0xff]  ;;  %v1305_v42 = vld [vmem:[%s1682_s1 + $0x170] sm:$0xff]  }
   0xe   :  { %1152 = vmatprep.subr.bf16.mxu1 %v1278_v13  ;;  %v1025_v34 = vcombine.low %v18_v32, %v18_v32  ;;  %v1026_v35 = vcombine.high %v18_v32, %v18_v32  ;;  %v1027_v36 = vcombine.low %v19_v33, %v19_v33  ;;  %v1028_v37 = vcombine.high %v19_v33, %v19_v33  ;;  %v1306_v43 = vld [vmem:[%s1682_s1 + $0x1f0] sm:$0xff]   ;;  %v1309_v46 = vld [vmem:[%s1682_s1 + $0x168] sm:$0xff]   ;;  %v1313_v50 = vld [vmem:[%s1682_s1 + $0x160] sm:$0xff]  }
   0xf   :  { %v1307_v44 = vld [vmem:[%s1682_s1 + $0x130] sm:$0xff]   ;;  %v1310_v47 = vld [vmem:[%s1682_s1 + $0x1e8] sm:$0xff]   ;;  %v1314_v51 = vld [vmem:[%s1682_s1 + $0x1e0] sm:$0xff]   ;;  %v1364_v13 = vmov 0.0  }
  0x10   :  { %1131 = vmatpush3.bf16.msra.mxu0 %v1279_v14  ;;  %806 = vmatprep.mubr.bf16.mxu0 %v1026_v35  ;;  %v1308_v45 = vld [vmem:[%s1682_s1 + $0x1b0] sm:$0xff]   ;;  %v1311_v48 = vld [vmem:[%s1682_s1 + $0x128] sm:$0xff]   ;;  %v1315_v52 = vld [vmem:[%s1682_s1 + $0x120] sm:$0xff]  }
  0x11   :  { %1153 = vmatpush3.bf16.msra.mxu1 %v1280_v15  ;;  %1132 = vmatprep.subr.bf16.mxu0 %v1281_v16  ;;  %v1312_v49 = vld [vmem:[%s1682_s1 + $0x1a8] sm:$0xff]   ;;  %v1316_v53 = vld [vmem:[%s1682_s1 + $0x1a0] sm:$0xff]   ;;  %v1317_v54 = vld [vmem:[%s1682_s1 + $0x158] sm:$0xff]  }
  0x12   :  { %1154 = vmatprep.subr.bf16.mxu1 %v1282_v17  ;;  %846 = vmatprep.mubr.bf16.mxu1 %v1028_v37  ;;  %v1318_v55 = vld [vmem:[%s1682_s1 + $0x1d8] sm:$0xff]   ;;  %v1321_v58 = vld [vmem:[%s1682_s1 + $0x150] sm:$0xff]   ;;  %v1325_v62 = vld [vmem:[%s1682_s1 + $0x148] sm:$0xff]  }
  0x13   :  { %v1319_v56 = vld [vmem:[%s1682_s1 + $0x118] sm:$0xff]   ;;  %v1322_v59 = vld [vmem:[%s1682_s1 + $0x1d0] sm:$0xff]   ;;  %v1326_v63 = vld [vmem:[%s1682_s1 + $0x1c8] sm:$0xff]  }
  0x14   :  { %1133 = vmatpush3.bf16.msra.mxu0 %v1283_v18  ;;  %v1320_v57 = vld [vmem:[%s1682_s1 + $0x198] sm:$0xff]   ;;  %v1323_v60 = vld [vmem:[%s1682_s1 + $0x110] sm:$0xff]   ;;  %v1327_v0 = vld [vmem:[%s1682_s1 + $0x108] sm:$0xff]  }
  0x15   :  { %1155 = vmatpush3.bf16.msra.mxu1 %v1284_v19  ;;  %1134 = vmatprep.subr.bf16.mxu0 %v1285_v20  ;;  %v1324_v61 = vld [vmem:[%s1682_s1 + $0x190] sm:$0xff]   ;;  %v1328_v1 = vld [vmem:[%s1682_s1 + $0x188] sm:$0xff]   ;;  %v1329_v2 = vld [vmem:[%s1682_s1 + $0x140] sm:$0xff]  }
  0x16   :  { %1156 = vmatprep.subr.bf16.mxu1 %v1286_v21  ;;  %v1330_v3 = vld [vmem:[%s1682_s1 + $0x1c0] sm:$0xff]   ;;  %v20_v6 = vld [vmem:[%s1683_s0 + $0x10] sm:$0xff]  ;;  %v21_v9 = vld [vmem:[%s1683_s0 + $0x18] sm:$0xff] }
  0x17   :  { %v1331_v4 = vld [vmem:[%s1682_s1 + $0x100] sm:$0xff]   ;;  %v1029_v7 = vcombine.low %v20_v6, %v20_v6  ;;  %v1030_v8 = vcombine.high %v20_v6, %v20_v6  ;;  %v1031_v10 = vcombine.low %v21_v9, %v21_v9  ;;  %v1032_v11 = vcombine.high %v21_v9, %v21_v9  ;;  %v1337_v12 = vld [vmem:[%s1682_s1 + $0x278] sm:$0xff]   ;;  %v1340_v16 = vld [vmem:[%s1682_s1 + $0x270] sm:$0xff]  }
  0x18   :  { %1135 = vmatpush3.bf16.msra.mxu0 %v1287_v22  ;;  %v1332_v5 = vld [vmem:[%s1682_s1 + $0x180] sm:$0xff]   ;;  %v1338_v14 = vld [vmem:[%s1682_s1 + $0x238] sm:$0xff]   ;;  %v1341_v17 = vld [vmem:[%s1682_s1 + $0x230] sm:$0xff]  }
  0x19   :  { %1157 = vmatpush3.bf16.msra.mxu1 %v1288_v23  ;;  %1136 = vmatprep.subr.bf16.mxu0 %v1289_v24  ;;  %v1339_v15 = vld [vmem:[%s1682_s1 + $0x2b8] sm:$0xff]   ;;  %v1342_v18 = vld [vmem:[%s1682_s1 + $0x2b0] sm:$0xff]   ;;  %v1343_v19 = vld [vmem:[%s1682_s1 + $0x268] sm:$0xff]  }
  0x1a   :  { %1158 = vmatprep.subr.bf16.mxu1 %v1290_v25  ;;  %v1344_v20 = vld [vmem:[%s1682_s1 + $0x228] sm:$0xff]   ;;  %v1346_v22 = vld [vmem:[%s1682_s1 + $0x260] sm:$0xff]   ;;  %v1349_v25 = vld [vmem:[%s1682_s1 + $0x258] sm:$0xff]  }
  0x1b   :  { %v1345_v21 = vld [vmem:[%s1682_s1 + $0x2a8] sm:$0xff]   ;;  %v1347_v23 = vld [vmem:[%s1682_s1 + $0x220] sm:$0xff]  }
  0x1c   :  { %1137 = vmatpush3.bf16.msra.mxu0 %v1291_v26  ;;  %v1348_v24 = vld [vmem:[%s1682_s1 + $0x2a0] sm:$0xff]   ;;  %v1350_v26 = vld [vmem:[%s1682_s1 + $0x218] sm:$0xff]   ;;  %v1356_v33 = vld [vmem:[%s1682_s1 + $0x208] sm:$0xff]  }
  0x1d   :  { %1159 = vmatpush3.bf16.msra.mxu1 %v1292_v27  ;;  %1138 = vmatprep.subr.bf16.mxu0 %v1293_v28  ;;  %v1351_v27 = vld [vmem:[%s1682_s1 + $0x298] sm:$0xff]   ;;  %v1352_v28 = vld [vmem:[%s1682_s1 + $0x250] sm:$0xff]   ;;  %v22_v32 = vld [vmem:[%s1683_s0 + $0x20] sm:$0xff] }
  0x1e   :  { %1160 = vmatprep.subr.bf16.mxu1 %v1294_v29  ;;  %v1353_v29 = vld [vmem:[%s1682_s1 + $0x210] sm:$0xff]   ;;  %v1034_v35 = vcombine.high %v22_v32, %v22_v32  ;;  %v1359_v37 = vld [vmem:[%s1682_s1 + $0x200] sm:$0xff]  }
  0x20   :  { %1139 = vmatpush3.bf16.msra.mxu0 %v1295_v30  ;;  %v1354_v30 = vld [vmem:[%s1682_s1 + $0x290] sm:$0xff]  }
  0x21   :  { %1161 = vmatpush3.bf16.msra.mxu1 %v1296_v31  ;;  %1168 = vmatprep.subr.bf16.mxu0 %v1301_v38  ;;  %v1355_v31 = vld [vmem:[%s1682_s1 + $0x248] sm:$0xff]   ;;  %v1360_v38 = vld [vmem:[%s1682_s1 + $0x280] sm:$0xff]  }
  0x22   :  { %1190 = vmatprep.subr.bf16.mxu1 %v1302_v39  ;;  %v1033_v39 = vcombine.low %v22_v32, %v22_v32 }
  0x23   :  { %807 = vmatmul.mubr.bf16.vlgmr.msra.gmra.mxu0 %v1025_v34  ;;  %v1357_v34 = vld [vmem:[%s1682_s1 + $0x288] sm:$0xff]  }
  0x24   :  { %847 = vmatmul.mubr.bf16.vlgmr.msra.gmra.mxu1 %v1027_v36  ;;  %1169 = vmatpush3.bf16.msra.mxu0 %v1303_v40  ;;  %v1358_v36 = vld [vmem:[%s1682_s1 + $0x240] sm:$0xff]   ;;  %v1363_v40 = vld [vmem:[%s1683_s0 + $0x28] ss:$0 sps:$4 sm:$0xff]  }
  0x25   :  { %1191 = vmatpush3.bf16.msra.mxu1 %v1304_v41  ;;  %1170 = vmatprep.subr.bf16.mxu0 %v1305_v42 }
  0x26   :  { %1192 = vmatprep.subr.bf16.mxu1 %v1306_v43  ;;  %886 = vmatprep.mubr.bf16.mxu0 %v1030_v8 }
  0x27   :  { %926 = vmatprep.mubr.bf16.mxu1 %v1032_v11 }
  0x28   :  { %1171 = vmatpush3.bf16.msra.mxu0 %v1307_v44 }
  0x29   :  { %1193 = vmatpush3.bf16.msra.mxu1 %v1308_v45  ;;  %1172 = vmatprep.subr.bf16.mxu0 %v1309_v46 }
  0x2a   :  { %1194 = vmatprep.subr.bf16.mxu1 %v1310_v47 }
  0x2c   :  { %1173 = vmatpush3.bf16.msra.mxu0 %v1311_v48 }
  0x2d   :  { %1195 = vmatpush3.bf16.msra.mxu1 %v1312_v49  ;;  %1174 = vmatprep.subr.bf16.mxu0 %v1313_v50 }
  0x2e   :  { %1196 = vmatprep.subr.bf16.mxu1 %v1314_v51 }
  0x30   :  { %1175 = vmatpush3.bf16.msra.mxu0 %v1315_v52 }
  0x31   :  { %1197 = vmatpush3.bf16.msra.mxu1 %v1316_v53  ;;  %1176 = vmatprep.subr.bf16.mxu0 %v1317_v54 }
  0x32   :  { %1198 = vmatprep.subr.bf16.mxu1 %v1318_v55 }
  0x34   :  { %1177 = vmatpush3.bf16.msra.mxu0 %v1319_v56 }
  0x35   :  { %1199 = vmatpush3.bf16.msra.mxu1 %v1320_v57  ;;  %1178 = vmatprep.subr.bf16.mxu0 %v1321_v58  ;;  %v1024_v58 = vld [vmem:[%s1684_s2] ss:$0 sm:$0xff] }
  0x36   :  { %1200 = vmatprep.subr.bf16.mxu1 %v1322_v59 }
  0x38   :  { %1179 = vmatpush3.bf16.msra.mxu0 %v1323_v60 }
  0x39   :  { %1201 = vmatpush3.bf16.msra.mxu1 %v1324_v61  ;;  %1180 = vmatprep.subr.bf16.mxu0 %v1325_v62 }
  0x3a   :  { %1202 = vmatprep.subr.bf16.mxu1 %v1326_v63 }
  0x3c   :  { %1181 = vmatpush3.bf16.msra.mxu0 %v1327_v0 }
  0x3d   :  { %1203 = vmatpush3.bf16.msra.mxu1 %v1328_v1  ;;  %1182 = vmatprep.subr.bf16.mxu0 %v1329_v2 }
  0x3e   :  { %1204 = vmatprep.subr.bf16.mxu1 %v1330_v3 }
  0x40   :  { %1183 = vmatpush3.bf16.msra.mxu0 %v1331_v4  ;;  %v1014_v4 = vld [vmem:[%s1685_s3] sm:$0xf] }
  0x41   :  { %1205 = vmatpush3.bf16.msra.mxu1 %v1332_v5  ;;  %1212 = vmatprep.subr.bf16.mxu0 %v1337_v12  ;;  %v1015_v11 = vunpack.c.l.bf16 %v1014_v4 }
  0x42   :  { %1243 = vmatprep.subr.bf16.mxu1 %v1364_v13 }
  0x43   :  { %887 = vmatmul.mubr.bf16.vlgmr.msra.gmra.mxu0 %v1029_v7 }
  0x44   :  { %927 = vmatmul.mubr.bf16.vlgmr.msra.gmra.mxu1 %v1031_v10  ;;  %1213 = vmatpush3.bf16.msra.mxu0 %v1338_v14 }
  0x45   :  { %1244 = vmatpush3.bf16.msra.mxu1 %v1339_v15  ;;  %1214 = vmatprep.subr.bf16.mxu0 %v1340_v16 }
  0x46   :  { %1245 = vmatprep.subr.bf16.mxu1 %v1364_v13  ;;  %1259 = vmatprep.mubr.msk.bf16.mxu1 %vm1365_vm0, %v1364_v13 }
  0x47   :  { %966 = vmatprep.mubr.bf16.mxu0 %v1034_v35 }
  0x48   :  { %1215 = vmatpush3.bf16.msra.mxu0 %v1341_v17 }
  0x49   :  { %1246 = vmatpush3.bf16.msra.mxu1 %v1342_v18  ;;  %1216 = vmatprep.subr.bf16.mxu0 %v1343_v19 }
  0x4a   :  { %1247 = vmatprep.subr.bf16.mxu1 %v1364_v13 }
  0x4c   :  { %1217 = vmatpush3.bf16.msra.mxu0 %v1344_v20 }
  0x4d   :  { %1248 = vmatpush3.bf16.msra.mxu1 %v1345_v21  ;;  %1218 = vmatprep.subr.bf16.mxu0 %v1346_v22 }
  0x4e   :  { %1249 = vmatprep.subr.bf16.mxu1 %v1364_v13 }
  0x50   :  { %1219 = vmatpush3.bf16.msra.mxu0 %v1347_v23 }
  0x51   :  { %1250 = vmatpush3.bf16.msra.mxu1 %v1348_v24  ;;  %1220 = vmatprep.subr.bf16.mxu0 %v1349_v25 }
  0x52   :  { %1251 = vmatprep.subr.bf16.mxu1 %v1364_v13 }
  0x54   :  { %1221 = vmatpush3.bf16.msra.mxu0 %v1350_v26 }
  0x55   :  { %1252 = vmatpush3.bf16.msra.mxu1 %v1351_v27  ;;  %1222 = vmatprep.subr.bf16.mxu0 %v1352_v28 }
  0x56   :  { %1253 = vmatprep.subr.bf16.mxu1 %v1364_v13 }
  0x58   :  { %1223 = vmatpush3.bf16.msra.mxu0 %v1353_v29 }
  0x59   :  { %1254 = vmatpush3.bf16.msra.mxu1 %v1354_v30  ;;  %1224 = vmatprep.subr.bf16.mxu0 %v1355_v31 }
  0x5a   :  { %1255 = vmatprep.subr.bf16.mxu1 %v1364_v13 }
  0x5c   :  { %1225 = vmatpush3.bf16.msra.mxu0 %v1356_v33 }
  0x5d   :  { %1256 = vmatpush3.bf16.msra.mxu1 %v1357_v34  ;;  %1226 = vmatprep.subr.bf16.mxu0 %v1358_v36 }
  0x5e   :  { %1257 = vmatprep.subr.bf16.mxu1 %v1364_v13 }
  0x60   :  { %1227 = vmatpush3.bf16.msra.mxu0 %v1359_v37 }
  0x61   :  { %1258 = vmatpush3.bf16.msra.mxu1 %v1360_v38 }
  0x63   :  { %967 = vmatmul.mubr.bf16.vlgmr.msra.gmra.mxu0 %v1033_v39 }
  0x64   :  { %1260 = vmatmul.mubr.bf16.vlgmr.msra.gmra.mxu1 %v1363_v40 }
  0xe3   :  { %v1140_v41 = vpop.f32.mrf.mxu0 }
  0xe4   :  { %v1162_v42 = vpop.f32.mrf.mxu1 }
  0xe5   :  { %v1141_v43 = vpop.f32.mrf.mxu0 }
  0xe6   :  { %v1163_v44 = vpop.f32.mrf.mxu1  ;;  %v1142_v57 = vadd.f32 %v1141_v43, %v1140_v41 }
  0xe7   :  { %v1143_v45 = vpop.f32.mrf.mxu0  ;;  %v1164_v60 = vadd.f32 %v1163_v44, %v1162_v42 }
  0xe8   :  { %v1165_v46 = vpop.f32.mrf.mxu1  ;;  %v809_v59 = vadd.f32 %v1142_v57, %v1024_v58 }
  0xe9   :  { %v1144_v47 = vpop.f32.mrf.mxu0 }
  0xea   :  { %v1166_v48 = vpop.f32.mrf.mxu1  ;;  %v849_v62 = vadd.f32 %v1164_v60, %v809_v59 }
 0x103   :  { %v1184_v49 = vpop.f32.mrf.mxu0 }
 0x104   :  { %v1206_v50 = vpop.f32.mrf.mxu1 }
 0x105   :  { %v1185_v51 = vpop.f32.mrf.mxu0 }
 0x106   :  { %v1207_v52 = vpop.f32.mrf.mxu1  ;;  %v1186_v61 = vadd.f32 %v1185_v51, %v1184_v49 }
 0x107   :  { %v1187_v53 = vpop.f32.mrf.mxu0  ;;  %v1208_v0 = vadd.f32 %v1207_v52, %v1206_v50 }
 0x108   :  { %v1209_v54 = vpop.f32.mrf.mxu1  ;;  %v889_v63 = vadd.f32 %v1186_v61, %v849_v62 }
 0x109   :  { %v1188_v55 = vpop.f32.mrf.mxu0 }
 0x10a   :  { %v1210_v56 = vpop.f32.mrf.mxu1  ;;  %v929_v6 = vadd.f32 %v1208_v0, %v889_v63 }
 0x123   :  { %v1228_v1 = vpop.f32.mrf.mxu0 }
 0x124   :  { %v1008_v2 = vpop.f32.mrf.mxu1 }
 0x125   :  { %v1229_v3 = vpop.f32.mrf.mxu0 }
 0x126   :  { %v1261_v5 = vpop.f32.mrf.mxu1  ;;  %v1230_v7 = vadd.f32 %v1229_v3, %v1228_v1 }
 0x127   :  { %v1231_v8 = vpop.f32.mrf.mxu0 }
 0x128   :  { %v1011_v9 = vpop.f32.mrf.mxu1  ;;  %v969_v10 = vadd.f32 %v1230_v7, %v929_v6 }
 0x129   :  { %v1232_v12 = vpop.f32.mrf.mxu0 }
 0x12a   :  { %v1262_v13 = vpop.f32.mrf.mxu1  ;;  %v1009_v14 = vadd.f32 %v1008_v2, %v969_v10 }
 0x12c   :  { %v1016_v15 = vadd.f32 %v1015_v11, %v1009_v14 }
 0x12e   :  { %v1017_v16 = vmax.f32 %v1016_v15, 0.0 }
 0x130   :  { %v1018_v17 = vpack.c.bf16 %v1017_v16, %v1017_v16 }
 0x132   :  { %1019 = vst [vmem:[%s1686_s4] sm:$0xf] %v1018_v17 }

// kernel: forward.38
= control target key start
LH: loop header
LB: loop body
LE: loop exit
PB: predicated region body
PF: predicated region fallthrough
CT: control target
= control target key end

     0   :  { %v178_v36 = vlaneseq  ;;  %v1519_v37 = vmov 1966171168   ;;  %vm1522_vm0 = vmmov 0   ;;  %s1950_s1 = inlined_call_operand.vmem [shape: bf16[640,384], index: 1, kind: input, shape index: {}]   ;;  %s1951_s0 = inlined_call_operand.vmem [shape: bf16[2,640], index: 0, kind: input, shape index: {}]   ;;  %s1952_s2 = inlined_call_operand.vmem [shape: f32[1,384], index: 2, kind: input, shape index: {}]   ;;  %s1953_s3 = inlined_call_operand.vmem [shape: bf16[2,384], index: 3, kind: output, shape index: {}]  }
   0x1   :  { %v1358_v0 = vld [vmem:[%s1950_s1 + $0xac] ss:$12 sps:$4 sm:$0xff]   ;;  %v1362_v2 = vld [vmem:[%s1950_s1 + $0xa8] ss:$12 sps:$4 sm:$0xff]   ;;  %v1368_v6 = vld [vmem:[%s1950_s1 + $0x90] ss:$12 sps:$4 sm:$0xff]   ;;  %v196_v38 = vunpack.c.l.s4 %v1519_v37 }
   0x2   :  { %v1360_v1 = vld [vmem:[%s1950_s1 + $0x22c] ss:$12 sps:$4 sm:$0xff]   ;;  %878 = vmatprep.subr.bf16.mxu0 %v1358_v0  ;;  %v1363_v3 = vld [vmem:[%s1950_s1 + $0x228] ss:$12 sps:$4 sm:$0xff]   ;;  %v1369_v7 = vld [vmem:[%s1950_s1 + $0x210] ss:$12 sps:$4 sm:$0xff]  }
   0x3   :  { %919 = vmatprep.subr.bf16.mxu1 %v1360_v1  ;;  %v1364_v4 = vld [vmem:[%s1950_s1 + $0x94] ss:$12 sps:$4 sm:$0xff]   ;;  %879 = vmatpush1.bf16.msra.mxu0 %v1362_v2  ;;  %v1370_v8 = vld [vmem:[%s1950_s1 + $0x7c] ss:$12 sps:$4 sm:$0xff]   ;;  %v1374_v10 = vld [vmem:[%s1950_s1 + $0x78] ss:$12 sps:$4 sm:$0xff]   ;;  %v197_v43 = vunpack.c.0.s8 %v196_v38 }
   0x4   :  { %920 = vmatpush1.bf16.msra.mxu1 %v1363_v3  ;;  %v1366_v5 = vld [vmem:[%s1950_s1 + $0x214] ss:$12 sps:$4 sm:$0xff]   ;;  %880 = vmatprep.subr.bf16.mxu0 %v1364_v4  ;;  %v1372_v9 = vld [vmem:[%s1950_s1 + $0x1fc] ss:$12 sps:$4 sm:$0xff]   ;;  %v1375_v11 = vld [vmem:[%s1950_s1 + $0x1f8] ss:$12 sps:$4 sm:$0xff]  }
   0x5   :  { %921 = vmatprep.subr.bf16.mxu1 %v1366_v5  ;;  %v1376_v12 = vld [vmem:[%s1950_s1 + $0x64] ss:$12 sps:$4 sm:$0xff]   ;;  %v1380_v14 = vld [vmem:[%s1950_s1 + $0x60] ss:$12 sps:$4 sm:$0xff]   ;;  %v1386_v18 = vld [vmem:[%s1950_s1 + $0x48] ss:$12 sps:$4 sm:$0xff]  }
   0x6   :  { %v1378_v13 = vld [vmem:[%s1950_s1 + $0x1e4] ss:$12 sps:$4 sm:$0xff]   ;;  %v1381_v15 = vld [vmem:[%s1950_s1 + $0x1e0] ss:$12 sps:$4 sm:$0xff]   ;;  %v1387_v19 = vld [vmem:[%s1950_s1 + $0x1c8] ss:$12 sps:$4 sm:$0xff]  }
   0x7   :  { %881 = vmatpush1.bf16.msra.mxu0 %v1368_v6  ;;  %v1382_v16 = vld [vmem:[%s1950_s1 + $0x4c] ss:$12 sps:$4 sm:$0xff]   ;;  %v1388_v20 = vld [vmem:[%s1950_s1 + $0x34] ss:$12 sps:$4 sm:$0xff]   ;;  %v1392_v22 = vld [vmem:[%s1950_s1 + $0x30] ss:$12 sps:$4 sm:$0xff]  }
   0x8   :  { %922 = vmatpush1.bf16.msra.mxu1 %v1369_v7  ;;  %882 = vmatprep.subr.bf16.mxu0 %v1370_v8  ;;  %v1384_v17 = vld [vmem:[%s1950_s1 + $0x1cc] ss:$12 sps:$4 sm:$0xff]   ;;  %v1390_v21 = vld [vmem:[%s1950_s1 + $0x1b4] ss:$12 sps:$4 sm:$0xff]   ;;  %v1393_v23 = vld [vmem:[%s1950_s1 + $0x1b0] ss:$12 sps:$4 sm:$0xff]  }
   0x9   :  { %923 = vmatprep.subr.bf16.mxu1 %v1372_v9  ;;  %v1394_v24 = vld [vmem:[%s1950_s1 + $0x1c] ss:$12 sps:$4 sm:$0xff]   ;;  %v1398_v26 = vld [vmem:[%s1950_s1 + $0x18] ss:$12 sps:$4 sm:$0xff]   ;;  %v1404_v30 = vld [vmem:[%s1950_s1] ss:$12 sps:$4 sm:$0xff]  }
   0xa   :  { %v1396_v25 = vld [vmem:[%s1950_s1 + $0x19c] ss:$12 sps:$4 sm:$0xff]   ;;  %v1399_v27 = vld [vmem:[%s1950_s1 + $0x198] ss:$12 sps:$4 sm:$0xff]   ;;  %v1405_v31 = vld [vmem:[%s1950_s1 + $0x180] ss:$12 sps:$4 sm:$0xff]  }
   0xb   :  { %883 = vmatpush1.bf16.msra.mxu0 %v1374_v10  ;;  %v1400_v28 = vld [vmem:[%s1950_s1 + $0x4] ss:$12 sps:$4 sm:$0xff]   ;;  %v1406_v32 = vld [vmem:[%s1950_s1 + $0x16c] ss:$12 sps:$4 sm:$0xff]   ;;  %v1410_v34 = vld [vmem:[%s1950_s1 + $0x168] ss:$12 sps:$4 sm:$0xff]  }
   0xc   :  { %924 = vmatpush1.bf16.msra.mxu1 %v1375_v11  ;;  %884 = vmatprep.subr.bf16.mxu0 %v1376_v12  ;;  %v1402_v29 = vld [vmem:[%s1950_s1 + $0x184] ss:$12 sps:$4 sm:$0xff]   ;;  %v1408_v33 = vld [vmem:[%s1950_s1 + $0x2ec] ss:$12 sps:$4 sm:$0xff]   ;;  %v1411_v35 = vld [vmem:[%s1950_s1 + $0x2e8] ss:$12 sps:$4 sm:$0xff]  }
   0xd   :  { %925 = vmatprep.subr.bf16.mxu1 %v1378_v13  ;;  %v1412_v39 = vld [vmem:[%s1950_s1 + $0x154] ss:$12 sps:$4 sm:$0xff]   ;;  %v1416_v41 = vld [vmem:[%s1950_s1 + $0x150] ss:$12 sps:$4 sm:$0xff]   ;;  %v1660_v42 = vshrl.u32 %v178_v36, 7 }
   0xe   :  { %v1414_v40 = vld [vmem:[%s1950_s1 + $0x2d4] ss:$12 sps:$4 sm:$0xff]   ;;  %v1417_v44 = vld [vmem:[%s1950_s1 + $0x2d0] ss:$12 sps:$4 sm:$0xff]   ;;  %v1422_v47 = vld [vmem:[%s1950_s1 + $0x138] ss:$12 sps:$4 sm:$0xff]  }
   0xf   :  { %885 = vmatpush1.bf16.msra.mxu0 %v1380_v14  ;;  %v1418_v45 = vld [vmem:[%s1950_s1 + $0x13c] ss:$12 sps:$4 sm:$0xff]   ;;  %v1423_v48 = vld [vmem:[%s1950_s1 + $0x2b8] ss:$12 sps:$4 sm:$0xff]   ;;  %v1678_v49 = vsub.s32 %v197_v43, %v1660_v42  ;;  %v1428_v52 = vld [vmem:[%s1950_s1 + $0x120] ss:$12 sps:$4 sm:$0xff]  }
  0x10   :  { %926 = vmatpush1.bf16.msra.mxu1 %v1381_v15  ;;  %886 = vmatprep.subr.bf16.mxu0 %v1382_v16  ;;  %v1420_v46 = vld [vmem:[%s1950_s1 + $0x2bc] ss:$12 sps:$4 sm:$0xff]   ;;  %v1424_v50 = vld [vmem:[%s1950_s1 + $0x124] ss:$12 sps:$4 sm:$0xff]   ;;  %v1429_v54 = vld [vmem:[%s1950_s1 + $0x2a0] ss:$12 sps:$4 sm:$0xff]  }
  0x11   :  { %927 = vmatprep.subr.bf16.mxu1 %v1384_v17  ;;  %v1426_v51 = vld [vmem:[%s1950_s1 + $0x2a4] ss:$12 sps:$4 sm:$0xff]   ;;  %v1430_v56 = vld [vmem:[%s1950_s1 + $0x10c] ss:$12 sps:$4 sm:$0xff]   ;;  %v1434_v59 = vld [vmem:[%s1950_s1 + $0x108] ss:$12 sps:$4 sm:$0xff]  }
  0x12   :  { %v1692_v53 = vld [vmem:[%s1951_s0] sm:$0x1f]  ;;  %v1432_v57 = vld [vmem:[%s1950_s1 + $0x28c] ss:$12 sps:$4 sm:$0xff]   ;;  %v1435_v60 = vld [vmem:[%s1950_s1 + $0x288] ss:$12 sps:$4 sm:$0xff]  }
  0x13   :  { %887 = vmatpush1.bf16.msra.mxu0 %v1386_v18  ;;  %v201_v55 = vrot.slane %v1692_v53, %v1678_v49  ;;  %v1436_v62 = vld [vmem:[%s1950_s1 + $0xf4] ss:$12 sps:$4 sm:$0xff]   ;;  %v1440_v1 = vld [vmem:[%s1950_s1 + $0xf0] ss:$12 sps:$4 sm:$0xff]   ;;  %v1446_v5 = vld [vmem:[%s1950_s1 + $0xd8] ss:$12 sps:$4 sm:$0xff]  }
  0x14   :  { %928 = vmatpush1.bf16.msra.mxu1 %v1387_v19  ;;  %888 = vmatprep.subr.bf16.mxu0 %v1388_v20  ;;  %v1438_v63 = vld [vmem:[%s1950_s1 + $0x274] ss:$12 sps:$4 sm:$0xff]   ;;  %v1441_v2 = vld [vmem:[%s1950_s1 + $0x270] ss:$12 sps:$4 sm:$0xff]   ;;  %v1447_v6 = vld [vmem:[%s1950_s1 + $0x258] ss:$12 sps:$4 sm:$0xff]  }
  0x15   :  { %929 = vmatprep.subr.bf16.mxu1 %v1390_v21  ;;  %v209_v58 = vcombine.high %v201_v55, %v201_v55  ;;  %v1442_v3 = vld [vmem:[%s1950_s1 + $0xdc] ss:$12 sps:$4 sm:$0xff]   ;;  %v1448_v7 = vld [vmem:[%s1950_s1 + $0xc4] ss:$12 sps:$4 sm:$0xff]   ;;  %v1452_v9 = vld [vmem:[%s1950_s1 + $0xc0] ss:$12 sps:$4 sm:$0xff]   ;;  %v1749_v10 = vrot.slane %v201_v55, %v1678_v49 }
  0x16   :  { %v1444_v4 = vld [vmem:[%s1950_s1 + $0x25c] ss:$12 sps:$4 sm:$0xff]   ;;  %v1450_v8 = vld [vmem:[%s1950_s1 + $0x244] ss:$12 sps:$4 sm:$0xff]   ;;  %v1453_v11 = vld [vmem:[%s1950_s1 + $0x240] ss:$12 sps:$4 sm:$0xff]  }
  0x17   :  { %889 = vmatpush1.bf16.msra.mxu0 %v1392_v22  ;;  %v230_v61 = vrot.slane %v209_v58, %v1678_v49  ;;  %v1457_v12 = vld [vmem:[%s1950_s1 + $0x3ac] ss:$12 sps:$4 sm:$0xff]   ;;  %v1458_v13 = vld [vmem:[%s1950_s1 + $0x170] ss:$12 sps:$4 sm:$0xff]   ;;  %v1455_v14 = vld [vmem:[%s1950_s1 + $0x3a8] ss:$12 sps:$4 sm:$0xff]   ;;  %v1765_v15 = vcombine.high %v1749_v10, %v1749_v10 }
  0x18   :  { %930 = vmatpush1.bf16.msra.mxu1 %v1393_v23  ;;  %890 = vmatprep.subr.bf16.mxu0 %v1394_v24  ;;  %v1459_v16 = vld [vmem:[%s1950_s1 + $0xb0] ss:$12 sps:$4 sm:$0xff]   ;;  %v1462_v17 = vld [vmem:[%s1950_s1 + $0x394] ss:$12 sps:$4 sm:$0xff]   ;;  %v1463_v18 = vld [vmem:[%s1950_s1 + $0x158] ss:$12 sps:$4 sm:$0xff]  }
  0x19   :  { %931 = vmatprep.subr.bf16.mxu1 %v1396_v25  ;;  %v1718_v0 = vcombine.high %v230_v61, %v230_v61  ;;  %910 = vmatprep.mubr.bf16.mxu0 %v230_v61  ;;  %v1460_v19 = vld [vmem:[%s1950_s1 + $0x390] ss:$12 sps:$4 sm:$0xff]   ;;  %v1464_v20 = vld [vmem:[%s1950_s1 + $0x98] ss:$12 sps:$4 sm:$0xff]   ;;  %v1468_v22 = vld [vmem:[%s1950_s1 + $0x140] ss:$12 sps:$4 sm:$0xff]  }
  0x1a   :  { %v1467_v21 = vld [vmem:[%s1950_s1 + $0x37c] ss:$12 sps:$4 sm:$0xff]   ;;  %v1465_v23 = vld [vmem:[%s1950_s1 + $0x378] ss:$12 sps:$4 sm:$0xff]   ;;  %v1520_v24 = vmov 0  }
  0x1b   :  { %891 = vmatpush1.bf16.msra.mxu0 %v1398_v26  ;;  %951 = vmatprep.mubr.bf16.mxu1 %v1718_v0  ;;  %v1469_v25 = vld [vmem:[%s1950_s1 + $0x80] ss:$12 sps:$4 sm:$0xff]   ;;  %v1472_v26 = vld [vmem:[%s1950_s1 + $0x364] ss:$12 sps:$4 sm:$0xff]   ;;  %v1487_v38 = vld [vmem:[%s1950_s1 + $0x31c] ss:$12 sps:$4 sm:$0xff]  }
  0x1c   :  { %932 = vmatpush1.bf16.msra.mxu1 %v1399_v27  ;;  %892 = vmatprep.subr.bf16.mxu0 %v1400_v28  ;;  %v1473_v27 = vld [vmem:[%s1950_s1 + $0x128] ss:$12 sps:$4 sm:$0xff]   ;;  %v1470_v28 = vld [vmem:[%s1950_s1 + $0x360] ss:$12 sps:$4 sm:$0xff]   ;;  %v1480_v36 = vld [vmem:[%s1950_s1 + $0x330] ss:$12 sps:$4 sm:$0xff]  }
  0x1d   :  { %933 = vmatprep.subr.bf16.mxu1 %v1402_v29  ;;  %v1474_v29 = vld [vmem:[%s1950_s1 + $0x68] ss:$12 sps:$4 sm:$0xff]   ;;  %v1484_v37 = vld [vmem:[%s1950_s1 + $0x38] ss:$12 sps:$4 sm:$0xff]   ;;  %v1489_v43 = vld [vmem:[%s1950_s1 + $0x20] ss:$12 sps:$4 sm:$0xff]  }
  0x1e   :  { %v1498_v55 = vld [vmem:[%s1950_s1 + $0x2d8] ss:$12 sps:$4 sm:$0xff]   ;;  %v1501_v58 = vld [vmem:[%s1950_s1 + $0x2c0] ss:$12 sps:$4 sm:$0xff]  }
  0x1f   :  { %893 = vmatpush1.bf16.msra.mxu0 %v1404_v30  ;;  %v1477_v30 = vld [vmem:[%s1950_s1 + $0x34c] ss:$12 sps:$4 sm:$0xff]  }
  0x20   :  { %934 = vmatpush1.bf16.msra.mxu1 %v1405_v31  ;;  %894 = vmatprep.subr.bf16.mxu0 %v1406_v32  ;;  %v1478_v31 = vld [vmem:[%s1950_s1 + $0x110] ss:$12 sps:$4 sm:$0xff]   ;;  %v1475_v32 = vld [vmem:[%s1950_s1 + $0x348] ss:$12 sps:$4 sm:$0xff]  }
  0x21   :  { %935 = vmatprep.subr.bf16.mxu1 %v1408_v33  ;;  %v1479_v33 = vld [vmem:[%s1950_s1 + $0x50] ss:$12 sps:$4 sm:$0xff]  }
  0x23   :  { %895 = vmatpush2.bf16.msra.mxu0 %v1410_v34  ;;  %v1482_v34 = vld [vmem:[%s1950_s1 + $0x334] ss:$12 sps:$4 sm:$0xff]  }
  0x24   :  { %936 = vmatpush2.bf16.msra.mxu1 %v1411_v35  ;;  %896 = vmatprep.subr.bf16.mxu0 %v1412_v39  ;;  %v1483_v35 = vld [vmem:[%s1950_s1 + $0xf8] ss:$12 sps:$4 sm:$0xff]   ;;  %v1488_v39 = vld [vmem:[%s1950_s1 + $0xe0] ss:$12 sps:$4 sm:$0xff]  }
  0x25   :  { %937 = vmatprep.subr.bf16.mxu1 %v1414_v40  ;;  %v1485_v40 = vld [vmem:[%s1950_s1 + $0x318] ss:$12 sps:$4 sm:$0xff]  }
  0x27   :  { %897 = vmatpush2.bf16.msra.mxu0 %v1416_v41  ;;  %v194_v41 = vcombine.high %v1692_v53, %v1692_v53  ;;  %v1497_v53 = vld [vmem:[%s1950_s1 + $0x3b0] ss:$12 sps:$4 sm:$0xff]  }
  0x28   :  { %938 = vmatpush2.bf16.msra.mxu1 %v1417_v44  ;;  %898 = vmatprep.subr.bf16.mxu0 %v1418_v45  ;;  %v1492_v44 = vld [vmem:[%s1950_s1 + $0x304] ss:$12 sps:$4 sm:$0xff]   ;;  %v1493_v45 = vld [vmem:[%s1950_s1 + $0xc8] ss:$12 sps:$4 sm:$0xff]  }
  0x29   :  { %939 = vmatprep.subr.bf16.mxu1 %v1420_v46  ;;  %v1490_v46 = vld [vmem:[%s1950_s1 + $0x300] ss:$12 sps:$4 sm:$0xff]  }
  0x2b   :  { %899 = vmatpush2.bf16.msra.mxu0 %v1422_v47  ;;  %v208_v47 = vrot.slane %v194_v41, %v1678_v49 }
  0x2c   :  { %940 = vmatpush2.bf16.msra.mxu1 %v1423_v48  ;;  %900 = vmatprep.subr.bf16.mxu0 %v1424_v50  ;;  %v1494_v48 = vld [vmem:[%s1950_s1 + $0x8] ss:$12 sps:$4 sm:$0xff]   ;;  %v1495_v50 = vld [vmem:[%s1950_s1 + $0x2f0] ss:$12 sps:$4 sm:$0xff]  }
  0x2d   :  { %941 = vmatprep.subr.bf16.mxu1 %v1426_v51  ;;  %v1863_v51 = vrot.slane %v208_v47, %v1678_v49 }
  0x2f   :  { %901 = vmatpush2.bf16.msra.mxu0 %v1428_v52  ;;  %v1496_v52 = vld [vmem:[%s1950_s1 + $0x230] ss:$12 sps:$4 sm:$0xff]  }
  0x30   :  { %942 = vmatpush2.bf16.msra.mxu1 %v1429_v54  ;;  %902 = vmatprep.subr.bf16.mxu0 %v1430_v56  ;;  %v1521_v54 = vmov 0.0   ;;  %v1499_v56 = vld [vmem:[%s1950_s1 + $0x218] ss:$12 sps:$4 sm:$0xff]  }
  0x31   :  { %943 = vmatprep.subr.bf16.mxu1 %v1432_v57  ;;  %v1500_v57 = vld [vmem:[%s1950_s1 + $0x398] ss:$12 sps:$4 sm:$0xff]  }
  0x33   :  { %903 = vmatpush2.bf16.msra.mxu0 %v1434_v59  ;;  %v1502_v59 = vld [vmem:[%s1950_s1 + $0x200] ss:$12 sps:$4 sm:$0xff]  }
  0x34   :  { %944 = vmatpush2.bf16.msra.mxu1 %v1435_v60  ;;  %904 = vmatprep.subr.bf16.mxu0 %v1436_v62  ;;  %v1503_v60 = vld [vmem:[%s1950_s1 + $0x380] ss:$12 sps:$4 sm:$0xff]   ;;  %v1505_v62 = vld [vmem:[%s1950_s1 + $0x1e8] ss:$12 sps:$4 sm:$0xff]  }
  0x35   :  { %945 = vmatprep.subr.bf16.mxu1 %v1438_v63  ;;  %v1506_v63 = vld [vmem:[%s1950_s1 + $0x368] ss:$12 sps:$4 sm:$0xff]  }
  0x37   :  { %905 = vmatpush2.bf16.msra.mxu0 %v1440_v1  ;;  %v1508_v1 = vld [vmem:[%s1950_s1 + $0x1d0] ss:$12 sps:$4 sm:$0xff]  }
  0x38   :  { %946 = vmatpush2.bf16.msra.mxu1 %v1441_v2  ;;  %906 = vmatprep.subr.bf16.mxu0 %v1442_v3  ;;  %v1509_v2 = vld [vmem:[%s1950_s1 + $0x350] ss:$12 sps:$4 sm:$0xff]   ;;  %v1510_v3 = vld [vmem:[%s1950_s1 + $0x278] ss:$12 sps:$4 sm:$0xff]  }
  0x39   :  { %947 = vmatprep.subr.bf16.mxu1 %v1444_v4  ;;  %v1511_v4 = vld [vmem:[%s1950_s1 + $0x1b8] ss:$12 sps:$4 sm:$0xff]  }
  0x3b   :  { %907 = vmatpush2.bf16.msra.mxu0 %v1446_v5  ;;  %v1512_v5 = vld [vmem:[%s1950_s1 + $0x338] ss:$12 sps:$4 sm:$0xff]  }
  0x3c   :  { %948 = vmatpush2.bf16.msra.mxu1 %v1447_v6  ;;  %908 = vmatprep.subr.bf16.mxu0 %v1448_v7  ;;  %v1513_v6 = vld [vmem:[%s1950_s1 + $0x260] ss:$12 sps:$4 sm:$0xff]  }
  0x3d   :  { %949 = vmatprep.subr.bf16.mxu1 %v1450_v8  ;;  %v1514_v7 = vld [vmem:[%s1950_s1 + $0x1a0] ss:$12 sps:$4 sm:$0xff]  }
  0x3e   :  { %v1515_v8 = vld [vmem:[%s1950_s1 + $0x320] ss:$12 sps:$4 sm:$0xff]  }
  0x3f   :  { %909 = vmatpush2.bf16.msra.mxu0 %v1452_v9  ;;  %v1516_v9 = vld [vmem:[%s1950_s1 + $0x248] ss:$12 sps:$4 sm:$0xff]  }
  0x40   :  { %950 = vmatpush2.bf16.msra.mxu1 %v1453_v11  ;;  %960 = vmatprep.subr.bf16.mxu0 %v1457_v12  ;;  %v1518_v11 = vld [vmem:[%s1950_s1 + $0x308] ss:$12 sps:$4 sm:$0xff]   ;;  %v180_v12 = vsub.s32 0, %v1660_v42 }
  0x41   :  { %1281 = vmatprep.subr.bf16.mxu1 %v1458_v13  ;;  %v176_v13 = vld [vmem:[%s1952_s2] sm:$0x7] }
  0x42   :  { %911 = vmatmul.mubr.bf16.vlgmr.msra.gmra.mxu0 %v1749_v10 }
  0x43   :  { %952 = vmatmul.mubr.bf16.vlgmr.msra.gmra.mxu1 %v1765_v15  ;;  %961 = vmatpush1.bf16.msra.mxu0 %v1455_v14  ;;  %v184_v14 = vsub.s32 1, %v1660_v42 }
  0x44   :  { %1282 = vmatpush3.bf16.msra.mxu1 %v1459_v16  ;;  %962 = vmatprep.subr.bf16.mxu0 %v1462_v17  ;;  %v181_v16 = vrot.slane %v176_v13, %v180_v12 }
  0x45   :  { %1283 = vmatprep.subr.bf16.mxu1 %v1463_v18  ;;  %992 = vmatprep.mubr.bf16.mxu0 %v1520_v24  ;;  %v185_v17 = vrot.slane %v176_v13, %v184_v14 }
  0x46   :  { %1033 = vmatprep.mubr.bf16.mxu1 %v230_v61  ;;  %v1504_v61 = vld [vmem:[%s1950_s1 + $0x2a8] ss:$12 sps:$4 sm:$0xff]  }
  0x47   :  { %963 = vmatpush1.bf16.msra.mxu0 %v1460_v19 }
  0x48   :  { %1284 = vmatpush3.bf16.msra.mxu1 %v1464_v20  ;;  %964 = vmatprep.subr.bf16.mxu0 %v1467_v21 }
  0x49   :  { %1285 = vmatprep.subr.bf16.mxu1 %v1468_v22 }
  0x4b   :  { %965 = vmatpush1.bf16.msra.mxu0 %v1465_v23 }
  0x4c   :  { %1286 = vmatpush3.bf16.msra.mxu1 %v1469_v25  ;;  %966 = vmatprep.subr.bf16.mxu0 %v1472_v26 }
  0x4d   :  { %1287 = vmatprep.subr.bf16.mxu1 %v1473_v27 }
  0x4f   :  { %967 = vmatpush1.bf16.msra.mxu0 %v1470_v28 }
  0x50   :  { %1288 = vmatpush3.bf16.msra.mxu1 %v1474_v29  ;;  %968 = vmatprep.subr.bf16.mxu0 %v1477_v30 }
  0x51   :  { %1289 = vmatprep.subr.bf16.mxu1 %v1478_v31 }
  0x53   :  { %969 = vmatpush1.bf16.msra.mxu0 %v1475_v32 }
  0x54   :  { %1290 = vmatpush3.bf16.msra.mxu1 %v1479_v33  ;;  %970 = vmatprep.subr.bf16.mxu0 %v1482_v34 }
  0x55   :  { %1291 = vmatprep.subr.bf16.mxu1 %v1483_v35 }
  0x57   :  { %971 = vmatpush1.bf16.msra.mxu0 %v1480_v36 }
  0x58   :  { %1292 = vmatpush3.bf16.msra.mxu1 %v1484_v37  ;;  %972 = vmatprep.subr.bf16.mxu0 %v1487_v38 }
  0x59   :  { %1293 = vmatprep.subr.bf16.mxu1 %v1488_v39 }
  0x5b   :  { %973 = vmatpush1.bf16.msra.mxu0 %v1485_v40 }
  0x5c   :  { %1294 = vmatpush3.bf16.msra.mxu1 %v1489_v43  ;;  %974 = vmatprep.subr.bf16.mxu0 %v1492_v44  ;;  %v188_v43 = vsub.s32 2, %v1660_v42 }
  0x5d   :  { %1295 = vmatprep.subr.bf16.mxu1 %v1493_v45 }
  0x5e   :  { %v189_v44 = vrot.slane %v176_v13, %v188_v43 }
  0x5f   :  { %975 = vmatpush1.bf16.msra.mxu0 %v1490_v46 }
  0x60   :  { %1296 = vmatpush3.bf16.msra.mxu1 %v1494_v48  ;;  %1303 = vmatprep.subr.bf16.mxu0 %v1495_v50 }
  0x61   :  { %1334 = vmatprep.subr.bf16.mxu1 %v1521_v54 }
  0x62   :  { %993 = vmatmul.mubr.bf16.vlgmr.msra.gmra.mxu0 %v1863_v51 }
  0x63   :  { %1034 = vmatmul.mubr.bf16.vlgmr.msra.gmra.mxu1 %v1749_v10  ;;  %1304 = vmatpush3.bf16.msra.mxu0 %v1496_v52  ;;  %v1517_v10 = vld [vmem:[%s1950_s1 + $0x188] ss:$12 sps:$4 sm:$0xff]  }
  0x64   :  { %1335 = vmatpush3.bf16.msra.mxu1 %v1497_v53  ;;  %1305 = vmatprep.subr.bf16.mxu0 %v1498_v55 }
  0x65   :  { %1336 = vmatprep.subr.bf16.mxu1 %v1521_v54  ;;  %1073 = vmatprep.mubr.bf16.mxu0 %v1718_v0  ;;  %v1507_v0 = vld [vmem:[%s1950_s1 + $0x290] ss:$12 sps:$4 sm:$0xff]  }
  0x66   :  { %1350 = vmatprep.mubr.msk.bf16.mxu1 %vm1522_vm0, %v1521_v54 }
  0x67   :  { %1306 = vmatpush3.bf16.msra.mxu0 %v1499_v56 }
  0x68   :  { %1337 = vmatpush3.bf16.msra.mxu1 %v1500_v57  ;;  %1307 = vmatprep.subr.bf16.mxu0 %v1501_v58 }
  0x69   :  { %1338 = vmatprep.subr.bf16.mxu1 %v1521_v54 }
  0x6b   :  { %1308 = vmatpush3.bf16.msra.mxu0 %v1502_v59 }
  0x6c   :  { %1339 = vmatpush3.bf16.msra.mxu1 %v1503_v60  ;;  %1309 = vmatprep.subr.bf16.mxu0 %v1504_v61 }
  0x6d   :  { %1340 = vmatprep.subr.bf16.mxu1 %v1521_v54 }
  0x6f   :  { %1310 = vmatpush3.bf16.msra.mxu0 %v1505_v62 }
  0x70   :  { %1341 = vmatpush3.bf16.msra.mxu1 %v1506_v63  ;;  %1311 = vmatprep.subr.bf16.mxu0 %v1507_v0 }
  0x71   :  { %1342 = vmatprep.subr.bf16.mxu1 %v1521_v54 }
  0x73   :  { %1312 = vmatpush3.bf16.msra.mxu0 %v1508_v1 }
  0x74   :  { %1343 = vmatpush3.bf16.msra.mxu1 %v1509_v2  ;;  %1313 = vmatprep.subr.bf16.mxu0 %v1510_v3 }
  0x75   :  { %1344 = vmatprep.subr.bf16.mxu1 %v1521_v54 }
  0x77   :  { %1314 = vmatpush3.bf16.msra.mxu0 %v1511_v4 }
  0x78   :  { %1345 = vmatpush3.bf16.msra.mxu1 %v1512_v5  ;;  %1315 = vmatprep.subr.bf16.mxu0 %v1513_v6 }
  0x79   :  { %1346 = vmatprep.subr.bf16.mxu1 %v1521_v54 }
  0x7b   :  { %1316 = vmatpush3.bf16.msra.mxu0 %v1514_v7 }
  0x7c   :  { %1347 = vmatpush3.bf16.msra.mxu1 %v1515_v8  ;;  %1317 = vmatprep.subr.bf16.mxu0 %v1516_v9 }
  0x7d   :  { %1348 = vmatprep.subr.bf16.mxu1 %v1521_v54 }
  0x7f   :  { %1318 = vmatpush3.bf16.msra.mxu0 %v1517_v10 }
  0x80   :  { %1349 = vmatpush3.bf16.msra.mxu1 %v1518_v11 }
  0x82   :  { %1074 = vmatmul.mubr.bf16.vlgmr.msra.gmra.mxu0 %v1765_v15 }
  0x83   :  { %1351 = vmatmul.mubr.bf16.vlgmr.msra.gmra.mxu1 %v1863_v51 }
 0x102   :  { %v912_v18 = vpop.f32.mrf.mxu0 }
 0x103   :  { %v953_v19 = vpop.f32.mrf.mxu1  ;;  %v913_v20 = vadd.f32 %v912_v18, %v181_v16 }
 0x104   :  { %v914_v21 = vpop.f32.mrf.mxu0 }
 0x105   :  { %v955_v22 = vpop.f32.mrf.mxu1  ;;  %v954_v23 = vadd.f32 %v953_v19, %v913_v20  ;;  %v915_v24 = vadd.f32 %v914_v21, %v185_v17 }
 0x106   :  { %v916_v15 = vpop.f32.mrf.mxu0 }
 0x107   :  { %v957_v25 = vpop.f32.mrf.mxu1  ;;  %v956_v26 = vadd.f32 %v955_v22, %v915_v24 }
 0x108   :  { %v917_v27 = vpop.f32.mrf.mxu0 }
 0x109   :  { %v958_v28 = vpop.f32.mrf.mxu1 }
 0x122   :  { %v994_v29 = vpop.f32.mrf.mxu0 }
 0x123   :  { %v1297_v30 = vpop.f32.mrf.mxu1  ;;  %v995_v31 = vadd.f32 %v994_v29, %v954_v23 }
 0x124   :  { %v996_v32 = vpop.f32.mrf.mxu0 }
 0x125   :  { %v1298_v33 = vpop.f32.mrf.mxu1  ;;  %v997_v34 = vadd.f32 %v996_v32, %v956_v26  ;;  %v1121_v37 = vmax.f32 %v995_v31, 0.0 }
 0x126   :  { %v998_v35 = vpop.f32.mrf.mxu0  ;;  %v1299_v45 = vadd.f32 %v1298_v33, %v1297_v30 }
 0x127   :  { %v1300_v36 = vpop.f32.mrf.mxu1  ;;  %v1122_v38 = vmax.f32 %v997_v34, 0.0 }
 0x128   :  { %v999_v39 = vpop.f32.mrf.mxu0  ;;  %v1036_v51 = vadd.f32 %v1299_v45, %v189_v44 }
 0x129   :  { %v1301_v40 = vpop.f32.mrf.mxu1  ;;  %v1279_v41 = vpack.c.bf16 %v1122_v38, %v1121_v37 }
 0x12b   :  { %v1137_v61 = vrot.slane %v1279_v41, %v1678_v49 }
 0x142   :  { %v1319_v46 = vpop.f32.mrf.mxu0 }
 0x143   :  { %v1115_v47 = vpop.f32.mrf.mxu1 }
 0x144   :  { %v1320_v48 = vpop.f32.mrf.mxu0 }
 0x145   :  { %v1352_v50 = vpop.f32.mrf.mxu1  ;;  %v1321_v52 = vadd.f32 %v1320_v48, %v1319_v46 }
 0x146   :  { %v1322_v53 = vpop.f32.mrf.mxu0 }
 0x147   :  { %v1118_v54 = vpop.f32.mrf.mxu1  ;;  %v1076_v55 = vadd.f32 %v1321_v52, %v1036_v51 }
 0x148   :  { %v1323_v56 = vpop.f32.mrf.mxu0 }
 0x149   :  { %v1353_v57 = vpop.f32.mrf.mxu1  ;;  %v1116_v58 = vadd.f32 %v1115_v47, %v1076_v55 }
 0x14b   :  { %v1123_v59 = vmax.f32 %v1116_v58, 0.0 }
 0x14d   :  { %v1126_v60 = vpack.c.bf16 %v1123_v59, %v1123_v59 }
 0x14f   :  { %v1144_v42 = vrot.slane %v1126_v60, %v1678_v49 }
 0x151   :  { %v1145_v62 = vcombine.low %v1137_v61, %v1144_v42 }
 0x153   :  { %1280 = vst.sshfl [vmem:[%s1953_s3] sm:$0x15 pattern:$0x73625140] %v1145_v62 }

// kernel: forward.39
= control target key start
LH: loop header
LB: loop body
LE: loop exit
PB: predicated region body
PF: predicated region fallthrough
CT: control target
= control target key end

     0   :  { %v327_v35 = vlaneseq  ;;  %v3220_v36 = vmov 1966171168   ;;  %s4232_s1 = inlined_call_operand.vmem [shape: bf16[2432,256], index: 1, kind: input, shape index: {}]   ;;  %s4233_s0 = inlined_call_operand.vmem [shape: bf16[2,2432], index: 0, kind: input, shape index: {}]   ;;  %s4234_s2 = inlined_call_operand.vmem [shape: f32[1,256], index: 2, kind: input, shape index: {}]   ;;  %s4235_s3 = inlined_call_operand.vmem [shape: bf16[2,256], index: 3, kind: input, shape index: {}]   ;;  %s4236_s4 = inlined_call_operand.vmem [shape: bf16[2,256], index: 4, kind: output, shape index: {}]  }
   0x1   :  { %v2762_v0 = vld [vmem:[%s4232_s1 + $0x74] ss:$8 sps:$4 sm:$0xff]   ;;  %v2764_v1 = vld [vmem:[%s4232_s1 + $0x70] ss:$8 sps:$4 sm:$0xff]   ;;  %v2768_v4 = vld [vmem:[%s4232_s1 + $0x64] ss:$8 sps:$4 sm:$0xff]   ;;  %v342_v37 = vunpack.c.l.s4 %v3220_v36 }
   0x2   :  { %2000 = vmatprep.subr.bf16.mxu0 %v2762_v0  ;;  %v2765_v2 = vld [vmem:[%s4232_s1 + $0x174] ss:$8 sps:$4 sm:$0xff]   ;;  %v2767_v3 = vld [vmem:[%s4232_s1 + $0x170] ss:$8 sps:$4 sm:$0xff]   ;;  %v2770_v5 = vld [vmem:[%s4232_s1 + $0x60] ss:$8 sps:$4 sm:$0xff]  }
   0x3   :  { %2001 = vmatpush1.bf16.msra.mxu0 %v2764_v1  ;;  %2041 = vmatprep.subr.bf16.mxu1 %v2765_v2  ;;  %v2771_v6 = vld [vmem:[%s4232_s1 + $0x164] ss:$8 sps:$4 sm:$0xff]   ;;  %v2773_v7 = vld [vmem:[%s4232_s1 + $0x160] ss:$8 sps:$4 sm:$0xff]   ;;  %v2774_v8 = vld [vmem:[%s4232_s1 + $0x54] ss:$8 sps:$4 sm:$0xff]   ;;  %v343_v43 = vunpack.c.0.s8 %v342_v37 }
   0x4   :  { %2042 = vmatpush1.bf16.msra.mxu1 %v2767_v3  ;;  %2002 = vmatprep.subr.bf16.mxu0 %v2768_v4  ;;  %v2776_v9 = vld [vmem:[%s4232_s1 + $0x50] ss:$8 sps:$4 sm:$0xff]   ;;  %v2777_v10 = vld [vmem:[%s4232_s1 + $0x154] ss:$8 sps:$4 sm:$0xff]   ;;  %v2780_v11 = vld [vmem:[%s4232_s1 + $0x44] ss:$8 sps:$4 sm:$0xff]  }
   0x5   :  { %2043 = vmatprep.subr.bf16.mxu1 %v2771_v6  ;;  %v2779_v12 = vld [vmem:[%s4232_s1 + $0x150] ss:$8 sps:$4 sm:$0xff]   ;;  %v2783_v13 = vld [vmem:[%s4232_s1 + $0x144] ss:$8 sps:$4 sm:$0xff]   ;;  %v2782_v14 = vld [vmem:[%s4232_s1 + $0x40] ss:$8 sps:$4 sm:$0xff]  }
   0x6   :  { %v2786_v15 = vld [vmem:[%s4232_s1 + $0x34] ss:$8 sps:$4 sm:$0xff]   ;;  %v2785_v16 = vld [vmem:[%s4232_s1 + $0x140] ss:$8 sps:$4 sm:$0xff]   ;;  %v2788_v18 = vld [vmem:[%s4232_s1 + $0x30] ss:$8 sps:$4 sm:$0xff]  }
   0x7   :  { %2003 = vmatpush1.bf16.msra.mxu0 %v2770_v5  ;;  %v2789_v17 = vld [vmem:[%s4232_s1 + $0x134] ss:$8 sps:$4 sm:$0xff]   ;;  %v2792_v19 = vld [vmem:[%s4232_s1 + $0x24] ss:$8 sps:$4 sm:$0xff]   ;;  %v2791_v20 = vld [vmem:[%s4232_s1 + $0x130] ss:$8 sps:$4 sm:$0xff]  }
   0x8   :  { %2004 = vmatprep.subr.bf16.mxu0 %v2774_v8  ;;  %2044 = vmatpush1.bf16.msra.mxu1 %v2773_v7  ;;  %v2795_v21 = vld [vmem:[%s4232_s1 + $0x124] ss:$8 sps:$4 sm:$0xff]   ;;  %v2794_v22 = vld [vmem:[%s4232_s1 + $0x20] ss:$8 sps:$4 sm:$0xff]   ;;  %v2798_v23 = vld [vmem:[%s4232_s1 + $0x14] ss:$8 sps:$4 sm:$0xff]  }
   0x9   :  { %2045 = vmatprep.subr.bf16.mxu1 %v2777_v10  ;;  %v2797_v24 = vld [vmem:[%s4232_s1 + $0x120] ss:$8 sps:$4 sm:$0xff]   ;;  %v2801_v25 = vld [vmem:[%s4232_s1 + $0x114] ss:$8 sps:$4 sm:$0xff]   ;;  %v2800_v26 = vld [vmem:[%s4232_s1 + $0x10] ss:$8 sps:$4 sm:$0xff]  }
   0xa   :  { %v2804_v27 = vld [vmem:[%s4232_s1 + $0x4] ss:$8 sps:$4 sm:$0xff]   ;;  %v2803_v28 = vld [vmem:[%s4232_s1 + $0x110] ss:$8 sps:$4 sm:$0xff]   ;;  %v2806_v30 = vld [vmem:[%s4232_s1] ss:$8 sps:$4 sm:$0xff]  }
   0xb   :  { %2005 = vmatpush1.bf16.msra.mxu0 %v2776_v9  ;;  %v2807_v29 = vld [vmem:[%s4232_s1 + $0x104] ss:$8 sps:$4 sm:$0xff]   ;;  %v2810_v31 = vld [vmem:[%s4232_s1 + $0xf4] ss:$8 sps:$4 sm:$0xff]   ;;  %v2809_v32 = vld [vmem:[%s4232_s1 + $0x100] ss:$8 sps:$4 sm:$0xff]  }
   0xc   :  { %2006 = vmatprep.subr.bf16.mxu0 %v2780_v11  ;;  %2046 = vmatpush1.bf16.msra.mxu1 %v2779_v12  ;;  %v2813_v33 = vld [vmem:[%s4232_s1 + $0x1f4] ss:$8 sps:$4 sm:$0xff]   ;;  %v2812_v34 = vld [vmem:[%s4232_s1 + $0xf0] ss:$8 sps:$4 sm:$0xff]   ;;  %v2816_v38 = vld [vmem:[%s4232_s1 + $0xe4] ss:$8 sps:$4 sm:$0xff]  }
   0xd   :  { %2047 = vmatprep.subr.bf16.mxu1 %v2783_v13  ;;  %v2815_v39 = vld [vmem:[%s4232_s1 + $0x1f0] ss:$8 sps:$4 sm:$0xff]   ;;  %v2819_v40 = vld [vmem:[%s4232_s1 + $0x1e4] ss:$8 sps:$4 sm:$0xff]   ;;  %v2818_v41 = vld [vmem:[%s4232_s1 + $0xe0] ss:$8 sps:$4 sm:$0xff]  }
   0xe   :  { %v3365_v42 = vshrl.u32 %v327_v35, 7  ;;  %v2822_v44 = vld [vmem:[%s4232_s1 + $0xd4] ss:$8 sps:$4 sm:$0xff]   ;;  %v2821_v45 = vld [vmem:[%s4232_s1 + $0x1e0] ss:$8 sps:$4 sm:$0xff]  }
   0xf   :  { %2007 = vmatpush1.bf16.msra.mxu0 %v2782_v14  ;;  %v2825_v46 = vld [vmem:[%s4232_s1 + $0x1d4] ss:$8 sps:$4 sm:$0xff]   ;;  %v2824_v47 = vld [vmem:[%s4232_s1 + $0xd0] ss:$8 sps:$4 sm:$0xff]   ;;  %v2828_v49 = vld [vmem:[%s4232_s1 + $0xc4] ss:$8 sps:$4 sm:$0xff]  }
  0x10   :  { %2008 = vmatprep.subr.bf16.mxu0 %v2786_v15  ;;  %2048 = vmatpush1.bf16.msra.mxu1 %v2785_v16  ;;  %v3380_v48 = vsub.s32 %v343_v43, %v3365_v42  ;;  %v2827_v50 = vld [vmem:[%s4232_s1 + $0x1d0] ss:$8 sps:$4 sm:$0xff]   ;;  %v2831_v51 = vld [vmem:[%s4232_s1 + $0x1c4] ss:$8 sps:$4 sm:$0xff]   ;;  %v2830_v53 = vld [vmem:[%s4232_s1 + $0xc0] ss:$8 sps:$4 sm:$0xff]  }
  0x11   :  { %2049 = vmatprep.subr.bf16.mxu1 %v2789_v17  ;;  %v18_v52 = vld [vmem:[%s4233_s0] sm:$0xff]  ;;  %v2834_v55 = vld [vmem:[%s4232_s1 + $0xb4] ss:$8 sps:$4 sm:$0xff]   ;;  %v2836_v59 = vld [vmem:[%s4232_s1 + $0xb0] ss:$8 sps:$4 sm:$0xff]  }
  0x12   :  { %v347_v54 = vrot.slane %v18_v52, %v3380_v48  ;;  %v2833_v56 = vld [vmem:[%s4232_s1 + $0x1c0] ss:$8 sps:$4 sm:$0xff]   ;;  %v2837_v58 = vld [vmem:[%s4232_s1 + $0x1b4] ss:$8 sps:$4 sm:$0xff]   ;;  %v2840_v61 = vld [vmem:[%s4232_s1 + $0xa4] ss:$8 sps:$4 sm:$0xff]   ;;  %v340_v63 = vcombine.high %v18_v52, %v18_v52 }
  0x13   :  { %2009 = vmatpush1.bf16.msra.mxu0 %v2788_v18  ;;  %v2839_v62 = vld [vmem:[%s4232_s1 + $0x1b0] ss:$8 sps:$4 sm:$0xff]   ;;  %v2843_v1 = vld [vmem:[%s4232_s1 + $0x1a4] ss:$8 sps:$4 sm:$0xff]   ;;  %v2842_v2 = vld [vmem:[%s4232_s1 + $0xa0] ss:$8 sps:$4 sm:$0xff]  }
  0x14   :  { %2010 = vmatprep.subr.bf16.mxu0 %v2792_v19  ;;  %2050 = vmatpush1.bf16.msra.mxu1 %v2791_v20  ;;  %v355_v57 = vcombine.high %v347_v54, %v347_v54  ;;  %v2846_v3 = vld [vmem:[%s4232_s1 + $0x94] ss:$8 sps:$4 sm:$0xff]   ;;  %v2845_v4 = vld [vmem:[%s4232_s1 + $0x1a0] ss:$8 sps:$4 sm:$0xff]   ;;  %v3430_v5 = vrot.slane %v340_v63, %v3380_v48  ;;  %v2848_v7 = vld [vmem:[%s4232_s1 + $0x90] ss:$8 sps:$4 sm:$0xff]   ;;  %v363_v13 = vrot.slane %v347_v54, %v3380_v48 }
  0x15   :  { %2051 = vmatprep.subr.bf16.mxu1 %v2795_v21  ;;  %v2849_v6 = vld [vmem:[%s4232_s1 + $0x194] ss:$8 sps:$4 sm:$0xff]   ;;  %v2852_v8 = vld [vmem:[%s4232_s1 + $0x84] ss:$8 sps:$4 sm:$0xff]   ;;  %v2851_v9 = vld [vmem:[%s4232_s1 + $0x190] ss:$8 sps:$4 sm:$0xff]  }
  0x16   :  { %v377_v60 = vrot.slane %v355_v57, %v3380_v48  ;;  %v356_v10 = vcombine.high %v3430_v5, %v3430_v5  ;;  %v2855_v11 = vld [vmem:[%s4232_s1 + $0x184] ss:$8 sps:$4 sm:$0xff]   ;;  %v2854_v12 = vld [vmem:[%s4232_s1 + $0x80] ss:$8 sps:$4 sm:$0xff]   ;;  %v2861_v14 = vld [vmem:[%s4232_s1 + $0x274] ss:$8 sps:$4 sm:$0xff]   ;;  %v385_v19 = vcombine.high %v363_v13, %v363_v13 }
  0x17   :  { %2011 = vmatpush1.bf16.msra.mxu0 %v2794_v22  ;;  %v2858_v15 = vld [vmem:[%s4232_s1 + $0x180] ss:$8 sps:$4 sm:$0xff]   ;;  %v2864_v17 = vld [vmem:[%s4232_s1 + $0x374] ss:$8 sps:$4 sm:$0xff]   ;;  %v2859_v18 = vld [vmem:[%s4232_s1 + $0x270] ss:$8 sps:$4 sm:$0xff]  }
  0x18   :  { %2012 = vmatprep.subr.bf16.mxu0 %v2798_v23  ;;  %2052 = vmatpush1.bf16.msra.mxu1 %v2797_v24  ;;  %v387_v0 = vcombine.high %v377_v60, %v377_v60  ;;  %v384_v16 = vrot.slane %v356_v10, %v3380_v48  ;;  %v2867_v20 = vld [vmem:[%s4232_s1 + $0x264] ss:$8 sps:$4 sm:$0xff]   ;;  %v2862_v21 = vld [vmem:[%s4232_s1 + $0x370] ss:$8 sps:$4 sm:$0xff]   ;;  %v2865_v24 = vld [vmem:[%s4232_s1 + $0x260] ss:$8 sps:$4 sm:$0xff]  }
  0x19   :  { %2053 = vmatprep.subr.bf16.mxu1 %v2801_v25  ;;  %2032 = vmatprep.mubr.bf16.mxu0 %v377_v60  ;;  %v2870_v23 = vld [vmem:[%s4232_s1 + $0x364] ss:$8 sps:$4 sm:$0xff]   ;;  %v2873_v25 = vld [vmem:[%s4232_s1 + $0x254] ss:$8 sps:$4 sm:$0xff]   ;;  %v2883_v36 = vld [vmem:[%s4232_s1 + $0x230] ss:$8 sps:$4 sm:$0xff]  }
  0x1a   :  { %2073 = vmatprep.mubr.bf16.mxu1 %v387_v0  ;;  %v388_v22 = vcombine.high %v384_v16, %v384_v16  ;;  %v2888_v35 = vld [vmem:[%s4232_s1 + $0x334] ss:$8 sps:$4 sm:$0xff]   ;;  %v2891_v37 = vld [vmem:[%s4232_s1 + $0x224] ss:$8 sps:$4 sm:$0xff]   ;;  %v2892_v43 = vld [vmem:[%s4232_s1 + $0x320] ss:$8 sps:$4 sm:$0xff]  }
  0x1b   :  { %2013 = vmatpush1.bf16.msra.mxu0 %v2800_v26  ;;  %v2868_v26 = vld [vmem:[%s4232_s1 + $0x360] ss:$8 sps:$4 sm:$0xff]   ;;  %v2907_v54 = vld [vmem:[%s4232_s1 + $0x2f0] ss:$8 sps:$4 sm:$0xff]   ;;  %v2918_v57 = vld [vmem:[%s4232_s1 + $0x3e4] ss:$8 sps:$4 sm:$0xff]  }
  0x1c   :  { %2014 = vmatprep.subr.bf16.mxu0 %v2804_v27  ;;  %2054 = vmatpush1.bf16.msra.mxu1 %v2803_v28  ;;  %v2876_v27 = vld [vmem:[%s4232_s1 + $0x354] ss:$8 sps:$4 sm:$0xff]   ;;  %v2871_v28 = vld [vmem:[%s4232_s1 + $0x250] ss:$8 sps:$4 sm:$0xff]   ;;  %v2904_v52 = vld [vmem:[%s4232_s1 + $0x300] ss:$8 sps:$4 sm:$0xff]  }
  0x1d   :  { %2055 = vmatprep.subr.bf16.mxu1 %v2807_v29  ;;  %v2879_v29 = vld [vmem:[%s4232_s1 + $0x244] ss:$8 sps:$4 sm:$0xff]   ;;  %v2916_v60 = vld [vmem:[%s4232_s1 + $0x3e0] ss:$8 sps:$4 sm:$0xff]   ;;  %v2922_v0 = vld [vmem:[%s4232_s1 + $0x3d0] ss:$8 sps:$4 sm:$0xff]  }
  0x1e   :  { %v2927_v63 = vld [vmem:[%s4232_s1 + $0x2c4] ss:$8 sps:$4 sm:$0xff]  }
  0x1f   :  { %2015 = vmatpush1.bf16.msra.mxu0 %v2806_v30  ;;  %v2874_v30 = vld [vmem:[%s4232_s1 + $0x350] ss:$8 sps:$4 sm:$0xff]   ;;  %v2942_v10 = vld [vmem:[%s4232_s1 + $0x3a4] ss:$8 sps:$4 sm:$0xff]  }
  0x20   :  { %2016 = vmatprep.subr.bf16.mxu0 %v2810_v31  ;;  %2056 = vmatpush1.bf16.msra.mxu1 %v2809_v32  ;;  %v2882_v31 = vld [vmem:[%s4232_s1 + $0x344] ss:$8 sps:$4 sm:$0xff]   ;;  %v2877_v32 = vld [vmem:[%s4232_s1 + $0x240] ss:$8 sps:$4 sm:$0xff]  }
  0x21   :  { %2057 = vmatprep.subr.bf16.mxu1 %v2813_v33  ;;  %v2885_v33 = vld [vmem:[%s4232_s1 + $0x234] ss:$8 sps:$4 sm:$0xff]  }
  0x23   :  { %2017 = vmatpush2.bf16.msra.mxu0 %v2812_v34  ;;  %v2880_v34 = vld [vmem:[%s4232_s1 + $0x340] ss:$8 sps:$4 sm:$0xff]  }
  0x24   :  { %2018 = vmatprep.subr.bf16.mxu0 %v2816_v38  ;;  %2058 = vmatpush2.bf16.msra.mxu1 %v2815_v39  ;;  %v2886_v38 = vld [vmem:[%s4232_s1 + $0x330] ss:$8 sps:$4 sm:$0xff]   ;;  %v2894_v39 = vld [vmem:[%s4232_s1 + $0x324] ss:$8 sps:$4 sm:$0xff]  }
  0x25   :  { %2059 = vmatprep.subr.bf16.mxu1 %v2819_v40  ;;  %v2889_v40 = vld [vmem:[%s4232_s1 + $0x220] ss:$8 sps:$4 sm:$0xff]  }
  0x27   :  { %2019 = vmatpush2.bf16.msra.mxu0 %v2818_v41  ;;  %v2897_v41 = vld [vmem:[%s4232_s1 + $0x214] ss:$8 sps:$4 sm:$0xff]  }
  0x28   :  { %2020 = vmatprep.subr.bf16.mxu0 %v2822_v44  ;;  %2060 = vmatpush2.bf16.msra.mxu1 %v2821_v45  ;;  %v2900_v44 = vld [vmem:[%s4232_s1 + $0x314] ss:$8 sps:$4 sm:$0xff]   ;;  %v2895_v45 = vld [vmem:[%s4232_s1 + $0x210] ss:$8 sps:$4 sm:$0xff]  }
  0x29   :  { %2061 = vmatprep.subr.bf16.mxu1 %v2825_v46  ;;  %v2903_v46 = vld [vmem:[%s4232_s1 + $0x204] ss:$8 sps:$4 sm:$0xff]  }
  0x2b   :  { %2021 = vmatpush2.bf16.msra.mxu0 %v2824_v47  ;;  %v2898_v47 = vld [vmem:[%s4232_s1 + $0x310] ss:$8 sps:$4 sm:$0xff]  }
  0x2c   :  { %2022 = vmatprep.subr.bf16.mxu0 %v2828_v49  ;;  %2062 = vmatpush2.bf16.msra.mxu1 %v2827_v50  ;;  %v2906_v49 = vld [vmem:[%s4232_s1 + $0x304] ss:$8 sps:$4 sm:$0xff]   ;;  %v2901_v50 = vld [vmem:[%s4232_s1 + $0x200] ss:$8 sps:$4 sm:$0xff]  }
  0x2d   :  { %2063 = vmatprep.subr.bf16.mxu1 %v2831_v51  ;;  %v2909_v51 = vld [vmem:[%s4232_s1 + $0x2f4] ss:$8 sps:$4 sm:$0xff]  }
  0x2f   :  { %2023 = vmatpush2.bf16.msra.mxu0 %v2830_v53  ;;  %v2912_v53 = vld [vmem:[%s4232_s1 + $0x3f4] ss:$8 sps:$4 sm:$0xff]  }
  0x30   :  { %2024 = vmatprep.subr.bf16.mxu0 %v2834_v55  ;;  %2064 = vmatpush2.bf16.msra.mxu1 %v2833_v56  ;;  %v2915_v55 = vld [vmem:[%s4232_s1 + $0x2e4] ss:$8 sps:$4 sm:$0xff]   ;;  %v2910_v56 = vld [vmem:[%s4232_s1 + $0x3f0] ss:$8 sps:$4 sm:$0xff]  }
  0x31   :  { %2065 = vmatprep.subr.bf16.mxu1 %v2837_v58  ;;  %v2913_v58 = vld [vmem:[%s4232_s1 + $0x2e0] ss:$8 sps:$4 sm:$0xff]  }
  0x33   :  { %2025 = vmatpush2.bf16.msra.mxu0 %v2836_v59  ;;  %v2921_v59 = vld [vmem:[%s4232_s1 + $0x2d4] ss:$8 sps:$4 sm:$0xff]  }
  0x34   :  { %2026 = vmatprep.subr.bf16.mxu0 %v2840_v61  ;;  %2066 = vmatpush2.bf16.msra.mxu1 %v2839_v62  ;;  %v2924_v61 = vld [vmem:[%s4232_s1 + $0x3d4] ss:$8 sps:$4 sm:$0xff]   ;;  %v2919_v62 = vld [vmem:[%s4232_s1 + $0x2d0] ss:$8 sps:$4 sm:$0xff]  }
  0x35   :  { %2067 = vmatprep.subr.bf16.mxu1 %v2843_v1  ;;  %v2930_v1 = vld [vmem:[%s4232_s1 + $0x3c4] ss:$8 sps:$4 sm:$0xff]  }
  0x37   :  { %2027 = vmatpush2.bf16.msra.mxu0 %v2842_v2  ;;  %v2925_v2 = vld [vmem:[%s4232_s1 + $0x2c0] ss:$8 sps:$4 sm:$0xff]  }
  0x38   :  { %2028 = vmatprep.subr.bf16.mxu0 %v2846_v3  ;;  %2068 = vmatpush2.bf16.msra.mxu1 %v2845_v4  ;;  %v2933_v3 = vld [vmem:[%s4232_s1 + $0x2b4] ss:$8 sps:$4 sm:$0xff]   ;;  %v2928_v4 = vld [vmem:[%s4232_s1 + $0x3c0] ss:$8 sps:$4 sm:$0xff]  }
  0x39   :  { %2069 = vmatprep.subr.bf16.mxu1 %v2849_v6  ;;  %v2936_v6 = vld [vmem:[%s4232_s1 + $0x3b4] ss:$8 sps:$4 sm:$0xff]  }
  0x3b   :  { %2029 = vmatpush2.bf16.msra.mxu0 %v2848_v7  ;;  %v2931_v7 = vld [vmem:[%s4232_s1 + $0x2b0] ss:$8 sps:$4 sm:$0xff]  }
  0x3c   :  { %2030 = vmatprep.subr.bf16.mxu0 %v2852_v8  ;;  %2070 = vmatpush2.bf16.msra.mxu1 %v2851_v9  ;;  %v2939_v8 = vld [vmem:[%s4232_s1 + $0x2a4] ss:$8 sps:$4 sm:$0xff]   ;;  %v2934_v9 = vld [vmem:[%s4232_s1 + $0x3b0] ss:$8 sps:$4 sm:$0xff]  }
  0x3d   :  { %2071 = vmatprep.subr.bf16.mxu1 %v2855_v11  ;;  %v2937_v11 = vld [vmem:[%s4232_s1 + $0x2a0] ss:$8 sps:$4 sm:$0xff]  }
  0x3f   :  { %2031 = vmatpush2.bf16.msra.mxu0 %v2854_v12  ;;  %v2945_v12 = vld [vmem:[%s4232_s1 + $0x294] ss:$8 sps:$4 sm:$0xff]  }
  0x40   :  { %2082 = vmatprep.subr.bf16.mxu0 %v2861_v14  ;;  %2072 = vmatpush2.bf16.msra.mxu1 %v2858_v15  ;;  %v2948_v14 = vld [vmem:[%s4232_s1 + $0x394] ss:$8 sps:$4 sm:$0xff]   ;;  %v2943_v15 = vld [vmem:[%s4232_s1 + $0x290] ss:$8 sps:$4 sm:$0xff]  }
  0x41   :  { %2123 = vmatprep.subr.bf16.mxu1 %v2864_v17  ;;  %v2946_v17 = vld [vmem:[%s4232_s1 + $0x390] ss:$8 sps:$4 sm:$0xff]  }
  0x42   :  { %2033 = vmatmul.mubr.bf16.vlgmr.msra.gmra.mxu0 %v363_v13  ;;  %v2940_v13 = vld [vmem:[%s4232_s1 + $0x3a0] ss:$8 sps:$4 sm:$0xff]  }
  0x43   :  { %2083 = vmatpush1.bf16.msra.mxu0 %v2859_v18  ;;  %2114 = vmatprep.mubr.bf16.mxu0 %v384_v16  ;;  %v2951_v16 = vld [vmem:[%s4232_s1 + $0x284] ss:$8 sps:$4 sm:$0xff]  }
  0x44   :  { %2074 = vmatmul.mubr.bf16.vlgmr.msra.gmra.mxu1 %v385_v19  ;;  %2084 = vmatprep.subr.bf16.mxu0 %v2867_v20  ;;  %v2954_v18 = vld [vmem:[%s4232_s1 + $0x384] ss:$8 sps:$4 sm:$0xff]   ;;  %v2949_v19 = vld [vmem:[%s4232_s1 + $0x280] ss:$8 sps:$4 sm:$0xff]   ;;  %v370_v20 = vrot.slane %v3430_v5, %v3380_v48 }
  0x45   :  { %2124 = vmatpush1.bf16.msra.mxu1 %v2862_v21  ;;  %2155 = vmatprep.mubr.bf16.mxu1 %v388_v22  ;;  %v2957_v21 = vld [vmem:[%s4232_s1 + $0x474] ss:$8 sps:$4 sm:$0xff]   ;;  %v2952_v22 = vld [vmem:[%s4232_s1 + $0x380] ss:$8 sps:$4 sm:$0xff]  }
  0x46   :  { %2125 = vmatprep.subr.bf16.mxu1 %v2870_v23  ;;  %v2960_v23 = vld [vmem:[%s4232_s1 + $0x574] ss:$8 sps:$4 sm:$0xff]   ;;  %v386_v5 = vcombine.high %v370_v20, %v370_v20 }
  0x47   :  { %2085 = vmatpush1.bf16.msra.mxu0 %v2865_v24  ;;  %v2955_v24 = vld [vmem:[%s4232_s1 + $0x470] ss:$8 sps:$4 sm:$0xff]  }
  0x48   :  { %2086 = vmatprep.subr.bf16.mxu0 %v2873_v25  ;;  %v2963_v25 = vld [vmem:[%s4232_s1 + $0x464] ss:$8 sps:$4 sm:$0xff]  }
  0x49   :  { %2126 = vmatpush1.bf16.msra.mxu1 %v2868_v26  ;;  %v3666_v26 = vld [vmem:[%s4233_s0 + $0x8] sm:$0xff] }
  0x4a   :  { %2127 = vmatprep.subr.bf16.mxu1 %v2876_v27  ;;  %v2958_v27 = vld [vmem:[%s4232_s1 + $0x570] ss:$8 sps:$4 sm:$0xff]  }
  0x4b   :  { %2087 = vmatpush1.bf16.msra.mxu0 %v2871_v28  ;;  %v3673_v28 = vrot.slane %v3666_v26, %v3380_v48 }
  0x4c   :  { %2088 = vmatprep.subr.bf16.mxu0 %v2879_v29  ;;  %v2966_v29 = vld [vmem:[%s4232_s1 + $0x564] ss:$8 sps:$4 sm:$0xff]  }
  0x4d   :  { %2128 = vmatpush1.bf16.msra.mxu1 %v2874_v30  ;;  %v2961_v30 = vld [vmem:[%s4232_s1 + $0x460] ss:$8 sps:$4 sm:$0xff]  }
  0x4e   :  { %2129 = vmatprep.subr.bf16.mxu1 %v2882_v31  ;;  %v404_v31 = vcombine.high %v3673_v28, %v3673_v28 }
  0x4f   :  { %2089 = vmatpush1.bf16.msra.mxu0 %v2877_v32  ;;  %v2969_v32 = vld [vmem:[%s4232_s1 + $0x454] ss:$8 sps:$4 sm:$0xff]  }
  0x50   :  { %2090 = vmatprep.subr.bf16.mxu0 %v2885_v33  ;;  %v2964_v33 = vld [vmem:[%s4232_s1 + $0x560] ss:$8 sps:$4 sm:$0xff]  }
  0x51   :  { %2130 = vmatpush1.bf16.msra.mxu1 %v2880_v34  ;;  %v426_v34 = vrot.slane %v404_v31, %v3380_v48  ;;  %v3045_v31 = vld [vmem:[%s4232_s1 + $0x480] ss:$8 sps:$4 sm:$0xff]  }
  0x52   :  { %2131 = vmatprep.subr.bf16.mxu1 %v2888_v35  ;;  %v2972_v35 = vld [vmem:[%s4232_s1 + $0x554] ss:$8 sps:$4 sm:$0xff]  }
  0x53   :  { %2091 = vmatpush1.bf16.msra.mxu0 %v2883_v36  ;;  %v2967_v36 = vld [vmem:[%s4232_s1 + $0x450] ss:$8 sps:$4 sm:$0xff]  }
  0x54   :  { %2092 = vmatprep.subr.bf16.mxu0 %v2891_v37  ;;  %v436_v37 = vcombine.high %v426_v34, %v426_v34 }
  0x55   :  { %2132 = vmatpush1.bf16.msra.mxu1 %v2886_v38  ;;  %v2975_v38 = vld [vmem:[%s4232_s1 + $0x444] ss:$8 sps:$4 sm:$0xff]  }
  0x56   :  { %2133 = vmatprep.subr.bf16.mxu1 %v2894_v39  ;;  %v2970_v39 = vld [vmem:[%s4232_s1 + $0x550] ss:$8 sps:$4 sm:$0xff]  }
  0x57   :  { %2093 = vmatpush1.bf16.msra.mxu0 %v2889_v40  ;;  %v2978_v40 = vld [vmem:[%s4232_s1 + $0x544] ss:$8 sps:$4 sm:$0xff]  }
  0x58   :  { %2094 = vmatprep.subr.bf16.mxu0 %v2897_v41  ;;  %v2973_v41 = vld [vmem:[%s4232_s1 + $0x440] ss:$8 sps:$4 sm:$0xff]  }
  0x59   :  { %2134 = vmatpush1.bf16.msra.mxu1 %v2892_v43  ;;  %v2981_v43 = vld [vmem:[%s4232_s1 + $0x434] ss:$8 sps:$4 sm:$0xff]  }
  0x5a   :  { %2135 = vmatprep.subr.bf16.mxu1 %v2900_v44  ;;  %v2976_v44 = vld [vmem:[%s4232_s1 + $0x540] ss:$8 sps:$4 sm:$0xff]  }
  0x5b   :  { %2095 = vmatpush1.bf16.msra.mxu0 %v2895_v45  ;;  %v2984_v45 = vld [vmem:[%s4232_s1 + $0x534] ss:$8 sps:$4 sm:$0xff]  }
  0x5c   :  { %2096 = vmatprep.subr.bf16.mxu0 %v2903_v46  ;;  %v2979_v46 = vld [vmem:[%s4232_s1 + $0x430] ss:$8 sps:$4 sm:$0xff]  }
  0x5d   :  { %2136 = vmatpush1.bf16.msra.mxu1 %v2898_v47  ;;  %v2987_v47 = vld [vmem:[%s4232_s1 + $0x424] ss:$8 sps:$4 sm:$0xff]  }
  0x5e   :  { %2137 = vmatprep.subr.bf16.mxu1 %v2906_v49  ;;  %v2982_v49 = vld [vmem:[%s4232_s1 + $0x530] ss:$8 sps:$4 sm:$0xff]  }
  0x5f   :  { %2097 = vmatpush1.bf16.msra.mxu0 %v2901_v50  ;;  %v2990_v50 = vld [vmem:[%s4232_s1 + $0x524] ss:$8 sps:$4 sm:$0xff]  }
  0x60   :  { %2098 = vmatprep.subr.bf16.mxu0 %v2909_v51  ;;  %v2985_v51 = vld [vmem:[%s4232_s1 + $0x420] ss:$8 sps:$4 sm:$0xff]  }
  0x61   :  { %2138 = vmatpush1.bf16.msra.mxu1 %v2904_v52  ;;  %v2993_v52 = vld [vmem:[%s4232_s1 + $0x414] ss:$8 sps:$4 sm:$0xff]  }
  0x62   :  { %2139 = vmatprep.subr.bf16.mxu1 %v2912_v53  ;;  %v2988_v53 = vld [vmem:[%s4232_s1 + $0x520] ss:$8 sps:$4 sm:$0xff]  }
  0x63   :  { %2099 = vmatpush2.bf16.msra.mxu0 %v2907_v54  ;;  %v2996_v54 = vld [vmem:[%s4232_s1 + $0x514] ss:$8 sps:$4 sm:$0xff]  }
  0x64   :  { %2100 = vmatprep.subr.bf16.mxu0 %v2915_v55  ;;  %v2991_v55 = vld [vmem:[%s4232_s1 + $0x410] ss:$8 sps:$4 sm:$0xff]  }
  0x65   :  { %2140 = vmatpush2.bf16.msra.mxu1 %v2910_v56  ;;  %v2999_v56 = vld [vmem:[%s4232_s1 + $0x404] ss:$8 sps:$4 sm:$0xff]  }
  0x66   :  { %2141 = vmatprep.subr.bf16.mxu1 %v2918_v57  ;;  %v2994_v57 = vld [vmem:[%s4232_s1 + $0x510] ss:$8 sps:$4 sm:$0xff]  }
  0x67   :  { %2101 = vmatpush2.bf16.msra.mxu0 %v2913_v58  ;;  %v3002_v58 = vld [vmem:[%s4232_s1 + $0x504] ss:$8 sps:$4 sm:$0xff]  }
  0x68   :  { %2102 = vmatprep.subr.bf16.mxu0 %v2921_v59  ;;  %v2997_v59 = vld [vmem:[%s4232_s1 + $0x400] ss:$8 sps:$4 sm:$0xff]  }
  0x69   :  { %2142 = vmatpush2.bf16.msra.mxu1 %v2916_v60  ;;  %v3005_v60 = vld [vmem:[%s4232_s1 + $0x4f4] ss:$8 sps:$4 sm:$0xff]  }
  0x6a   :  { %2143 = vmatprep.subr.bf16.mxu1 %v2924_v61  ;;  %v3000_v61 = vld [vmem:[%s4232_s1 + $0x500] ss:$8 sps:$4 sm:$0xff]  }
  0x6b   :  { %2103 = vmatpush2.bf16.msra.mxu0 %v2919_v62  ;;  %v3008_v62 = vld [vmem:[%s4232_s1 + $0x5f4] ss:$8 sps:$4 sm:$0xff]  }
  0x6c   :  { %2104 = vmatprep.subr.bf16.mxu0 %v2927_v63  ;;  %v3003_v63 = vld [vmem:[%s4232_s1 + $0x4f0] ss:$8 sps:$4 sm:$0xff]  }
  0x6d   :  { %2144 = vmatpush2.bf16.msra.mxu1 %v2922_v0  ;;  %v3011_v0 = vld [vmem:[%s4232_s1 + $0x4e4] ss:$8 sps:$4 sm:$0xff]  }
  0x6e   :  { %2145 = vmatprep.subr.bf16.mxu1 %v2930_v1  ;;  %v3006_v1 = vld [vmem:[%s4232_s1 + $0x5f0] ss:$8 sps:$4 sm:$0xff]  }
  0x6f   :  { %2105 = vmatpush2.bf16.msra.mxu0 %v2925_v2  ;;  %v3014_v2 = vld [vmem:[%s4232_s1 + $0x5e4] ss:$8 sps:$4 sm:$0xff]  }
  0x70   :  { %2106 = vmatprep.subr.bf16.mxu0 %v2933_v3  ;;  %v3009_v3 = vld [vmem:[%s4232_s1 + $0x4e0] ss:$8 sps:$4 sm:$0xff]  }
  0x71   :  { %2146 = vmatpush2.bf16.msra.mxu1 %v2928_v4  ;;  %v3017_v4 = vld [vmem:[%s4232_s1 + $0x4d4] ss:$8 sps:$4 sm:$0xff]  }
  0x72   :  { %2147 = vmatprep.subr.bf16.mxu1 %v2936_v6  ;;  %v3012_v6 = vld [vmem:[%s4232_s1 + $0x5e0] ss:$8 sps:$4 sm:$0xff]  }
  0x73   :  { %2107 = vmatpush2.bf16.msra.mxu0 %v2931_v7  ;;  %v3020_v7 = vld [vmem:[%s4232_s1 + $0x5d4] ss:$8 sps:$4 sm:$0xff]  }
  0x74   :  { %2108 = vmatprep.subr.bf16.mxu0 %v2939_v8  ;;  %v3015_v8 = vld [vmem:[%s4232_s1 + $0x4d0] ss:$8 sps:$4 sm:$0xff]  }
  0x75   :  { %2148 = vmatpush2.bf16.msra.mxu1 %v2934_v9  ;;  %v3023_v9 = vld [vmem:[%s4232_s1 + $0x4c4] ss:$8 sps:$4 sm:$0xff]  }
  0x76   :  { %2149 = vmatprep.subr.bf16.mxu1 %v2942_v10  ;;  %v3018_v10 = vld [vmem:[%s4232_s1 + $0x5d0] ss:$8 sps:$4 sm:$0xff]  }
  0x77   :  { %2109 = vmatpush2.bf16.msra.mxu0 %v2937_v11  ;;  %v3026_v11 = vld [vmem:[%s4232_s1 + $0x5c4] ss:$8 sps:$4 sm:$0xff]  }
  0x78   :  { %2110 = vmatprep.subr.bf16.mxu0 %v2945_v12  ;;  %v3021_v12 = vld [vmem:[%s4232_s1 + $0x4c0] ss:$8 sps:$4 sm:$0xff]  }
  0x79   :  { %2150 = vmatpush2.bf16.msra.mxu1 %v2940_v13  ;;  %v3029_v13 = vld [vmem:[%s4232_s1 + $0x4b4] ss:$8 sps:$4 sm:$0xff]  }
  0x7a   :  { %2151 = vmatprep.subr.bf16.mxu1 %v2948_v14  ;;  %v3024_v14 = vld [vmem:[%s4232_s1 + $0x5c0] ss:$8 sps:$4 sm:$0xff]  }
  0x7b   :  { %2111 = vmatpush2.bf16.msra.mxu0 %v2943_v15  ;;  %v3032_v15 = vld [vmem:[%s4232_s1 + $0x5b4] ss:$8 sps:$4 sm:$0xff]  }
  0x7c   :  { %2112 = vmatprep.subr.bf16.mxu0 %v2951_v16  ;;  %v3027_v16 = vld [vmem:[%s4232_s1 + $0x4b0] ss:$8 sps:$4 sm:$0xff]  }
  0x7d   :  { %2152 = vmatpush2.bf16.msra.mxu1 %v2946_v17  ;;  %v3035_v17 = vld [vmem:[%s4232_s1 + $0x4a4] ss:$8 sps:$4 sm:$0xff]  }
  0x7e   :  { %2153 = vmatprep.subr.bf16.mxu1 %v2954_v18  ;;  %v3030_v18 = vld [vmem:[%s4232_s1 + $0x5b0] ss:$8 sps:$4 sm:$0xff]  }
  0x7f   :  { %2113 = vmatpush2.bf16.msra.mxu0 %v2949_v19  ;;  %v389_v19 = vcombine.high %v3666_v26, %v3666_v26  ;;  %v3047_v26 = vld [vmem:[%s4232_s1 + $0x484] ss:$8 sps:$4 sm:$0xff]  }
  0x80   :  { %2164 = vmatprep.subr.bf16.mxu0 %v2957_v21  ;;  %v3033_v21 = vld [vmem:[%s4232_s1 + $0x4a0] ss:$8 sps:$4 sm:$0xff]  }
  0x81   :  { %2154 = vmatpush2.bf16.msra.mxu1 %v2952_v22  ;;  %v3041_v22 = vld [vmem:[%s4232_s1 + $0x494] ss:$8 sps:$4 sm:$0xff]  }
  0x82   :  { %2115 = vmatmul.mubr.bf16.vlgmr.msra.gmra.mxu0 %v370_v20  ;;  %2205 = vmatprep.subr.bf16.mxu1 %v2960_v23  ;;  %v3038_v20 = vld [vmem:[%s4232_s1 + $0x5a4] ss:$8 sps:$4 sm:$0xff]   ;;  %v3036_v23 = vld [vmem:[%s4232_s1 + $0x5a0] ss:$8 sps:$4 sm:$0xff]  }
  0x83   :  { %2165 = vmatpush1.bf16.msra.mxu0 %v2955_v24  ;;  %2196 = vmatprep.mubr.bf16.mxu0 %v426_v34  ;;  %v3837_v24 = vrot.slane %v389_v19, %v3380_v48  ;;  %v3048_v34 = vld [vmem:[%s4232_s1 + $0x580] ss:$8 sps:$4 sm:$0xff]   ;;  %v3114_v19 = vld [vmem:[%s4232_s1 + $0x7d0] ss:$8 sps:$4 sm:$0xff]  }
  0x84   :  { %2156 = vmatmul.mubr.bf16.vlgmr.msra.gmra.mxu1 %v386_v5  ;;  %2166 = vmatprep.subr.bf16.mxu0 %v2963_v25  ;;  %v3044_v5 = vld [vmem:[%s4232_s1 + $0x594] ss:$8 sps:$4 sm:$0xff]   ;;  %v3039_v25 = vld [vmem:[%s4232_s1 + $0x490] ss:$8 sps:$4 sm:$0xff]  }
  0x85   :  { %2206 = vmatpush1.bf16.msra.mxu1 %v2958_v27  ;;  %2237 = vmatprep.mubr.bf16.mxu1 %v436_v37  ;;  %v3042_v27 = vld [vmem:[%s4232_s1 + $0x590] ss:$8 sps:$4 sm:$0xff]  }
  0x86   :  { %2207 = vmatprep.subr.bf16.mxu1 %v2966_v29  ;;  %v405_v29 = vcombine.high %v3837_v24, %v3837_v24 }
  0x87   :  { %2167 = vmatpush1.bf16.msra.mxu0 %v2961_v30  ;;  %v3050_v30 = vld [vmem:[%s4232_s1 + $0x584] ss:$8 sps:$4 sm:$0xff]  }
  0x88   :  { %2168 = vmatprep.subr.bf16.mxu0 %v2969_v32  ;;  %v412_v32 = vrot.slane %v3673_v28, %v3380_v48  ;;  %v3051_v28 = vld [vmem:[%s4232_s1 + $0x670] ss:$8 sps:$4 sm:$0xff]  }
  0x89   :  { %2208 = vmatpush1.bf16.msra.mxu1 %v2964_v33  ;;  %v3053_v33 = vld [vmem:[%s4232_s1 + $0x674] ss:$8 sps:$4 sm:$0xff]  }
  0x8a   :  { %2209 = vmatprep.subr.bf16.mxu1 %v2972_v35  ;;  %v433_v35 = vrot.slane %v405_v29, %v3380_v48  ;;  %v434_v37 = vcombine.high %v412_v32, %v412_v32  ;;  %v3134_v29 = vld [vmem:[%s4232_s1 + $0x7a4] ss:$8 sps:$4 sm:$0xff]  }
  0x8b   :  { %2169 = vmatpush1.bf16.msra.mxu0 %v2967_v36  ;;  %v3056_v36 = vld [vmem:[%s4232_s1 + $0x774] ss:$8 sps:$4 sm:$0xff]  }
  0x8c   :  { %2170 = vmatprep.subr.bf16.mxu0 %v2975_v38  ;;  %v3059_v38 = vld [vmem:[%s4232_s1 + $0x664] ss:$8 sps:$4 sm:$0xff]  }
  0x8d   :  { %2210 = vmatpush1.bf16.msra.mxu1 %v2970_v39  ;;  %v3054_v39 = vld [vmem:[%s4232_s1 + $0x770] ss:$8 sps:$4 sm:$0xff]  }
  0x8e   :  { %2211 = vmatprep.subr.bf16.mxu1 %v2978_v40  ;;  %v437_v40 = vcombine.high %v433_v35, %v433_v35 }
  0x8f   :  { %2171 = vmatpush1.bf16.msra.mxu0 %v2973_v41  ;;  %v3062_v41 = vld [vmem:[%s4232_s1 + $0x764] ss:$8 sps:$4 sm:$0xff]  }
  0x90   :  { %2172 = vmatprep.subr.bf16.mxu0 %v2981_v43  ;;  %v3057_v43 = vld [vmem:[%s4232_s1 + $0x660] ss:$8 sps:$4 sm:$0xff]  }
  0x91   :  { %2212 = vmatpush1.bf16.msra.mxu1 %v2976_v44  ;;  %v3065_v44 = vld [vmem:[%s4232_s1 + $0x654] ss:$8 sps:$4 sm:$0xff]  }
  0x92   :  { %2213 = vmatprep.subr.bf16.mxu1 %v2984_v45  ;;  %v3060_v45 = vld [vmem:[%s4232_s1 + $0x760] ss:$8 sps:$4 sm:$0xff]  }
  0x93   :  { %2173 = vmatpush1.bf16.msra.mxu0 %v2979_v46  ;;  %v3068_v46 = vld [vmem:[%s4232_s1 + $0x754] ss:$8 sps:$4 sm:$0xff]  }
  0x94   :  { %2174 = vmatprep.subr.bf16.mxu0 %v2987_v47  ;;  %v3063_v47 = vld [vmem:[%s4232_s1 + $0x650] ss:$8 sps:$4 sm:$0xff]  }
  0x95   :  { %2214 = vmatpush1.bf16.msra.mxu1 %v2982_v49  ;;  %v3071_v49 = vld [vmem:[%s4232_s1 + $0x644] ss:$8 sps:$4 sm:$0xff]  }
  0x96   :  { %2215 = vmatprep.subr.bf16.mxu1 %v2990_v50  ;;  %v3066_v50 = vld [vmem:[%s4232_s1 + $0x750] ss:$8 sps:$4 sm:$0xff]  }
  0x97   :  { %2175 = vmatpush1.bf16.msra.mxu0 %v2985_v51  ;;  %v3074_v51 = vld [vmem:[%s4232_s1 + $0x744] ss:$8 sps:$4 sm:$0xff]  }
  0x98   :  { %2176 = vmatprep.subr.bf16.mxu0 %v2993_v52  ;;  %v3069_v52 = vld [vmem:[%s4232_s1 + $0x640] ss:$8 sps:$4 sm:$0xff]  }
  0x99   :  { %2216 = vmatpush1.bf16.msra.mxu1 %v2988_v53  ;;  %v3077_v53 = vld [vmem:[%s4232_s1 + $0x634] ss:$8 sps:$4 sm:$0xff]  }
  0x9a   :  { %2217 = vmatprep.subr.bf16.mxu1 %v2996_v54  ;;  %v3072_v54 = vld [vmem:[%s4232_s1 + $0x740] ss:$8 sps:$4 sm:$0xff]  }
  0x9b   :  { %2177 = vmatpush1.bf16.msra.mxu0 %v2991_v55  ;;  %v3080_v55 = vld [vmem:[%s4232_s1 + $0x734] ss:$8 sps:$4 sm:$0xff]  }
  0x9c   :  { %2178 = vmatprep.subr.bf16.mxu0 %v2999_v56  ;;  %v3075_v56 = vld [vmem:[%s4232_s1 + $0x630] ss:$8 sps:$4 sm:$0xff]  }
  0x9d   :  { %2218 = vmatpush1.bf16.msra.mxu1 %v2994_v57  ;;  %v3083_v57 = vld [vmem:[%s4232_s1 + $0x624] ss:$8 sps:$4 sm:$0xff]  }
  0x9e   :  { %2219 = vmatprep.subr.bf16.mxu1 %v3002_v58  ;;  %v3078_v58 = vld [vmem:[%s4232_s1 + $0x730] ss:$8 sps:$4 sm:$0xff]  }
  0x9f   :  { %2179 = vmatpush1.bf16.msra.mxu0 %v2997_v59  ;;  %v3086_v59 = vld [vmem:[%s4232_s1 + $0x724] ss:$8 sps:$4 sm:$0xff]  }
  0xa0   :  { %2180 = vmatprep.subr.bf16.mxu0 %v3005_v60  ;;  %v3081_v60 = vld [vmem:[%s4232_s1 + $0x620] ss:$8 sps:$4 sm:$0xff]  }
  0xa1   :  { %2220 = vmatpush1.bf16.msra.mxu1 %v3000_v61  ;;  %v3089_v61 = vld [vmem:[%s4232_s1 + $0x614] ss:$8 sps:$4 sm:$0xff]  }
  0xa2   :  { %2221 = vmatprep.subr.bf16.mxu1 %v3008_v62  ;;  %v3084_v62 = vld [vmem:[%s4232_s1 + $0x720] ss:$8 sps:$4 sm:$0xff]  }
  0xa3   :  { %2181 = vmatpush2.bf16.msra.mxu0 %v3003_v63  ;;  %v3092_v63 = vld [vmem:[%s4232_s1 + $0x714] ss:$8 sps:$4 sm:$0xff]  }
  0xa4   :  { %2182 = vmatprep.subr.bf16.mxu0 %v3011_v0  ;;  %v3087_v0 = vld [vmem:[%s4232_s1 + $0x610] ss:$8 sps:$4 sm:$0xff]  }
  0xa5   :  { %2222 = vmatpush2.bf16.msra.mxu1 %v3006_v1  ;;  %v3095_v1 = vld [vmem:[%s4232_s1 + $0x604] ss:$8 sps:$4 sm:$0xff]  }
  0xa6   :  { %2223 = vmatprep.subr.bf16.mxu1 %v3014_v2  ;;  %v3090_v2 = vld [vmem:[%s4232_s1 + $0x710] ss:$8 sps:$4 sm:$0xff]  }
  0xa7   :  { %2183 = vmatpush2.bf16.msra.mxu0 %v3009_v3  ;;  %v3098_v3 = vld [vmem:[%s4232_s1 + $0x704] ss:$8 sps:$4 sm:$0xff]  }
  0xa8   :  { %2184 = vmatprep.subr.bf16.mxu0 %v3017_v4  ;;  %v3093_v4 = vld [vmem:[%s4232_s1 + $0x600] ss:$8 sps:$4 sm:$0xff]  }
  0xa9   :  { %2224 = vmatpush2.bf16.msra.mxu1 %v3012_v6  ;;  %v3101_v6 = vld [vmem:[%s4232_s1 + $0x6f4] ss:$8 sps:$4 sm:$0xff]  }
  0xaa   :  { %2225 = vmatprep.subr.bf16.mxu1 %v3020_v7  ;;  %v3096_v7 = vld [vmem:[%s4232_s1 + $0x700] ss:$8 sps:$4 sm:$0xff]  }
  0xab   :  { %2185 = vmatpush2.bf16.msra.mxu0 %v3015_v8  ;;  %v3104_v8 = vld [vmem:[%s4232_s1 + $0x7f4] ss:$8 sps:$4 sm:$0xff]  }
  0xac   :  { %2186 = vmatprep.subr.bf16.mxu0 %v3023_v9  ;;  %v3099_v9 = vld [vmem:[%s4232_s1 + $0x6f0] ss:$8 sps:$4 sm:$0xff]  }
  0xad   :  { %2226 = vmatpush2.bf16.msra.mxu1 %v3018_v10  ;;  %v3107_v10 = vld [vmem:[%s4232_s1 + $0x6e4] ss:$8 sps:$4 sm:$0xff]  }
  0xae   :  { %2227 = vmatprep.subr.bf16.mxu1 %v3026_v11  ;;  %v3102_v11 = vld [vmem:[%s4232_s1 + $0x7f0] ss:$8 sps:$4 sm:$0xff]  }
  0xaf   :  { %2187 = vmatpush2.bf16.msra.mxu0 %v3021_v12  ;;  %v3110_v12 = vld [vmem:[%s4232_s1 + $0x7e4] ss:$8 sps:$4 sm:$0xff]  }
  0xb0   :  { %2188 = vmatprep.subr.bf16.mxu0 %v3029_v13  ;;  %v3105_v13 = vld [vmem:[%s4232_s1 + $0x6e0] ss:$8 sps:$4 sm:$0xff]  }
  0xb1   :  { %2228 = vmatpush2.bf16.msra.mxu1 %v3024_v14  ;;  %v3113_v14 = vld [vmem:[%s4232_s1 + $0x6d4] ss:$8 sps:$4 sm:$0xff]  }
  0xb2   :  { %2229 = vmatprep.subr.bf16.mxu1 %v3032_v15  ;;  %v3108_v15 = vld [vmem:[%s4232_s1 + $0x7e0] ss:$8 sps:$4 sm:$0xff]  }
  0xb3   :  { %2189 = vmatpush2.bf16.msra.mxu0 %v3027_v16  ;;  %v3116_v16 = vld [vmem:[%s4232_s1 + $0x7d4] ss:$8 sps:$4 sm:$0xff]  }
  0xb4   :  { %2190 = vmatprep.subr.bf16.mxu0 %v3035_v17  ;;  %v3111_v17 = vld [vmem:[%s4232_s1 + $0x6d0] ss:$8 sps:$4 sm:$0xff]  }
  0xb5   :  { %2230 = vmatpush2.bf16.msra.mxu1 %v3030_v18  ;;  %v3119_v18 = vld [vmem:[%s4232_s1 + $0x6c4] ss:$8 sps:$4 sm:$0xff]  }
  0xb6   :  { %2231 = vmatprep.subr.bf16.mxu1 %v3038_v20  ;;  %v3122_v20 = vld [vmem:[%s4232_s1 + $0x7c4] ss:$8 sps:$4 sm:$0xff]  }
  0xb7   :  { %2191 = vmatpush2.bf16.msra.mxu0 %v3033_v21  ;;  %v3117_v21 = vld [vmem:[%s4232_s1 + $0x6c0] ss:$8 sps:$4 sm:$0xff]  }
  0xb8   :  { %2192 = vmatprep.subr.bf16.mxu0 %v3041_v22  ;;  %v3125_v22 = vld [vmem:[%s4232_s1 + $0x6b4] ss:$8 sps:$4 sm:$0xff]  }
  0xb9   :  { %2232 = vmatpush2.bf16.msra.mxu1 %v3036_v23  ;;  %v3120_v23 = vld [vmem:[%s4232_s1 + $0x7c0] ss:$8 sps:$4 sm:$0xff]  }
  0xba   :  { %2233 = vmatprep.subr.bf16.mxu1 %v3044_v5  ;;  %v3128_v5 = vld [vmem:[%s4232_s1 + $0x7b4] ss:$8 sps:$4 sm:$0xff]  }
  0xbb   :  { %2193 = vmatpush2.bf16.msra.mxu0 %v3039_v25  ;;  %v3123_v25 = vld [vmem:[%s4232_s1 + $0x6b0] ss:$8 sps:$4 sm:$0xff]  }
  0xbc   :  { %2194 = vmatprep.subr.bf16.mxu0 %v3047_v26  ;;  %v3131_v26 = vld [vmem:[%s4232_s1 + $0x6a4] ss:$8 sps:$4 sm:$0xff]  }
  0xbd   :  { %2234 = vmatpush2.bf16.msra.mxu1 %v3042_v27  ;;  %v3126_v27 = vld [vmem:[%s4232_s1 + $0x7b0] ss:$8 sps:$4 sm:$0xff]  }
  0xbe   :  { %2235 = vmatprep.subr.bf16.mxu1 %v3050_v30  ;;  %v3129_v30 = vld [vmem:[%s4232_s1 + $0x6a0] ss:$8 sps:$4 sm:$0xff]  }
  0xbf   :  { %2195 = vmatpush2.bf16.msra.mxu0 %v3045_v31  ;;  %v3137_v31 = vld [vmem:[%s4232_s1 + $0x694] ss:$8 sps:$4 sm:$0xff]  }
  0xc0   :  { %2246 = vmatprep.subr.bf16.mxu0 %v3053_v33  ;;  %v3140_v33 = vld [vmem:[%s4232_s1 + $0x794] ss:$8 sps:$4 sm:$0xff]  }
  0xc1   :  { %2236 = vmatpush2.bf16.msra.mxu1 %v3048_v34  ;;  %v3135_v34 = vld [vmem:[%s4232_s1 + $0x690] ss:$8 sps:$4 sm:$0xff]  }
  0xc2   :  { %2197 = vmatmul.mubr.bf16.vlgmr.msra.gmra.mxu0 %v412_v32  ;;  %2287 = vmatprep.subr.bf16.mxu1 %v3056_v36  ;;  %v3132_v32 = vld [vmem:[%s4232_s1 + $0x7a0] ss:$8 sps:$4 sm:$0xff]   ;;  %v3138_v36 = vld [vmem:[%s4232_s1 + $0x790] ss:$8 sps:$4 sm:$0xff]  }
  0xc3   :  { %2247 = vmatpush1.bf16.msra.mxu0 %v3051_v28  ;;  %2278 = vmatprep.mubr.bf16.mxu0 %v433_v35  ;;  %v3143_v35 = vld [vmem:[%s4232_s1 + $0x684] ss:$8 sps:$4 sm:$0xff]  }
  0xc4   :  { %2238 = vmatmul.mubr.bf16.vlgmr.msra.gmra.mxu1 %v434_v37  ;;  %2248 = vmatprep.subr.bf16.mxu0 %v3059_v38  ;;  %v3146_v28 = vld [vmem:[%s4232_s1 + $0x784] ss:$8 sps:$4 sm:$0xff]   ;;  %v4054_v37 = vld.sshfl [vmem:[%s4233_s0 + $0x10] sm:$0x13 pattern:$0x75316420] }
  0xc5   :  { %2288 = vmatpush1.bf16.msra.mxu1 %v3054_v39  ;;  %2319 = vmatprep.mubr.bf16.mxu1 %v437_v40  ;;  %v3141_v38 = vld [vmem:[%s4232_s1 + $0x680] ss:$8 sps:$4 sm:$0xff]   ;;  %v329_v39 = vsub.s32 0, %v3365_v42  ;;  %v445_v40 = vcombine.high %v4054_v37, %v4054_v37 }
  0xc6   :  { %2289 = vmatprep.subr.bf16.mxu1 %v3062_v41  ;;  %v325_v41 = vld [vmem:[%s4234_s2] sm:$0x3] }
  0xc7   :  { %2249 = vmatpush1.bf16.msra.mxu0 %v3057_v43  ;;  %v419_v43 = vrot.slane %v3837_v24, %v3380_v48  ;;  %v3148_v24 = vld [vmem:[%s4232_s1 + $0x870] ss:$8 sps:$4 sm:$0xff]  }
  0xc8   :  { %2250 = vmatprep.subr.bf16.mxu0 %v3065_v44  ;;  %v3150_v44 = vld [vmem:[%s4232_s1 + $0x874] ss:$8 sps:$4 sm:$0xff]  }
  0xc9   :  { %2290 = vmatpush1.bf16.msra.mxu1 %v3060_v45  ;;  %v3144_v45 = vld [vmem:[%s4232_s1 + $0x780] ss:$8 sps:$4 sm:$0xff]  }
  0xca   :  { %2291 = vmatprep.subr.bf16.mxu1 %v3068_v46  ;;  %v333_v46 = vsub.s32 1, %v3365_v42 }
  0xcb   :  { %2251 = vmatpush1.bf16.msra.mxu0 %v3063_v47  ;;  %v3174_v47 = vld [vmem:[%s4232_s1 + $0x974] ss:$8 sps:$4 sm:$0xff]  }
  0xcc   :  { %2252 = vmatprep.subr.bf16.mxu0 %v3071_v49  ;;  %v330_v49 = vrot.slane %v325_v41, %v329_v39  ;;  %v3187_v39 = vld [vmem:[%s4232_s1 + $0x8d0] ss:$8 sps:$4 sm:$0xff]  }
  0xcd   :  { %2292 = vmatpush1.bf16.msra.mxu1 %v3066_v50  ;;  %v459_v50 = vrot.slane %v445_v40, %v3380_v48  ;;  %v3195_v40 = vld [vmem:[%s4232_s1 + $0x8c4] ss:$8 sps:$4 sm:$0xff]  }
  0xce   :  { %2293 = vmatprep.subr.bf16.mxu1 %v3074_v51  ;;  %v435_v51 = vcombine.high %v419_v43, %v419_v43 }
  0xcf   :  { %2253 = vmatpush1.bf16.msra.mxu0 %v3069_v52  ;;  %v3153_v52 = vld [vmem:[%s4232_s1 + $0x864] ss:$8 sps:$4 sm:$0xff]  }
  0xd0   :  { %2254 = vmatprep.subr.bf16.mxu0 %v3077_v53  ;;  %v334_v53 = vrot.slane %v325_v41, %v333_v46  ;;  %v3193_v41 = vld [vmem:[%s4232_s1 + $0x8c0] ss:$8 sps:$4 sm:$0xff]  }
  0xd1   :  { %2294 = vmatpush1.bf16.msra.mxu1 %v3072_v54  ;;  %v3172_v54 = vld [vmem:[%s4232_s1 + $0x970] ss:$8 sps:$4 sm:$0xff]   ;;  %v3205_v46 = vld [vmem:[%s4232_s1 + $0x8a0] ss:$8 sps:$4 sm:$0xff]  }
  0xd2   :  { %2295 = vmatprep.subr.bf16.mxu1 %v3080_v55 }
  0xd3   :  { %2255 = vmatpush1.bf16.msra.mxu0 %v3075_v56  ;;  %v3180_v56 = vld [vmem:[%s4232_s1 + $0x964] ss:$8 sps:$4 sm:$0xff]  }
  0xd4   :  { %2256 = vmatprep.subr.bf16.mxu0 %v3083_v57 }
  0xd5   :  { %2296 = vmatpush1.bf16.msra.mxu1 %v3078_v58  ;;  %v3151_v58 = vld [vmem:[%s4232_s1 + $0x860] ss:$8 sps:$4 sm:$0xff]  }
  0xd6   :  { %2297 = vmatprep.subr.bf16.mxu1 %v3086_v59 }
  0xd7   :  { %2257 = vmatpush1.bf16.msra.mxu0 %v3081_v60 }
  0xd8   :  { %2258 = vmatprep.subr.bf16.mxu0 %v3089_v61  ;;  %v3156_v61 = vld [vmem:[%s4232_s1 + $0x854] ss:$8 sps:$4 sm:$0xff]  }
  0xd9   :  { %2298 = vmatpush1.bf16.msra.mxu1 %v3084_v62 }
  0xda   :  { %2299 = vmatprep.subr.bf16.mxu1 %v3092_v63 }
  0xdb   :  { %2259 = vmatpush1.bf16.msra.mxu0 %v3087_v0  ;;  %v3178_v0 = vld [vmem:[%s4232_s1 + $0x960] ss:$8 sps:$4 sm:$0xff]  }
  0xdc   :  { %2260 = vmatprep.subr.bf16.mxu0 %v3095_v1  ;;  %v3221_v1 = vmov 0  }
  0xdd   :  { %2300 = vmatpush1.bf16.msra.mxu1 %v3090_v2 }
  0xde   :  { %2301 = vmatprep.subr.bf16.mxu1 %v3098_v3 }
  0xdf   :  { %2261 = vmatpush1.bf16.msra.mxu0 %v3093_v4  ;;  %v3186_v4 = vld [vmem:[%s4232_s1 + $0x954] ss:$8 sps:$4 sm:$0xff]  }
  0xe0   :  { %2262 = vmatprep.subr.bf16.mxu0 %v3101_v6 }
  0xe1   :  { %2302 = vmatpush1.bf16.msra.mxu1 %v3096_v7  ;;  %v3154_v7 = vld [vmem:[%s4232_s1 + $0x850] ss:$8 sps:$4 sm:$0xff]  }
  0xe2   :  { %2303 = vmatprep.subr.bf16.mxu1 %v3104_v8 }
  0xe3   :  { %2263 = vmatpush2.bf16.msra.mxu0 %v3099_v9  ;;  %v3159_v9 = vld [vmem:[%s4232_s1 + $0x844] ss:$8 sps:$4 sm:$0xff]  }
  0xe4   :  { %2264 = vmatprep.subr.bf16.mxu0 %v3107_v10 }
  0xe5   :  { %2304 = vmatpush2.bf16.msra.mxu1 %v3102_v11  ;;  %v3184_v11 = vld [vmem:[%s4232_s1 + $0x950] ss:$8 sps:$4 sm:$0xff]  }
  0xe6   :  { %2305 = vmatprep.subr.bf16.mxu1 %v3110_v12 }
  0xe7   :  { %2265 = vmatpush2.bf16.msra.mxu0 %v3105_v13  ;;  %v3192_v13 = vld [vmem:[%s4232_s1 + $0x944] ss:$8 sps:$4 sm:$0xff]  }
  0xe8   :  { %2266 = vmatprep.subr.bf16.mxu0 %v3113_v14  ;;  %v3157_v14 = vld [vmem:[%s4232_s1 + $0x840] ss:$8 sps:$4 sm:$0xff]  }
  0xe9   :  { %2306 = vmatpush2.bf16.msra.mxu1 %v3108_v15  ;;  %v3162_v15 = vld [vmem:[%s4232_s1 + $0x834] ss:$8 sps:$4 sm:$0xff]  }
  0xea   :  { %2307 = vmatprep.subr.bf16.mxu1 %v3116_v16  ;;  %v3190_v16 = vld [vmem:[%s4232_s1 + $0x940] ss:$8 sps:$4 sm:$0xff]  }
  0xeb   :  { %2267 = vmatpush2.bf16.msra.mxu0 %v3111_v17  ;;  %v3198_v17 = vld [vmem:[%s4232_s1 + $0x934] ss:$8 sps:$4 sm:$0xff]  }
  0xec   :  { %2268 = vmatprep.subr.bf16.mxu0 %v3119_v18  ;;  %v3160_v18 = vld [vmem:[%s4232_s1 + $0x830] ss:$8 sps:$4 sm:$0xff]  }
  0xed   :  { %2308 = vmatpush2.bf16.msra.mxu1 %v3114_v19  ;;  %v3165_v19 = vld [vmem:[%s4232_s1 + $0x824] ss:$8 sps:$4 sm:$0xff]  }
  0xee   :  { %2309 = vmatprep.subr.bf16.mxu1 %v3122_v20  ;;  %v3196_v20 = vld [vmem:[%s4232_s1 + $0x930] ss:$8 sps:$4 sm:$0xff]  }
  0xef   :  { %2269 = vmatpush2.bf16.msra.mxu0 %v3117_v21  ;;  %v3204_v21 = vld [vmem:[%s4232_s1 + $0x924] ss:$8 sps:$4 sm:$0xff]  }
  0xf0   :  { %2270 = vmatprep.subr.bf16.mxu0 %v3125_v22  ;;  %v3163_v22 = vld [vmem:[%s4232_s1 + $0x820] ss:$8 sps:$4 sm:$0xff]  }
  0xf1   :  { %2310 = vmatpush2.bf16.msra.mxu1 %v3120_v23  ;;  %v3168_v23 = vld [vmem:[%s4232_s1 + $0x814] ss:$8 sps:$4 sm:$0xff]  }
  0xf2   :  { %2311 = vmatprep.subr.bf16.mxu1 %v3128_v5  ;;  %v3202_v5 = vld [vmem:[%s4232_s1 + $0x920] ss:$8 sps:$4 sm:$0xff]  }
  0xf3   :  { %2271 = vmatpush2.bf16.msra.mxu0 %v3123_v25  ;;  %v3210_v25 = vld [vmem:[%s4232_s1 + $0x914] ss:$8 sps:$4 sm:$0xff]  }
  0xf4   :  { %2272 = vmatprep.subr.bf16.mxu0 %v3131_v26  ;;  %v3166_v26 = vld [vmem:[%s4232_s1 + $0x810] ss:$8 sps:$4 sm:$0xff]  }
  0xf5   :  { %2312 = vmatpush2.bf16.msra.mxu1 %v3126_v27  ;;  %v3171_v27 = vld [vmem:[%s4232_s1 + $0x804] ss:$8 sps:$4 sm:$0xff]  }
  0xf6   :  { %2313 = vmatprep.subr.bf16.mxu1 %v3134_v29  ;;  %v3208_v29 = vld [vmem:[%s4232_s1 + $0x910] ss:$8 sps:$4 sm:$0xff]  }
  0xf7   :  { %2273 = vmatpush2.bf16.msra.mxu0 %v3129_v30  ;;  %v3216_v30 = vld [vmem:[%s4232_s1 + $0x904] ss:$8 sps:$4 sm:$0xff]  }
  0xf8   :  { %2274 = vmatprep.subr.bf16.mxu0 %v3137_v31  ;;  %v3169_v31 = vld [vmem:[%s4232_s1 + $0x800] ss:$8 sps:$4 sm:$0xff]  }
  0xf9   :  { %2314 = vmatpush2.bf16.msra.mxu1 %v3132_v32  ;;  %v3177_v32 = vld [vmem:[%s4232_s1 + $0x8f4] ss:$8 sps:$4 sm:$0xff]  }
  0xfa   :  { %2315 = vmatprep.subr.bf16.mxu1 %v3140_v33  ;;  %v452_v33 = vrot.slane %v4054_v37, %v3380_v48  ;;  %v3181_v37 = vld [vmem:[%s4232_s1 + $0x8e0] ss:$8 sps:$4 sm:$0xff]  }
  0xfb   :  { %2275 = vmatpush2.bf16.msra.mxu0 %v3135_v34  ;;  %v3214_v34 = vld [vmem:[%s4232_s1 + $0x900] ss:$8 sps:$4 sm:$0xff]  }
  0xfc   :  { %2276 = vmatprep.subr.bf16.mxu0 %v3143_v35  ;;  %v3175_v35 = vld [vmem:[%s4232_s1 + $0x8f0] ss:$8 sps:$4 sm:$0xff]  }
  0xfd   :  { %2316 = vmatpush2.bf16.msra.mxu1 %v3138_v36  ;;  %v3183_v36 = vld [vmem:[%s4232_s1 + $0x8e4] ss:$8 sps:$4 sm:$0xff]  }
  0xfe   :  { %2317 = vmatprep.subr.bf16.mxu1 %v3146_v28  ;;  %v460_v28 = vcombine.high %v452_v33, %v452_v33 }
  0xff   :  { %2277 = vmatpush2.bf16.msra.mxu0 %v3141_v38  ;;  %v3189_v38 = vld [vmem:[%s4232_s1 + $0x8d4] ss:$8 sps:$4 sm:$0xff]  }
 0x100   :  { %2328 = vmatprep.subr.bf16.mxu0 %v3150_v44  ;;  %v3199_v44 = vld [vmem:[%s4232_s1 + $0x8b0] ss:$8 sps:$4 sm:$0xff]  }
 0x101   :  { %2318 = vmatpush2.bf16.msra.mxu1 %v3144_v45  ;;  %v3207_v45 = vld [vmem:[%s4232_s1 + $0x8a4] ss:$8 sps:$4 sm:$0xff]  }
 0x102   :  { %v2034_v55 = vpop.f32.mrf.mxu0  ;;  %2279 = vmatmul.mubr.bf16.vlgmr.msra.gmra.mxu0 %v419_v43  ;;  %2369 = vmatprep.subr.bf16.mxu1 %v3174_v47  ;;  %v3201_v43 = vld [vmem:[%s4232_s1 + $0x8b4] ss:$8 sps:$4 sm:$0xff]  }
 0x103   :  { %v2035_v57 = vadd.f32 %v2034_v55, %v330_v49  ;;  %2329 = vmatpush1.bf16.msra.mxu0 %v3148_v24  ;;  %2360 = vmatprep.mubr.bf16.mxu0 %v459_v50  ;;  %v3213_v47 = vld [vmem:[%s4232_s1 + $0x894] ss:$8 sps:$4 sm:$0xff]   ;;  %v3211_v49 = vld [vmem:[%s4232_s1 + $0x890] ss:$8 sps:$4 sm:$0xff]   ;;  %v3219_v24 = vld [vmem:[%s4232_s1 + $0x884] ss:$8 sps:$4 sm:$0xff]  }
 0x104   :  { %v2036_v59 = vpop.f32.mrf.mxu0  ;;  %v2075_v60 = vpop.f32.mrf.mxu1  ;;  %2320 = vmatmul.mubr.bf16.vlgmr.msra.gmra.mxu1 %v435_v51  ;;  %2330 = vmatprep.subr.bf16.mxu0 %v3153_v52  ;;  %v3217_v50 = vld [vmem:[%s4232_s1 + $0x880] ss:$8 sps:$4 sm:$0xff]  }
 0x105   :  { %v2037_v62 = vadd.f32 %v2036_v59, %v334_v53  ;;  %v4096_v63 = vadd.f32 %v2075_v60, %v2035_v57  ;;  %2370 = vmatpush1.bf16.msra.mxu1 %v3172_v54  ;;  %2401 = vmatprep.mubr.bf16.mxu1 %v3221_v1 }
 0x106   :  { %v2038_v2 = vpop.f32.mrf.mxu0  ;;  %v2077_v3 = vpop.f32.mrf.mxu1  ;;  %2371 = vmatprep.subr.bf16.mxu1 %v3180_v56 }
 0x107   :  { %v4104_v6 = vadd.f32 %v2077_v3, %v2037_v62  ;;  %2331 = vmatpush1.bf16.msra.mxu0 %v3151_v58 }
 0x108   :  { %v2039_v8 = vpop.f32.mrf.mxu0  ;;  %2332 = vmatprep.subr.bf16.mxu0 %v3156_v61  ;;  %v2079_v10 = vpop.f32.mrf.mxu1 }
 0x109   :  { %2372 = vmatpush1.bf16.msra.mxu1 %v3178_v0 }
 0x10a   :  { %v2080_v12 = vpop.f32.mrf.mxu1  ;;  %2373 = vmatprep.subr.bf16.mxu1 %v3186_v4 }
 0x10b   :  { %2333 = vmatpush1.bf16.msra.mxu0 %v3154_v7 }
 0x10c   :  { %2334 = vmatprep.subr.bf16.mxu0 %v3159_v9 }
 0x10d   :  { %2374 = vmatpush1.bf16.msra.mxu1 %v3184_v11 }
 0x10e   :  { %2375 = vmatprep.subr.bf16.mxu1 %v3192_v13 }
 0x10f   :  { %2335 = vmatpush1.bf16.msra.mxu0 %v3157_v14 }
 0x110   :  { %2336 = vmatprep.subr.bf16.mxu0 %v3162_v15 }
 0x111   :  { %2376 = vmatpush1.bf16.msra.mxu1 %v3190_v16 }
 0x112   :  { %2377 = vmatprep.subr.bf16.mxu1 %v3198_v17 }
 0x113   :  { %2337 = vmatpush1.bf16.msra.mxu0 %v3160_v18 }
 0x114   :  { %2338 = vmatprep.subr.bf16.mxu0 %v3165_v19 }
 0x115   :  { %2378 = vmatpush1.bf16.msra.mxu1 %v3196_v20 }
 0x116   :  { %2379 = vmatprep.subr.bf16.mxu1 %v3204_v21 }
 0x117   :  { %2339 = vmatpush1.bf16.msra.mxu0 %v3163_v22 }
 0x118   :  { %2340 = vmatprep.subr.bf16.mxu0 %v3168_v23 }
 0x119   :  { %2380 = vmatpush1.bf16.msra.mxu1 %v3202_v5  ;;  %v3222_v5 = vmov 1983009808  }
 0x11a   :  { %2381 = vmatprep.subr.bf16.mxu1 %v3210_v25  ;;  %v2414_v25 = vunpack.c.l.s4 %v3222_v5 }
 0x11b   :  { %2341 = vmatpush1.bf16.msra.mxu0 %v3166_v26 }
 0x11c   :  { %2342 = vmatprep.subr.bf16.mxu0 %v3171_v27  ;;  %v2415_v26 = vunpack.c.0.s8 %v2414_v25  ;;  %v2410_v27 = vld [vmem:[%s4235_s3] sm:$0x3] }
 0x11d   :  { %2382 = vmatpush1.bf16.msra.mxu1 %v3208_v29 }
 0x11e   :  { %2383 = vmatprep.subr.bf16.mxu1 %v3216_v30  ;;  %v2411_v30 = vunpack.c.l.bf16 %v2410_v27 }
 0x11f   :  { %2343 = vmatpush1.bf16.msra.mxu0 %v3169_v31  ;;  %v2418_v31 = vsub.s32 %v2415_v26, %v3365_v42 }
 0x120   :  { %2344 = vmatprep.subr.bf16.mxu0 %v3177_v32 }
 0x121   :  { %2384 = vmatpush1.bf16.msra.mxu1 %v3214_v34  ;;  %v2419_v34 = vrot.slane %v2411_v30, %v2418_v31 }
 0x123   :  { %2345 = vmatpush2.bf16.msra.mxu0 %v3175_v35 }
 0x124   :  { %2346 = vmatprep.subr.bf16.mxu0 %v3183_v36  ;;  %2402 = vmatmul.mubr.bf16.vlgmr.msra.gmra.mxu1 %v460_v28 }
 0x127   :  { %2347 = vmatpush2.bf16.msra.mxu0 %v3181_v37 }
 0x128   :  { %2348 = vmatprep.subr.bf16.mxu0 %v3189_v38 }
 0x12b   :  { %2349 = vmatpush2.bf16.msra.mxu0 %v3187_v39 }
 0x12c   :  { %2350 = vmatprep.subr.bf16.mxu0 %v3195_v40  ;;  %v2420_v40 = vcombine.high %v2419_v34, %v2419_v34 }
 0x12f   :  { %2351 = vmatpush2.bf16.msra.mxu0 %v3193_v41 }
 0x130   :  { %2352 = vmatprep.subr.bf16.mxu0 %v3201_v43 }
 0x133   :  { %2353 = vmatpush2.bf16.msra.mxu0 %v3199_v44 }
 0x134   :  { %2354 = vmatprep.subr.bf16.mxu0 %v3207_v45 }
 0x137   :  { %2355 = vmatpush2.bf16.msra.mxu0 %v3205_v46 }
 0x138   :  { %2356 = vmatprep.subr.bf16.mxu0 %v3213_v47 }
 0x13b   :  { %2357 = vmatpush2.bf16.msra.mxu0 %v3211_v49 }
 0x13c   :  { %2358 = vmatprep.subr.bf16.mxu0 %v3219_v24 }
 0x13f   :  { %2359 = vmatpush2.bf16.msra.mxu0 %v3217_v50 }
 0x142   :  { %v2116_v51 = vpop.f32.mrf.mxu0  ;;  %2361 = vmatmul.mubr.bf16.vlgmr.msra.gmra.mxu0 %v452_v33 }
 0x143   :  { %v2117_v52 = vadd.f32 %v2116_v51, %v4096_v63 }
 0x144   :  { %v2118_v53 = vpop.f32.mrf.mxu0  ;;  %v2157_v54 = vpop.f32.mrf.mxu1 }
 0x145   :  { %v2119_v55 = vadd.f32 %v2118_v53, %v4104_v6  ;;  %v2158_v56 = vadd.f32 %v2157_v54, %v2117_v52 }
 0x146   :  { %v2120_v57 = vpop.f32.mrf.mxu0  ;;  %v2159_v58 = vpop.f32.mrf.mxu1 }
 0x147   :  { %v2160_v59 = vadd.f32 %v2159_v58, %v2119_v55 }
 0x148   :  { %v2121_v60 = vpop.f32.mrf.mxu0  ;;  %v2161_v61 = vpop.f32.mrf.mxu1 }
 0x14a   :  { %v2162_v62 = vpop.f32.mrf.mxu1 }
 0x182   :  { %v2198_v0 = vpop.f32.mrf.mxu0 }
 0x183   :  { %v2199_v1 = vadd.f32 %v2198_v0, %v2158_v56 }
 0x184   :  { %v2200_v2 = vpop.f32.mrf.mxu0  ;;  %v2239_v3 = vpop.f32.mrf.mxu1 }
 0x185   :  { %v2201_v4 = vadd.f32 %v2200_v2, %v2160_v59  ;;  %v2240_v7 = vadd.f32 %v2239_v3, %v2199_v1 }
 0x186   :  { %v2202_v8 = vpop.f32.mrf.mxu0  ;;  %v2241_v9 = vpop.f32.mrf.mxu1 }
 0x187   :  { %v2242_v63 = vadd.f32 %v2241_v9, %v2201_v4 }
 0x188   :  { %v2203_v10 = vpop.f32.mrf.mxu0  ;;  %v2243_v11 = vpop.f32.mrf.mxu1 }
 0x18a   :  { %v2244_v12 = vpop.f32.mrf.mxu1 }
 0x1c2   :  { %v2280_v6 = vpop.f32.mrf.mxu0 }
 0x1c3   :  { %v2281_v29 = vadd.f32 %v2280_v6, %v2240_v7 }
 0x1c4   :  { %v2282_v13 = vpop.f32.mrf.mxu0  ;;  %v2321_v14 = vpop.f32.mrf.mxu1 }
 0x1c5   :  { %v2283_v32 = vadd.f32 %v2282_v13, %v2242_v63  ;;  %v2322_v33 = vadd.f32 %v2321_v14, %v2281_v29 }
 0x1c6   :  { %v2284_v15 = vpop.f32.mrf.mxu0  ;;  %v2323_v16 = vpop.f32.mrf.mxu1 }
 0x1c7   :  { %v2324_v36 = vadd.f32 %v2323_v16, %v2283_v32 }
 0x1c8   :  { %v2285_v17 = vpop.f32.mrf.mxu0  ;;  %v2325_v18 = vpop.f32.mrf.mxu1 }
 0x1ca   :  { %v2326_v19 = vpop.f32.mrf.mxu1 }
 0x1e4   :  { %v2403_v20 = vpop.f32.mrf.mxu1 }
 0x1e6   :  { %v2405_v21 = vpop.f32.mrf.mxu1 }
 0x1e8   :  { %v2407_v22 = vpop.f32.mrf.mxu1 }
 0x1ea   :  { %v2408_v23 = vpop.f32.mrf.mxu1 }
 0x202   :  { %v2362_v35 = vpop.f32.mrf.mxu0 }
 0x203   :  { %v2363_v28 = vadd.f32 %v2362_v35, %v2322_v33 }
 0x204   :  { %v2364_v37 = vpop.f32.mrf.mxu0 }
 0x205   :  { %v2404_v38 = vadd.f32 %v2403_v20, %v2363_v28  ;;  %v2365_v39 = vadd.f32 %v2364_v37, %v2324_v36 }
 0x206   :  { %v2366_v41 = vpop.f32.mrf.mxu0 }
 0x207   :  { %v2423_v43 = vadd.f32 %v2419_v34, %v2404_v38  ;;  %v2406_v44 = vadd.f32 %v2405_v21, %v2365_v39 }
 0x208   :  { %v2367_v45 = vpop.f32.mrf.mxu0 }
 0x209   :  { %v2424_v46 = vadd.f32 %v2420_v40, %v2406_v44  ;;  %v2425_v47 = vmax.f32 %v2423_v43, 0.0 }
 0x20b   :  { %v2426_v49 = vmax.f32 %v2424_v46, 0.0 }
 0x20d   :  { %v2757_v24 = vpack.c.bf16 %v2426_v49, %v2425_v47 }
 0x20f   :  { %v2438_v42 = vrot.slane %v2757_v24, %v3380_v48 }
 0x211   :  { %2758 = vst.sshfl [vmem:[%s4236_s4] sm:$0x5 pattern:$0x73625140] %v2438_v42 }

// kernel: forward.40
= control target key start
LH: loop header
LB: loop body
LE: loop exit
PB: predicated region body
PF: predicated region fallthrough
CT: control target
= control target key end

     0   :  { %v371_v35 = vlaneseq  ;;  %v3166_v36 = vmov 1966171168   ;;  %vm3169_vm0 = vmmov 0   ;;  %s4081_s1 = inlined_call_operand.vmem [shape: bf16[1408,384], index: 1, kind: input, shape index: {}]   ;;  %s4082_s0 = inlined_call_operand.vmem [shape: bf16[2,1408], index: 0, kind: input, shape index: {}]   ;;  %s4083_s2 = inlined_call_operand.vmem [shape: f32[1,384], index: 2, kind: input, shape index: {}]   ;;  %s4084_s3 = inlined_call_operand.vmem [shape: bf16[2,384], index: 3, kind: output, shape index: {}]  }
   0x1   :  { %v2813_v0 = vld [vmem:[%s4081_s1 + $0xac] ss:$12 sps:$4 sm:$0xff]   ;;  %v2815_v1 = vld [vmem:[%s4081_s1 + $0xa8] ss:$12 sps:$4 sm:$0xff]   ;;  %v2821_v5 = vld [vmem:[%s4081_s1 + $0x90] ss:$12 sps:$4 sm:$0xff]   ;;  %v390_v37 = vunpack.c.l.s4 %v3166_v36 }
   0x2   :  { %1879 = vmatprep.subr.bf16.mxu0 %v2813_v0  ;;  %v2816_v2 = vld [vmem:[%s4081_s1 + $0x22c] ss:$12 sps:$4 sm:$0xff]   ;;  %v2818_v3 = vld [vmem:[%s4081_s1 + $0x228] ss:$12 sps:$4 sm:$0xff]   ;;  %v2824_v7 = vld [vmem:[%s4081_s1 + $0x210] ss:$12 sps:$4 sm:$0xff]  }
   0x3   :  { %1880 = vmatpush1.bf16.msra.mxu0 %v2815_v1  ;;  %v2819_v4 = vld [vmem:[%s4081_s1 + $0x94] ss:$12 sps:$4 sm:$0xff]   ;;  %1920 = vmatprep.subr.bf16.mxu1 %v2816_v2  ;;  %v2825_v8 = vld [vmem:[%s4081_s1 + $0x7c] ss:$12 sps:$4 sm:$0xff]   ;;  %v2827_v9 = vld [vmem:[%s4081_s1 + $0x78] ss:$12 sps:$4 sm:$0xff]   ;;  %v391_v43 = vunpack.c.0.s8 %v390_v37 }
   0x4   :  { %v2822_v6 = vld [vmem:[%s4081_s1 + $0x214] ss:$12 sps:$4 sm:$0xff]   ;;  %1921 = vmatpush1.bf16.msra.mxu1 %v2818_v3  ;;  %1881 = vmatprep.subr.bf16.mxu0 %v2819_v4  ;;  %v2828_v10 = vld [vmem:[%s4081_s1 + $0x1fc] ss:$12 sps:$4 sm:$0xff]   ;;  %v2831_v11 = vld [vmem:[%s4081_s1 + $0x64] ss:$12 sps:$4 sm:$0xff]  }
   0x5   :  { %1922 = vmatprep.subr.bf16.mxu1 %v2822_v6  ;;  %v2830_v12 = vld [vmem:[%s4081_s1 + $0x1f8] ss:$12 sps:$4 sm:$0xff]   ;;  %v2833_v14 = vld [vmem:[%s4081_s1 + $0x60] ss:$12 sps:$4 sm:$0xff]   ;;  %v2839_v18 = vld [vmem:[%s4081_s1 + $0x48] ss:$12 sps:$4 sm:$0xff]  }
   0x6   :  { %v2834_v13 = vld [vmem:[%s4081_s1 + $0x1e4] ss:$12 sps:$4 sm:$0xff]   ;;  %v2837_v15 = vld [vmem:[%s4081_s1 + $0x4c] ss:$12 sps:$4 sm:$0xff]   ;;  %v2843_v19 = vld [vmem:[%s4081_s1 + $0x34] ss:$12 sps:$4 sm:$0xff]  }
   0x7   :  { %1882 = vmatpush1.bf16.msra.mxu0 %v2821_v5  ;;  %v2836_v16 = vld [vmem:[%s4081_s1 + $0x1e0] ss:$12 sps:$4 sm:$0xff]   ;;  %v2842_v20 = vld [vmem:[%s4081_s1 + $0x1c8] ss:$12 sps:$4 sm:$0xff]   ;;  %v2845_v22 = vld [vmem:[%s4081_s1 + $0x30] ss:$12 sps:$4 sm:$0xff]  }
   0x8   :  { %1883 = vmatprep.subr.bf16.mxu0 %v2825_v8  ;;  %1923 = vmatpush1.bf16.msra.mxu1 %v2824_v7  ;;  %v2840_v17 = vld [vmem:[%s4081_s1 + $0x1cc] ss:$12 sps:$4 sm:$0xff]   ;;  %v2846_v21 = vld [vmem:[%s4081_s1 + $0x1b4] ss:$12 sps:$4 sm:$0xff]   ;;  %v2849_v23 = vld [vmem:[%s4081_s1 + $0x1c] ss:$12 sps:$4 sm:$0xff]  }
   0x9   :  { %1924 = vmatprep.subr.bf16.mxu1 %v2828_v10  ;;  %v2848_v24 = vld [vmem:[%s4081_s1 + $0x1b0] ss:$12 sps:$4 sm:$0xff]   ;;  %v2851_v26 = vld [vmem:[%s4081_s1 + $0x18] ss:$12 sps:$4 sm:$0xff]   ;;  %v2857_v30 = vld [vmem:[%s4081_s1] ss:$12 sps:$4 sm:$0xff]  }
   0xa   :  { %v2852_v25 = vld [vmem:[%s4081_s1 + $0x19c] ss:$12 sps:$4 sm:$0xff]   ;;  %v2855_v27 = vld [vmem:[%s4081_s1 + $0x4] ss:$12 sps:$4 sm:$0xff]   ;;  %v2861_v31 = vld [vmem:[%s4081_s1 + $0x16c] ss:$12 sps:$4 sm:$0xff]  }
   0xb   :  { %1884 = vmatpush1.bf16.msra.mxu0 %v2827_v9  ;;  %v2854_v28 = vld [vmem:[%s4081_s1 + $0x198] ss:$12 sps:$4 sm:$0xff]   ;;  %v2860_v32 = vld [vmem:[%s4081_s1 + $0x180] ss:$12 sps:$4 sm:$0xff]   ;;  %v2863_v34 = vld [vmem:[%s4081_s1 + $0x168] ss:$12 sps:$4 sm:$0xff]  }
   0xc   :  { %1885 = vmatprep.subr.bf16.mxu0 %v2831_v11  ;;  %1925 = vmatpush1.bf16.msra.mxu1 %v2830_v12  ;;  %v2858_v29 = vld [vmem:[%s4081_s1 + $0x184] ss:$12 sps:$4 sm:$0xff]   ;;  %v2864_v33 = vld [vmem:[%s4081_s1 + $0x2ec] ss:$12 sps:$4 sm:$0xff]   ;;  %v2867_v38 = vld [vmem:[%s4081_s1 + $0x154] ss:$12 sps:$4 sm:$0xff]  }
   0xd   :  { %1926 = vmatprep.subr.bf16.mxu1 %v2834_v13  ;;  %v2866_v39 = vld [vmem:[%s4081_s1 + $0x2e8] ss:$12 sps:$4 sm:$0xff]   ;;  %v2869_v41 = vld [vmem:[%s4081_s1 + $0x150] ss:$12 sps:$4 sm:$0xff]   ;;  %v3307_v42 = vshrl.u32 %v371_v35, 7  ;;  %v15_v52 = vld [vmem:[%s4082_s0] sm:$0xff] }
   0xe   :  { %v2870_v40 = vld [vmem:[%s4081_s1 + $0x2d4] ss:$12 sps:$4 sm:$0xff]   ;;  %v2873_v44 = vld [vmem:[%s4081_s1 + $0x13c] ss:$12 sps:$4 sm:$0xff]   ;;  %v2875_v47 = vld [vmem:[%s4081_s1 + $0x138] ss:$12 sps:$4 sm:$0xff]   ;;  %v388_v0 = vcombine.high %v15_v52, %v15_v52 }
   0xf   :  { %1886 = vmatpush1.bf16.msra.mxu0 %v2833_v14  ;;  %v2872_v45 = vld [vmem:[%s4081_s1 + $0x2d0] ss:$12 sps:$4 sm:$0xff]   ;;  %v3322_v48 = vsub.s32 %v391_v43, %v3307_v42  ;;  %v2878_v50 = vld [vmem:[%s4081_s1 + $0x2b8] ss:$12 sps:$4 sm:$0xff]   ;;  %v2881_v53 = vld [vmem:[%s4081_s1 + $0x120] ss:$12 sps:$4 sm:$0xff]  }
  0x10   :  { %1887 = vmatprep.subr.bf16.mxu0 %v2837_v15  ;;  %1927 = vmatpush1.bf16.msra.mxu1 %v2836_v16  ;;  %v2876_v46 = vld [vmem:[%s4081_s1 + $0x2bc] ss:$12 sps:$4 sm:$0xff]   ;;  %v2879_v49 = vld [vmem:[%s4081_s1 + $0x124] ss:$12 sps:$4 sm:$0xff]   ;;  %v2885_v55 = vld [vmem:[%s4081_s1 + $0x10c] ss:$12 sps:$4 sm:$0xff]  }
  0x11   :  { %1928 = vmatprep.subr.bf16.mxu1 %v2840_v17  ;;  %v2882_v51 = vld [vmem:[%s4081_s1 + $0x2a4] ss:$12 sps:$4 sm:$0xff]   ;;  %v395_v54 = vrot.slane %v15_v52, %v3322_v48  ;;  %v2884_v56 = vld [vmem:[%s4081_s1 + $0x2a0] ss:$12 sps:$4 sm:$0xff]   ;;  %v2887_v59 = vld [vmem:[%s4081_s1 + $0x108] ss:$12 sps:$4 sm:$0xff]   ;;  %v3380_v5 = vrot.slane %v388_v0, %v3322_v48 }
  0x12   :  { %v2888_v58 = vld [vmem:[%s4081_s1 + $0x28c] ss:$12 sps:$4 sm:$0xff]   ;;  %v2891_v61 = vld [vmem:[%s4081_s1 + $0xf4] ss:$12 sps:$4 sm:$0xff]   ;;  %v2893_v2 = vld [vmem:[%s4081_s1 + $0xf0] ss:$12 sps:$4 sm:$0xff]  }
  0x13   :  { %1888 = vmatpush1.bf16.msra.mxu0 %v2839_v18  ;;  %v403_v57 = vcombine.high %v395_v54, %v395_v54  ;;  %v2890_v62 = vld [vmem:[%s4081_s1 + $0x288] ss:$12 sps:$4 sm:$0xff]   ;;  %v2896_v4 = vld [vmem:[%s4081_s1 + $0x270] ss:$12 sps:$4 sm:$0xff]   ;;  %v2899_v7 = vld [vmem:[%s4081_s1 + $0xd8] ss:$12 sps:$4 sm:$0xff]   ;;  %v404_v10 = vcombine.high %v3380_v5, %v3380_v5  ;;  %v3403_v13 = vrot.slane %v395_v54, %v3322_v48 }
  0x14   :  { %1889 = vmatprep.subr.bf16.mxu0 %v2843_v19  ;;  %1929 = vmatpush1.bf16.msra.mxu1 %v2842_v20  ;;  %v2894_v1 = vld [vmem:[%s4081_s1 + $0x274] ss:$12 sps:$4 sm:$0xff]   ;;  %v2897_v3 = vld [vmem:[%s4081_s1 + $0xdc] ss:$12 sps:$4 sm:$0xff]   ;;  %v2903_v8 = vld [vmem:[%s4081_s1 + $0xc4] ss:$12 sps:$4 sm:$0xff]  }
  0x15   :  { %1930 = vmatprep.subr.bf16.mxu1 %v2846_v21  ;;  %v3353_v60 = vrot.slane %v403_v57, %v3322_v48  ;;  %v2900_v6 = vld [vmem:[%s4081_s1 + $0x25c] ss:$12 sps:$4 sm:$0xff]   ;;  %v2902_v9 = vld [vmem:[%s4081_s1 + $0x258] ss:$12 sps:$4 sm:$0xff]   ;;  %v2905_v12 = vld [vmem:[%s4081_s1 + $0xc0] ss:$12 sps:$4 sm:$0xff]   ;;  %v3412_v16 = vrot.slane %v404_v10, %v3322_v48  ;;  %v3422_v19 = vcombine.high %v3403_v13, %v3403_v13 }
  0x16   :  { %v2906_v11 = vld [vmem:[%s4081_s1 + $0x244] ss:$12 sps:$4 sm:$0xff]   ;;  %v2911_v14 = vld [vmem:[%s4081_s1 + $0x3ac] ss:$12 sps:$4 sm:$0xff]   ;;  %v2909_v18 = vld [vmem:[%s4081_s1 + $0x3a8] ss:$12 sps:$4 sm:$0xff]  }
  0x17   :  { %1890 = vmatpush1.bf16.msra.mxu0 %v2845_v22  ;;  %1911 = vmatprep.mubr.bf16.mxu0 %v3353_v60  ;;  %v3364_v63 = vcombine.high %v3353_v60, %v3353_v60  ;;  %v2908_v15 = vld [vmem:[%s4081_s1 + $0x240] ss:$12 sps:$4 sm:$0xff]   ;;  %v2912_v21 = vld [vmem:[%s4081_s1 + $0x528] ss:$12 sps:$4 sm:$0xff]   ;;  %v3432_v22 = vcombine.high %v3412_v16, %v3412_v16  ;;  %v2942_v43 = vld [vmem:[%s4081_s1 + $0x4b0] ss:$12 sps:$4 sm:$0xff]  }
  0x18   :  { %1891 = vmatprep.subr.bf16.mxu0 %v2849_v23  ;;  %1931 = vmatpush1.bf16.msra.mxu1 %v2848_v24  ;;  %v2914_v17 = vld [vmem:[%s4081_s1 + $0x52c] ss:$12 sps:$4 sm:$0xff]   ;;  %v2917_v20 = vld [vmem:[%s4081_s1 + $0x394] ss:$12 sps:$4 sm:$0xff]   ;;  %v2915_v24 = vld [vmem:[%s4081_s1 + $0x390] ss:$12 sps:$4 sm:$0xff]  }
  0x19   :  { %1932 = vmatprep.subr.bf16.mxu1 %v2852_v25  ;;  %1952 = vmatprep.mubr.bf16.mxu1 %v3364_v63  ;;  %v2920_v23 = vld [vmem:[%s4081_s1 + $0x514] ss:$12 sps:$4 sm:$0xff]   ;;  %v2923_v25 = vld [vmem:[%s4081_s1 + $0x37c] ss:$12 sps:$4 sm:$0xff]   ;;  %v2938_v35 = vld [vmem:[%s4081_s1 + $0x4cc] ss:$12 sps:$4 sm:$0xff]  }
  0x1a   :  { %v2933_v36 = vld [vmem:[%s4081_s1 + $0x348] ss:$12 sps:$4 sm:$0xff]   ;;  %v2954_v52 = vld [vmem:[%s4081_s1 + $0x480] ss:$12 sps:$4 sm:$0xff]   ;;  %v2969_v0 = vld [vmem:[%s4081_s1 + $0x438] ss:$12 sps:$4 sm:$0xff]  }
  0x1b   :  { %1892 = vmatpush1.bf16.msra.mxu0 %v2851_v26  ;;  %v2918_v26 = vld [vmem:[%s4081_s1 + $0x510] ss:$12 sps:$4 sm:$0xff]   ;;  %v2941_v37 = vld [vmem:[%s4081_s1 + $0x334] ss:$12 sps:$4 sm:$0xff]  }
  0x1c   :  { %1893 = vmatprep.subr.bf16.mxu0 %v2855_v27  ;;  %1933 = vmatpush1.bf16.msra.mxu1 %v2854_v28  ;;  %v2926_v27 = vld [vmem:[%s4081_s1 + $0x4fc] ss:$12 sps:$4 sm:$0xff]   ;;  %v2921_v28 = vld [vmem:[%s4081_s1 + $0x378] ss:$12 sps:$4 sm:$0xff]   ;;  %v2968_v57 = vld [vmem:[%s4081_s1 + $0x5d4] ss:$12 sps:$4 sm:$0xff]  }
  0x1d   :  { %1934 = vmatprep.subr.bf16.mxu1 %v2858_v29  ;;  %v2929_v29 = vld [vmem:[%s4081_s1 + $0x364] ss:$12 sps:$4 sm:$0xff]   ;;  %v2957_v54 = vld [vmem:[%s4081_s1 + $0x468] ss:$12 sps:$4 sm:$0xff]  }
  0x1e   :  { %v2989_v10 = vld [vmem:[%s4081_s1 + $0x3f4] ss:$12 sps:$4 sm:$0xff]  }
  0x1f   :  { %1894 = vmatpush1.bf16.msra.mxu0 %v2857_v30  ;;  %v2924_v30 = vld [vmem:[%s4081_s1 + $0x4f8] ss:$12 sps:$4 sm:$0xff]  }
  0x20   :  { %1895 = vmatprep.subr.bf16.mxu0 %v2861_v31  ;;  %1935 = vmatpush1.bf16.msra.mxu1 %v2860_v32  ;;  %v2932_v31 = vld [vmem:[%s4081_s1 + $0x4e4] ss:$12 sps:$4 sm:$0xff]   ;;  %v2927_v32 = vld [vmem:[%s4081_s1 + $0x360] ss:$12 sps:$4 sm:$0xff]  }
  0x21   :  { %1936 = vmatprep.subr.bf16.mxu1 %v2864_v33  ;;  %v2935_v33 = vld [vmem:[%s4081_s1 + $0x34c] ss:$12 sps:$4 sm:$0xff]  }
  0x23   :  { %1896 = vmatpush2.bf16.msra.mxu0 %v2863_v34  ;;  %v2930_v34 = vld [vmem:[%s4081_s1 + $0x4e0] ss:$12 sps:$4 sm:$0xff]  }
  0x24   :  { %1897 = vmatprep.subr.bf16.mxu0 %v2867_v38  ;;  %1937 = vmatpush2.bf16.msra.mxu1 %v2866_v39  ;;  %v2936_v38 = vld [vmem:[%s4081_s1 + $0x4c8] ss:$12 sps:$4 sm:$0xff]  }
  0x25   :  { %1938 = vmatprep.subr.bf16.mxu1 %v2870_v40  ;;  %v2944_v39 = vld [vmem:[%s4081_s1 + $0x4b4] ss:$12 sps:$4 sm:$0xff]   ;;  %v2939_v40 = vld [vmem:[%s4081_s1 + $0x330] ss:$12 sps:$4 sm:$0xff]  }
  0x27   :  { %1898 = vmatpush2.bf16.msra.mxu0 %v2869_v41  ;;  %v2947_v41 = vld [vmem:[%s4081_s1 + $0x31c] ss:$12 sps:$4 sm:$0xff]  }
  0x28   :  { %1899 = vmatprep.subr.bf16.mxu0 %v2873_v44  ;;  %1939 = vmatpush2.bf16.msra.mxu1 %v2872_v45  ;;  %v2950_v44 = vld [vmem:[%s4081_s1 + $0x49c] ss:$12 sps:$4 sm:$0xff]   ;;  %v2945_v45 = vld [vmem:[%s4081_s1 + $0x318] ss:$12 sps:$4 sm:$0xff]  }
  0x29   :  { %1940 = vmatprep.subr.bf16.mxu1 %v2876_v46  ;;  %v2953_v46 = vld [vmem:[%s4081_s1 + $0x304] ss:$12 sps:$4 sm:$0xff]  }
  0x2b   :  { %1900 = vmatpush2.bf16.msra.mxu0 %v2875_v47  ;;  %v2948_v47 = vld [vmem:[%s4081_s1 + $0x498] ss:$12 sps:$4 sm:$0xff]  }
  0x2c   :  { %1901 = vmatprep.subr.bf16.mxu0 %v2879_v49  ;;  %1941 = vmatpush2.bf16.msra.mxu1 %v2878_v50  ;;  %v2956_v49 = vld [vmem:[%s4081_s1 + $0x484] ss:$12 sps:$4 sm:$0xff]   ;;  %v2951_v50 = vld [vmem:[%s4081_s1 + $0x300] ss:$12 sps:$4 sm:$0xff]  }
  0x2d   :  { %1942 = vmatprep.subr.bf16.mxu1 %v2882_v51  ;;  %v2959_v51 = vld [vmem:[%s4081_s1 + $0x46c] ss:$12 sps:$4 sm:$0xff]  }
  0x2f   :  { %1902 = vmatpush2.bf16.msra.mxu0 %v2881_v53  ;;  %v2962_v53 = vld [vmem:[%s4081_s1 + $0x5ec] ss:$12 sps:$4 sm:$0xff]  }
  0x30   :  { %1903 = vmatprep.subr.bf16.mxu0 %v2885_v55  ;;  %1943 = vmatpush2.bf16.msra.mxu1 %v2884_v56  ;;  %v2965_v55 = vld [vmem:[%s4081_s1 + $0x454] ss:$12 sps:$4 sm:$0xff]  }
  0x31   :  { %1944 = vmatprep.subr.bf16.mxu1 %v2888_v58  ;;  %v2960_v56 = vld [vmem:[%s4081_s1 + $0x5e8] ss:$12 sps:$4 sm:$0xff]   ;;  %v2963_v58 = vld [vmem:[%s4081_s1 + $0x450] ss:$12 sps:$4 sm:$0xff]  }
  0x33   :  { %1904 = vmatpush2.bf16.msra.mxu0 %v2887_v59  ;;  %v2971_v59 = vld [vmem:[%s4081_s1 + $0x43c] ss:$12 sps:$4 sm:$0xff]  }
  0x34   :  { %1905 = vmatprep.subr.bf16.mxu0 %v2891_v61  ;;  %1945 = vmatpush2.bf16.msra.mxu1 %v2890_v62  ;;  %v2966_v61 = vld [vmem:[%s4081_s1 + $0x5d0] ss:$12 sps:$4 sm:$0xff]  }
  0x35   :  { %1946 = vmatprep.subr.bf16.mxu1 %v2894_v1  ;;  %v2974_v62 = vld [vmem:[%s4081_s1 + $0x5bc] ss:$12 sps:$4 sm:$0xff]   ;;  %v2977_v1 = vld [vmem:[%s4081_s1 + $0x424] ss:$12 sps:$4 sm:$0xff]  }
  0x37   :  { %1906 = vmatpush2.bf16.msra.mxu0 %v2893_v2  ;;  %v2972_v2 = vld [vmem:[%s4081_s1 + $0x5b8] ss:$12 sps:$4 sm:$0xff]  }
  0x38   :  { %1907 = vmatprep.subr.bf16.mxu0 %v2897_v3  ;;  %1947 = vmatpush2.bf16.msra.mxu1 %v2896_v4  ;;  %v2980_v3 = vld [vmem:[%s4081_s1 + $0x5a4] ss:$12 sps:$4 sm:$0xff]   ;;  %v2975_v4 = vld [vmem:[%s4081_s1 + $0x420] ss:$12 sps:$4 sm:$0xff]  }
  0x39   :  { %1948 = vmatprep.subr.bf16.mxu1 %v2900_v6  ;;  %v2983_v6 = vld [vmem:[%s4081_s1 + $0x40c] ss:$12 sps:$4 sm:$0xff]  }
  0x3b   :  { %1908 = vmatpush2.bf16.msra.mxu0 %v2899_v7  ;;  %v2978_v7 = vld [vmem:[%s4081_s1 + $0x5a0] ss:$12 sps:$4 sm:$0xff]  }
  0x3c   :  { %1909 = vmatprep.subr.bf16.mxu0 %v2903_v8  ;;  %1949 = vmatpush2.bf16.msra.mxu1 %v2902_v9  ;;  %v2986_v8 = vld [vmem:[%s4081_s1 + $0x58c] ss:$12 sps:$4 sm:$0xff]   ;;  %v2981_v9 = vld [vmem:[%s4081_s1 + $0x408] ss:$12 sps:$4 sm:$0xff]  }
  0x3d   :  { %1950 = vmatprep.subr.bf16.mxu1 %v2906_v11  ;;  %v2984_v11 = vld [vmem:[%s4081_s1 + $0x588] ss:$12 sps:$4 sm:$0xff]  }
  0x3f   :  { %1910 = vmatpush2.bf16.msra.mxu0 %v2905_v12  ;;  %v2992_v12 = vld [vmem:[%s4081_s1 + $0x574] ss:$12 sps:$4 sm:$0xff]  }
  0x40   :  { %1961 = vmatprep.subr.bf16.mxu0 %v2911_v14  ;;  %1951 = vmatpush2.bf16.msra.mxu1 %v2908_v15  ;;  %v2987_v14 = vld [vmem:[%s4081_s1 + $0x3f0] ss:$12 sps:$4 sm:$0xff]  }
  0x41   :  { %2002 = vmatprep.subr.bf16.mxu1 %v2914_v17  ;;  %v2995_v15 = vld [vmem:[%s4081_s1 + $0x3dc] ss:$12 sps:$4 sm:$0xff]  }
  0x42   :  { %1912 = vmatmul.mubr.bf16.vlgmr.msra.gmra.mxu0 %v3403_v13  ;;  %v2990_v17 = vld [vmem:[%s4081_s1 + $0x570] ss:$12 sps:$4 sm:$0xff]  }
  0x43   :  { %1962 = vmatpush1.bf16.msra.mxu0 %v2909_v18  ;;  %1993 = vmatprep.mubr.bf16.mxu0 %v3412_v16  ;;  %v2998_v18 = vld [vmem:[%s4081_s1 + $0x55c] ss:$12 sps:$4 sm:$0xff]  }
  0x44   :  { %1953 = vmatmul.mubr.bf16.vlgmr.msra.gmra.mxu1 %v3422_v19  ;;  %1963 = vmatprep.subr.bf16.mxu0 %v2917_v20  ;;  %v2993_v20 = vld [vmem:[%s4081_s1 + $0x3d8] ss:$12 sps:$4 sm:$0xff]  }
  0x45   :  { %2003 = vmatpush1.bf16.msra.mxu1 %v2912_v21  ;;  %2034 = vmatprep.mubr.bf16.mxu1 %v3432_v22  ;;  %v3603_v21 = vld.sshfl [vmem:[%s4082_s0 + $0x8] sm:$0x13 pattern:$0x75316420] }
  0x46   :  { %2004 = vmatprep.subr.bf16.mxu1 %v2920_v23  ;;  %v3001_v23 = vld [vmem:[%s4081_s1 + $0x3c4] ss:$12 sps:$4 sm:$0xff]  }
  0x47   :  { %1964 = vmatpush1.bf16.msra.mxu0 %v2915_v24  ;;  %v2996_v24 = vld [vmem:[%s4081_s1 + $0x558] ss:$12 sps:$4 sm:$0xff]  }
  0x48   :  { %1965 = vmatprep.subr.bf16.mxu0 %v2923_v25  ;;  %v3004_v25 = vld [vmem:[%s4081_s1 + $0x544] ss:$12 sps:$4 sm:$0xff]  }
  0x49   :  { %2005 = vmatpush1.bf16.msra.mxu1 %v2918_v26  ;;  %v2999_v26 = vld [vmem:[%s4081_s1 + $0x3c0] ss:$12 sps:$4 sm:$0xff]  }
  0x4a   :  { %2006 = vmatprep.subr.bf16.mxu1 %v2926_v27  ;;  %v444_v27 = vcombine.high %v3603_v21, %v3603_v21 }
  0x4b   :  { %1966 = vmatpush1.bf16.msra.mxu0 %v2921_v28  ;;  %v3621_v28 = vrot.slane %v3380_v5, %v3322_v48  ;;  %v3006_v5 = vld [vmem:[%s4081_s1 + $0x6a8] ss:$12 sps:$4 sm:$0xff]  }
  0x4c   :  { %1967 = vmatprep.subr.bf16.mxu0 %v2929_v29  ;;  %v3008_v29 = vld [vmem:[%s4081_s1 + $0x6ac] ss:$12 sps:$4 sm:$0xff]  }
  0x4d   :  { %2007 = vmatpush1.bf16.msra.mxu1 %v2924_v30  ;;  %v3002_v30 = vld [vmem:[%s4081_s1 + $0x540] ss:$12 sps:$4 sm:$0xff]  }
  0x4e   :  { %2008 = vmatprep.subr.bf16.mxu1 %v2932_v31  ;;  %v3011_v31 = vld [vmem:[%s4081_s1 + $0x82c] ss:$12 sps:$4 sm:$0xff]  }
  0x4f   :  { %1968 = vmatpush1.bf16.msra.mxu0 %v2927_v32  ;;  %v3636_v32 = vrot.slane %v444_v27, %v3322_v48  ;;  %v3077_v27 = vld [vmem:[%s4081_s1 + $0x110] ss:$12 sps:$4 sm:$0xff]  }
  0x50   :  { %1969 = vmatprep.subr.bf16.mxu0 %v2935_v33  ;;  %v3640_v33 = vcombine.high %v3621_v28, %v3621_v28 }
  0x51   :  { %2009 = vmatpush1.bf16.msra.mxu1 %v2930_v34  ;;  %v3014_v34 = vld [vmem:[%s4081_s1 + $0x694] ss:$12 sps:$4 sm:$0xff]  }
  0x52   :  { %2010 = vmatprep.subr.bf16.mxu1 %v2938_v35  ;;  %v3009_v35 = vld [vmem:[%s4081_s1 + $0x828] ss:$12 sps:$4 sm:$0xff]  }
  0x53   :  { %1970 = vmatpush1.bf16.msra.mxu0 %v2933_v36  ;;  %v3017_v36 = vld [vmem:[%s4081_s1 + $0x814] ss:$12 sps:$4 sm:$0xff]  }
  0x54   :  { %1971 = vmatprep.subr.bf16.mxu0 %v2941_v37  ;;  %v3012_v37 = vld [vmem:[%s4081_s1 + $0x690] ss:$12 sps:$4 sm:$0xff]  }
  0x55   :  { %2011 = vmatpush1.bf16.msra.mxu1 %v2936_v38  ;;  %v3020_v38 = vld [vmem:[%s4081_s1 + $0x67c] ss:$12 sps:$4 sm:$0xff]  }
  0x56   :  { %2012 = vmatprep.subr.bf16.mxu1 %v2944_v39  ;;  %v3015_v39 = vld [vmem:[%s4081_s1 + $0x810] ss:$12 sps:$4 sm:$0xff]  }
  0x57   :  { %1972 = vmatpush1.bf16.msra.mxu0 %v2939_v40  ;;  %v3167_v40 = vmov 0  }
  0x58   :  { %1973 = vmatprep.subr.bf16.mxu0 %v2947_v41  ;;  %v3023_v41 = vld [vmem:[%s4081_s1 + $0x7fc] ss:$12 sps:$4 sm:$0xff]  }
  0x59   :  { %2013 = vmatpush1.bf16.msra.mxu1 %v2942_v43  ;;  %v3018_v43 = vld [vmem:[%s4081_s1 + $0x678] ss:$12 sps:$4 sm:$0xff]  }
  0x5a   :  { %2014 = vmatprep.subr.bf16.mxu1 %v2950_v44  ;;  %v3026_v44 = vld [vmem:[%s4081_s1 + $0x664] ss:$12 sps:$4 sm:$0xff]  }
  0x5b   :  { %1974 = vmatpush1.bf16.msra.mxu0 %v2945_v45  ;;  %v3021_v45 = vld [vmem:[%s4081_s1 + $0x7f8] ss:$12 sps:$4 sm:$0xff]  }
  0x5c   :  { %1975 = vmatprep.subr.bf16.mxu0 %v2953_v46  ;;  %v3029_v46 = vld [vmem:[%s4081_s1 + $0x7e4] ss:$12 sps:$4 sm:$0xff]  }
  0x5d   :  { %2015 = vmatpush1.bf16.msra.mxu1 %v2948_v47  ;;  %v3024_v47 = vld [vmem:[%s4081_s1 + $0x660] ss:$12 sps:$4 sm:$0xff]  }
  0x5e   :  { %2016 = vmatprep.subr.bf16.mxu1 %v2956_v49  ;;  %v3032_v49 = vld [vmem:[%s4081_s1 + $0x64c] ss:$12 sps:$4 sm:$0xff]  }
  0x5f   :  { %1976 = vmatpush1.bf16.msra.mxu0 %v2951_v50  ;;  %v3027_v50 = vld [vmem:[%s4081_s1 + $0x7e0] ss:$12 sps:$4 sm:$0xff]  }
  0x60   :  { %1977 = vmatprep.subr.bf16.mxu0 %v2959_v51  ;;  %v3035_v51 = vld [vmem:[%s4081_s1 + $0x7cc] ss:$12 sps:$4 sm:$0xff]  }
  0x61   :  { %2017 = vmatpush1.bf16.msra.mxu1 %v2954_v52  ;;  %v3030_v52 = vld [vmem:[%s4081_s1 + $0x648] ss:$12 sps:$4 sm:$0xff]  }
  0x62   :  { %2018 = vmatprep.subr.bf16.mxu1 %v2962_v53  ;;  %v3038_v53 = vld [vmem:[%s4081_s1 + $0x634] ss:$12 sps:$4 sm:$0xff]  }
  0x63   :  { %1978 = vmatpush2.bf16.msra.mxu0 %v2957_v54  ;;  %v3033_v54 = vld [vmem:[%s4081_s1 + $0x7c8] ss:$12 sps:$4 sm:$0xff]  }
  0x64   :  { %1979 = vmatprep.subr.bf16.mxu0 %v2965_v55  ;;  %v3041_v55 = vld [vmem:[%s4081_s1 + $0x7b4] ss:$12 sps:$4 sm:$0xff]  }
  0x65   :  { %2019 = vmatpush2.bf16.msra.mxu1 %v2960_v56  ;;  %v3036_v56 = vld [vmem:[%s4081_s1 + $0x630] ss:$12 sps:$4 sm:$0xff]  }
  0x66   :  { %2020 = vmatprep.subr.bf16.mxu1 %v2968_v57  ;;  %v3044_v57 = vld [vmem:[%s4081_s1 + $0x61c] ss:$12 sps:$4 sm:$0xff]  }
  0x67   :  { %1980 = vmatpush2.bf16.msra.mxu0 %v2963_v58  ;;  %v3039_v58 = vld [vmem:[%s4081_s1 + $0x7b0] ss:$12 sps:$4 sm:$0xff]  }
  0x68   :  { %1981 = vmatprep.subr.bf16.mxu0 %v2971_v59  ;;  %v3047_v59 = vld [vmem:[%s4081_s1 + $0x79c] ss:$12 sps:$4 sm:$0xff]  }
  0x69   :  { %2021 = vmatpush2.bf16.msra.mxu1 %v2966_v61  ;;  %v3042_v61 = vld [vmem:[%s4081_s1 + $0x618] ss:$12 sps:$4 sm:$0xff]  }
  0x6a   :  { %2022 = vmatprep.subr.bf16.mxu1 %v2974_v62  ;;  %v3050_v62 = vld [vmem:[%s4081_s1 + $0x604] ss:$12 sps:$4 sm:$0xff]  }
  0x6b   :  { %1982 = vmatpush2.bf16.msra.mxu0 %v2969_v0  ;;  %v3045_v0 = vld [vmem:[%s4081_s1 + $0x798] ss:$12 sps:$4 sm:$0xff]  }
  0x6c   :  { %1983 = vmatprep.subr.bf16.mxu0 %v2977_v1  ;;  %v3053_v1 = vld [vmem:[%s4081_s1 + $0x784] ss:$12 sps:$4 sm:$0xff]  }
  0x6d   :  { %2023 = vmatpush2.bf16.msra.mxu1 %v2972_v2  ;;  %v3048_v2 = vld [vmem:[%s4081_s1 + $0x600] ss:$12 sps:$4 sm:$0xff]  }
  0x6e   :  { %2024 = vmatprep.subr.bf16.mxu1 %v2980_v3  ;;  %v3056_v3 = vld [vmem:[%s4081_s1 + $0x76c] ss:$12 sps:$4 sm:$0xff]  }
  0x6f   :  { %1984 = vmatpush2.bf16.msra.mxu0 %v2975_v4  ;;  %v3734_v4 = vrot.slane %v3603_v21, %v3322_v48  ;;  %v3071_v21 = vld [vmem:[%s4081_s1 + $0x724] ss:$12 sps:$4 sm:$0xff]  }
  0x70   :  { %1985 = vmatprep.subr.bf16.mxu0 %v2983_v6  ;;  %v3051_v6 = vld [vmem:[%s4081_s1 + $0x780] ss:$12 sps:$4 sm:$0xff]  }
  0x71   :  { %2025 = vmatpush2.bf16.msra.mxu1 %v2978_v7  ;;  %v3057_v7 = vld [vmem:[%s4081_s1 + $0x170] ss:$12 sps:$4 sm:$0xff]  }
  0x72   :  { %2026 = vmatprep.subr.bf16.mxu1 %v2986_v8  ;;  %v3054_v8 = vld [vmem:[%s4081_s1 + $0x768] ss:$12 sps:$4 sm:$0xff]  }
  0x73   :  { %1986 = vmatpush2.bf16.msra.mxu0 %v2981_v9  ;;  %v3747_v9 = vcombine.high %v3734_v4, %v3734_v4 }
  0x74   :  { %1987 = vmatprep.subr.bf16.mxu0 %v2989_v10  ;;  %v3061_v10 = vld [vmem:[%s4081_s1 + $0x754] ss:$12 sps:$4 sm:$0xff]  }
  0x75   :  { %2027 = vmatpush2.bf16.msra.mxu1 %v2984_v11  ;;  %v3058_v11 = vld [vmem:[%s4081_s1 + $0xb0] ss:$12 sps:$4 sm:$0xff]  }
  0x76   :  { %2028 = vmatprep.subr.bf16.mxu1 %v2992_v12  ;;  %v3062_v12 = vld [vmem:[%s4081_s1 + $0x158] ss:$12 sps:$4 sm:$0xff]  }
  0x77   :  { %1988 = vmatpush2.bf16.msra.mxu0 %v2987_v14  ;;  %v3059_v14 = vld [vmem:[%s4081_s1 + $0x750] ss:$12 sps:$4 sm:$0xff]  }
  0x78   :  { %1989 = vmatprep.subr.bf16.mxu0 %v2995_v15  ;;  %v3066_v15 = vld [vmem:[%s4081_s1 + $0x73c] ss:$12 sps:$4 sm:$0xff]  }
  0x79   :  { %2029 = vmatpush2.bf16.msra.mxu1 %v2990_v17  ;;  %v3063_v17 = vld [vmem:[%s4081_s1 + $0x98] ss:$12 sps:$4 sm:$0xff]  }
  0x7a   :  { %2030 = vmatprep.subr.bf16.mxu1 %v2998_v18  ;;  %v3067_v18 = vld [vmem:[%s4081_s1 + $0x140] ss:$12 sps:$4 sm:$0xff]  }
  0x7b   :  { %1990 = vmatpush2.bf16.msra.mxu0 %v2993_v20  ;;  %v3064_v20 = vld [vmem:[%s4081_s1 + $0x738] ss:$12 sps:$4 sm:$0xff]  }
  0x7c   :  { %1991 = vmatprep.subr.bf16.mxu0 %v3001_v23  ;;  %v3072_v23 = vld [vmem:[%s4081_s1 + $0x128] ss:$12 sps:$4 sm:$0xff]  }
  0x7d   :  { %2031 = vmatpush2.bf16.msra.mxu1 %v2996_v24  ;;  %v3069_v24 = vld [vmem:[%s4081_s1 + $0x720] ss:$12 sps:$4 sm:$0xff]  }
  0x7e   :  { %2032 = vmatprep.subr.bf16.mxu1 %v3004_v25  ;;  %v3076_v25 = vld [vmem:[%s4081_s1 + $0x70c] ss:$12 sps:$4 sm:$0xff]  }
  0x7f   :  { %1992 = vmatpush2.bf16.msra.mxu0 %v2999_v26  ;;  %v3073_v26 = vld [vmem:[%s4081_s1 + $0x68] ss:$12 sps:$4 sm:$0xff]  }
  0x80   :  { %2043 = vmatprep.subr.bf16.mxu0 %v3008_v29  ;;  %v3074_v29 = vld [vmem:[%s4081_s1 + $0x708] ss:$12 sps:$4 sm:$0xff]  }
  0x81   :  { %2033 = vmatpush2.bf16.msra.mxu1 %v3002_v30  ;;  %v3081_v30 = vld [vmem:[%s4081_s1 + $0x6f4] ss:$12 sps:$4 sm:$0xff]  }
  0x82   :  { %1994 = vmatmul.mubr.bf16.vlgmr.msra.gmra.mxu0 %v3621_v28  ;;  %2084 = vmatprep.subr.bf16.mxu1 %v3011_v31  ;;  %v3078_v31 = vld [vmem:[%s4081_s1 + $0x50] ss:$12 sps:$4 sm:$0xff]  }
  0x83   :  { %2044 = vmatpush1.bf16.msra.mxu0 %v3006_v5  ;;  %2075 = vmatprep.mubr.bf16.mxu0 %v3636_v32  ;;  %v3082_v5 = vld [vmem:[%s4081_s1 + $0xf8] ss:$12 sps:$4 sm:$0xff]  }
  0x84   :  { %2035 = vmatmul.mubr.bf16.vlgmr.msra.gmra.mxu1 %v3640_v33  ;;  %2045 = vmatprep.subr.bf16.mxu0 %v3014_v34  ;;  %v3079_v34 = vld [vmem:[%s4081_s1 + $0x6f0] ss:$12 sps:$4 sm:$0xff]  }
  0x85   :  { %2085 = vmatpush1.bf16.msra.mxu1 %v3009_v35  ;;  %2116 = vmatprep.mubr.bf16.mxu1 %v3167_v40  ;;  %v3086_v35 = vld [vmem:[%s4081_s1 + $0x6dc] ss:$12 sps:$4 sm:$0xff]   ;;  %v3088_v40 = vld [vmem:[%s4081_s1 + $0x20] ss:$12 sps:$4 sm:$0xff]  }
  0x86   :  { %2086 = vmatprep.subr.bf16.mxu1 %v3017_v36  ;;  %v3083_v36 = vld [vmem:[%s4081_s1 + $0x38] ss:$12 sps:$4 sm:$0xff]  }
  0x87   :  { %2046 = vmatpush1.bf16.msra.mxu0 %v3012_v37  ;;  %v3087_v37 = vld [vmem:[%s4081_s1 + $0xe0] ss:$12 sps:$4 sm:$0xff]  }
  0x88   :  { %2047 = vmatprep.subr.bf16.mxu0 %v3020_v38  ;;  %v3084_v38 = vld [vmem:[%s4081_s1 + $0x6d8] ss:$12 sps:$4 sm:$0xff]  }
  0x89   :  { %2087 = vmatpush1.bf16.msra.mxu1 %v3015_v39  ;;  %v3091_v39 = vld [vmem:[%s4081_s1 + $0x6c4] ss:$12 sps:$4 sm:$0xff]  }
  0x8a   :  { %2088 = vmatprep.subr.bf16.mxu1 %v3023_v41  ;;  %v3092_v41 = vld [vmem:[%s4081_s1 + $0xc8] ss:$12 sps:$4 sm:$0xff]  }
  0x8b   :  { %2048 = vmatpush1.bf16.msra.mxu0 %v3018_v43  ;;  %v3089_v43 = vld [vmem:[%s4081_s1 + $0x6c0] ss:$12 sps:$4 sm:$0xff]  }
  0x8c   :  { %2049 = vmatprep.subr.bf16.mxu0 %v3026_v44  ;;  %v3094_v44 = vld [vmem:[%s4081_s1 + $0x2f0] ss:$12 sps:$4 sm:$0xff]  }
  0x8d   :  { %2089 = vmatpush1.bf16.msra.mxu1 %v3021_v45  ;;  %v3093_v45 = vld [vmem:[%s4081_s1 + $0x8] ss:$12 sps:$4 sm:$0xff]  }
  0x8e   :  { %2090 = vmatprep.subr.bf16.mxu1 %v3029_v46  ;;  %v3096_v46 = vld [vmem:[%s4081_s1 + $0x470] ss:$12 sps:$4 sm:$0xff]  }
  0x8f   :  { %2050 = vmatpush1.bf16.msra.mxu0 %v3024_v47  ;;  %v3095_v47 = vld [vmem:[%s4081_s1 + $0x230] ss:$12 sps:$4 sm:$0xff]  }
  0x90   :  { %2051 = vmatprep.subr.bf16.mxu0 %v3032_v49  ;;  %v3098_v49 = vld [vmem:[%s4081_s1 + $0x2d8] ss:$12 sps:$4 sm:$0xff]  }
  0x91   :  { %2091 = vmatpush1.bf16.msra.mxu1 %v3027_v50  ;;  %v3097_v50 = vld [vmem:[%s4081_s1 + $0x3b0] ss:$12 sps:$4 sm:$0xff]  }
  0x92   :  { %2092 = vmatprep.subr.bf16.mxu1 %v3035_v51  ;;  %v3100_v51 = vld [vmem:[%s4081_s1 + $0x458] ss:$12 sps:$4 sm:$0xff]  }
  0x93   :  { %2052 = vmatpush1.bf16.msra.mxu0 %v3030_v52  ;;  %v3099_v52 = vld [vmem:[%s4081_s1 + $0x218] ss:$12 sps:$4 sm:$0xff]  }
  0x94   :  { %2053 = vmatprep.subr.bf16.mxu0 %v3038_v53  ;;  %v3102_v53 = vld [vmem:[%s4081_s1 + $0x2c0] ss:$12 sps:$4 sm:$0xff]  }
  0x95   :  { %2093 = vmatpush1.bf16.msra.mxu1 %v3033_v54  ;;  %v3101_v54 = vld [vmem:[%s4081_s1 + $0x398] ss:$12 sps:$4 sm:$0xff]  }
  0x96   :  { %2094 = vmatprep.subr.bf16.mxu1 %v3041_v55  ;;  %v3104_v55 = vld [vmem:[%s4081_s1 + $0x440] ss:$12 sps:$4 sm:$0xff]  }
  0x97   :  { %2054 = vmatpush1.bf16.msra.mxu0 %v3036_v56  ;;  %v3108_v56 = vld [vmem:[%s4081_s1 + $0x428] ss:$12 sps:$4 sm:$0xff]  }
  0x98   :  { %2055 = vmatprep.subr.bf16.mxu0 %v3044_v57  ;;  %v3107_v57 = vld [vmem:[%s4081_s1 + $0x1e8] ss:$12 sps:$4 sm:$0xff]  }
  0x99   :  { %2095 = vmatpush1.bf16.msra.mxu1 %v3039_v58  ;;  %v3110_v58 = vld [vmem:[%s4081_s1 + $0x290] ss:$12 sps:$4 sm:$0xff]  }
  0x9a   :  { %2096 = vmatprep.subr.bf16.mxu1 %v3047_v59  ;;  %v3109_v59 = vld [vmem:[%s4081_s1 + $0x368] ss:$12 sps:$4 sm:$0xff]  }
  0x9b   :  { %2056 = vmatpush1.bf16.msra.mxu0 %v3042_v61  ;;  %v3112_v61 = vld [vmem:[%s4081_s1 + $0x410] ss:$12 sps:$4 sm:$0xff]  }
  0x9c   :  { %2057 = vmatprep.subr.bf16.mxu0 %v3050_v62  ;;  %v3111_v62 = vld [vmem:[%s4081_s1 + $0x1d0] ss:$12 sps:$4 sm:$0xff]  }
  0x9d   :  { %2097 = vmatpush1.bf16.msra.mxu1 %v3045_v0  ;;  %v3114_v0 = vld [vmem:[%s4081_s1 + $0x278] ss:$12 sps:$4 sm:$0xff]  }
  0x9e   :  { %2098 = vmatprep.subr.bf16.mxu1 %v3053_v1  ;;  %v3113_v1 = vld [vmem:[%s4081_s1 + $0x350] ss:$12 sps:$4 sm:$0xff]  }
  0x9f   :  { %2058 = vmatpush1.bf16.msra.mxu0 %v3048_v2  ;;  %v3116_v2 = vld [vmem:[%s4081_s1 + $0x3f8] ss:$12 sps:$4 sm:$0xff]  }
  0xa0   :  { %2059 = vmatprep.subr.bf16.mxu0 %v3056_v3  ;;  %v3115_v3 = vld [vmem:[%s4081_s1 + $0x1b8] ss:$12 sps:$4 sm:$0xff]  }
  0xa1   :  { %2099 = vmatpush1.bf16.msra.mxu1 %v3051_v6  ;;  %v3118_v6 = vld [vmem:[%s4081_s1 + $0x260] ss:$12 sps:$4 sm:$0xff]  }
  0xa2   :  { %2670 = vmatprep.subr.bf16.mxu1 %v3057_v7  ;;  %v3117_v7 = vld [vmem:[%s4081_s1 + $0x338] ss:$12 sps:$4 sm:$0xff]  }
  0xa3   :  { %2060 = vmatpush2.bf16.msra.mxu0 %v3054_v8  ;;  %v3120_v8 = vld [vmem:[%s4081_s1 + $0x3e0] ss:$12 sps:$4 sm:$0xff]  }
  0xa4   :  { %2117 = vmatmul.mubr.bf16.vlgmr.msra.gmra.mxu1 %v3747_v9  ;;  %2061 = vmatprep.subr.bf16.mxu0 %v3061_v10  ;;  %v3119_v10 = vld [vmem:[%s4081_s1 + $0x1a0] ss:$12 sps:$4 sm:$0xff]  }
  0xa5   :  { %2671 = vmatpush3.bf16.msra.mxu1 %v3058_v11  ;;  %2157 = vmatprep.mubr.bf16.mxu1 %v3353_v60  ;;  %v3068_v60 = vld [vmem:[%s4081_s1 + $0x80] ss:$12 sps:$4 sm:$0xff]   ;;  %v3122_v11 = vld [vmem:[%s4081_s1 + $0x248] ss:$12 sps:$4 sm:$0xff]  }
  0xa6   :  { %2672 = vmatprep.subr.bf16.mxu1 %v3062_v12  ;;  %v3121_v12 = vld [vmem:[%s4081_s1 + $0x320] ss:$12 sps:$4 sm:$0xff]  }
  0xa7   :  { %2062 = vmatpush2.bf16.msra.mxu0 %v3059_v14  ;;  %v3124_v14 = vld [vmem:[%s4081_s1 + $0x3c8] ss:$12 sps:$4 sm:$0xff]  }
  0xa8   :  { %2063 = vmatprep.subr.bf16.mxu0 %v3066_v15  ;;  %v3123_v15 = vld [vmem:[%s4081_s1 + $0x188] ss:$12 sps:$4 sm:$0xff]  }
  0xa9   :  { %2673 = vmatpush3.bf16.msra.mxu1 %v3063_v17  ;;  %v3126_v17 = vld [vmem:[%s4081_s1 + $0x5f0] ss:$12 sps:$4 sm:$0xff]  }
  0xaa   :  { %2674 = vmatprep.subr.bf16.mxu1 %v3067_v18  ;;  %v3125_v18 = vld [vmem:[%s4081_s1 + $0x308] ss:$12 sps:$4 sm:$0xff]  }
  0xab   :  { %2064 = vmatpush2.bf16.msra.mxu0 %v3064_v20  ;;  %v3128_v20 = vld [vmem:[%s4081_s1 + $0x770] ss:$12 sps:$4 sm:$0xff]  }
  0xac   :  { %2065 = vmatprep.subr.bf16.mxu0 %v3071_v21  ;;  %v3127_v21 = vld [vmem:[%s4081_s1 + $0x530] ss:$12 sps:$4 sm:$0xff]  }
  0xad   :  { %2675 = vmatpush3.bf16.msra.mxu1 %v3068_v60  ;;  %v3130_v60 = vld [vmem:[%s4081_s1 + $0x5d8] ss:$12 sps:$4 sm:$0xff]  }
  0xae   :  { %2676 = vmatprep.subr.bf16.mxu1 %v3072_v23  ;;  %v3129_v23 = vld [vmem:[%s4081_s1 + $0x6b0] ss:$12 sps:$4 sm:$0xff]  }
  0xaf   :  { %2066 = vmatpush2.bf16.msra.mxu0 %v3069_v24  ;;  %v3132_v24 = vld [vmem:[%s4081_s1 + $0x758] ss:$12 sps:$4 sm:$0xff]  }
  0xb0   :  { %2067 = vmatprep.subr.bf16.mxu0 %v3076_v25  ;;  %v3131_v25 = vld [vmem:[%s4081_s1 + $0x518] ss:$12 sps:$4 sm:$0xff]  }
  0xb1   :  { %2677 = vmatpush3.bf16.msra.mxu1 %v3073_v26  ;;  %v3134_v26 = vld [vmem:[%s4081_s1 + $0x5c0] ss:$12 sps:$4 sm:$0xff]  }
  0xb2   :  { %2678 = vmatprep.subr.bf16.mxu1 %v3077_v27  ;;  %v3136_v27 = vld [vmem:[%s4081_s1 + $0x740] ss:$12 sps:$4 sm:$0xff]  }
  0xb3   :  { %2068 = vmatpush2.bf16.msra.mxu0 %v3074_v29  ;;  %v3140_v29 = vld [vmem:[%s4081_s1 + $0x728] ss:$12 sps:$4 sm:$0xff]  }
  0xb4   :  { %2069 = vmatprep.subr.bf16.mxu0 %v3081_v30  ;;  %v3139_v30 = vld [vmem:[%s4081_s1 + $0x4e8] ss:$12 sps:$4 sm:$0xff]  }
  0xb5   :  { %2679 = vmatpush3.bf16.msra.mxu1 %v3078_v31  ;;  %v3142_v31 = vld [vmem:[%s4081_s1 + $0x590] ss:$12 sps:$4 sm:$0xff]  }
  0xb6   :  { %2680 = vmatprep.subr.bf16.mxu1 %v3082_v5  ;;  %v3141_v5 = vld [vmem:[%s4081_s1 + $0x668] ss:$12 sps:$4 sm:$0xff]  }
  0xb7   :  { %2070 = vmatpush2.bf16.msra.mxu0 %v3079_v34  ;;  %v3144_v34 = vld [vmem:[%s4081_s1 + $0x710] ss:$12 sps:$4 sm:$0xff]  }
  0xb8   :  { %2071 = vmatprep.subr.bf16.mxu0 %v3086_v35  ;;  %v3143_v35 = vld [vmem:[%s4081_s1 + $0x4d0] ss:$12 sps:$4 sm:$0xff]  }
  0xb9   :  { %2681 = vmatpush3.bf16.msra.mxu1 %v3083_v36  ;;  %v3146_v36 = vld [vmem:[%s4081_s1 + $0x578] ss:$12 sps:$4 sm:$0xff]  }
  0xba   :  { %2682 = vmatprep.subr.bf16.mxu1 %v3087_v37  ;;  %v3145_v37 = vld [vmem:[%s4081_s1 + $0x650] ss:$12 sps:$4 sm:$0xff]  }
  0xbb   :  { %2072 = vmatpush2.bf16.msra.mxu0 %v3084_v38  ;;  %v3148_v38 = vld [vmem:[%s4081_s1 + $0x6f8] ss:$12 sps:$4 sm:$0xff]  }
  0xbc   :  { %2073 = vmatprep.subr.bf16.mxu0 %v3091_v39  ;;  %v3147_v39 = vld [vmem:[%s4081_s1 + $0x4b8] ss:$12 sps:$4 sm:$0xff]  }
  0xbd   :  { %2683 = vmatpush3.bf16.msra.mxu1 %v3088_v40  ;;  %v3150_v40 = vld [vmem:[%s4081_s1 + $0x560] ss:$12 sps:$4 sm:$0xff]  }
  0xbe   :  { %2684 = vmatprep.subr.bf16.mxu1 %v3092_v41  ;;  %v3149_v41 = vld [vmem:[%s4081_s1 + $0x638] ss:$12 sps:$4 sm:$0xff]  }
  0xbf   :  { %2074 = vmatpush2.bf16.msra.mxu0 %v3089_v43  ;;  %v3152_v43 = vld [vmem:[%s4081_s1 + $0x6e0] ss:$12 sps:$4 sm:$0xff]  }
  0xc0   :  { %2692 = vmatprep.subr.bf16.mxu0 %v3094_v44  ;;  %v3151_v44 = vld [vmem:[%s4081_s1 + $0x4a0] ss:$12 sps:$4 sm:$0xff]  }
  0xc1   :  { %2685 = vmatpush3.bf16.msra.mxu1 %v3093_v45  ;;  %v3154_v45 = vld [vmem:[%s4081_s1 + $0x548] ss:$12 sps:$4 sm:$0xff]  }
  0xc2   :  { %2076 = vmatmul.mubr.bf16.vlgmr.msra.gmra.mxu0 %v3734_v4  ;;  %2714 = vmatprep.subr.bf16.mxu1 %v3096_v46  ;;  %v3153_v46 = vld [vmem:[%s4081_s1 + $0x620] ss:$12 sps:$4 sm:$0xff]  }
  0xc3   :  { %2693 = vmatpush3.bf16.msra.mxu0 %v3095_v47  ;;  %2197 = vmatprep.mubr.bf16.mxu0 %v3364_v63  ;;  %v3103_v63 = vld [vmem:[%s4081_s1 + $0x200] ss:$12 sps:$4 sm:$0xff]   ;;  %v3156_v47 = vld [vmem:[%s4081_s1 + $0x6c8] ss:$12 sps:$4 sm:$0xff]  }
  0xc4   :  { %2158 = vmatmul.mubr.bf16.vlgmr.msra.gmra.mxu1 %v3403_v13  ;;  %2694 = vmatprep.subr.bf16.mxu0 %v3098_v49  ;;  %v3106_v13 = vld [vmem:[%s4081_s1 + $0x2a8] ss:$12 sps:$4 sm:$0xff]  }
  0xc5   :  { %2715 = vmatpush3.bf16.msra.mxu1 %v3097_v50  ;;  %2237 = vmatprep.mubr.bf16.mxu1 %v3412_v16  ;;  %v3105_v16 = vld [vmem:[%s4081_s1 + $0x380] ss:$12 sps:$4 sm:$0xff]   ;;  %v3155_v49 = vld [vmem:[%s4081_s1 + $0x488] ss:$12 sps:$4 sm:$0xff]   ;;  %v373_v50 = vsub.s32 0, %v3307_v42 }
  0xc6   :  { %2716 = vmatprep.subr.bf16.mxu1 %v3100_v51  ;;  %v4039_v51 = vld [vmem:[%s4083_s2] sm:$0x7] }
  0xc7   :  { %2695 = vmatpush3.bf16.msra.mxu0 %v3099_v52  ;;  %v3157_v52 = vld [vmem:[%s4081_s1 + $0x608] ss:$12 sps:$4 sm:$0xff]  }
  0xc8   :  { %2696 = vmatprep.subr.bf16.mxu0 %v3102_v53  ;;  %v377_v53 = vsub.s32 1, %v3307_v42 }
  0xc9   :  { %2717 = vmatpush3.bf16.msra.mxu1 %v3101_v54  ;;  %v374_v54 = vrot.slane %v4039_v51, %v373_v50 }
  0xca   :  { %2718 = vmatprep.subr.bf16.mxu1 %v3104_v55  ;;  %v3158_v55 = vld [vmem:[%s4081_s1 + $0x830] ss:$12 sps:$4 sm:$0xff]  }
  0xcb   :  { %2697 = vmatpush3.bf16.msra.mxu0 %v3103_v63  ;;  %v3168_v63 = vmov 0.0  }
  0xcc   :  { %2698 = vmatprep.subr.bf16.mxu0 %v3106_v13  ;;  %v378_v13 = vrot.slane %v4039_v51, %v377_v53 }
  0xcd   :  { %2719 = vmatpush3.bf16.msra.mxu1 %v3105_v16 }
  0xce   :  { %2720 = vmatprep.subr.bf16.mxu1 %v3108_v56 }
  0xcf   :  { %2699 = vmatpush3.bf16.msra.mxu0 %v3107_v57  ;;  %v3159_v57 = vld [vmem:[%s4081_s1 + $0x818] ss:$12 sps:$4 sm:$0xff]  }
  0xd0   :  { %2700 = vmatprep.subr.bf16.mxu0 %v3110_v58 }
  0xd1   :  { %2721 = vmatpush3.bf16.msra.mxu1 %v3109_v59 }
  0xd2   :  { %2722 = vmatprep.subr.bf16.mxu1 %v3112_v61 }
  0xd3   :  { %2701 = vmatpush3.bf16.msra.mxu0 %v3111_v62 }
  0xd4   :  { %2702 = vmatprep.subr.bf16.mxu0 %v3114_v0 }
  0xd5   :  { %2723 = vmatpush3.bf16.msra.mxu1 %v3113_v1 }
  0xd6   :  { %2724 = vmatprep.subr.bf16.mxu1 %v3116_v2 }
  0xd7   :  { %2703 = vmatpush3.bf16.msra.mxu0 %v3115_v3 }
  0xd8   :  { %2704 = vmatprep.subr.bf16.mxu0 %v3118_v6 }
  0xd9   :  { %2725 = vmatpush3.bf16.msra.mxu1 %v3117_v7 }
  0xda   :  { %2726 = vmatprep.subr.bf16.mxu1 %v3120_v8  ;;  %v3162_v8 = vld [vmem:[%s4081_s1 + $0x7d0] ss:$12 sps:$4 sm:$0xff]  }
  0xdb   :  { %2705 = vmatpush3.bf16.msra.mxu0 %v3119_v10  ;;  %v3163_v10 = vld [vmem:[%s4081_s1 + $0x7b8] ss:$12 sps:$4 sm:$0xff]  }
  0xdc   :  { %2706 = vmatprep.subr.bf16.mxu0 %v3122_v11  ;;  %v3164_v11 = vld [vmem:[%s4081_s1 + $0x7a0] ss:$12 sps:$4 sm:$0xff]  }
  0xdd   :  { %2727 = vmatpush3.bf16.msra.mxu1 %v3121_v12  ;;  %v3165_v12 = vld [vmem:[%s4081_s1 + $0x788] ss:$12 sps:$4 sm:$0xff]  }
  0xde   :  { %2728 = vmatprep.subr.bf16.mxu1 %v3124_v14 }
  0xdf   :  { %2707 = vmatpush3.bf16.msra.mxu0 %v3123_v15 }
  0xe0   :  { %2736 = vmatprep.subr.bf16.mxu0 %v3126_v17 }
  0xe1   :  { %2729 = vmatpush3.bf16.msra.mxu1 %v3125_v18 }
  0xe2   :  { %2198 = vmatmul.mubr.bf16.vlgmr.msra.gmra.mxu0 %v3422_v19  ;;  %2758 = vmatprep.subr.bf16.mxu1 %v3128_v20  ;;  %v3133_v19 = vld [vmem:[%s4081_s1 + $0x698] ss:$12 sps:$4 sm:$0xff]  }
  0xe3   :  { %2737 = vmatpush3.bf16.msra.mxu0 %v3127_v21  ;;  %2277 = vmatprep.mubr.bf16.mxu0 %v3432_v22  ;;  %v3135_v22 = vld [vmem:[%s4081_s1 + $0x500] ss:$12 sps:$4 sm:$0xff]  }
  0xe4   :  { %2238 = vmatmul.mubr.bf16.vlgmr.msra.gmra.mxu1 %v3621_v28  ;;  %2738 = vmatprep.subr.bf16.mxu0 %v3130_v60  ;;  %v3138_v28 = vld [vmem:[%s4081_s1 + $0x5a8] ss:$12 sps:$4 sm:$0xff]  }
  0xe5   :  { %2759 = vmatpush3.bf16.msra.mxu1 %v3129_v23  ;;  %2317 = vmatprep.mubr.bf16.mxu1 %v3636_v32  ;;  %v3137_v32 = vld [vmem:[%s4081_s1 + $0x680] ss:$12 sps:$4 sm:$0xff]  }
  0xe6   :  { %2760 = vmatprep.subr.bf16.mxu1 %v3132_v24 }
  0xe7   :  { %2739 = vmatpush3.bf16.msra.mxu0 %v3131_v25 }
  0xe8   :  { %2740 = vmatprep.subr.bf16.mxu0 %v3134_v26 }
  0xe9   :  { %2761 = vmatpush3.bf16.msra.mxu1 %v3133_v19 }
  0xea   :  { %2762 = vmatprep.subr.bf16.mxu1 %v3136_v27 }
  0xeb   :  { %2741 = vmatpush3.bf16.msra.mxu0 %v3135_v22 }
  0xec   :  { %2742 = vmatprep.subr.bf16.mxu0 %v3138_v28 }
  0xed   :  { %2763 = vmatpush3.bf16.msra.mxu1 %v3137_v32 }
  0xee   :  { %2764 = vmatprep.subr.bf16.mxu1 %v3140_v29 }
  0xef   :  { %2743 = vmatpush3.bf16.msra.mxu0 %v3139_v30 }
  0xf0   :  { %2744 = vmatprep.subr.bf16.mxu0 %v3142_v31 }
  0xf1   :  { %2765 = vmatpush3.bf16.msra.mxu1 %v3141_v5 }
  0xf2   :  { %2766 = vmatprep.subr.bf16.mxu1 %v3144_v34 }
  0xf3   :  { %2745 = vmatpush3.bf16.msra.mxu0 %v3143_v35 }
  0xf4   :  { %2746 = vmatprep.subr.bf16.mxu0 %v3146_v36 }
  0xf5   :  { %2767 = vmatpush3.bf16.msra.mxu1 %v3145_v37 }
  0xf6   :  { %2768 = vmatprep.subr.bf16.mxu1 %v3148_v38 }
  0xf7   :  { %2747 = vmatpush3.bf16.msra.mxu0 %v3147_v39 }
  0xf8   :  { %2748 = vmatprep.subr.bf16.mxu0 %v3150_v40 }
  0xf9   :  { %2769 = vmatpush3.bf16.msra.mxu1 %v3149_v41 }
  0xfa   :  { %2770 = vmatprep.subr.bf16.mxu1 %v3152_v43 }
  0xfb   :  { %2749 = vmatpush3.bf16.msra.mxu0 %v3151_v44 }
  0xfc   :  { %2750 = vmatprep.subr.bf16.mxu0 %v3154_v45 }
  0xfd   :  { %2771 = vmatpush3.bf16.msra.mxu1 %v3153_v46 }
  0xfe   :  { %2772 = vmatprep.subr.bf16.mxu1 %v3156_v47 }
  0xff   :  { %2751 = vmatpush3.bf16.msra.mxu0 %v3155_v49 }
 0x100   :  { %2789 = vmatprep.subr.bf16.mxu0 %v3168_v63 }
 0x101   :  { %2773 = vmatpush3.bf16.msra.mxu1 %v3157_v52 }
 0x102   :  { %v1913_v16 = vpop.f32.mrf.mxu0  ;;  %2278 = vmatmul.mubr.bf16.vlgmr.msra.gmra.mxu0 %v3640_v33  ;;  %v3160_v33 = vld [vmem:[%s4081_s1 + $0x800] ss:$12 sps:$4 sm:$0xff]  }
 0x103   :  { %v1914_v56 = vadd.f32 %v1913_v16, %v374_v54  ;;  %2790 = vmatpush3.bf16.msra.mxu0 %v3158_v55  ;;  %2805 = vmatprep.mubr.msk.bf16.mxu0 %vm3169_vm0, %v3168_v63 }
 0x104   :  { %v1915_v58 = vpop.f32.mrf.mxu0  ;;  %v1954_v59 = vpop.f32.mrf.mxu1  ;;  %2318 = vmatmul.mubr.bf16.vlgmr.msra.gmra.mxu1 %v3734_v4  ;;  %2791 = vmatprep.subr.bf16.mxu0 %v3168_v63  ;;  %v3161_v4 = vld [vmem:[%s4081_s1 + $0x7e8] ss:$12 sps:$4 sm:$0xff]  }
 0x105   :  { %v1916_v61 = vadd.f32 %v1915_v58, %v378_v13  ;;  %v1955_v62 = vadd.f32 %v1954_v59, %v1914_v56 }
 0x106   :  { %v1917_v0 = vpop.f32.mrf.mxu0  ;;  %v1956_v1 = vpop.f32.mrf.mxu1 }
 0x107   :  { %v1957_v2 = vadd.f32 %v1956_v1, %v1916_v61  ;;  %2792 = vmatpush3.bf16.msra.mxu0 %v3159_v57 }
 0x108   :  { %v1918_v3 = vpop.f32.mrf.mxu0  ;;  %2793 = vmatprep.subr.bf16.mxu0 %v3168_v63  ;;  %v1958_v6 = vpop.f32.mrf.mxu1 }
 0x10a   :  { %v1959_v7 = vpop.f32.mrf.mxu1 }
 0x10b   :  { %2794 = vmatpush3.bf16.msra.mxu0 %v3160_v33 }
 0x10c   :  { %2795 = vmatprep.subr.bf16.mxu0 %v3168_v63 }
 0x10f   :  { %2796 = vmatpush3.bf16.msra.mxu0 %v3161_v4 }
 0x110   :  { %2797 = vmatprep.subr.bf16.mxu0 %v3168_v63 }
 0x113   :  { %2798 = vmatpush3.bf16.msra.mxu0 %v3162_v8 }
 0x114   :  { %2799 = vmatprep.subr.bf16.mxu0 %v3168_v63 }
 0x117   :  { %2800 = vmatpush3.bf16.msra.mxu0 %v3163_v10 }
 0x118   :  { %2801 = vmatprep.subr.bf16.mxu0 %v3168_v63 }
 0x11b   :  { %2802 = vmatpush3.bf16.msra.mxu0 %v3164_v11 }
 0x11c   :  { %2803 = vmatprep.subr.bf16.mxu0 %v3168_v63 }
 0x11f   :  { %2804 = vmatpush3.bf16.msra.mxu0 %v3165_v12 }
 0x122   :  { %2806 = vmatmul.mubr.bf16.vlgmr.msra.gmra.mxu0 %v3747_v9 }
 0x142   :  { %v1995_v14 = vpop.f32.mrf.mxu0 }
 0x143   :  { %v1996_v15 = vadd.f32 %v1995_v14, %v1955_v62  ;;  %v381_v62 = vsub.s32 2, %v3307_v42 }
 0x144   :  { %v1997_v17 = vpop.f32.mrf.mxu0  ;;  %v2036_v18 = vpop.f32.mrf.mxu1 }
 0x145   :  { %v1998_v20 = vadd.f32 %v1997_v17, %v1957_v2  ;;  %v2037_v21 = vadd.f32 %v2036_v18, %v1996_v15  ;;  %v382_v0 = vrot.slane %v4039_v51, %v381_v62 }
 0x146   :  { %v1999_v60 = vpop.f32.mrf.mxu0  ;;  %v2038_v23 = vpop.f32.mrf.mxu1 }
 0x147   :  { %v2039_v24 = vadd.f32 %v2038_v23, %v1998_v20 }
 0x148   :  { %v2000_v25 = vpop.f32.mrf.mxu0  ;;  %v2040_v26 = vpop.f32.mrf.mxu1 }
 0x14a   :  { %v2041_v19 = vpop.f32.mrf.mxu1 }
 0x164   :  { %v2118_v27 = vpop.f32.mrf.mxu1 }
 0x166   :  { %v2120_v22 = vpop.f32.mrf.mxu1 }
 0x168   :  { %v2122_v28 = vpop.f32.mrf.mxu1 }
 0x16a   :  { %v2123_v32 = vpop.f32.mrf.mxu1 }
 0x182   :  { %v2077_v29 = vpop.f32.mrf.mxu0 }
 0x183   :  { %v2078_v30 = vadd.f32 %v2077_v29, %v2037_v21 }
 0x184   :  { %v2079_v31 = vpop.f32.mrf.mxu0  ;;  %v2686_v9 = vpop.f32.mrf.mxu1 }
 0x185   :  { %v2119_v5 = vadd.f32 %v2118_v27, %v2078_v30  ;;  %v2080_v34 = vadd.f32 %v2079_v31, %v2039_v24 }
 0x186   :  { %v2081_v35 = vpop.f32.mrf.mxu0  ;;  %v2687_v36 = vpop.f32.mrf.mxu1 }
 0x187   :  { %v2121_v37 = vadd.f32 %v2120_v22, %v2080_v34  ;;  %v2688_v38 = vadd.f32 %v2687_v36, %v2686_v9  ;;  %v2365_v41 = vmax.f32 %v2119_v5, 0.0 }
 0x188   :  { %v2082_v39 = vpop.f32.mrf.mxu0  ;;  %v2689_v40 = vpop.f32.mrf.mxu1 }
 0x189   :  { %v2366_v43 = vmax.f32 %v2121_v37, 0.0  ;;  %v2160_v2 = vadd.f32 %v2688_v38, %v382_v0 }
 0x18a   :  { %v2690_v44 = vpop.f32.mrf.mxu1 }
 0x18b   :  { %v2668_v45 = vpack.c.bf16 %v2366_v43, %v2365_v41 }
 0x18d   :  { %v2381_v42 = vrot.slane %v2668_v45, %v3322_v48 }
 0x1a2   :  { %v2708_v46 = vpop.f32.mrf.mxu0 }
 0x1a4   :  { %v2709_v47 = vpop.f32.mrf.mxu0  ;;  %v2730_v49 = vpop.f32.mrf.mxu1 }
 0x1a5   :  { %v2710_v1 = vadd.f32 %v2709_v47, %v2708_v46 }
 0x1a6   :  { %v2711_v50 = vpop.f32.mrf.mxu0  ;;  %v2731_v52 = vpop.f32.mrf.mxu1 }
 0x1a7   :  { %v2200_v33 = vadd.f32 %v2710_v1, %v2160_v2  ;;  %v2732_v3 = vadd.f32 %v2731_v52, %v2730_v49 }
 0x1a8   :  { %v2712_v53 = vpop.f32.mrf.mxu0  ;;  %v2733_v54 = vpop.f32.mrf.mxu1 }
 0x1a9   :  { %v2240_v7 = vadd.f32 %v2732_v3, %v2200_v33 }
 0x1aa   :  { %v2734_v55 = vpop.f32.mrf.mxu1 }
 0x1c2   :  { %v2752_v63 = vpop.f32.mrf.mxu0 }
 0x1c4   :  { %v2753_v13 = vpop.f32.mrf.mxu0  ;;  %v2774_v16 = vpop.f32.mrf.mxu1 }
 0x1c5   :  { %v2754_v6 = vadd.f32 %v2753_v13, %v2752_v63 }
 0x1c6   :  { %v2755_v56 = vpop.f32.mrf.mxu0  ;;  %v2775_v57 = vpop.f32.mrf.mxu1 }
 0x1c7   :  { %v2280_v4 = vadd.f32 %v2754_v6, %v2240_v7  ;;  %v2776_v8 = vadd.f32 %v2775_v57, %v2774_v16 }
 0x1c8   :  { %v2756_v58 = vpop.f32.mrf.mxu0  ;;  %v2777_v59 = vpop.f32.mrf.mxu1 }
 0x1c9   :  { %v2320_v10 = vadd.f32 %v2776_v8, %v2280_v4 }
 0x1ca   :  { %v2778_v61 = vpop.f32.mrf.mxu1 }
 0x1e2   :  { %v2359_v11 = vpop.f32.mrf.mxu0 }
 0x1e3   :  { %v2360_v12 = vadd.f32 %v2359_v11, %v2320_v10 }
 0x1e4   :  { %v2807_v14 = vpop.f32.mrf.mxu0 }
 0x1e5   :  { %v2367_v15 = vmax.f32 %v2360_v12, 0.0 }
 0x1e6   :  { %v2362_v17 = vpop.f32.mrf.mxu0 }
 0x1e7   :  { %v2370_v18 = vpack.c.bf16 %v2367_v15, %v2367_v15 }
 0x1e8   :  { %v2808_v20 = vpop.f32.mrf.mxu0 }
 0x1e9   :  { %v2388_v51 = vrot.slane %v2370_v18, %v3322_v48 }
 0x1eb   :  { %v2389_v21 = vcombine.low %v2381_v42, %v2388_v51 }
 0x1ed   :  { %2669 = vst.sshfl [vmem:[%s4084_s3] sm:$0x15 pattern:$0x73625140] %v2389_v21 }

// kernel: forward.41
= control target key start
LH: loop header
LB: loop body
LE: loop exit
PB: predicated region body
PF: predicated region fallthrough
CT: control target
= control target key end

     0   :  { %v337_v35 = vlaneseq  ;;  %v3955_v36 = vmov 1966171168   ;;  %s5790_s0 = inlined_call_operand.vmem [shape: bf16[2,2432], index: 0, kind: input, shape index: {}]   ;;  %s5791_s1 = inlined_call_operand.vmem [shape: bf16[2432,256], index: 1, kind: input, shape index: {}]   ;;  %s5792_s2 = inlined_call_operand.vmem [shape: f32[1,256], index: 2, kind: input, shape index: {}]   ;;  %s5793_s3 = inlined_call_operand.vmem [shape: bf16[2,256], index: 3, kind: input, shape index: {}]   ;;  %s5794_s4 = inlined_call_operand.vmem [shape: f32[2,2], index: 4, kind: input, shape index: {}]   ;;  %s5795_s5 = inlined_call_operand.vmem [shape: f32[256,1024], index: 5, kind: input, shape index: {}]   ;;  %s5796_s6 = inlined_call_operand.vmem [shape: f32[1,1024], index: 6, kind: input, shape index: {}]   ;;  %s5797_s7 = inlined_call_operand.hbm [shape: f32[2,1024], index: 7, kind: output, shape index: {}]  }
   0x1   :  { %v3475_v0 = vld [vmem:[%s5791_s1 + $0x74] ss:$8 sps:$4 sm:$0xff]   ;;  %v3477_v1 = vld [vmem:[%s5791_s1 + $0x70] ss:$8 sps:$4 sm:$0xff]   ;;  %v3481_v4 = vld [vmem:[%s5791_s1 + $0x64] ss:$8 sps:$4 sm:$0xff]   ;;  %v352_v37 = vunpack.c.l.s4 %v3955_v36 }
   0x2   :  { %2010 = vmatprep.subr.bf16.mxu0 %v3475_v0  ;;  %v3478_v2 = vld [vmem:[%s5791_s1 + $0x174] ss:$8 sps:$4 sm:$0xff]   ;;  %v3480_v3 = vld [vmem:[%s5791_s1 + $0x170] ss:$8 sps:$4 sm:$0xff]   ;;  %v3483_v5 = vld [vmem:[%s5791_s1 + $0x60] ss:$8 sps:$4 sm:$0xff]  }
   0x3   :  { %2011 = vmatpush1.bf16.msra.mxu0 %v3477_v1  ;;  %2051 = vmatprep.subr.bf16.mxu1 %v3478_v2  ;;  %v3484_v6 = vld [vmem:[%s5791_s1 + $0x164] ss:$8 sps:$4 sm:$0xff]   ;;  %v3486_v7 = vld [vmem:[%s5791_s1 + $0x160] ss:$8 sps:$4 sm:$0xff]   ;;  %v3487_v8 = vld [vmem:[%s5791_s1 + $0x54] ss:$8 sps:$4 sm:$0xff]   ;;  %v353_v43 = vunpack.c.0.s8 %v352_v37 }
   0x4   :  { %2052 = vmatpush1.bf16.msra.mxu1 %v3480_v3  ;;  %2012 = vmatprep.subr.bf16.mxu0 %v3481_v4  ;;  %v3489_v9 = vld [vmem:[%s5791_s1 + $0x50] ss:$8 sps:$4 sm:$0xff]   ;;  %v3490_v10 = vld [vmem:[%s5791_s1 + $0x154] ss:$8 sps:$4 sm:$0xff]   ;;  %v3493_v11 = vld [vmem:[%s5791_s1 + $0x44] ss:$8 sps:$4 sm:$0xff]  }
   0x5   :  { %2053 = vmatprep.subr.bf16.mxu1 %v3484_v6  ;;  %v3492_v12 = vld [vmem:[%s5791_s1 + $0x150] ss:$8 sps:$4 sm:$0xff]   ;;  %v3496_v13 = vld [vmem:[%s5791_s1 + $0x144] ss:$8 sps:$4 sm:$0xff]   ;;  %v3495_v14 = vld [vmem:[%s5791_s1 + $0x40] ss:$8 sps:$4 sm:$0xff]  }
   0x6   :  { %v3499_v15 = vld [vmem:[%s5791_s1 + $0x34] ss:$8 sps:$4 sm:$0xff]   ;;  %v3498_v16 = vld [vmem:[%s5791_s1 + $0x140] ss:$8 sps:$4 sm:$0xff]   ;;  %v3501_v18 = vld [vmem:[%s5791_s1 + $0x30] ss:$8 sps:$4 sm:$0xff]  }
   0x7   :  { %2013 = vmatpush1.bf16.msra.mxu0 %v3483_v5  ;;  %v3502_v17 = vld [vmem:[%s5791_s1 + $0x134] ss:$8 sps:$4 sm:$0xff]   ;;  %v3505_v19 = vld [vmem:[%s5791_s1 + $0x24] ss:$8 sps:$4 sm:$0xff]   ;;  %v3504_v20 = vld [vmem:[%s5791_s1 + $0x130] ss:$8 sps:$4 sm:$0xff]  }
   0x8   :  { %2014 = vmatprep.subr.bf16.mxu0 %v3487_v8  ;;  %2054 = vmatpush1.bf16.msra.mxu1 %v3486_v7  ;;  %v3508_v21 = vld [vmem:[%s5791_s1 + $0x124] ss:$8 sps:$4 sm:$0xff]   ;;  %v3507_v22 = vld [vmem:[%s5791_s1 + $0x20] ss:$8 sps:$4 sm:$0xff]   ;;  %v3511_v23 = vld [vmem:[%s5791_s1 + $0x14] ss:$8 sps:$4 sm:$0xff]  }
   0x9   :  { %2055 = vmatprep.subr.bf16.mxu1 %v3490_v10  ;;  %v3510_v24 = vld [vmem:[%s5791_s1 + $0x120] ss:$8 sps:$4 sm:$0xff]   ;;  %v3514_v25 = vld [vmem:[%s5791_s1 + $0x114] ss:$8 sps:$4 sm:$0xff]   ;;  %v3513_v26 = vld [vmem:[%s5791_s1 + $0x10] ss:$8 sps:$4 sm:$0xff]  }
   0xa   :  { %v3517_v27 = vld [vmem:[%s5791_s1 + $0x4] ss:$8 sps:$4 sm:$0xff]   ;;  %v3516_v28 = vld [vmem:[%s5791_s1 + $0x110] ss:$8 sps:$4 sm:$0xff]   ;;  %v3519_v30 = vld [vmem:[%s5791_s1] ss:$8 sps:$4 sm:$0xff]  }
   0xb   :  { %2015 = vmatpush1.bf16.msra.mxu0 %v3489_v9  ;;  %v3520_v29 = vld [vmem:[%s5791_s1 + $0x104] ss:$8 sps:$4 sm:$0xff]   ;;  %v3523_v31 = vld [vmem:[%s5791_s1 + $0xf4] ss:$8 sps:$4 sm:$0xff]   ;;  %v3522_v32 = vld [vmem:[%s5791_s1 + $0x100] ss:$8 sps:$4 sm:$0xff]  }
   0xc   :  { %2016 = vmatprep.subr.bf16.mxu0 %v3493_v11  ;;  %2056 = vmatpush1.bf16.msra.mxu1 %v3492_v12  ;;  %v3526_v33 = vld [vmem:[%s5791_s1 + $0x1f4] ss:$8 sps:$4 sm:$0xff]   ;;  %v3525_v34 = vld [vmem:[%s5791_s1 + $0xf0] ss:$8 sps:$4 sm:$0xff]   ;;  %v3529_v38 = vld [vmem:[%s5791_s1 + $0xe4] ss:$8 sps:$4 sm:$0xff]  }
   0xd   :  { %2057 = vmatprep.subr.bf16.mxu1 %v3496_v13  ;;  %v3528_v39 = vld [vmem:[%s5791_s1 + $0x1f0] ss:$8 sps:$4 sm:$0xff]   ;;  %v3532_v40 = vld [vmem:[%s5791_s1 + $0x1e4] ss:$8 sps:$4 sm:$0xff]   ;;  %v3531_v41 = vld [vmem:[%s5791_s1 + $0xe0] ss:$8 sps:$4 sm:$0xff]  }
   0xe   :  { %v4117_v42 = vshrl.u32 %v337_v35, 7  ;;  %v3535_v44 = vld [vmem:[%s5791_s1 + $0xd4] ss:$8 sps:$4 sm:$0xff]   ;;  %v3534_v45 = vld [vmem:[%s5791_s1 + $0x1e0] ss:$8 sps:$4 sm:$0xff]  }
   0xf   :  { %2017 = vmatpush1.bf16.msra.mxu0 %v3495_v14  ;;  %v3538_v46 = vld [vmem:[%s5791_s1 + $0x1d4] ss:$8 sps:$4 sm:$0xff]   ;;  %v3537_v47 = vld [vmem:[%s5791_s1 + $0xd0] ss:$8 sps:$4 sm:$0xff]   ;;  %v3541_v49 = vld [vmem:[%s5791_s1 + $0xc4] ss:$8 sps:$4 sm:$0xff]  }
  0x10   :  { %2018 = vmatprep.subr.bf16.mxu0 %v3499_v15  ;;  %2058 = vmatpush1.bf16.msra.mxu1 %v3498_v16  ;;  %v4132_v48 = vsub.s32 %v353_v43, %v4117_v42  ;;  %v3540_v50 = vld [vmem:[%s5791_s1 + $0x1d0] ss:$8 sps:$4 sm:$0xff]   ;;  %v3544_v51 = vld [vmem:[%s5791_s1 + $0x1c4] ss:$8 sps:$4 sm:$0xff]   ;;  %v3543_v53 = vld [vmem:[%s5791_s1 + $0xc0] ss:$8 sps:$4 sm:$0xff]  }
  0x11   :  { %2059 = vmatprep.subr.bf16.mxu1 %v3502_v17  ;;  %v28_v52 = vld [vmem:[%s5790_s0] sm:$0xff]  ;;  %v3547_v55 = vld [vmem:[%s5791_s1 + $0xb4] ss:$8 sps:$4 sm:$0xff]   ;;  %v3549_v59 = vld [vmem:[%s5791_s1 + $0xb0] ss:$8 sps:$4 sm:$0xff]  }
  0x12   :  { %v357_v54 = vrot.slane %v28_v52, %v4132_v48  ;;  %v3546_v56 = vld [vmem:[%s5791_s1 + $0x1c0] ss:$8 sps:$4 sm:$0xff]   ;;  %v3550_v58 = vld [vmem:[%s5791_s1 + $0x1b4] ss:$8 sps:$4 sm:$0xff]   ;;  %v3553_v61 = vld [vmem:[%s5791_s1 + $0xa4] ss:$8 sps:$4 sm:$0xff]   ;;  %v350_v63 = vcombine.high %v28_v52, %v28_v52 }
  0x13   :  { %2019 = vmatpush1.bf16.msra.mxu0 %v3501_v18  ;;  %v3552_v62 = vld [vmem:[%s5791_s1 + $0x1b0] ss:$8 sps:$4 sm:$0xff]   ;;  %v3556_v1 = vld [vmem:[%s5791_s1 + $0x1a4] ss:$8 sps:$4 sm:$0xff]   ;;  %v3555_v2 = vld [vmem:[%s5791_s1 + $0xa0] ss:$8 sps:$4 sm:$0xff]  }
  0x14   :  { %2020 = vmatprep.subr.bf16.mxu0 %v3505_v19  ;;  %2060 = vmatpush1.bf16.msra.mxu1 %v3504_v20  ;;  %v365_v57 = vcombine.high %v357_v54, %v357_v54  ;;  %v3559_v3 = vld [vmem:[%s5791_s1 + $0x94] ss:$8 sps:$4 sm:$0xff]   ;;  %v3558_v4 = vld [vmem:[%s5791_s1 + $0x1a0] ss:$8 sps:$4 sm:$0xff]   ;;  %v4182_v5 = vrot.slane %v350_v63, %v4132_v48  ;;  %v3561_v7 = vld [vmem:[%s5791_s1 + $0x90] ss:$8 sps:$4 sm:$0xff]   ;;  %v373_v13 = vrot.slane %v357_v54, %v4132_v48 }
  0x15   :  { %2061 = vmatprep.subr.bf16.mxu1 %v3508_v21  ;;  %v3562_v6 = vld [vmem:[%s5791_s1 + $0x194] ss:$8 sps:$4 sm:$0xff]   ;;  %v3565_v8 = vld [vmem:[%s5791_s1 + $0x84] ss:$8 sps:$4 sm:$0xff]   ;;  %v3564_v9 = vld [vmem:[%s5791_s1 + $0x190] ss:$8 sps:$4 sm:$0xff]  }
  0x16   :  { %v387_v60 = vrot.slane %v365_v57, %v4132_v48  ;;  %v366_v10 = vcombine.high %v4182_v5, %v4182_v5  ;;  %v3568_v11 = vld [vmem:[%s5791_s1 + $0x184] ss:$8 sps:$4 sm:$0xff]   ;;  %v3567_v12 = vld [vmem:[%s5791_s1 + $0x80] ss:$8 sps:$4 sm:$0xff]   ;;  %v3574_v14 = vld [vmem:[%s5791_s1 + $0x274] ss:$8 sps:$4 sm:$0xff]   ;;  %v395_v19 = vcombine.high %v373_v13, %v373_v13 }
  0x17   :  { %2021 = vmatpush1.bf16.msra.mxu0 %v3507_v22  ;;  %v3571_v15 = vld [vmem:[%s5791_s1 + $0x180] ss:$8 sps:$4 sm:$0xff]   ;;  %v3577_v17 = vld [vmem:[%s5791_s1 + $0x374] ss:$8 sps:$4 sm:$0xff]   ;;  %v3572_v18 = vld [vmem:[%s5791_s1 + $0x270] ss:$8 sps:$4 sm:$0xff]  }
  0x18   :  { %2022 = vmatprep.subr.bf16.mxu0 %v3511_v23  ;;  %2062 = vmatpush1.bf16.msra.mxu1 %v3510_v24  ;;  %v397_v0 = vcombine.high %v387_v60, %v387_v60  ;;  %v394_v16 = vrot.slane %v366_v10, %v4132_v48  ;;  %v3580_v20 = vld [vmem:[%s5791_s1 + $0x264] ss:$8 sps:$4 sm:$0xff]   ;;  %v3575_v21 = vld [vmem:[%s5791_s1 + $0x370] ss:$8 sps:$4 sm:$0xff]   ;;  %v3578_v24 = vld [vmem:[%s5791_s1 + $0x260] ss:$8 sps:$4 sm:$0xff]  }
  0x19   :  { %2063 = vmatprep.subr.bf16.mxu1 %v3514_v25  ;;  %2042 = vmatprep.mubr.bf16.mxu0 %v387_v60  ;;  %v3583_v23 = vld [vmem:[%s5791_s1 + $0x364] ss:$8 sps:$4 sm:$0xff]   ;;  %v3586_v25 = vld [vmem:[%s5791_s1 + $0x254] ss:$8 sps:$4 sm:$0xff]   ;;  %v3596_v36 = vld [vmem:[%s5791_s1 + $0x230] ss:$8 sps:$4 sm:$0xff]  }
  0x1a   :  { %2083 = vmatprep.mubr.bf16.mxu1 %v397_v0  ;;  %v398_v22 = vcombine.high %v394_v16, %v394_v16  ;;  %v3601_v35 = vld [vmem:[%s5791_s1 + $0x334] ss:$8 sps:$4 sm:$0xff]   ;;  %v3604_v37 = vld [vmem:[%s5791_s1 + $0x224] ss:$8 sps:$4 sm:$0xff]   ;;  %v3605_v43 = vld [vmem:[%s5791_s1 + $0x320] ss:$8 sps:$4 sm:$0xff]  }
  0x1b   :  { %2023 = vmatpush1.bf16.msra.mxu0 %v3513_v26  ;;  %v3581_v26 = vld [vmem:[%s5791_s1 + $0x360] ss:$8 sps:$4 sm:$0xff]   ;;  %v3620_v54 = vld [vmem:[%s5791_s1 + $0x2f0] ss:$8 sps:$4 sm:$0xff]   ;;  %v3631_v57 = vld [vmem:[%s5791_s1 + $0x3e4] ss:$8 sps:$4 sm:$0xff]  }
  0x1c   :  { %2024 = vmatprep.subr.bf16.mxu0 %v3517_v27  ;;  %2064 = vmatpush1.bf16.msra.mxu1 %v3516_v28  ;;  %v3589_v27 = vld [vmem:[%s5791_s1 + $0x354] ss:$8 sps:$4 sm:$0xff]   ;;  %v3584_v28 = vld [vmem:[%s5791_s1 + $0x250] ss:$8 sps:$4 sm:$0xff]   ;;  %v3617_v52 = vld [vmem:[%s5791_s1 + $0x300] ss:$8 sps:$4 sm:$0xff]  }
  0x1d   :  { %2065 = vmatprep.subr.bf16.mxu1 %v3520_v29  ;;  %v3592_v29 = vld [vmem:[%s5791_s1 + $0x244] ss:$8 sps:$4 sm:$0xff]   ;;  %v3629_v60 = vld [vmem:[%s5791_s1 + $0x3e0] ss:$8 sps:$4 sm:$0xff]   ;;  %v3635_v0 = vld [vmem:[%s5791_s1 + $0x3d0] ss:$8 sps:$4 sm:$0xff]  }
  0x1e   :  { %v3640_v63 = vld [vmem:[%s5791_s1 + $0x2c4] ss:$8 sps:$4 sm:$0xff]  }
  0x1f   :  { %2025 = vmatpush1.bf16.msra.mxu0 %v3519_v30  ;;  %v3587_v30 = vld [vmem:[%s5791_s1 + $0x350] ss:$8 sps:$4 sm:$0xff]   ;;  %v3655_v10 = vld [vmem:[%s5791_s1 + $0x3a4] ss:$8 sps:$4 sm:$0xff]  }
  0x20   :  { %2026 = vmatprep.subr.bf16.mxu0 %v3523_v31  ;;  %2066 = vmatpush1.bf16.msra.mxu1 %v3522_v32  ;;  %v3595_v31 = vld [vmem:[%s5791_s1 + $0x344] ss:$8 sps:$4 sm:$0xff]   ;;  %v3590_v32 = vld [vmem:[%s5791_s1 + $0x240] ss:$8 sps:$4 sm:$0xff]  }
  0x21   :  { %2067 = vmatprep.subr.bf16.mxu1 %v3526_v33  ;;  %v3598_v33 = vld [vmem:[%s5791_s1 + $0x234] ss:$8 sps:$4 sm:$0xff]  }
  0x23   :  { %2027 = vmatpush2.bf16.msra.mxu0 %v3525_v34  ;;  %v3593_v34 = vld [vmem:[%s5791_s1 + $0x340] ss:$8 sps:$4 sm:$0xff]  }
  0x24   :  { %2028 = vmatprep.subr.bf16.mxu0 %v3529_v38  ;;  %2068 = vmatpush2.bf16.msra.mxu1 %v3528_v39  ;;  %v3599_v38 = vld [vmem:[%s5791_s1 + $0x330] ss:$8 sps:$4 sm:$0xff]   ;;  %v3607_v39 = vld [vmem:[%s5791_s1 + $0x324] ss:$8 sps:$4 sm:$0xff]  }
  0x25   :  { %2069 = vmatprep.subr.bf16.mxu1 %v3532_v40  ;;  %v3602_v40 = vld [vmem:[%s5791_s1 + $0x220] ss:$8 sps:$4 sm:$0xff]  }
  0x27   :  { %2029 = vmatpush2.bf16.msra.mxu0 %v3531_v41  ;;  %v3610_v41 = vld [vmem:[%s5791_s1 + $0x214] ss:$8 sps:$4 sm:$0xff]  }
  0x28   :  { %2030 = vmatprep.subr.bf16.mxu0 %v3535_v44  ;;  %2070 = vmatpush2.bf16.msra.mxu1 %v3534_v45  ;;  %v3613_v44 = vld [vmem:[%s5791_s1 + $0x314] ss:$8 sps:$4 sm:$0xff]   ;;  %v3608_v45 = vld [vmem:[%s5791_s1 + $0x210] ss:$8 sps:$4 sm:$0xff]  }
  0x29   :  { %2071 = vmatprep.subr.bf16.mxu1 %v3538_v46  ;;  %v3616_v46 = vld [vmem:[%s5791_s1 + $0x204] ss:$8 sps:$4 sm:$0xff]  }
  0x2b   :  { %2031 = vmatpush2.bf16.msra.mxu0 %v3537_v47  ;;  %v3611_v47 = vld [vmem:[%s5791_s1 + $0x310] ss:$8 sps:$4 sm:$0xff]  }
  0x2c   :  { %2032 = vmatprep.subr.bf16.mxu0 %v3541_v49  ;;  %2072 = vmatpush2.bf16.msra.mxu1 %v3540_v50  ;;  %v3619_v49 = vld [vmem:[%s5791_s1 + $0x304] ss:$8 sps:$4 sm:$0xff]   ;;  %v3614_v50 = vld [vmem:[%s5791_s1 + $0x200] ss:$8 sps:$4 sm:$0xff]  }
  0x2d   :  { %2073 = vmatprep.subr.bf16.mxu1 %v3544_v51  ;;  %v3622_v51 = vld [vmem:[%s5791_s1 + $0x2f4] ss:$8 sps:$4 sm:$0xff]  }
  0x2f   :  { %2033 = vmatpush2.bf16.msra.mxu0 %v3543_v53  ;;  %v3625_v53 = vld [vmem:[%s5791_s1 + $0x3f4] ss:$8 sps:$4 sm:$0xff]  }
  0x30   :  { %2034 = vmatprep.subr.bf16.mxu0 %v3547_v55  ;;  %2074 = vmatpush2.bf16.msra.mxu1 %v3546_v56  ;;  %v3628_v55 = vld [vmem:[%s5791_s1 + $0x2e4] ss:$8 sps:$4 sm:$0xff]   ;;  %v3623_v56 = vld [vmem:[%s5791_s1 + $0x3f0] ss:$8 sps:$4 sm:$0xff]  }
  0x31   :  { %2075 = vmatprep.subr.bf16.mxu1 %v3550_v58  ;;  %v3626_v58 = vld [vmem:[%s5791_s1 + $0x2e0] ss:$8 sps:$4 sm:$0xff]  }
  0x33   :  { %2035 = vmatpush2.bf16.msra.mxu0 %v3549_v59  ;;  %v3634_v59 = vld [vmem:[%s5791_s1 + $0x2d4] ss:$8 sps:$4 sm:$0xff]  }
  0x34   :  { %2036 = vmatprep.subr.bf16.mxu0 %v3553_v61  ;;  %2076 = vmatpush2.bf16.msra.mxu1 %v3552_v62  ;;  %v3637_v61 = vld [vmem:[%s5791_s1 + $0x3d4] ss:$8 sps:$4 sm:$0xff]   ;;  %v3632_v62 = vld [vmem:[%s5791_s1 + $0x2d0] ss:$8 sps:$4 sm:$0xff]  }
  0x35   :  { %2077 = vmatprep.subr.bf16.mxu1 %v3556_v1  ;;  %v3643_v1 = vld [vmem:[%s5791_s1 + $0x3c4] ss:$8 sps:$4 sm:$0xff]  }
  0x37   :  { %2037 = vmatpush2.bf16.msra.mxu0 %v3555_v2  ;;  %v3638_v2 = vld [vmem:[%s5791_s1 + $0x2c0] ss:$8 sps:$4 sm:$0xff]  }
  0x38   :  { %2038 = vmatprep.subr.bf16.mxu0 %v3559_v3  ;;  %2078 = vmatpush2.bf16.msra.mxu1 %v3558_v4  ;;  %v3646_v3 = vld [vmem:[%s5791_s1 + $0x2b4] ss:$8 sps:$4 sm:$0xff]   ;;  %v3641_v4 = vld [vmem:[%s5791_s1 + $0x3c0] ss:$8 sps:$4 sm:$0xff]  }
  0x39   :  { %2079 = vmatprep.subr.bf16.mxu1 %v3562_v6  ;;  %v3649_v6 = vld [vmem:[%s5791_s1 + $0x3b4] ss:$8 sps:$4 sm:$0xff]  }
  0x3b   :  { %2039 = vmatpush2.bf16.msra.mxu0 %v3561_v7  ;;  %v3644_v7 = vld [vmem:[%s5791_s1 + $0x2b0] ss:$8 sps:$4 sm:$0xff]  }
  0x3c   :  { %2040 = vmatprep.subr.bf16.mxu0 %v3565_v8  ;;  %2080 = vmatpush2.bf16.msra.mxu1 %v3564_v9  ;;  %v3652_v8 = vld [vmem:[%s5791_s1 + $0x2a4] ss:$8 sps:$4 sm:$0xff]   ;;  %v3647_v9 = vld [vmem:[%s5791_s1 + $0x3b0] ss:$8 sps:$4 sm:$0xff]  }
  0x3d   :  { %2081 = vmatprep.subr.bf16.mxu1 %v3568_v11  ;;  %v3650_v11 = vld [vmem:[%s5791_s1 + $0x2a0] ss:$8 sps:$4 sm:$0xff]  }
  0x3f   :  { %2041 = vmatpush2.bf16.msra.mxu0 %v3567_v12  ;;  %v3658_v12 = vld [vmem:[%s5791_s1 + $0x294] ss:$8 sps:$4 sm:$0xff]  }
  0x40   :  { %2092 = vmatprep.subr.bf16.mxu0 %v3574_v14  ;;  %2082 = vmatpush2.bf16.msra.mxu1 %v3571_v15  ;;  %v3661_v14 = vld [vmem:[%s5791_s1 + $0x394] ss:$8 sps:$4 sm:$0xff]   ;;  %v3656_v15 = vld [vmem:[%s5791_s1 + $0x290] ss:$8 sps:$4 sm:$0xff]  }
  0x41   :  { %2133 = vmatprep.subr.bf16.mxu1 %v3577_v17  ;;  %v3659_v17 = vld [vmem:[%s5791_s1 + $0x390] ss:$8 sps:$4 sm:$0xff]  }
  0x42   :  { %2043 = vmatmul.mubr.bf16.vlgmr.msra.gmra.mxu0 %v373_v13  ;;  %v3653_v13 = vld [vmem:[%s5791_s1 + $0x3a0] ss:$8 sps:$4 sm:$0xff]  }
  0x43   :  { %2093 = vmatpush1.bf16.msra.mxu0 %v3572_v18  ;;  %2124 = vmatprep.mubr.bf16.mxu0 %v394_v16  ;;  %v3664_v16 = vld [vmem:[%s5791_s1 + $0x284] ss:$8 sps:$4 sm:$0xff]  }
  0x44   :  { %2084 = vmatmul.mubr.bf16.vlgmr.msra.gmra.mxu1 %v395_v19  ;;  %2094 = vmatprep.subr.bf16.mxu0 %v3580_v20  ;;  %v3667_v18 = vld [vmem:[%s5791_s1 + $0x384] ss:$8 sps:$4 sm:$0xff]   ;;  %v3662_v19 = vld [vmem:[%s5791_s1 + $0x280] ss:$8 sps:$4 sm:$0xff]   ;;  %v380_v20 = vrot.slane %v4182_v5, %v4132_v48 }
  0x45   :  { %2134 = vmatpush1.bf16.msra.mxu1 %v3575_v21  ;;  %2165 = vmatprep.mubr.bf16.mxu1 %v398_v22  ;;  %v3670_v21 = vld [vmem:[%s5791_s1 + $0x474] ss:$8 sps:$4 sm:$0xff]   ;;  %v3665_v22 = vld [vmem:[%s5791_s1 + $0x380] ss:$8 sps:$4 sm:$0xff]  }
  0x46   :  { %2135 = vmatprep.subr.bf16.mxu1 %v3583_v23  ;;  %v3673_v23 = vld [vmem:[%s5791_s1 + $0x574] ss:$8 sps:$4 sm:$0xff]   ;;  %v396_v5 = vcombine.high %v380_v20, %v380_v20 }
  0x47   :  { %2095 = vmatpush1.bf16.msra.mxu0 %v3578_v24  ;;  %v3668_v24 = vld [vmem:[%s5791_s1 + $0x470] ss:$8 sps:$4 sm:$0xff]  }
  0x48   :  { %2096 = vmatprep.subr.bf16.mxu0 %v3586_v25  ;;  %v3676_v25 = vld [vmem:[%s5791_s1 + $0x464] ss:$8 sps:$4 sm:$0xff]  }
  0x49   :  { %2136 = vmatpush1.bf16.msra.mxu1 %v3581_v26  ;;  %v4418_v26 = vld [vmem:[%s5790_s0 + $0x8] sm:$0xff] }
  0x4a   :  { %2137 = vmatprep.subr.bf16.mxu1 %v3589_v27  ;;  %v3671_v27 = vld [vmem:[%s5791_s1 + $0x570] ss:$8 sps:$4 sm:$0xff]  }
  0x4b   :  { %2097 = vmatpush1.bf16.msra.mxu0 %v3584_v28  ;;  %v4425_v28 = vrot.slane %v4418_v26, %v4132_v48 }
  0x4c   :  { %2098 = vmatprep.subr.bf16.mxu0 %v3592_v29  ;;  %v3679_v29 = vld [vmem:[%s5791_s1 + $0x564] ss:$8 sps:$4 sm:$0xff]  }
  0x4d   :  { %2138 = vmatpush1.bf16.msra.mxu1 %v3587_v30  ;;  %v3674_v30 = vld [vmem:[%s5791_s1 + $0x460] ss:$8 sps:$4 sm:$0xff]  }
  0x4e   :  { %2139 = vmatprep.subr.bf16.mxu1 %v3595_v31  ;;  %v414_v31 = vcombine.high %v4425_v28, %v4425_v28 }
  0x4f   :  { %2099 = vmatpush1.bf16.msra.mxu0 %v3590_v32  ;;  %v3682_v32 = vld [vmem:[%s5791_s1 + $0x454] ss:$8 sps:$4 sm:$0xff]  }
  0x50   :  { %2100 = vmatprep.subr.bf16.mxu0 %v3598_v33  ;;  %v3677_v33 = vld [vmem:[%s5791_s1 + $0x560] ss:$8 sps:$4 sm:$0xff]  }
  0x51   :  { %2140 = vmatpush1.bf16.msra.mxu1 %v3593_v34  ;;  %v436_v34 = vrot.slane %v414_v31, %v4132_v48  ;;  %v3758_v31 = vld [vmem:[%s5791_s1 + $0x480] ss:$8 sps:$4 sm:$0xff]  }
  0x52   :  { %2141 = vmatprep.subr.bf16.mxu1 %v3601_v35  ;;  %v3685_v35 = vld [vmem:[%s5791_s1 + $0x554] ss:$8 sps:$4 sm:$0xff]  }
  0x53   :  { %2101 = vmatpush1.bf16.msra.mxu0 %v3596_v36  ;;  %v3680_v36 = vld [vmem:[%s5791_s1 + $0x450] ss:$8 sps:$4 sm:$0xff]  }
  0x54   :  { %2102 = vmatprep.subr.bf16.mxu0 %v3604_v37  ;;  %v446_v37 = vcombine.high %v436_v34, %v436_v34 }
  0x55   :  { %2142 = vmatpush1.bf16.msra.mxu1 %v3599_v38  ;;  %v3688_v38 = vld [vmem:[%s5791_s1 + $0x444] ss:$8 sps:$4 sm:$0xff]  }
  0x56   :  { %2143 = vmatprep.subr.bf16.mxu1 %v3607_v39  ;;  %v3683_v39 = vld [vmem:[%s5791_s1 + $0x550] ss:$8 sps:$4 sm:$0xff]  }
  0x57   :  { %2103 = vmatpush1.bf16.msra.mxu0 %v3602_v40  ;;  %v3691_v40 = vld [vmem:[%s5791_s1 + $0x544] ss:$8 sps:$4 sm:$0xff]  }
  0x58   :  { %2104 = vmatprep.subr.bf16.mxu0 %v3610_v41  ;;  %v3686_v41 = vld [vmem:[%s5791_s1 + $0x440] ss:$8 sps:$4 sm:$0xff]  }
  0x59   :  { %2144 = vmatpush1.bf16.msra.mxu1 %v3605_v43  ;;  %v3694_v43 = vld [vmem:[%s5791_s1 + $0x434] ss:$8 sps:$4 sm:$0xff]  }
  0x5a   :  { %2145 = vmatprep.subr.bf16.mxu1 %v3613_v44  ;;  %v3689_v44 = vld [vmem:[%s5791_s1 + $0x540] ss:$8 sps:$4 sm:$0xff]  }
  0x5b   :  { %2105 = vmatpush1.bf16.msra.mxu0 %v3608_v45  ;;  %v3697_v45 = vld [vmem:[%s5791_s1 + $0x534] ss:$8 sps:$4 sm:$0xff]  }
  0x5c   :  { %2106 = vmatprep.subr.bf16.mxu0 %v3616_v46  ;;  %v3692_v46 = vld [vmem:[%s5791_s1 + $0x430] ss:$8 sps:$4 sm:$0xff]  }
  0x5d   :  { %2146 = vmatpush1.bf16.msra.mxu1 %v3611_v47  ;;  %v3700_v47 = vld [vmem:[%s5791_s1 + $0x424] ss:$8 sps:$4 sm:$0xff]  }
  0x5e   :  { %2147 = vmatprep.subr.bf16.mxu1 %v3619_v49  ;;  %v3695_v49 = vld [vmem:[%s5791_s1 + $0x530] ss:$8 sps:$4 sm:$0xff]  }
  0x5f   :  { %2107 = vmatpush1.bf16.msra.mxu0 %v3614_v50  ;;  %v3703_v50 = vld [vmem:[%s5791_s1 + $0x524] ss:$8 sps:$4 sm:$0xff]  }
  0x60   :  { %2108 = vmatprep.subr.bf16.mxu0 %v3622_v51  ;;  %v3698_v51 = vld [vmem:[%s5791_s1 + $0x420] ss:$8 sps:$4 sm:$0xff]  }
  0x61   :  { %2148 = vmatpush1.bf16.msra.mxu1 %v3617_v52  ;;  %v3706_v52 = vld [vmem:[%s5791_s1 + $0x414] ss:$8 sps:$4 sm:$0xff]  }
  0x62   :  { %2149 = vmatprep.subr.bf16.mxu1 %v3625_v53  ;;  %v3701_v53 = vld [vmem:[%s5791_s1 + $0x520] ss:$8 sps:$4 sm:$0xff]  }
  0x63   :  { %2109 = vmatpush2.bf16.msra.mxu0 %v3620_v54  ;;  %v3709_v54 = vld [vmem:[%s5791_s1 + $0x514] ss:$8 sps:$4 sm:$0xff]  }
  0x64   :  { %2110 = vmatprep.subr.bf16.mxu0 %v3628_v55  ;;  %v3704_v55 = vld [vmem:[%s5791_s1 + $0x410] ss:$8 sps:$4 sm:$0xff]  }
  0x65   :  { %2150 = vmatpush2.bf16.msra.mxu1 %v3623_v56  ;;  %v3712_v56 = vld [vmem:[%s5791_s1 + $0x404] ss:$8 sps:$4 sm:$0xff]  }
  0x66   :  { %2151 = vmatprep.subr.bf16.mxu1 %v3631_v57  ;;  %v3707_v57 = vld [vmem:[%s5791_s1 + $0x510] ss:$8 sps:$4 sm:$0xff]  }
  0x67   :  { %2111 = vmatpush2.bf16.msra.mxu0 %v3626_v58  ;;  %v3715_v58 = vld [vmem:[%s5791_s1 + $0x504] ss:$8 sps:$4 sm:$0xff]  }
  0x68   :  { %2112 = vmatprep.subr.bf16.mxu0 %v3634_v59  ;;  %v3710_v59 = vld [vmem:[%s5791_s1 + $0x400] ss:$8 sps:$4 sm:$0xff]  }
  0x69   :  { %2152 = vmatpush2.bf16.msra.mxu1 %v3629_v60  ;;  %v3718_v60 = vld [vmem:[%s5791_s1 + $0x4f4] ss:$8 sps:$4 sm:$0xff]  }
  0x6a   :  { %2153 = vmatprep.subr.bf16.mxu1 %v3637_v61  ;;  %v3713_v61 = vld [vmem:[%s5791_s1 + $0x500] ss:$8 sps:$4 sm:$0xff]  }
  0x6b   :  { %2113 = vmatpush2.bf16.msra.mxu0 %v3632_v62  ;;  %v3721_v62 = vld [vmem:[%s5791_s1 + $0x5f4] ss:$8 sps:$4 sm:$0xff]  }
  0x6c   :  { %2114 = vmatprep.subr.bf16.mxu0 %v3640_v63  ;;  %v3716_v63 = vld [vmem:[%s5791_s1 + $0x4f0] ss:$8 sps:$4 sm:$0xff]  }
  0x6d   :  { %2154 = vmatpush2.bf16.msra.mxu1 %v3635_v0  ;;  %v3724_v0 = vld [vmem:[%s5791_s1 + $0x4e4] ss:$8 sps:$4 sm:$0xff]  }
  0x6e   :  { %2155 = vmatprep.subr.bf16.mxu1 %v3643_v1  ;;  %v3719_v1 = vld [vmem:[%s5791_s1 + $0x5f0] ss:$8 sps:$4 sm:$0xff]  }
  0x6f   :  { %2115 = vmatpush2.bf16.msra.mxu0 %v3638_v2  ;;  %v3727_v2 = vld [vmem:[%s5791_s1 + $0x5e4] ss:$8 sps:$4 sm:$0xff]  }
  0x70   :  { %2116 = vmatprep.subr.bf16.mxu0 %v3646_v3  ;;  %v3722_v3 = vld [vmem:[%s5791_s1 + $0x4e0] ss:$8 sps:$4 sm:$0xff]  }
  0x71   :  { %2156 = vmatpush2.bf16.msra.mxu1 %v3641_v4  ;;  %v3730_v4 = vld [vmem:[%s5791_s1 + $0x4d4] ss:$8 sps:$4 sm:$0xff]  }
  0x72   :  { %2157 = vmatprep.subr.bf16.mxu1 %v3649_v6  ;;  %v3725_v6 = vld [vmem:[%s5791_s1 + $0x5e0] ss:$8 sps:$4 sm:$0xff]  }
  0x73   :  { %2117 = vmatpush2.bf16.msra.mxu0 %v3644_v7  ;;  %v3733_v7 = vld [vmem:[%s5791_s1 + $0x5d4] ss:$8 sps:$4 sm:$0xff]  }
  0x74   :  { %2118 = vmatprep.subr.bf16.mxu0 %v3652_v8  ;;  %v3728_v8 = vld [vmem:[%s5791_s1 + $0x4d0] ss:$8 sps:$4 sm:$0xff]  }
  0x75   :  { %2158 = vmatpush2.bf16.msra.mxu1 %v3647_v9  ;;  %v3736_v9 = vld [vmem:[%s5791_s1 + $0x4c4] ss:$8 sps:$4 sm:$0xff]  }
  0x76   :  { %2159 = vmatprep.subr.bf16.mxu1 %v3655_v10  ;;  %v3731_v10 = vld [vmem:[%s5791_s1 + $0x5d0] ss:$8 sps:$4 sm:$0xff]  }
  0x77   :  { %2119 = vmatpush2.bf16.msra.mxu0 %v3650_v11  ;;  %v3739_v11 = vld [vmem:[%s5791_s1 + $0x5c4] ss:$8 sps:$4 sm:$0xff]  }
  0x78   :  { %2120 = vmatprep.subr.bf16.mxu0 %v3658_v12  ;;  %v3734_v12 = vld [vmem:[%s5791_s1 + $0x4c0] ss:$8 sps:$4 sm:$0xff]  }
  0x79   :  { %2160 = vmatpush2.bf16.msra.mxu1 %v3653_v13  ;;  %v3742_v13 = vld [vmem:[%s5791_s1 + $0x4b4] ss:$8 sps:$4 sm:$0xff]  }
  0x7a   :  { %2161 = vmatprep.subr.bf16.mxu1 %v3661_v14  ;;  %v3737_v14 = vld [vmem:[%s5791_s1 + $0x5c0] ss:$8 sps:$4 sm:$0xff]  }
  0x7b   :  { %2121 = vmatpush2.bf16.msra.mxu0 %v3656_v15  ;;  %v3745_v15 = vld [vmem:[%s5791_s1 + $0x5b4] ss:$8 sps:$4 sm:$0xff]  }
  0x7c   :  { %2122 = vmatprep.subr.bf16.mxu0 %v3664_v16  ;;  %v3740_v16 = vld [vmem:[%s5791_s1 + $0x4b0] ss:$8 sps:$4 sm:$0xff]  }
  0x7d   :  { %2162 = vmatpush2.bf16.msra.mxu1 %v3659_v17  ;;  %v3748_v17 = vld [vmem:[%s5791_s1 + $0x4a4] ss:$8 sps:$4 sm:$0xff]  }
  0x7e   :  { %2163 = vmatprep.subr.bf16.mxu1 %v3667_v18  ;;  %v3743_v18 = vld [vmem:[%s5791_s1 + $0x5b0] ss:$8 sps:$4 sm:$0xff]  }
  0x7f   :  { %2123 = vmatpush2.bf16.msra.mxu0 %v3662_v19  ;;  %v399_v19 = vcombine.high %v4418_v26, %v4418_v26  ;;  %v3760_v26 = vld [vmem:[%s5791_s1 + $0x484] ss:$8 sps:$4 sm:$0xff]  }
  0x80   :  { %2174 = vmatprep.subr.bf16.mxu0 %v3670_v21  ;;  %v3746_v21 = vld [vmem:[%s5791_s1 + $0x4a0] ss:$8 sps:$4 sm:$0xff]  }
  0x81   :  { %2164 = vmatpush2.bf16.msra.mxu1 %v3665_v22  ;;  %v3754_v22 = vld [vmem:[%s5791_s1 + $0x494] ss:$8 sps:$4 sm:$0xff]  }
  0x82   :  { %2125 = vmatmul.mubr.bf16.vlgmr.msra.gmra.mxu0 %v380_v20  ;;  %2215 = vmatprep.subr.bf16.mxu1 %v3673_v23  ;;  %v3751_v20 = vld [vmem:[%s5791_s1 + $0x5a4] ss:$8 sps:$4 sm:$0xff]   ;;  %v3749_v23 = vld [vmem:[%s5791_s1 + $0x5a0] ss:$8 sps:$4 sm:$0xff]  }
  0x83   :  { %2175 = vmatpush1.bf16.msra.mxu0 %v3668_v24  ;;  %2206 = vmatprep.mubr.bf16.mxu0 %v436_v34  ;;  %v4589_v24 = vrot.slane %v399_v19, %v4132_v48  ;;  %v3761_v34 = vld [vmem:[%s5791_s1 + $0x580] ss:$8 sps:$4 sm:$0xff]  }
  0x84   :  { %2166 = vmatmul.mubr.bf16.vlgmr.msra.gmra.mxu1 %v396_v5  ;;  %2176 = vmatprep.subr.bf16.mxu0 %v3676_v25  ;;  %v3757_v5 = vld [vmem:[%s5791_s1 + $0x594] ss:$8 sps:$4 sm:$0xff]   ;;  %v3752_v25 = vld [vmem:[%s5791_s1 + $0x490] ss:$8 sps:$4 sm:$0xff]  }
  0x85   :  { %2216 = vmatpush1.bf16.msra.mxu1 %v3671_v27  ;;  %2247 = vmatprep.mubr.bf16.mxu1 %v446_v37  ;;  %v3755_v27 = vld [vmem:[%s5791_s1 + $0x590] ss:$8 sps:$4 sm:$0xff]  }
  0x86   :  { %2217 = vmatprep.subr.bf16.mxu1 %v3679_v29  ;;  %v415_v29 = vcombine.high %v4589_v24, %v4589_v24 }
  0x87   :  { %2177 = vmatpush1.bf16.msra.mxu0 %v3674_v30  ;;  %v3763_v30 = vld [vmem:[%s5791_s1 + $0x584] ss:$8 sps:$4 sm:$0xff]  }
  0x88   :  { %2178 = vmatprep.subr.bf16.mxu0 %v3682_v32  ;;  %v422_v32 = vrot.slane %v4425_v28, %v4132_v48  ;;  %v3764_v28 = vld [vmem:[%s5791_s1 + $0x670] ss:$8 sps:$4 sm:$0xff]  }
  0x89   :  { %2218 = vmatpush1.bf16.msra.mxu1 %v3677_v33  ;;  %v3766_v33 = vld [vmem:[%s5791_s1 + $0x674] ss:$8 sps:$4 sm:$0xff]  }
  0x8a   :  { %2219 = vmatprep.subr.bf16.mxu1 %v3685_v35  ;;  %v443_v35 = vrot.slane %v415_v29, %v4132_v48  ;;  %v444_v37 = vcombine.high %v422_v32, %v422_v32 }
  0x8b   :  { %2179 = vmatpush1.bf16.msra.mxu0 %v3680_v36  ;;  %v3769_v36 = vld [vmem:[%s5791_s1 + $0x774] ss:$8 sps:$4 sm:$0xff]  }
  0x8c   :  { %2180 = vmatprep.subr.bf16.mxu0 %v3688_v38  ;;  %v3772_v38 = vld [vmem:[%s5791_s1 + $0x664] ss:$8 sps:$4 sm:$0xff]  }
  0x8d   :  { %2220 = vmatpush1.bf16.msra.mxu1 %v3683_v39  ;;  %v3767_v39 = vld [vmem:[%s5791_s1 + $0x770] ss:$8 sps:$4 sm:$0xff]  }
  0x8e   :  { %2221 = vmatprep.subr.bf16.mxu1 %v3691_v40  ;;  %v447_v40 = vcombine.high %v443_v35, %v443_v35 }
  0x8f   :  { %2181 = vmatpush1.bf16.msra.mxu0 %v3686_v41  ;;  %v3775_v41 = vld [vmem:[%s5791_s1 + $0x764] ss:$8 sps:$4 sm:$0xff]  }
  0x90   :  { %2182 = vmatprep.subr.bf16.mxu0 %v3694_v43  ;;  %v3770_v43 = vld [vmem:[%s5791_s1 + $0x660] ss:$8 sps:$4 sm:$0xff]  }
  0x91   :  { %2222 = vmatpush1.bf16.msra.mxu1 %v3689_v44  ;;  %v3778_v44 = vld [vmem:[%s5791_s1 + $0x654] ss:$8 sps:$4 sm:$0xff]  }
  0x92   :  { %2223 = vmatprep.subr.bf16.mxu1 %v3697_v45  ;;  %v3773_v45 = vld [vmem:[%s5791_s1 + $0x760] ss:$8 sps:$4 sm:$0xff]  }
  0x93   :  { %2183 = vmatpush1.bf16.msra.mxu0 %v3692_v46  ;;  %v3781_v46 = vld [vmem:[%s5791_s1 + $0x754] ss:$8 sps:$4 sm:$0xff]  }
  0x94   :  { %2184 = vmatprep.subr.bf16.mxu0 %v3700_v47  ;;  %v3776_v47 = vld [vmem:[%s5791_s1 + $0x650] ss:$8 sps:$4 sm:$0xff]  }
  0x95   :  { %2224 = vmatpush1.bf16.msra.mxu1 %v3695_v49  ;;  %v3784_v49 = vld [vmem:[%s5791_s1 + $0x644] ss:$8 sps:$4 sm:$0xff]  }
  0x96   :  { %2225 = vmatprep.subr.bf16.mxu1 %v3703_v50  ;;  %v3779_v50 = vld [vmem:[%s5791_s1 + $0x750] ss:$8 sps:$4 sm:$0xff]  }
  0x97   :  { %2185 = vmatpush1.bf16.msra.mxu0 %v3698_v51  ;;  %v3787_v51 = vld [vmem:[%s5791_s1 + $0x744] ss:$8 sps:$4 sm:$0xff]  }
  0x98   :  { %2186 = vmatprep.subr.bf16.mxu0 %v3706_v52  ;;  %v3782_v52 = vld [vmem:[%s5791_s1 + $0x640] ss:$8 sps:$4 sm:$0xff]  }
  0x99   :  { %2226 = vmatpush1.bf16.msra.mxu1 %v3701_v53 }
  0x9a   :  { %2227 = vmatprep.subr.bf16.mxu1 %v3709_v54 }
  0x9b   :  { %2187 = vmatpush1.bf16.msra.mxu0 %v3704_v55 }
  0x9c   :  { %2188 = vmatprep.subr.bf16.mxu0 %v3712_v56 }
  0x9d   :  { %2228 = vmatpush1.bf16.msra.mxu1 %v3707_v57 }
  0x9e   :  { %2229 = vmatprep.subr.bf16.mxu1 %v3715_v58 }
  0x9f   :  { %2189 = vmatpush1.bf16.msra.mxu0 %v3710_v59 }
  0xa0   :  { %2190 = vmatprep.subr.bf16.mxu0 %v3718_v60 }
  0xa1   :  { %2230 = vmatpush1.bf16.msra.mxu1 %v3713_v61 }
  0xa2   :  { %2231 = vmatprep.subr.bf16.mxu1 %v3721_v62 }
  0xa3   :  { %2191 = vmatpush2.bf16.msra.mxu0 %v3716_v63 }
  0xa4   :  { %2192 = vmatprep.subr.bf16.mxu0 %v3724_v0 }
  0xa5   :  { %2232 = vmatpush2.bf16.msra.mxu1 %v3719_v1 }
  0xa6   :  { %2233 = vmatprep.subr.bf16.mxu1 %v3727_v2 }
  0xa7   :  { %2193 = vmatpush2.bf16.msra.mxu0 %v3722_v3 }
  0xa8   :  { %2194 = vmatprep.subr.bf16.mxu0 %v3730_v4 }
  0xa9   :  { %2234 = vmatpush2.bf16.msra.mxu1 %v3725_v6 }
  0xaa   :  { %2235 = vmatprep.subr.bf16.mxu1 %v3733_v7 }
  0xab   :  { %2195 = vmatpush2.bf16.msra.mxu0 %v3728_v8 }
  0xac   :  { %2196 = vmatprep.subr.bf16.mxu0 %v3736_v9 }
  0xad   :  { %2236 = vmatpush2.bf16.msra.mxu1 %v3731_v10 }
  0xae   :  { %2237 = vmatprep.subr.bf16.mxu1 %v3739_v11 }
  0xaf   :  { %2197 = vmatpush2.bf16.msra.mxu0 %v3734_v12 }
  0xb0   :  { %2198 = vmatprep.subr.bf16.mxu0 %v3742_v13 }
  0xb1   :  { %2238 = vmatpush2.bf16.msra.mxu1 %v3737_v14 }
  0xb2   :  { %2239 = vmatprep.subr.bf16.mxu1 %v3745_v15 }
  0xb3   :  { %2199 = vmatpush2.bf16.msra.mxu0 %v3740_v16 }
  0xb4   :  { %2200 = vmatprep.subr.bf16.mxu0 %v3748_v17 }
  0xb5   :  { %2240 = vmatpush2.bf16.msra.mxu1 %v3743_v18 }
  0xb6   :  { %2241 = vmatprep.subr.bf16.mxu1 %v3751_v20 }
  0xb7   :  { %2201 = vmatpush2.bf16.msra.mxu0 %v3746_v21 }
  0xb8   :  { %2202 = vmatprep.subr.bf16.mxu0 %v3754_v22 }
  0xb9   :  { %2242 = vmatpush2.bf16.msra.mxu1 %v3749_v23 }
  0xba   :  { %2243 = vmatprep.subr.bf16.mxu1 %v3757_v5 }
  0xbb   :  { %2203 = vmatpush2.bf16.msra.mxu0 %v3752_v25 }
  0xbc   :  { %2204 = vmatprep.subr.bf16.mxu0 %v3760_v26 }
  0xbd   :  { %2244 = vmatpush2.bf16.msra.mxu1 %v3755_v27 }
  0xbe   :  { %2245 = vmatprep.subr.bf16.mxu1 %v3763_v30 }
  0xbf   :  { %2205 = vmatpush2.bf16.msra.mxu0 %v3758_v31 }
  0xc0   :  { %2256 = vmatprep.subr.bf16.mxu0 %v3766_v33 }
  0xc1   :  { %2246 = vmatpush2.bf16.msra.mxu1 %v3761_v34 }
  0xc2   :  { %2207 = vmatmul.mubr.bf16.vlgmr.msra.gmra.mxu0 %v422_v32  ;;  %2297 = vmatprep.subr.bf16.mxu1 %v3769_v36 }
  0xc3   :  { %2257 = vmatpush1.bf16.msra.mxu0 %v3764_v28  ;;  %2288 = vmatprep.mubr.bf16.mxu0 %v443_v35 }
  0xc4   :  { %2248 = vmatmul.mubr.bf16.vlgmr.msra.gmra.mxu1 %v444_v37  ;;  %2258 = vmatprep.subr.bf16.mxu0 %v3772_v38 }
  0xc5   :  { %2298 = vmatpush1.bf16.msra.mxu1 %v3767_v39  ;;  %2329 = vmatprep.mubr.bf16.mxu1 %v447_v40 }
  0xc6   :  { %2299 = vmatprep.subr.bf16.mxu1 %v3775_v41 }
  0xc7   :  { %2259 = vmatpush1.bf16.msra.mxu0 %v3770_v43 }
  0xc8   :  { %2260 = vmatprep.subr.bf16.mxu0 %v3778_v44 }
  0xc9   :  { %2300 = vmatpush1.bf16.msra.mxu1 %v3773_v45 }
  0xca   :  { %2301 = vmatprep.subr.bf16.mxu1 %v3781_v46 }
  0xcb   :  { %2261 = vmatpush1.bf16.msra.mxu0 %v3776_v47 }
  0xcc   :  { %12 = vsyncpa [#allocation3], 0  ;;  %2262 = vmatprep.subr.bf16.mxu0 %v3784_v49  ;;  %v3790_v53 = vld [vmem:[%s5791_s1 + $0x634] ss:$8 sps:$4 sm:$0xff]   ;;  %v3785_v54 = vld [vmem:[%s5791_s1 + $0x740] ss:$8 sps:$4 sm:$0xff]   ;;  %v429_v43 = vrot.slane %v4589_v24, %v4132_v48 }
  0xcd   :  { %2302 = vmatpush1.bf16.msra.mxu1 %v3779_v50  ;;  %v3793_v55 = vld [vmem:[%s5791_s1 + $0x734] ss:$8 sps:$4 sm:$0xff]   ;;  %v3788_v56 = vld [vmem:[%s5791_s1 + $0x630] ss:$8 sps:$4 sm:$0xff]   ;;  %v3796_v57 = vld [vmem:[%s5791_s1 + $0x624] ss:$8 sps:$4 sm:$0xff]  }
  0xce   :  { %2303 = vmatprep.subr.bf16.mxu1 %v3787_v51  ;;  %v3791_v58 = vld [vmem:[%s5791_s1 + $0x730] ss:$8 sps:$4 sm:$0xff]   ;;  %v3799_v59 = vld [vmem:[%s5791_s1 + $0x724] ss:$8 sps:$4 sm:$0xff]   ;;  %v3794_v60 = vld [vmem:[%s5791_s1 + $0x620] ss:$8 sps:$4 sm:$0xff]   ;;  %v445_v51 = vcombine.high %v429_v43, %v429_v43 }
  0xcf   :  { %2263 = vmatpush1.bf16.msra.mxu0 %v3782_v52  ;;  %v3802_v61 = vld [vmem:[%s5791_s1 + $0x614] ss:$8 sps:$4 sm:$0xff]   ;;  %v3797_v62 = vld [vmem:[%s5791_s1 + $0x720] ss:$8 sps:$4 sm:$0xff]   ;;  %v3800_v0 = vld [vmem:[%s5791_s1 + $0x610] ss:$8 sps:$4 sm:$0xff]  }
  0xd0   :  { %2264 = vmatprep.subr.bf16.mxu0 %v3790_v53  ;;  %v3805_v63 = vld [vmem:[%s5791_s1 + $0x714] ss:$8 sps:$4 sm:$0xff]   ;;  %v3808_v1 = vld [vmem:[%s5791_s1 + $0x604] ss:$8 sps:$4 sm:$0xff]   ;;  %v3803_v2 = vld [vmem:[%s5791_s1 + $0x710] ss:$8 sps:$4 sm:$0xff]  }
  0xd1   :  { %2304 = vmatpush1.bf16.msra.mxu1 %v3785_v54  ;;  %v3811_v3 = vld [vmem:[%s5791_s1 + $0x704] ss:$8 sps:$4 sm:$0xff]   ;;  %v3806_v4 = vld [vmem:[%s5791_s1 + $0x600] ss:$8 sps:$4 sm:$0xff]   ;;  %v3814_v6 = vld [vmem:[%s5791_s1 + $0x6f4] ss:$8 sps:$4 sm:$0xff]  }
  0xd2   :  { %2305 = vmatprep.subr.bf16.mxu1 %v3793_v55  ;;  %v3809_v7 = vld [vmem:[%s5791_s1 + $0x700] ss:$8 sps:$4 sm:$0xff]   ;;  %v3817_v8 = vld [vmem:[%s5791_s1 + $0x7f4] ss:$8 sps:$4 sm:$0xff]   ;;  %v3812_v9 = vld [vmem:[%s5791_s1 + $0x6f0] ss:$8 sps:$4 sm:$0xff]  }
  0xd3   :  { %2265 = vmatpush1.bf16.msra.mxu0 %v3788_v56  ;;  %v3820_v10 = vld [vmem:[%s5791_s1 + $0x6e4] ss:$8 sps:$4 sm:$0xff]   ;;  %v3815_v11 = vld [vmem:[%s5791_s1 + $0x7f0] ss:$8 sps:$4 sm:$0xff]   ;;  %v3818_v13 = vld [vmem:[%s5791_s1 + $0x6e0] ss:$8 sps:$4 sm:$0xff]  }
  0xd4   :  { %2266 = vmatprep.subr.bf16.mxu0 %v3796_v57  ;;  %v3823_v12 = vld [vmem:[%s5791_s1 + $0x7e4] ss:$8 sps:$4 sm:$0xff]   ;;  %v3826_v14 = vld [vmem:[%s5791_s1 + $0x6d4] ss:$8 sps:$4 sm:$0xff]   ;;  %v3821_v15 = vld [vmem:[%s5791_s1 + $0x7e0] ss:$8 sps:$4 sm:$0xff]  }
  0xd5   :  { %2306 = vmatpush1.bf16.msra.mxu1 %v3791_v58  ;;  %v3829_v16 = vld [vmem:[%s5791_s1 + $0x7d4] ss:$8 sps:$4 sm:$0xff]   ;;  %v3824_v17 = vld [vmem:[%s5791_s1 + $0x6d0] ss:$8 sps:$4 sm:$0xff]   ;;  %v3832_v18 = vld [vmem:[%s5791_s1 + $0x6c4] ss:$8 sps:$4 sm:$0xff]  }
  0xd6   :  { %2307 = vmatprep.subr.bf16.mxu1 %v3799_v59  ;;  %v3827_v19 = vld [vmem:[%s5791_s1 + $0x7d0] ss:$8 sps:$4 sm:$0xff]   ;;  %v3835_v20 = vld [vmem:[%s5791_s1 + $0x7c4] ss:$8 sps:$4 sm:$0xff]   ;;  %v3830_v21 = vld [vmem:[%s5791_s1 + $0x6c0] ss:$8 sps:$4 sm:$0xff]  }
  0xd7   :  { %2267 = vmatpush1.bf16.msra.mxu0 %v3794_v60  ;;  %v3838_v22 = vld [vmem:[%s5791_s1 + $0x6b4] ss:$8 sps:$4 sm:$0xff]   ;;  %v3833_v23 = vld [vmem:[%s5791_s1 + $0x7c0] ss:$8 sps:$4 sm:$0xff]   ;;  %v3836_v25 = vld [vmem:[%s5791_s1 + $0x6b0] ss:$8 sps:$4 sm:$0xff]  }
  0xd8   :  { %2268 = vmatprep.subr.bf16.mxu0 %v3802_v61  ;;  %v3841_v5 = vld [vmem:[%s5791_s1 + $0x7b4] ss:$8 sps:$4 sm:$0xff]   ;;  %v3844_v26 = vld [vmem:[%s5791_s1 + $0x6a4] ss:$8 sps:$4 sm:$0xff]   ;;  %v3839_v27 = vld [vmem:[%s5791_s1 + $0x7b0] ss:$8 sps:$4 sm:$0xff]  }
  0xd9   :  { %2308 = vmatpush1.bf16.msra.mxu1 %v3797_v62  ;;  %v3847_v29 = vld [vmem:[%s5791_s1 + $0x7a4] ss:$8 sps:$4 sm:$0xff]   ;;  %v3842_v30 = vld [vmem:[%s5791_s1 + $0x6a0] ss:$8 sps:$4 sm:$0xff]   ;;  %v3850_v31 = vld [vmem:[%s5791_s1 + $0x694] ss:$8 sps:$4 sm:$0xff]  }
  0xda   :  { %2309 = vmatprep.subr.bf16.mxu1 %v3805_v63  ;;  %v3845_v32 = vld [vmem:[%s5791_s1 + $0x7a0] ss:$8 sps:$4 sm:$0xff]   ;;  %v3853_v33 = vld [vmem:[%s5791_s1 + $0x794] ss:$8 sps:$4 sm:$0xff]   ;;  %v3848_v34 = vld [vmem:[%s5791_s1 + $0x690] ss:$8 sps:$4 sm:$0xff]  }
  0xdb   :  { %2269 = vmatpush1.bf16.msra.mxu0 %v3800_v0  ;;  %v3856_v35 = vld [vmem:[%s5791_s1 + $0x684] ss:$8 sps:$4 sm:$0xff]   ;;  %v3851_v36 = vld [vmem:[%s5791_s1 + $0x790] ss:$8 sps:$4 sm:$0xff]   ;;  %v3854_v38 = vld [vmem:[%s5791_s1 + $0x680] ss:$8 sps:$4 sm:$0xff]  }
  0xdc   :  { %2270 = vmatprep.subr.bf16.mxu0 %v3808_v1  ;;  %v3859_v28 = vld [vmem:[%s5791_s1 + $0x784] ss:$8 sps:$4 sm:$0xff]   ;;  %v4806_v37 = vld.sshfl [vmem:[%s5790_s0 + $0x10] sm:$0x13 pattern:$0x75316420] }
  0xdd   :  { %2310 = vmatpush1.bf16.msra.mxu1 %v3803_v2  ;;  %v339_v39 = vsub.s32 0, %v4117_v42  ;;  %v455_v40 = vcombine.high %v4806_v37, %v4806_v37  ;;  %v335_v41 = vld [vmem:[%s5792_s2] sm:$0x3]  ;;  %v3863_v44 = vld [vmem:[%s5791_s1 + $0x874] ss:$8 sps:$4 sm:$0xff]   ;;  %v343_v46 = vsub.s32 1, %v4117_v42 }
  0xde   :  { %2311 = vmatprep.subr.bf16.mxu1 %v3811_v3  ;;  %v3857_v45 = vld [vmem:[%s5791_s1 + $0x780] ss:$8 sps:$4 sm:$0xff]   ;;  %v3887_v47 = vld [vmem:[%s5791_s1 + $0x974] ss:$8 sps:$4 sm:$0xff]   ;;  %v3861_v49 = vld [vmem:[%s5791_s1 + $0x870] ss:$8 sps:$4 sm:$0xff]  }
  0xdf   :  { %2271 = vmatpush1.bf16.msra.mxu0 %v3806_v4  ;;  %v340_v24 = vrot.slane %v335_v41, %v339_v39  ;;  %v469_v50 = vrot.slane %v455_v40, %v4132_v48  ;;  %v3866_v52 = vld [vmem:[%s5791_s1 + $0x864] ss:$8 sps:$4 sm:$0xff]   ;;  %v344_v53 = vrot.slane %v335_v41, %v343_v46  ;;  %v3885_v54 = vld [vmem:[%s5791_s1 + $0x970] ss:$8 sps:$4 sm:$0xff]   ;;  %v3864_v58 = vld [vmem:[%s5791_s1 + $0x860] ss:$8 sps:$4 sm:$0xff]  }
  0xe0   :  { %2272 = vmatprep.subr.bf16.mxu0 %v3814_v6  ;;  %v3893_v56 = vld [vmem:[%s5791_s1 + $0x964] ss:$8 sps:$4 sm:$0xff]   ;;  %v3869_v61 = vld [vmem:[%s5791_s1 + $0x854] ss:$8 sps:$4 sm:$0xff]   ;;  %v3891_v0 = vld [vmem:[%s5791_s1 + $0x960] ss:$8 sps:$4 sm:$0xff]  }
  0xe1   :  { %2312 = vmatpush1.bf16.msra.mxu1 %v3809_v7  ;;  %v3956_v1 = vmov 0   ;;  %v3899_v4 = vld [vmem:[%s5791_s1 + $0x954] ss:$8 sps:$4 sm:$0xff]   ;;  %v3867_v7 = vld [vmem:[%s5791_s1 + $0x850] ss:$8 sps:$4 sm:$0xff]   ;;  %vm2442_vm0 = vcmask 1041408  }
  0xe2   :  { %2313 = vmatprep.subr.bf16.mxu1 %v3817_v8  ;;  %v3908_v40 = vld [vmem:[%s5791_s1 + $0x8c4] ss:$8 sps:$4 sm:$0xff]   ;;  %v3906_v41 = vld [vmem:[%s5791_s1 + $0x8c0] ss:$8 sps:$4 sm:$0xff]   ;;  %vm2438_vm1 = vcmask 15360  }
  0xe3   :  { %2273 = vmatpush2.bf16.msra.mxu0 %v3812_v9  ;;  %v3872_v9 = vld [vmem:[%s5791_s1 + $0x844] ss:$8 sps:$4 sm:$0xff]  }
  0xe4   :  { %2274 = vmatprep.subr.bf16.mxu0 %v3820_v10 }
  0xe5   :  { %2314 = vmatpush2.bf16.msra.mxu1 %v3815_v11  ;;  %v3897_v11 = vld [vmem:[%s5791_s1 + $0x950] ss:$8 sps:$4 sm:$0xff]  }
  0xe6   :  { %2315 = vmatprep.subr.bf16.mxu1 %v3823_v12 }
  0xe7   :  { %2275 = vmatpush2.bf16.msra.mxu0 %v3818_v13  ;;  %v3905_v13 = vld [vmem:[%s5791_s1 + $0x944] ss:$8 sps:$4 sm:$0xff]  }
  0xe8   :  { %2276 = vmatprep.subr.bf16.mxu0 %v3826_v14  ;;  %v3870_v14 = vld [vmem:[%s5791_s1 + $0x840] ss:$8 sps:$4 sm:$0xff]  }
  0xe9   :  { %2316 = vmatpush2.bf16.msra.mxu1 %v3821_v15  ;;  %v3875_v15 = vld [vmem:[%s5791_s1 + $0x834] ss:$8 sps:$4 sm:$0xff]  }
  0xea   :  { %2317 = vmatprep.subr.bf16.mxu1 %v3829_v16  ;;  %v3903_v16 = vld [vmem:[%s5791_s1 + $0x940] ss:$8 sps:$4 sm:$0xff]  }
  0xeb   :  { %2277 = vmatpush2.bf16.msra.mxu0 %v3824_v17  ;;  %v3911_v17 = vld [vmem:[%s5791_s1 + $0x934] ss:$8 sps:$4 sm:$0xff]  }
  0xec   :  { %2278 = vmatprep.subr.bf16.mxu0 %v3832_v18  ;;  %v3873_v18 = vld [vmem:[%s5791_s1 + $0x830] ss:$8 sps:$4 sm:$0xff]  }
  0xed   :  { %2318 = vmatpush2.bf16.msra.mxu1 %v3827_v19  ;;  %v3878_v19 = vld [vmem:[%s5791_s1 + $0x824] ss:$8 sps:$4 sm:$0xff]  }
  0xee   :  { %2319 = vmatprep.subr.bf16.mxu1 %v3835_v20  ;;  %v3909_v20 = vld [vmem:[%s5791_s1 + $0x930] ss:$8 sps:$4 sm:$0xff]  }
  0xef   :  { %2279 = vmatpush2.bf16.msra.mxu0 %v3830_v21  ;;  %v3917_v21 = vld [vmem:[%s5791_s1 + $0x924] ss:$8 sps:$4 sm:$0xff]  }
  0xf0   :  { %2280 = vmatprep.subr.bf16.mxu0 %v3838_v22  ;;  %v3876_v22 = vld [vmem:[%s5791_s1 + $0x820] ss:$8 sps:$4 sm:$0xff]  }
  0xf1   :  { %2320 = vmatpush2.bf16.msra.mxu1 %v3833_v23  ;;  %v3881_v23 = vld [vmem:[%s5791_s1 + $0x814] ss:$8 sps:$4 sm:$0xff]  }
  0xf2   :  { %2321 = vmatprep.subr.bf16.mxu1 %v3841_v5  ;;  %v3915_v5 = vld [vmem:[%s5791_s1 + $0x920] ss:$8 sps:$4 sm:$0xff]  }
  0xf3   :  { %2281 = vmatpush2.bf16.msra.mxu0 %v3836_v25  ;;  %v3923_v25 = vld [vmem:[%s5791_s1 + $0x914] ss:$8 sps:$4 sm:$0xff]  }
  0xf4   :  { %2282 = vmatprep.subr.bf16.mxu0 %v3844_v26  ;;  %v3879_v26 = vld [vmem:[%s5791_s1 + $0x810] ss:$8 sps:$4 sm:$0xff]  }
  0xf5   :  { %2322 = vmatpush2.bf16.msra.mxu1 %v3839_v27  ;;  %v3884_v27 = vld [vmem:[%s5791_s1 + $0x804] ss:$8 sps:$4 sm:$0xff]  }
  0xf6   :  { %2323 = vmatprep.subr.bf16.mxu1 %v3847_v29  ;;  %v3921_v29 = vld [vmem:[%s5791_s1 + $0x910] ss:$8 sps:$4 sm:$0xff]  }
  0xf7   :  { %2283 = vmatpush2.bf16.msra.mxu0 %v3842_v30  ;;  %v3929_v30 = vld [vmem:[%s5791_s1 + $0x904] ss:$8 sps:$4 sm:$0xff]  }
  0xf8   :  { %2284 = vmatprep.subr.bf16.mxu0 %v3850_v31  ;;  %v3882_v31 = vld [vmem:[%s5791_s1 + $0x800] ss:$8 sps:$4 sm:$0xff]  }
  0xf9   :  { %2324 = vmatpush2.bf16.msra.mxu1 %v3845_v32  ;;  %v3890_v32 = vld [vmem:[%s5791_s1 + $0x8f4] ss:$8 sps:$4 sm:$0xff]  }
  0xfa   :  { %2325 = vmatprep.subr.bf16.mxu1 %v3853_v33  ;;  %v462_v33 = vrot.slane %v4806_v37, %v4132_v48  ;;  %v3894_v48 = vld [vmem:[%s5791_s1 + $0x8e0] ss:$8 sps:$4 sm:$0xff]   ;;  %v3902_v37 = vld [vmem:[%s5791_s1 + $0x8d4] ss:$8 sps:$4 sm:$0xff]  }
  0xfb   :  { %2285 = vmatpush2.bf16.msra.mxu0 %v3848_v34  ;;  %v3927_v34 = vld [vmem:[%s5791_s1 + $0x900] ss:$8 sps:$4 sm:$0xff]  }
  0xfc   :  { %2286 = vmatprep.subr.bf16.mxu0 %v3856_v35  ;;  %v3888_v35 = vld [vmem:[%s5791_s1 + $0x8f0] ss:$8 sps:$4 sm:$0xff]  }
  0xfd   :  { %2326 = vmatpush2.bf16.msra.mxu1 %v3851_v36  ;;  %v3896_v36 = vld [vmem:[%s5791_s1 + $0x8e4] ss:$8 sps:$4 sm:$0xff]  }
  0xfe   :  { %2327 = vmatprep.subr.bf16.mxu1 %v3859_v28  ;;  %v470_v28 = vcombine.high %v462_v33, %v462_v33 }
  0xff   :  { %2287 = vmatpush2.bf16.msra.mxu0 %v3854_v38  ;;  %v3900_v38 = vld [vmem:[%s5791_s1 + $0x8d0] ss:$8 sps:$4 sm:$0xff]  }
 0x100   :  { %2338 = vmatprep.subr.bf16.mxu0 %v3863_v44  ;;  %v3912_v44 = vld [vmem:[%s5791_s1 + $0x8b0] ss:$8 sps:$4 sm:$0xff]  }
 0x101   :  { %2328 = vmatpush2.bf16.msra.mxu1 %v3857_v45  ;;  %v3920_v45 = vld [vmem:[%s5791_s1 + $0x8a4] ss:$8 sps:$4 sm:$0xff]  }
 0x102   :  { %v2044_v55 = vpop.f32.mrf.mxu0  ;;  %2289 = vmatmul.mubr.bf16.vlgmr.msra.gmra.mxu0 %v429_v43  ;;  %2379 = vmatprep.subr.bf16.mxu1 %v3887_v47  ;;  %v3914_v43 = vld [vmem:[%s5791_s1 + $0x8b4] ss:$8 sps:$4 sm:$0xff]   ;;  %v3918_v47 = vld [vmem:[%s5791_s1 + $0x8a0] ss:$8 sps:$4 sm:$0xff]  }
 0x103   :  { %v2045_v57 = vadd.f32 %v2044_v55, %v340_v24  ;;  %2339 = vmatpush1.bf16.msra.mxu0 %v3861_v49  ;;  %2370 = vmatprep.mubr.bf16.mxu0 %v469_v50  ;;  %v3926_v24 = vld [vmem:[%s5791_s1 + $0x894] ss:$8 sps:$4 sm:$0xff]   ;;  %v3924_v49 = vld [vmem:[%s5791_s1 + $0x890] ss:$8 sps:$4 sm:$0xff]   ;;  %v3932_v50 = vld [vmem:[%s5791_s1 + $0x884] ss:$8 sps:$4 sm:$0xff]  }
 0x104   :  { %v2046_v59 = vpop.f32.mrf.mxu0  ;;  %v2085_v60 = vpop.f32.mrf.mxu1  ;;  %2330 = vmatmul.mubr.bf16.vlgmr.msra.gmra.mxu1 %v445_v51  ;;  %2340 = vmatprep.subr.bf16.mxu0 %v3866_v52  ;;  %v3930_v51 = vld [vmem:[%s5791_s1 + $0x880] ss:$8 sps:$4 sm:$0xff]  }
 0x105   :  { %v2047_v62 = vadd.f32 %v2046_v59, %v344_v53  ;;  %v4852_v63 = vadd.f32 %v2085_v60, %v2045_v57  ;;  %2380 = vmatpush1.bf16.msra.mxu1 %v3885_v54  ;;  %2411 = vmatprep.mubr.bf16.mxu1 %v3956_v1 }
 0x106   :  { %v2048_v2 = vpop.f32.mrf.mxu0  ;;  %v2087_v3 = vpop.f32.mrf.mxu1  ;;  %2381 = vmatprep.subr.bf16.mxu1 %v3893_v56 }
 0x107   :  { %v4860_v6 = vadd.f32 %v2087_v3, %v2047_v62  ;;  %2341 = vmatpush1.bf16.msra.mxu0 %v3864_v58 }
 0x108   :  { %v2049_v8 = vpop.f32.mrf.mxu0  ;;  %2342 = vmatprep.subr.bf16.mxu0 %v3869_v61  ;;  %v2089_v10 = vpop.f32.mrf.mxu1 }
 0x109   :  { %2382 = vmatpush1.bf16.msra.mxu1 %v3891_v0 }
 0x10a   :  { %v2090_v12 = vpop.f32.mrf.mxu1  ;;  %2383 = vmatprep.subr.bf16.mxu1 %v3899_v4 }
 0x10b   :  { %2343 = vmatpush1.bf16.msra.mxu0 %v3867_v7 }
 0x10c   :  { %2344 = vmatprep.subr.bf16.mxu0 %v3872_v9 }
 0x10d   :  { %2384 = vmatpush1.bf16.msra.mxu1 %v3897_v11 }
 0x10e   :  { %2385 = vmatprep.subr.bf16.mxu1 %v3905_v13  ;;  %v3957_v13 = vmov 0.0  }
 0x10f   :  { %2345 = vmatpush1.bf16.msra.mxu0 %v3870_v14  ;;  %v2643_v14 = vld [vmem:[%s5795_s5 + $0x3d8] sm:$0xff] }
 0x110   :  { %2346 = vmatprep.subr.bf16.mxu0 %v3875_v15  ;;  %v2642_v15 = vld [vmem:[%s5795_s5 + $0x3d0] sm:$0xff] }
 0x111   :  { %2386 = vmatpush1.bf16.msra.mxu1 %v3903_v16  ;;  %v2635_v16 = vld [vmem:[%s5795_s5 + $0x398] sm:$0xff] }
 0x112   :  { %2387 = vmatprep.subr.bf16.mxu1 %v3911_v17  ;;  %v2634_v17 = vld [vmem:[%s5795_s5 + $0x390] sm:$0xff] }
 0x113   :  { %2347 = vmatpush1.bf16.msra.mxu0 %v3873_v18  ;;  %v2627_v18 = vld [vmem:[%s5795_s5 + $0x358] sm:$0xff] }
 0x114   :  { %2348 = vmatprep.subr.bf16.mxu0 %v3878_v19  ;;  %v2626_v19 = vld [vmem:[%s5795_s5 + $0x350] sm:$0xff] }
 0x115   :  { %2388 = vmatpush1.bf16.msra.mxu1 %v3909_v20  ;;  %v2619_v20 = vld [vmem:[%s5795_s5 + $0x318] sm:$0xff] }
 0x116   :  { %2389 = vmatprep.subr.bf16.mxu1 %v3917_v21  ;;  %v2618_v21 = vld [vmem:[%s5795_s5 + $0x310] sm:$0xff] }
 0x117   :  { %2349 = vmatpush1.bf16.msra.mxu0 %v3876_v22  ;;  %v2611_v22 = vld [vmem:[%s5795_s5 + $0x2d8] sm:$0xff] }
 0x118   :  { %2350 = vmatprep.subr.bf16.mxu0 %v3881_v23  ;;  %v2610_v23 = vld [vmem:[%s5795_s5 + $0x2d0] sm:$0xff] }
 0x119   :  { %2390 = vmatpush1.bf16.msra.mxu1 %v3915_v5  ;;  %v2603_v5 = vld [vmem:[%s5795_s5 + $0x298] sm:$0xff] }
 0x11a   :  { %2391 = vmatprep.subr.bf16.mxu1 %v3923_v25  ;;  %v2602_v25 = vld [vmem:[%s5795_s5 + $0x290] sm:$0xff] }
 0x11b   :  { %2351 = vmatpush1.bf16.msra.mxu0 %v3879_v26  ;;  %v2595_v26 = vld [vmem:[%s5795_s5 + $0x258] sm:$0xff] }
 0x11c   :  { %2352 = vmatprep.subr.bf16.mxu0 %v3884_v27  ;;  %v2594_v27 = vld [vmem:[%s5795_s5 + $0x250] sm:$0xff] }
 0x11d   :  { %2392 = vmatpush1.bf16.msra.mxu1 %v3921_v29  ;;  %v2587_v29 = vld [vmem:[%s5795_s5 + $0x218] sm:$0xff] }
 0x11e   :  { %2393 = vmatprep.subr.bf16.mxu1 %v3929_v30  ;;  %v2586_v30 = vld [vmem:[%s5795_s5 + $0x210] sm:$0xff] }
 0x11f   :  { %2353 = vmatpush1.bf16.msra.mxu0 %v3882_v31  ;;  %v2579_v31 = vld [vmem:[%s5795_s5 + $0x1d8] sm:$0xff] }
 0x120   :  { %2354 = vmatprep.subr.bf16.mxu0 %v3890_v32  ;;  %v2578_v32 = vld [vmem:[%s5795_s5 + $0x1d0] sm:$0xff] }
 0x121   :  { %2394 = vmatpush1.bf16.msra.mxu1 %v3927_v34  ;;  %v2570_v34 = vld [vmem:[%s5795_s5 + $0x190] sm:$0xff] }
 0x123   :  { %2355 = vmatpush2.bf16.msra.mxu0 %v3888_v35  ;;  %v2563_v35 = vld [vmem:[%s5795_s5 + $0x158] sm:$0xff] }
 0x124   :  { %2356 = vmatprep.subr.bf16.mxu0 %v3896_v36  ;;  %2412 = vmatmul.mubr.bf16.vlgmr.msra.gmra.mxu1 %v470_v28  ;;  %v2562_v36 = vld [vmem:[%s5795_s5 + $0x150] sm:$0xff]  ;;  %v2555_v28 = vld [vmem:[%s5795_s5 + $0x118] sm:$0xff] }
 0x125   :  { %2513 = vmatprep.mubr.f32.mxu1 %v3957_v13 }
 0x127   :  { %2357 = vmatpush2.bf16.msra.mxu0 %v3894_v48  ;;  %v2554_v48 = vld [vmem:[%s5795_s5 + $0x110] sm:$0xff] }
 0x128   :  { %2358 = vmatprep.subr.bf16.mxu0 %v3902_v37  ;;  %v2547_v37 = vld [vmem:[%s5795_s5 + $0xd8] sm:$0xff] }
 0x12b   :  { %2359 = vmatpush2.bf16.msra.mxu0 %v3900_v38  ;;  %v2546_v38 = vld [vmem:[%s5795_s5 + $0xd0] sm:$0xff] }
 0x12c   :  { %2360 = vmatprep.subr.bf16.mxu0 %v3908_v40  ;;  %v2539_v40 = vld [vmem:[%s5795_s5 + $0x98] sm:$0xff] }
 0x12f   :  { %2361 = vmatpush2.bf16.msra.mxu0 %v3906_v41  ;;  %v2538_v41 = vld [vmem:[%s5795_s5 + $0x90] sm:$0xff] }
 0x130   :  { %2362 = vmatprep.subr.bf16.mxu0 %v3914_v43  ;;  %v2531_v43 = vld [vmem:[%s5795_s5 + $0x58] sm:$0xff] }
 0x133   :  { %2363 = vmatpush2.bf16.msra.mxu0 %v3912_v44  ;;  %v2530_v44 = vld [vmem:[%s5795_s5 + $0x50] sm:$0xff] }
 0x134   :  { %2364 = vmatprep.subr.bf16.mxu0 %v3920_v45  ;;  %v2523_v45 = vld [vmem:[%s5795_s5 + $0x18] sm:$0xff] }
 0x137   :  { %2365 = vmatpush2.bf16.msra.mxu0 %v3918_v47  ;;  %v2522_v47 = vld [vmem:[%s5795_s5 + $0x10] sm:$0xff] }
 0x138   :  { %2366 = vmatprep.subr.bf16.mxu0 %v3926_v24  ;;  %v2771_v24 = vld [vmem:[%s5795_s5 + $0x7d8] sm:$0xff] }
 0x13b   :  { %2367 = vmatpush2.bf16.msra.mxu0 %v3924_v49  ;;  %v2770_v49 = vld [vmem:[%s5795_s5 + $0x7d0] sm:$0xff] }
 0x13c   :  { %2368 = vmatprep.subr.bf16.mxu0 %v3932_v50  ;;  %v2763_v50 = vld [vmem:[%s5795_s5 + $0x798] sm:$0xff] }
 0x13f   :  { %2369 = vmatpush2.bf16.msra.mxu0 %v3930_v51  ;;  %v2762_v51 = vld [vmem:[%s5795_s5 + $0x790] sm:$0xff] }
 0x140   :  { %2889 = vmatprep.subr.mxu0 %v2643_v14 }
 0x142   :  { %v2126_v52 = vpop.f32.mrf.mxu0  ;;  %2371 = vmatmul.mubr.bf16.vlgmr.msra.gmra.mxu0 %v462_v33  ;;  %v2571_v33 = vld [vmem:[%s5795_s5 + $0x198] sm:$0xff] }
 0x143   :  { %v2127_v53 = vadd.f32 %v2126_v52, %v4852_v63  ;;  %2890 = vmatpush1.msra.mxu0 %v2642_v15  ;;  %v2755_v52 = vld [vmem:[%s5795_s5 + $0x758] sm:$0xff]  ;;  %v2682_v15 = vld [vmem:[%s5795_s5 + $0x510] sm:$0xff] }
 0x144   :  { %v2128_v54 = vpop.f32.mrf.mxu0  ;;  %v2167_v55 = vpop.f32.mrf.mxu1  ;;  %2891 = vmatprep.subr.mxu0 %v2635_v16  ;;  %v2675_v16 = vld [vmem:[%s5795_s5 + $0x4d8] sm:$0xff] }
 0x145   :  { %v2129_v56 = vadd.f32 %v2128_v54, %v4860_v6  ;;  %v2168_v57 = vadd.f32 %v2167_v55, %v2127_v53  ;;  %2892 = vmatpush1.msra.mxu0 %v2634_v17  ;;  %v2754_v53 = vld [vmem:[%s5795_s5 + $0x750] sm:$0xff]  ;;  %v2747_v54 = vld [vmem:[%s5795_s5 + $0x718] sm:$0xff] }
 0x146   :  { %v2130_v58 = vpop.f32.mrf.mxu0  ;;  %v2169_v59 = vpop.f32.mrf.mxu1  ;;  %2893 = vmatprep.subr.mxu0 %v2627_v18  ;;  %v2746_v55 = vld [vmem:[%s5795_s5 + $0x710] sm:$0xff] }
 0x147   :  { %v2170_v60 = vadd.f32 %v2169_v59, %v2129_v56  ;;  %2894 = vmatpush1.msra.mxu0 %v2626_v19  ;;  %v2739_v56 = vld [vmem:[%s5795_s5 + $0x6d8] sm:$0xff]  ;;  %v2730_v59 = vld [vmem:[%s5795_s5 + $0x690] sm:$0xff] }
 0x148   :  { %v2131_v61 = vpop.f32.mrf.mxu0  ;;  %v2171_v62 = vpop.f32.mrf.mxu1  ;;  %2895 = vmatprep.subr.mxu0 %v2619_v20  ;;  %v2731_v58 = vld [vmem:[%s5795_s5 + $0x698] sm:$0xff]  ;;  %v2674_v19 = vld [vmem:[%s5795_s5 + $0x4d0] sm:$0xff] }
 0x149   :  { %2896 = vmatpush1.msra.mxu0 %v2618_v21  ;;  %v2722_v61 = vld [vmem:[%s5795_s5 + $0x650] sm:$0xff]  ;;  %v2715_v62 = vld [vmem:[%s5795_s5 + $0x618] sm:$0xff] }
 0x14a   :  { %v2172_v0 = vpop.f32.mrf.mxu1  ;;  %2897 = vmatprep.subr.mxu0 %v2611_v22  ;;  %v2667_v20 = vld [vmem:[%s5795_s5 + $0x498] sm:$0xff]  ;;  %v2666_v22 = vld [vmem:[%s5795_s5 + $0x490] sm:$0xff] }
 0x14b   :  { %2898 = vmatpush1.msra.mxu0 %v2610_v23  ;;  %v2714_v0 = vld [vmem:[%s5795_s5 + $0x610] sm:$0xff]  ;;  %v2659_v23 = vld [vmem:[%s5795_s5 + $0x458] sm:$0xff] }
 0x14c   :  { %2899 = vmatprep.subr.mxu0 %v2603_v5 }
 0x14d   :  { %2900 = vmatpush1.msra.mxu0 %v2602_v25 }
 0x14e   :  { %2901 = vmatprep.subr.mxu0 %v2595_v26 }
 0x14f   :  { %2902 = vmatpush1.msra.mxu0 %v2594_v27 }
 0x150   :  { %2903 = vmatprep.subr.mxu0 %v2587_v29  ;;  %v3958_v29 = vmov 1983009808  }
 0x151   :  { %2904 = vmatpush1.msra.mxu0 %v2586_v30  ;;  %v2424_v30 = vunpack.c.l.s4 %v3958_v29  ;;  %v2753_v29 = vld [vmem:[%s5795_s5 + $0x748] sm:$0xff] }
 0x152   :  { %2905 = vmatprep.subr.mxu0 %v2579_v31 }
 0x153   :  { %2906 = vmatpush1.msra.mxu0 %v2578_v32  ;;  %v2425_v31 = vunpack.c.0.s8 %v2424_v30  ;;  %v2420_v32 = vld [vmem:[%s5793_s3] sm:$0x3] }
 0x154   :  { %2907 = vmatprep.subr.mxu0 %v2571_v33  ;;  %v2752_v30 = vld [vmem:[%s5795_s5 + $0x740] sm:$0xff] }
 0x155   :  { %2908 = vmatpush1.msra.mxu0 %v2570_v34  ;;  %v2421_v34 = vunpack.c.l.bf16 %v2420_v32  ;;  %v2744_v32 = vld [vmem:[%s5795_s5 + $0x700] sm:$0xff] }
 0x156   :  { %2909 = vmatprep.subr.mxu0 %v2563_v35  ;;  %v5172_v35 = vsub.s32 %v2425_v31, %v4117_v42  ;;  %v2745_v31 = vld [vmem:[%s5795_s5 + $0x708] sm:$0xff] }
 0x157   :  { %2910 = vmatpush1.msra.mxu0 %v2562_v36 }
 0x158   :  { %2911 = vmatprep.subr.mxu0 %v2555_v28 }
 0x159   :  { %2912 = vmatpush1.msra.mxu0 %v2554_v48  ;;  %v2429_v48 = vrot.slane %v2421_v34, %v5172_v35  ;;  %v2736_v34 = vld [vmem:[%s5795_s5 + $0x6c0] sm:$0xff] }
 0x15a   :  { %2913 = vmatprep.subr.mxu0 %v2547_v37 }
 0x15b   :  { %2914 = vmatpush1.msra.mxu0 %v2546_v38 }
 0x15c   :  { %2915 = vmatprep.subr.mxu0 %v2539_v40 }
 0x15d   :  { %2916 = vmatpush1.msra.mxu0 %v2538_v41 }
 0x15e   :  { %2917 = vmatprep.subr.mxu0 %v2531_v43 }
 0x15f   :  { %2918 = vmatpush1.msra.mxu0 %v2530_v44 }
 0x160   :  { %2919 = vmatprep.subr.mxu0 %v2523_v45  ;;  %v2430_v45 = vcombine.high %v2429_v48, %v2429_v48 }
 0x161   :  { %2920 = vmatpush1.msra.mxu0 %v2522_v47 }
 0x162   :  { %2921 = vmatprep.subr.mxu0 %v2771_v24 }
 0x163   :  { %2922 = vmatpush2.msra.mxu0 %v2770_v49 }
 0x164   :  { %2923 = vmatprep.subr.mxu0 %v2763_v50 }
 0x165   :  { %2924 = vmatpush2.msra.mxu0 %v2762_v51 }
 0x166   :  { %2925 = vmatprep.subr.mxu0 %v2755_v52 }
 0x167   :  { %2926 = vmatpush2.msra.mxu0 %v2754_v53  ;;  %v2641_v53 = vld [vmem:[%s5795_s5 + $0x3c8] sm:$0xff] }
 0x168   :  { %2927 = vmatprep.subr.mxu0 %v2747_v54  ;;  %v2640_v54 = vld [vmem:[%s5795_s5 + $0x3c0] sm:$0xff] }
 0x169   :  { %2928 = vmatpush2.msra.mxu0 %v2746_v55  ;;  %v2633_v55 = vld [vmem:[%s5795_s5 + $0x388] sm:$0xff] }
 0x16a   :  { %2929 = vmatprep.subr.mxu0 %v2739_v56  ;;  %v2632_v56 = vld [vmem:[%s5795_s5 + $0x380] sm:$0xff] }
 0x182   :  { %v2208_v1 = vpop.f32.mrf.mxu0 }
 0x183   :  { %v2209_v2 = vadd.f32 %v2208_v1, %v2168_v57  ;;  %v2738_v57 = vld [vmem:[%s5795_s5 + $0x6d0] sm:$0xff]  ;;  %v2707_v1 = vld [vmem:[%s5795_s5 + $0x5d8] sm:$0xff] }
 0x184   :  { %v2210_v3 = vpop.f32.mrf.mxu0  ;;  %v2249_v4 = vpop.f32.mrf.mxu1  ;;  %2930 = vmatpush2.msra.mxu0 %v2738_v57  ;;  %v2625_v57 = vld [vmem:[%s5795_s5 + $0x348] sm:$0xff] }
 0x185   :  { %v2211_v7 = vadd.f32 %v2210_v3, %v2170_v60  ;;  %v4980_v8 = vadd.f32 %v2249_v4, %v2209_v2  ;;  %2931 = vmatprep.subr.mxu0 %v2731_v58  ;;  %v2723_v60 = vld [vmem:[%s5795_s5 + $0x658] sm:$0xff]  ;;  %v2706_v2 = vld [vmem:[%s5795_s5 + $0x5d0] sm:$0xff]  ;;  %v2624_v58 = vld [vmem:[%s5795_s5 + $0x340] sm:$0xff] }
 0x186   :  { %v2212_v9 = vpop.f32.mrf.mxu0  ;;  %v2251_v63 = vpop.f32.mrf.mxu1  ;;  %2932 = vmatpush2.msra.mxu0 %v2730_v59  ;;  %v2699_v3 = vld [vmem:[%s5795_s5 + $0x598] sm:$0xff]  ;;  %v2617_v59 = vld [vmem:[%s5795_s5 + $0x308] sm:$0xff] }
 0x187   :  { %v4982_v10 = vadd.f32 %v2251_v63, %v2211_v7  ;;  %2933 = vmatprep.subr.mxu0 %v2723_v60  ;;  %v2698_v7 = vld [vmem:[%s5795_s5 + $0x590] sm:$0xff]  ;;  %v2691_v9 = vld [vmem:[%s5795_s5 + $0x558] sm:$0xff]  ;;  %v2616_v60 = vld [vmem:[%s5795_s5 + $0x300] sm:$0xff] }
 0x188   :  { %v2213_v11 = vpop.f32.mrf.mxu0  ;;  %v2253_v6 = vpop.f32.mrf.mxu1  ;;  %2934 = vmatpush2.msra.mxu0 %v2722_v61  ;;  %v2609_v61 = vld [vmem:[%s5795_s5 + $0x2c8] sm:$0xff] }
 0x189   :  { %2935 = vmatprep.subr.mxu0 %v2715_v62  ;;  %v2690_v6 = vld [vmem:[%s5795_s5 + $0x550] sm:$0xff]  ;;  %v2608_v62 = vld [vmem:[%s5795_s5 + $0x2c0] sm:$0xff] }
 0x18a   :  { %v2254_v12 = vpop.f32.mrf.mxu1  ;;  %2936 = vmatpush2.msra.mxu0 %v2714_v0  ;;  %v2601_v0 = vld [vmem:[%s5795_s5 + $0x288] sm:$0xff] }
 0x18b   :  { %2937 = vmatprep.subr.mxu0 %v2707_v1  ;;  %v2683_v12 = vld [vmem:[%s5795_s5 + $0x518] sm:$0xff]  ;;  %v2600_v1 = vld [vmem:[%s5795_s5 + $0x280] sm:$0xff] }
 0x18c   :  { %2938 = vmatpush2.msra.mxu0 %v2706_v2  ;;  %v2593_v2 = vld [vmem:[%s5795_s5 + $0x248] sm:$0xff] }
 0x18d   :  { %2939 = vmatprep.subr.mxu0 %v2699_v3  ;;  %v2592_v3 = vld [vmem:[%s5795_s5 + $0x240] sm:$0xff] }
 0x18e   :  { %2940 = vmatpush2.msra.mxu0 %v2698_v7  ;;  %v2584_v7 = vld [vmem:[%s5795_s5 + $0x200] sm:$0xff] }
 0x18f   :  { %2941 = vmatprep.subr.mxu0 %v2691_v9  ;;  %v2577_v9 = vld [vmem:[%s5795_s5 + $0x1c8] sm:$0xff] }
 0x190   :  { %2942 = vmatpush2.msra.mxu0 %v2690_v6  ;;  %v2568_v6 = vld [vmem:[%s5795_s5 + $0x180] sm:$0xff] }
 0x191   :  { %2943 = vmatprep.subr.mxu0 %v2683_v12  ;;  %v2561_v12 = vld [vmem:[%s5795_s5 + $0x148] sm:$0xff] }
 0x192   :  { %2944 = vmatpush2.msra.mxu0 %v2682_v15  ;;  %v2552_v15 = vld [vmem:[%s5795_s5 + $0x100] sm:$0xff] }
 0x193   :  { %2945 = vmatprep.subr.mxu0 %v2675_v16  ;;  %v2545_v16 = vld [vmem:[%s5795_s5 + $0xc8] sm:$0xff] }
 0x194   :  { %2946 = vmatpush2.msra.mxu0 %v2674_v19  ;;  %v2536_v19 = vld [vmem:[%s5795_s5 + $0x80] sm:$0xff] }
 0x195   :  { %2947 = vmatprep.subr.mxu0 %v2667_v20  ;;  %v2529_v20 = vld [vmem:[%s5795_s5 + $0x48] sm:$0xff] }
 0x196   :  { %2948 = vmatpush2.msra.mxu0 %v2666_v22  ;;  %v2521_v22 = vld [vmem:[%s5795_s5 + $0x8] sm:$0xff] }
 0x197   :  { %2949 = vmatprep.subr.mxu0 %v2659_v23  ;;  %v2520_v23 = vld [vmem:[%s5795_s5] sm:$0xff] }
 0x1c2   :  { %v2290_v4 = vpop.f32.mrf.mxu0 }
 0x1c3   :  { %v2291_v33 = vadd.f32 %v2290_v4, %v4980_v8  ;;  %v2585_v4 = vld [vmem:[%s5795_s5 + $0x208] sm:$0xff] }
 0x1c4   :  { %v2292_v63 = vpop.f32.mrf.mxu0  ;;  %v2331_v11 = vpop.f32.mrf.mxu1 }
 0x1c5   :  { %v2293_v36 = vadd.f32 %v2292_v63, %v4982_v10  ;;  %v2332_v28 = vadd.f32 %v2331_v11, %v2291_v33  ;;  %v2437_v10 = vld [vmem:[%s5794_s4] sm:$0x3]  ;;  %v2569_v11 = vld [vmem:[%s5795_s5 + $0x188] sm:$0xff] }
 0x1c6   :  { %v2294_v13 = vpop.f32.mrf.mxu0  ;;  %v2333_v14 = vpop.f32.mrf.mxu1  ;;  %v2576_v63 = vld [vmem:[%s5795_s5 + $0x1c0] sm:$0xff]  ;;  %v2737_v33 = vld [vmem:[%s5795_s5 + $0x6c8] sm:$0xff] }
 0x1c7   :  { %v2334_v38 = vadd.f32 %v2333_v14, %v2293_v36  ;;  %v2560_v13 = vld [vmem:[%s5795_s5 + $0x140] sm:$0xff]  ;;  %v2553_v14 = vld [vmem:[%s5795_s5 + $0x108] sm:$0xff] }
 0x1c8   :  { %v2295_v17 = vpop.f32.mrf.mxu0  ;;  %v2335_v18 = vpop.f32.mrf.mxu1  ;;  %v2729_v36 = vld [vmem:[%s5795_s5 + $0x688] sm:$0xff] }
 0x1c9   :  { %v2544_v17 = vld [vmem:[%s5795_s5 + $0xc0] sm:$0xff]  ;;  %v2537_v18 = vld [vmem:[%s5795_s5 + $0x88] sm:$0xff] }
 0x1ca   :  { %v2336_v21 = vpop.f32.mrf.mxu1 }
 0x1cb   :  { %v2528_v21 = vld [vmem:[%s5795_s5 + $0x40] sm:$0xff] }
 0x1e4   :  { %v2413_v5 = vpop.f32.mrf.mxu1 }
 0x1e6   :  { %v2415_v25 = vpop.f32.mrf.mxu1 }
 0x1e8   :  { %v2417_v26 = vpop.f32.mrf.mxu1 }
 0x1e9   :  { %v2761_v26 = vld [vmem:[%s5795_s5 + $0x788] sm:$0xff] }
 0x1ea   :  { %v2418_v27 = vpop.f32.mrf.mxu1 }
 0x1eb   :  { %v2760_v27 = vld [vmem:[%s5795_s5 + $0x780] sm:$0xff] }
 0x202   :  { %v2372_v37 = vpop.f32.mrf.mxu0 }
 0x203   :  { %v2373_v40 = vadd.f32 %v2372_v37, %v2332_v28  ;;  %v2728_v28 = vld [vmem:[%s5795_s5 + $0x680] sm:$0xff] }
 0x204   :  { %v2374_v41 = vpop.f32.mrf.mxu0  ;;  %v2720_v37 = vld [vmem:[%s5795_s5 + $0x640] sm:$0xff] }
 0x205   :  { %v2414_v43 = vadd.f32 %v2413_v5, %v2373_v40  ;;  %v2375_v44 = vadd.f32 %v2374_v41, %v2334_v38  ;;  %v2769_v5 = vld [vmem:[%s5795_s5 + $0x7c8] sm:$0xff]  ;;  %v2712_v40 = vld [vmem:[%s5795_s5 + $0x600] sm:$0xff] }
 0x206   :  { %v2376_v47 = vpop.f32.mrf.mxu0  ;;  %v2713_v38 = vld [vmem:[%s5795_s5 + $0x608] sm:$0xff] }
 0x207   :  { %v2416_v24 = vadd.f32 %v2415_v25, %v2375_v44  ;;  %v2433_v49 = vadd.f32 %v2429_v48, %v2414_v43  ;;  %v2768_v25 = vld [vmem:[%s5795_s5 + $0x7c0] sm:$0xff]  ;;  %v2721_v48 = vld [vmem:[%s5795_s5 + $0x648] sm:$0xff] }
 0x208   :  { %v2377_v8 = vpop.f32.mrf.mxu0  ;;  %v2705_v41 = vld [vmem:[%s5795_s5 + $0x5c8] sm:$0xff]  ;;  %v2704_v43 = vld [vmem:[%s5795_s5 + $0x5c0] sm:$0xff] }
 0x209   :  { %v2434_v50 = vadd.f32 %v2430_v45, %v2416_v24  ;;  %v2435_v52 = vmax.f32 %v2433_v49, 0.0  ;;  %v2697_v44 = vld [vmem:[%s5795_s5 + $0x588] sm:$0xff]  ;;  %v2696_v45 = vld [vmem:[%s5795_s5 + $0x580] sm:$0xff] }
 0x20a   :  { %v2689_v47 = vld [vmem:[%s5795_s5 + $0x548] sm:$0xff]  ;;  %v2688_v24 = vld [vmem:[%s5795_s5 + $0x540] sm:$0xff] }
 0x20b   :  { %v2436_v51 = vmax.f32 %v2434_v50, 0.0  ;;  %v2681_v49 = vld [vmem:[%s5795_s5 + $0x508] sm:$0xff]  ;;  %v2680_v8 = vld [vmem:[%s5795_s5 + $0x500] sm:$0xff] }
 0x20c   :  { %v2673_v50 = vld [vmem:[%s5795_s5 + $0x4c8] sm:$0xff] }
 0x20d   :  { %3467 = vmatprep.subr.msk.mxu1 %vm2442_vm0, %v2436_v51  ;;  %v2672_v51 = vld [vmem:[%s5795_s5 + $0x4c0] sm:$0xff] }
 0x20e   :  { %3468 = vmatpush1.msk.msra.mxu1 %vm2442_vm0, %v2435_v52  ;;  %v2665_v52 = vld [vmem:[%s5795_s5 + $0x488] sm:$0xff] }
 0x20f   :  { %3469 = vmatmul.mubr.msk.f32.vlgmr.msra.gmra.mxu1 %vm2438_vm1, %v2437_v10  ;;  %2818 = vmatprep.subr.mxu1 %v2641_v53  ;;  %v2664_v10 = vld [vmem:[%s5795_s5 + $0x480] sm:$0xff]  ;;  %v2657_v53 = vld [vmem:[%s5795_s5 + $0x448] sm:$0xff] }
 0x210   :  { %2819 = vmatpush1.msra.mxu1 %v2640_v54  ;;  %v2656_v54 = vld [vmem:[%s5795_s5 + $0x440] sm:$0xff] }
 0x211   :  { %2820 = vmatprep.subr.mxu1 %v2633_v55  ;;  %v2658_v55 = vld [vmem:[%s5795_s5 + $0x450] sm:$0xff] }
 0x212   :  { %2821 = vmatpush1.msra.mxu1 %v2632_v56  ;;  %2950 = vmatpush2.msra.mxu0 %v2658_v55  ;;  %v2649_v56 = vld [vmem:[%s5795_s5 + $0x408] sm:$0xff]  ;;  %v2543_v55 = vld [vmem:[%s5795_s5 + $0xb8] sm:$0xff] }
 0x213   :  { %2822 = vmatprep.subr.mxu1 %v2625_v57  ;;  %v2651_v57 = vld [vmem:[%s5795_s5 + $0x418] sm:$0xff] }
 0x214   :  { %2823 = vmatpush1.msra.mxu1 %v2624_v58  ;;  %2951 = vmatprep.subr.mxu0 %v2651_v57  ;;  %v2648_v58 = vld [vmem:[%s5795_s5 + $0x400] sm:$0xff]  ;;  %v2542_v57 = vld [vmem:[%s5795_s5 + $0xb0] sm:$0xff] }
 0x215   :  { %2824 = vmatprep.subr.mxu1 %v2617_v59  ;;  %v2650_v59 = vld [vmem:[%s5795_s5 + $0x410] sm:$0xff] }
 0x216   :  { %2825 = vmatpush1.msra.mxu1 %v2616_v60  ;;  %2952 = vmatpush2.msra.mxu0 %v2650_v59  ;;  %v2645_v60 = vld [vmem:[%s5795_s5 + $0x3e8] sm:$0xff]  ;;  %v2535_v59 = vld [vmem:[%s5795_s5 + $0x78] sm:$0xff] }
 0x217   :  { %2826 = vmatprep.subr.mxu1 %v2609_v61  ;;  %v2647_v61 = vld [vmem:[%s5795_s5 + $0x3f8] sm:$0xff] }
 0x218   :  { %2827 = vmatpush1.msra.mxu1 %v2608_v62  ;;  %3031 = vmatprep.subr.mxu0 %v2647_v61  ;;  %v2534_v61 = vld [vmem:[%s5795_s5 + $0x70] sm:$0xff] }
 0x219   :  { %2828 = vmatprep.subr.mxu1 %v2601_v0 }
 0x21a   :  { %2829 = vmatpush1.msra.mxu1 %v2600_v1  ;;  %v2644_v1 = vld [vmem:[%s5795_s5 + $0x3e0] sm:$0xff] }
 0x21b   :  { %2830 = vmatprep.subr.mxu1 %v2593_v2  ;;  %v2646_v2 = vld [vmem:[%s5795_s5 + $0x3f0] sm:$0xff] }
 0x21c   :  { %2831 = vmatpush1.msra.mxu1 %v2592_v3  ;;  %v2637_v3 = vld [vmem:[%s5795_s5 + $0x3a8] sm:$0xff] }
 0x21d   :  { %2832 = vmatprep.subr.mxu1 %v2585_v4  ;;  %v2639_v4 = vld [vmem:[%s5795_s5 + $0x3b8] sm:$0xff] }
 0x21e   :  { %2833 = vmatpush1.msra.mxu1 %v2584_v7  ;;  %v2636_v7 = vld [vmem:[%s5795_s5 + $0x3a0] sm:$0xff] }
 0x21f   :  { %2834 = vmatprep.subr.mxu1 %v2577_v9  ;;  %v2638_v9 = vld [vmem:[%s5795_s5 + $0x3b0] sm:$0xff] }
 0x220   :  { %2835 = vmatpush1.msra.mxu1 %v2576_v63  ;;  %v2629_v63 = vld [vmem:[%s5795_s5 + $0x368] sm:$0xff] }
 0x221   :  { %2836 = vmatprep.subr.mxu1 %v2569_v11  ;;  %v2631_v11 = vld [vmem:[%s5795_s5 + $0x378] sm:$0xff] }
 0x222   :  { %2837 = vmatpush1.msra.mxu1 %v2568_v6  ;;  %v2628_v6 = vld [vmem:[%s5795_s5 + $0x360] sm:$0xff] }
 0x223   :  { %2838 = vmatprep.subr.mxu1 %v2561_v12  ;;  %v2630_v12 = vld [vmem:[%s5795_s5 + $0x370] sm:$0xff] }
 0x224   :  { %2839 = vmatpush1.msra.mxu1 %v2560_v13  ;;  %v2621_v13 = vld [vmem:[%s5795_s5 + $0x328] sm:$0xff] }
 0x225   :  { %2840 = vmatprep.subr.mxu1 %v2553_v14  ;;  %v2623_v14 = vld [vmem:[%s5795_s5 + $0x338] sm:$0xff] }
 0x226   :  { %2841 = vmatpush1.msra.mxu1 %v2552_v15  ;;  %v2620_v15 = vld [vmem:[%s5795_s5 + $0x320] sm:$0xff] }
 0x227   :  { %2842 = vmatprep.subr.mxu1 %v2545_v16  ;;  %v2622_v16 = vld [vmem:[%s5795_s5 + $0x330] sm:$0xff] }
 0x228   :  { %2843 = vmatpush1.msra.mxu1 %v2544_v17  ;;  %v2613_v17 = vld [vmem:[%s5795_s5 + $0x2e8] sm:$0xff] }
 0x229   :  { %2844 = vmatprep.subr.mxu1 %v2537_v18  ;;  %v2615_v18 = vld [vmem:[%s5795_s5 + $0x2f8] sm:$0xff] }
 0x22a   :  { %2845 = vmatpush1.msra.mxu1 %v2536_v19  ;;  %v2612_v19 = vld [vmem:[%s5795_s5 + $0x2e0] sm:$0xff] }
 0x22b   :  { %2846 = vmatprep.subr.mxu1 %v2529_v20  ;;  %v2614_v20 = vld [vmem:[%s5795_s5 + $0x2f0] sm:$0xff] }
 0x22c   :  { %2847 = vmatpush1.msra.mxu1 %v2528_v21  ;;  %v2605_v21 = vld [vmem:[%s5795_s5 + $0x2a8] sm:$0xff] }
 0x22d   :  { %2848 = vmatprep.subr.mxu1 %v2521_v22  ;;  %v2607_v22 = vld [vmem:[%s5795_s5 + $0x2b8] sm:$0xff] }
 0x22e   :  { %2849 = vmatpush1.msra.mxu1 %v2520_v23  ;;  %v2604_v23 = vld [vmem:[%s5795_s5 + $0x2a0] sm:$0xff] }
 0x22f   :  { %2850 = vmatprep.subr.mxu1 %v2769_v5  ;;  %v2606_v5 = vld [vmem:[%s5795_s5 + $0x2b0] sm:$0xff] }
 0x230   :  { %2851 = vmatpush2.msra.mxu1 %v2768_v25  ;;  %v2597_v25 = vld [vmem:[%s5795_s5 + $0x268] sm:$0xff] }
 0x231   :  { %2852 = vmatprep.subr.mxu1 %v2761_v26  ;;  %v2599_v26 = vld [vmem:[%s5795_s5 + $0x278] sm:$0xff] }
 0x232   :  { %2853 = vmatpush2.msra.mxu1 %v2760_v27  ;;  %v2596_v27 = vld [vmem:[%s5795_s5 + $0x260] sm:$0xff] }
 0x233   :  { %2854 = vmatprep.subr.mxu1 %v2753_v29  ;;  %v2598_v29 = vld [vmem:[%s5795_s5 + $0x270] sm:$0xff] }
 0x234   :  { %2855 = vmatpush2.msra.mxu1 %v2752_v30  ;;  %v2589_v30 = vld [vmem:[%s5795_s5 + $0x228] sm:$0xff] }
 0x235   :  { %2856 = vmatprep.subr.mxu1 %v2745_v31  ;;  %v2591_v31 = vld [vmem:[%s5795_s5 + $0x238] sm:$0xff] }
 0x236   :  { %2857 = vmatpush2.msra.mxu1 %v2744_v32  ;;  %v2588_v32 = vld [vmem:[%s5795_s5 + $0x220] sm:$0xff] }
 0x237   :  { %2858 = vmatprep.subr.mxu1 %v2737_v33  ;;  %v2590_v33 = vld [vmem:[%s5795_s5 + $0x230] sm:$0xff] }
 0x238   :  { %2859 = vmatpush2.msra.mxu1 %v2736_v34  ;;  %v2581_v34 = vld [vmem:[%s5795_s5 + $0x1e8] sm:$0xff] }
 0x239   :  { %2860 = vmatprep.subr.mxu1 %v2729_v36  ;;  %v2583_v36 = vld [vmem:[%s5795_s5 + $0x1f8] sm:$0xff] }
 0x23a   :  { %2861 = vmatpush2.msra.mxu1 %v2728_v28  ;;  %v2580_v28 = vld [vmem:[%s5795_s5 + $0x1e0] sm:$0xff] }
 0x23b   :  { %2862 = vmatprep.subr.mxu1 %v2721_v48  ;;  %v2582_v48 = vld [vmem:[%s5795_s5 + $0x1f0] sm:$0xff] }
 0x23c   :  { %2863 = vmatpush2.msra.mxu1 %v2720_v37  ;;  %v2573_v37 = vld [vmem:[%s5795_s5 + $0x1a8] sm:$0xff] }
 0x23d   :  { %2864 = vmatprep.subr.mxu1 %v2713_v38  ;;  %v2575_v38 = vld [vmem:[%s5795_s5 + $0x1b8] sm:$0xff] }
 0x23e   :  { %2865 = vmatpush2.msra.mxu1 %v2712_v40  ;;  %v2572_v40 = vld [vmem:[%s5795_s5 + $0x1a0] sm:$0xff] }
 0x23f   :  { %2866 = vmatprep.subr.mxu1 %v2705_v41  ;;  %v2574_v41 = vld [vmem:[%s5795_s5 + $0x1b0] sm:$0xff] }
 0x240   :  { %2867 = vmatpush2.msra.mxu1 %v2704_v43  ;;  %v2565_v43 = vld [vmem:[%s5795_s5 + $0x168] sm:$0xff] }
 0x241   :  { %2868 = vmatprep.subr.mxu1 %v2697_v44  ;;  %v2567_v44 = vld [vmem:[%s5795_s5 + $0x178] sm:$0xff] }
 0x242   :  { %2869 = vmatpush2.msra.mxu1 %v2696_v45  ;;  %v2564_v45 = vld [vmem:[%s5795_s5 + $0x160] sm:$0xff] }
 0x243   :  { %2870 = vmatprep.subr.mxu1 %v2689_v47  ;;  %v2566_v47 = vld [vmem:[%s5795_s5 + $0x170] sm:$0xff] }
 0x244   :  { %2871 = vmatpush2.msra.mxu1 %v2688_v24  ;;  %v2557_v24 = vld [vmem:[%s5795_s5 + $0x128] sm:$0xff] }
 0x245   :  { %2872 = vmatprep.subr.mxu1 %v2681_v49  ;;  %v2559_v49 = vld [vmem:[%s5795_s5 + $0x138] sm:$0xff] }
 0x246   :  { %2873 = vmatpush2.msra.mxu1 %v2680_v8  ;;  %v2556_v8 = vld [vmem:[%s5795_s5 + $0x120] sm:$0xff] }
 0x247   :  { %2874 = vmatprep.subr.mxu1 %v2673_v50  ;;  %v2558_v50 = vld [vmem:[%s5795_s5 + $0x130] sm:$0xff] }
 0x248   :  { %2875 = vmatpush2.msra.mxu1 %v2672_v51  ;;  %v2549_v51 = vld [vmem:[%s5795_s5 + $0xe8] sm:$0xff] }
 0x249   :  { %2876 = vmatprep.subr.mxu1 %v2665_v52  ;;  %v2551_v52 = vld [vmem:[%s5795_s5 + $0xf8] sm:$0xff] }
 0x24a   :  { %2877 = vmatpush2.msra.mxu1 %v2664_v10  ;;  %v2548_v10 = vld [vmem:[%s5795_s5 + $0xe0] sm:$0xff] }
 0x24b   :  { %2878 = vmatprep.subr.mxu1 %v2657_v53  ;;  %v2550_v53 = vld [vmem:[%s5795_s5 + $0xf0] sm:$0xff] }
 0x24c   :  { %2879 = vmatpush2.msra.mxu1 %v2656_v54  ;;  %v2541_v54 = vld [vmem:[%s5795_s5 + $0xa8] sm:$0xff] }
 0x24d   :  { %2880 = vmatprep.subr.mxu1 %v2649_v56  ;;  %v2540_v56 = vld [vmem:[%s5795_s5 + $0xa0] sm:$0xff] }
 0x24e   :  { %2881 = vmatpush2.msra.mxu1 %v2648_v58  ;;  %v2533_v58 = vld [vmem:[%s5795_s5 + $0x68] sm:$0xff] }
 0x24f   :  { %2960 = vmatprep.subr.mxu1 %v2645_v60  ;;  %v2532_v60 = vld [vmem:[%s5795_s5 + $0x60] sm:$0xff] }
 0x2cf   :  { %v5386_v62 = vpop.f32.mrf.mxu1 }
 0x2d1   :  { %v2517_v0 = vpop.f32.mrf.mxu1 }
 0x2d2   :  { %2882 = vmatprep.mubr.f32.mxu1 %v2517_v0  ;;  %2953 = vmatprep.mubr.f32.mxu0 %v2517_v0 }
 0x2d3   :  { %2883 = vmatmul.mubr.f32.vlgmr.msra.gmra.mxu1 %v5386_v62  ;;  %2954 = vmatmul.mubr.f32.vlgmr.msra.gmra.mxu0 %v5386_v62 }
 0x2d4   :  { %2961 = vmatpush1.msra.mxu1 %v2644_v1  ;;  %3032 = vmatpush1.msra.mxu0 %v2646_v2  ;;  %v2527_v1 = vld [vmem:[%s5795_s5 + $0x38] sm:$0xff]  ;;  %v2524_v2 = vld [vmem:[%s5795_s5 + $0x20] sm:$0xff] }
 0x2d5   :  { %2962 = vmatprep.subr.mxu1 %v2637_v3  ;;  %3033 = vmatprep.subr.mxu0 %v2639_v4  ;;  %v2526_v3 = vld [vmem:[%s5795_s5 + $0x30] sm:$0xff]  ;;  %v2773_v4 = vld [vmem:[%s5795_s5 + $0x7e8] sm:$0xff] }
 0x2d6   :  { %2963 = vmatpush1.msra.mxu1 %v2636_v7  ;;  %3034 = vmatpush1.msra.mxu0 %v2638_v9  ;;  %v2775_v7 = vld [vmem:[%s5795_s5 + $0x7f8] sm:$0xff]  ;;  %v2772_v9 = vld [vmem:[%s5795_s5 + $0x7e0] sm:$0xff] }
 0x2d7   :  { %2964 = vmatprep.subr.mxu1 %v2629_v63  ;;  %3035 = vmatprep.subr.mxu0 %v2631_v11  ;;  %v2774_v63 = vld [vmem:[%s5795_s5 + $0x7f0] sm:$0xff]  ;;  %v2765_v11 = vld [vmem:[%s5795_s5 + $0x7a8] sm:$0xff] }
 0x2d8   :  { %2965 = vmatpush1.msra.mxu1 %v2628_v6  ;;  %3024 = vmatprep.mubr.f32.mxu1 %v2517_v0  ;;  %v2767_v6 = vld [vmem:[%s5795_s5 + $0x7b8] sm:$0xff] }
 0x2d9   :  { %3036 = vmatpush1.msra.mxu0 %v2630_v12  ;;  %3095 = vmatprep.mubr.f32.mxu0 %v2517_v0  ;;  %v2525_v0 = vld [vmem:[%s5795_s5 + $0x28] sm:$0xff]  ;;  %v2764_v12 = vld [vmem:[%s5795_s5 + $0x7a0] sm:$0xff] }
 0x2da   :  { %2966 = vmatprep.subr.mxu1 %v2621_v13  ;;  %3037 = vmatprep.subr.mxu0 %v2623_v14  ;;  %v2766_v13 = vld [vmem:[%s5795_s5 + $0x7b0] sm:$0xff]  ;;  %v2757_v14 = vld [vmem:[%s5795_s5 + $0x768] sm:$0xff] }
 0x2db   :  { %2967 = vmatpush1.msra.mxu1 %v2620_v15  ;;  %3038 = vmatpush1.msra.mxu0 %v2622_v16  ;;  %v2759_v15 = vld [vmem:[%s5795_s5 + $0x778] sm:$0xff]  ;;  %v2756_v16 = vld [vmem:[%s5795_s5 + $0x760] sm:$0xff] }
 0x2dc   :  { %2968 = vmatprep.subr.mxu1 %v2613_v17  ;;  %3039 = vmatprep.subr.mxu0 %v2615_v18  ;;  %v2758_v17 = vld [vmem:[%s5795_s5 + $0x770] sm:$0xff]  ;;  %v2749_v18 = vld [vmem:[%s5795_s5 + $0x728] sm:$0xff] }
 0x2dd   :  { %2969 = vmatpush1.msra.mxu1 %v2612_v19  ;;  %3040 = vmatpush1.msra.mxu0 %v2614_v20  ;;  %v2751_v19 = vld [vmem:[%s5795_s5 + $0x738] sm:$0xff]  ;;  %v2748_v20 = vld [vmem:[%s5795_s5 + $0x720] sm:$0xff] }
 0x2de   :  { %2970 = vmatprep.subr.mxu1 %v2605_v21  ;;  %3041 = vmatprep.subr.mxu0 %v2607_v22  ;;  %v2750_v21 = vld [vmem:[%s5795_s5 + $0x730] sm:$0xff]  ;;  %v2741_v22 = vld [vmem:[%s5795_s5 + $0x6e8] sm:$0xff] }
 0x2df   :  { %2971 = vmatpush1.msra.mxu1 %v2604_v23  ;;  %3042 = vmatpush1.msra.mxu0 %v2606_v5  ;;  %v2743_v23 = vld [vmem:[%s5795_s5 + $0x6f8] sm:$0xff]  ;;  %v2740_v5 = vld [vmem:[%s5795_s5 + $0x6e0] sm:$0xff] }
 0x2e0   :  { %2972 = vmatprep.subr.mxu1 %v2597_v25  ;;  %3043 = vmatprep.subr.mxu0 %v2599_v26  ;;  %v2742_v25 = vld [vmem:[%s5795_s5 + $0x6f0] sm:$0xff]  ;;  %v2733_v26 = vld [vmem:[%s5795_s5 + $0x6a8] sm:$0xff] }
 0x2e1   :  { %2973 = vmatpush1.msra.mxu1 %v2596_v27  ;;  %3044 = vmatpush1.msra.mxu0 %v2598_v29  ;;  %v2735_v27 = vld [vmem:[%s5795_s5 + $0x6b8] sm:$0xff]  ;;  %v2732_v29 = vld [vmem:[%s5795_s5 + $0x6a0] sm:$0xff] }
 0x2e2   :  { %2974 = vmatprep.subr.mxu1 %v2589_v30  ;;  %3045 = vmatprep.subr.mxu0 %v2591_v31  ;;  %v2734_v30 = vld [vmem:[%s5795_s5 + $0x6b0] sm:$0xff]  ;;  %v2725_v31 = vld [vmem:[%s5795_s5 + $0x668] sm:$0xff] }
 0x2e3   :  { %2975 = vmatpush1.msra.mxu1 %v2588_v32  ;;  %3046 = vmatpush1.msra.mxu0 %v2590_v33  ;;  %v2727_v32 = vld [vmem:[%s5795_s5 + $0x678] sm:$0xff]  ;;  %v2724_v33 = vld [vmem:[%s5795_s5 + $0x660] sm:$0xff] }
 0x2e4   :  { %2976 = vmatprep.subr.mxu1 %v2581_v34  ;;  %3047 = vmatprep.subr.mxu0 %v2583_v36  ;;  %v2726_v34 = vld [vmem:[%s5795_s5 + $0x670] sm:$0xff]  ;;  %v2717_v36 = vld [vmem:[%s5795_s5 + $0x628] sm:$0xff] }
 0x2e5   :  { %2977 = vmatpush1.msra.mxu1 %v2580_v28  ;;  %3048 = vmatpush1.msra.mxu0 %v2582_v48  ;;  %v2719_v28 = vld [vmem:[%s5795_s5 + $0x638] sm:$0xff]  ;;  %v2716_v48 = vld [vmem:[%s5795_s5 + $0x620] sm:$0xff] }
 0x2e6   :  { %2978 = vmatprep.subr.mxu1 %v2573_v37  ;;  %3049 = vmatprep.subr.mxu0 %v2575_v38  ;;  %v2718_v37 = vld [vmem:[%s5795_s5 + $0x630] sm:$0xff]  ;;  %v2709_v38 = vld [vmem:[%s5795_s5 + $0x5e8] sm:$0xff] }
 0x2e7   :  { %2979 = vmatpush1.msra.mxu1 %v2572_v40  ;;  %3050 = vmatpush1.msra.mxu0 %v2574_v41  ;;  %v2711_v40 = vld [vmem:[%s5795_s5 + $0x5f8] sm:$0xff]  ;;  %v2708_v41 = vld [vmem:[%s5795_s5 + $0x5e0] sm:$0xff] }
 0x2e8   :  { %2980 = vmatprep.subr.mxu1 %v2565_v43  ;;  %3051 = vmatprep.subr.mxu0 %v2567_v44  ;;  %v2710_v43 = vld [vmem:[%s5795_s5 + $0x5f0] sm:$0xff]  ;;  %v2701_v44 = vld [vmem:[%s5795_s5 + $0x5a8] sm:$0xff] }
 0x2e9   :  { %2981 = vmatpush1.msra.mxu1 %v2564_v45  ;;  %3052 = vmatpush1.msra.mxu0 %v2566_v47  ;;  %v2703_v45 = vld [vmem:[%s5795_s5 + $0x5b8] sm:$0xff]  ;;  %v2700_v47 = vld [vmem:[%s5795_s5 + $0x5a0] sm:$0xff] }
 0x2ea   :  { %2982 = vmatprep.subr.mxu1 %v2557_v24  ;;  %3053 = vmatprep.subr.mxu0 %v2559_v49  ;;  %v2702_v24 = vld [vmem:[%s5795_s5 + $0x5b0] sm:$0xff]  ;;  %v2693_v49 = vld [vmem:[%s5795_s5 + $0x568] sm:$0xff] }
 0x2eb   :  { %2983 = vmatpush1.msra.mxu1 %v2556_v8  ;;  %3054 = vmatpush1.msra.mxu0 %v2558_v50  ;;  %v2695_v8 = vld [vmem:[%s5795_s5 + $0x578] sm:$0xff]  ;;  %v2692_v50 = vld [vmem:[%s5795_s5 + $0x560] sm:$0xff] }
 0x2ec   :  { %2984 = vmatprep.subr.mxu1 %v2549_v51  ;;  %3055 = vmatprep.subr.mxu0 %v2551_v52  ;;  %v2694_v51 = vld [vmem:[%s5795_s5 + $0x570] sm:$0xff]  ;;  %v2685_v52 = vld [vmem:[%s5795_s5 + $0x528] sm:$0xff] }
 0x2ed   :  { %2985 = vmatpush1.msra.mxu1 %v2548_v10  ;;  %3056 = vmatpush1.msra.mxu0 %v2550_v53  ;;  %v2687_v10 = vld [vmem:[%s5795_s5 + $0x538] sm:$0xff]  ;;  %v2684_v53 = vld [vmem:[%s5795_s5 + $0x520] sm:$0xff] }
 0x2ee   :  { %2986 = vmatprep.subr.mxu1 %v2541_v54  ;;  %3057 = vmatprep.subr.mxu0 %v2543_v55  ;;  %v2686_v54 = vld [vmem:[%s5795_s5 + $0x530] sm:$0xff]  ;;  %v2677_v55 = vld [vmem:[%s5795_s5 + $0x4e8] sm:$0xff] }
 0x2ef   :  { %2987 = vmatpush1.msra.mxu1 %v2540_v56  ;;  %3058 = vmatpush1.msra.mxu0 %v2542_v57  ;;  %v2679_v56 = vld [vmem:[%s5795_s5 + $0x4f8] sm:$0xff]  ;;  %v2676_v57 = vld [vmem:[%s5795_s5 + $0x4e0] sm:$0xff] }
 0x2f0   :  { %2988 = vmatprep.subr.mxu1 %v2533_v58  ;;  %3059 = vmatprep.subr.mxu0 %v2535_v59  ;;  %v2678_v58 = vld [vmem:[%s5795_s5 + $0x4f0] sm:$0xff]  ;;  %v2669_v59 = vld [vmem:[%s5795_s5 + $0x4a8] sm:$0xff] }
 0x2f1   :  { %2989 = vmatpush1.msra.mxu1 %v2532_v60  ;;  %3060 = vmatpush1.msra.mxu0 %v2534_v61  ;;  %v2671_v60 = vld [vmem:[%s5795_s5 + $0x4b8] sm:$0xff]  ;;  %v2668_v61 = vld [vmem:[%s5795_s5 + $0x4a0] sm:$0xff] }
 0x2f2   :  { %2990 = vmatprep.subr.mxu1 %v2525_v0  ;;  %3061 = vmatprep.subr.mxu0 %v2527_v1  ;;  %v2670_v0 = vld [vmem:[%s5795_s5 + $0x4b0] sm:$0xff]  ;;  %v2661_v1 = vld [vmem:[%s5795_s5 + $0x468] sm:$0xff] }
 0x2f3   :  { %2991 = vmatpush1.msra.mxu1 %v2524_v2  ;;  %3062 = vmatpush1.msra.mxu0 %v2526_v3  ;;  %v2663_v2 = vld [vmem:[%s5795_s5 + $0x478] sm:$0xff]  ;;  %v2660_v3 = vld [vmem:[%s5795_s5 + $0x460] sm:$0xff] }
 0x2f4   :  { %2992 = vmatprep.subr.mxu1 %v2773_v4  ;;  %3063 = vmatprep.subr.mxu0 %v2775_v7  ;;  %v2662_v4 = vld [vmem:[%s5795_s5 + $0x470] sm:$0xff]  ;;  %v2653_v7 = vld [vmem:[%s5795_s5 + $0x428] sm:$0xff] }
 0x2f5   :  { %2993 = vmatpush2.msra.mxu1 %v2772_v9  ;;  %3064 = vmatpush2.msra.mxu0 %v2774_v63  ;;  %v2655_v9 = vld [vmem:[%s5795_s5 + $0x438] sm:$0xff]  ;;  %v2652_v63 = vld [vmem:[%s5795_s5 + $0x420] sm:$0xff] }
 0x2f6   :  { %2994 = vmatprep.subr.mxu1 %v2765_v11  ;;  %3065 = vmatprep.subr.mxu0 %v2767_v6  ;;  %v2654_v11 = vld [vmem:[%s5795_s5 + $0x430] sm:$0xff]  ;;  %v2788_v6 = vsub.s32 2, %v4117_v42  ;;  %s3959_s5 = smov [#allocation2]  }
 0x2f7   :  { %2995 = vmatpush2.msra.mxu1 %v2764_v12  ;;  %3066 = vmatpush2.msra.mxu0 %v2766_v13  ;;  %v2792_v12 = vsub.s32 3, %v4117_v42  ;;  %v2776_v13 = vld [vmem:[%s5796_s6] sm:$0xff]  ;;  %s3154_s6 = sshll.u32 %s3959_s5, 4  ;;  %s3155_s6 = int_to_ptr.vmem [resolvable:$true] %s3154_s6 }
 0x2f8   :  { %2996 = vmatprep.subr.mxu1 %v2757_v14  ;;  %3067 = vmatprep.subr.mxu0 %v2759_v15  ;;  %v2781_v14 = vrot.slane %v2776_v13, %v339_v39  ;;  %v2789_v15 = vrot.slane %v2776_v13, %v2788_v6  ;;  %s3933_s29 = scalar_lea.vmem %s3155_s6, 256  ;;  %p3938_p1 = scmp.lt.s32.totalorder %s3155_s6, %s3155_s6 }
 0x2f9   :  { %2997 = vmatpush2.msra.mxu1 %v2756_v16  ;;  %3068 = vmatpush2.msra.mxu0 %v2758_v17  ;;  %v2785_v16 = vrot.slane %v2776_v13, %v343_v46  ;;  %v2793_v17 = vrot.slane %v2776_v13, %v2792_v12  ;;  %v2804_v46 = vsub.s32 6, %v4117_v42  ;;  %p3934_p0 = scmp.ne.s32.totalorder %s3155_s6, %s3933_s29  ;;  %p3939_p2 = scmp.lt.s32.totalorder %s3933_s29, %s3933_s29 }
 0x2fa   :  { %2998 = vmatprep.subr.mxu1 %v2749_v18  ;;  %3069 = vmatprep.subr.mxu0 %v2751_v19 }
 0x2fb   :  { %2999 = vmatpush2.msra.mxu1 %v2748_v20  ;;  %3070 = vmatpush2.msra.mxu0 %v2750_v21  ;;  %p3940_p3 = por %p3939_p2, %p3938_p1 }
 0x2fc   :  { %3000 = vmatprep.subr.mxu1 %v2741_v22  ;;  %3071 = vmatprep.subr.mxu0 %v2743_v23 }
 0x2fd   :  { %3001 = vmatpush2.msra.mxu1 %v2740_v5  ;;  %3072 = vmatpush2.msra.mxu0 %v2742_v25  ;;  %p3941_p4 = pnand %p3940_p3, %p3934_p0 }
 0x2fe   :  { %3002 = vmatprep.subr.mxu1 %v2733_v26  ;;  %3073 = vmatprep.subr.mxu0 %v2735_v27 }
 0x2ff   :  { %3003 = vmatpush2.msra.mxu1 %v2732_v29  ;;  %3074 = vmatpush2.msra.mxu0 %v2734_v30  ;;  %v2796_v30 = vsub.s32 4, %v4117_v42 }
 0x300   :  { %3004 = vmatprep.subr.mxu1 %v2725_v31  ;;  %3075 = vmatprep.subr.mxu0 %v2727_v32  ;;  %v2800_v31 = vsub.s32 5, %v4117_v42  ;;  %v2808_v32 = vsub.s32 7, %v4117_v42 }
 0x301   :  { %3005 = vmatpush2.msra.mxu1 %v2724_v33  ;;  %3076 = vmatpush2.msra.mxu0 %v2726_v34  ;;  %v2797_v33 = vrot.slane %v2776_v13, %v2796_v30  ;;  %v2805_v34 = vrot.slane %v2776_v13, %v2804_v46 }
 0x302   :  { %3006 = vmatprep.subr.mxu1 %v2717_v36  ;;  %3077 = vmatprep.subr.mxu0 %v2719_v28  ;;  %v2801_v36 = vrot.slane %v2776_v13, %v2800_v31  ;;  %v2809_v28 = vrot.slane %v2776_v13, %v2808_v32 }
 0x303   :  { %3007 = vmatpush2.msra.mxu1 %v2716_v48  ;;  %3078 = vmatpush2.msra.mxu0 %v2718_v37 }
 0x304   :  { %3008 = vmatprep.subr.mxu1 %v2709_v38  ;;  %3079 = vmatprep.subr.mxu0 %v2711_v40 }
 0x305   :  { %3009 = vmatpush2.msra.mxu1 %v2708_v41  ;;  %3080 = vmatpush2.msra.mxu0 %v2710_v43 }
 0x306   :  { %3010 = vmatprep.subr.mxu1 %v2701_v44  ;;  %3081 = vmatprep.subr.mxu0 %v2703_v45 }
 0x307   :  { %3011 = vmatpush2.msra.mxu1 %v2700_v47  ;;  %3082 = vmatpush2.msra.mxu0 %v2702_v24 }
 0x308   :  { %3012 = vmatprep.subr.mxu1 %v2693_v49  ;;  %3083 = vmatprep.subr.mxu0 %v2695_v8 }
 0x309   :  { %3013 = vmatpush2.msra.mxu1 %v2692_v50  ;;  %3084 = vmatpush2.msra.mxu0 %v2694_v51 }
 0x30a   :  { %3014 = vmatprep.subr.mxu1 %v2685_v52  ;;  %3085 = vmatprep.subr.mxu0 %v2687_v10 }
 0x30b   :  { %3015 = vmatpush2.msra.mxu1 %v2684_v53  ;;  %3086 = vmatpush2.msra.mxu0 %v2686_v54 }
 0x30c   :  { %3016 = vmatprep.subr.mxu1 %v2677_v55  ;;  %3087 = vmatprep.subr.mxu0 %v2679_v56 }
 0x30d   :  { %3017 = vmatpush2.msra.mxu1 %v2676_v57  ;;  %3088 = vmatpush2.msra.mxu0 %v2678_v58 }
 0x30e   :  { %3018 = vmatprep.subr.mxu1 %v2669_v59  ;;  %3089 = vmatprep.subr.mxu0 %v2671_v60 }
 0x30f   :  { %3019 = vmatpush2.msra.mxu1 %v2668_v61  ;;  %3090 = vmatpush2.msra.mxu0 %v2670_v0 }
 0x310   :  { %3020 = vmatprep.subr.mxu1 %v2661_v1  ;;  %3091 = vmatprep.subr.mxu0 %v2663_v2 }
 0x311   :  { %3021 = vmatpush2.msra.mxu1 %v2660_v3  ;;  %3092 = vmatpush2.msra.mxu0 %v2662_v4 }
 0x312   :  { %3022 = vmatprep.subr.mxu1 %v2653_v7  ;;  %3093 = vmatprep.subr.mxu0 %v2655_v9 }
 0x313   :  { %3023 = vmatpush2.msra.mxu1 %v2652_v63  ;;  %3094 = vmatpush2.msra.mxu0 %v2654_v11 }
 0x314   :  { %3025 = vmatmul.mubr.f32.vlgmr.msra.gmra.mxu1 %v5386_v62  ;;  %3096 = vmatmul.mubr.f32.vlgmr.msra.gmra.mxu0 %v5386_v62 }
 0x393   :  { %v2884_v18 = vpop.f32.mrf.mxu1  ;;  %v2955_v19 = vpop.f32.mrf.mxu0 }
 0x394   :  { %v2885_v21 = vadd.f32 %v2884_v18, %v2781_v14  ;;  %v2956_v22 = vadd.f32 %v2955_v19, %v2789_v15 }
 0x395   :  { %v2886_v20 = vpop.f32.mrf.mxu1  ;;  %v2957_v62 = vpop.f32.mrf.mxu0 }
 0x396   :  { %v2887_v23 = vadd.f32 %v2886_v20, %v2785_v16  ;;  %v2958_v5 = vadd.f32 %v2957_v62, %v2793_v17 }
 0x398   :  { %v3110_v25 = vcombine.low %v2885_v21, %v2887_v23  ;;  %v3111_v26 = vcombine.low %v2956_v22, %v2958_v5 }
 0x39a   :  { %v3118_v27 = vrot.slane %v3110_v25, %v5172_v35  ;;  %v3125_v29 = vrot.slane %v3111_v26, %v5172_v35 }
 0x39c   :  { %v3126_v39 = vcombine.low %v3118_v27, %v3125_v29 }
 0x39e   :  { %3146 = vst [vmem:[#allocation2] sm:$0xff] %v3126_v39 }
 0x3d4   :  { %v3026_v48 = vpop.f32.mrf.mxu1  ;;  %v3097_v37 = vpop.f32.mrf.mxu0 }
 0x3d5   :  { %v3027_v41 = vadd.f32 %v3026_v48, %v2797_v33  ;;  %v3098_v43 = vadd.f32 %v3097_v37, %v2805_v34 }
 0x3d6   :  { %v3028_v38 = vpop.f32.mrf.mxu1  ;;  %v3099_v40 = vpop.f32.mrf.mxu0 }
 0x3d7   :  { %v3029_v44 = vadd.f32 %v3028_v38, %v2801_v36  ;;  %v3100_v45 = vadd.f32 %v3099_v40, %v2809_v28 }
 0x3d9   :  { %v3127_v47 = vcombine.low %v3027_v41, %v3029_v44  ;;  %v3128_v24 = vcombine.low %v3098_v43, %v3100_v45 }
 0x3db   :  { %v3135_v49 = vrot.slane %v3127_v47, %v5172_v35  ;;  %v3142_v42 = vrot.slane %v3128_v24, %v5172_v35 }
 0x3dd   :  { %v3143_v8 = vcombine.low %v3135_v49, %v3142_v42 }
 0x3df   :  { %3147 = vst [vmem:[#allocation2 + $0x8] sm:$0xff] %v3143_v8 }
 0x3e0   :  { %3944 = shalt.err (!%p3941_p4)
}
 0x3e1   :  { %3157 = dma.vmem_to_hbm [thread:$0]  %s3155_s6, 256, %s5797_s7, [#allocation3]  }
 0x3e2   :  { %3953 = dma.done.wait [#allocation3], 256  }
 0x3e3   :  { %3954 = vsyncadd [#allocation3], 4294967040 }
 0x3e4   :  { %3161 = vsyncpa [#allocation3], 1 }

</bundles_post_ra>
